<compile_context>
chip_gen: v5e
topology: v5e:2x2
jax: 0.10.0
libtpu: 0.0.40
codegen_flags: <defaults>
</compile_context>

<pallas_src>
import random

import jax
import jax.numpy as jnp
from jax.experimental import pallas as pl
from jax.experimental.pallas import tpu as pltpu

LANE = 128
SUBLANE = 8


def _round_up(x, m):
    return ((x + m - 1) // m) * m


# ---------------------------------------------------------------------------
# Fused translator kernel (gridless).
# Gate order [r, z, n].  *_bi holds (b_ih + b_hh) for the r/z columns and b_in for
# the n column; *_bhn holds b_hn separately:
#   n = tanh(Wx + b_in + r * (Wh h + b_hn))   (torch GRU convention).
# ---------------------------------------------------------------------------
def _translator_kernel(teach_ref,                 # SMEM (S-1,) int32 teacher-forcing flags
                       x_flat_ref,                # (S*Bp, Ep) encoder embeddings, time-major
                       emb0_ref,                  # (Bp, Ep)   embedding of trg[:, 0]
                       trg_emb_ref,               # (S-1, Bp, Ep) teacher embeddings
                       enc_wi_ref, enc_wh_ref, enc_bi_ref, enc_bhn_ref,
                       dec_wie_ref, dec_wic_ref, dec_wh_ref, dec_bi_ref, dec_bhn_ref,
                       cls_weh_ref,               # (Ep+Hp, Vp) classifier rows [embed ; h_new]
                       cls_wc_ref,                # (Hp, Vp)    classifier rows (context)
                       cls_b_ref,                 # (1, Vp)     classifier bias (pads = -1e9)
                       emb_tbl_ref,               # (Vp, Ep)    decoder embedding table
                       logits_ref,                # OUT (S-1, Bp, Vp)
                       gi_scr):                   # VMEM scratch (S*Bp, 3Hp)
    Sm1, Bp, Vp = logits_ref.shape
    Hp = enc_bhn_ref.shape[-1]
    SB = x_flat_ref.shape[0]
    S = SB // Bp

    # ---------------- Encoder ----------------
    # Hoisted input projection for ALL timesteps: one (S*Bp, Ep) x (Ep, 3Hp) MXU matmul.
    gi_scr[...] = (jnp.dot(x_flat_ref[...], enc_wi_ref[...],
                           preferred_element_type=jnp.float32) + enc_bi_ref[...])
    enc_wh = enc_wh_ref[...]
    enc_bhn = enc_bhn_ref[...]

    def enc_step(t, h):
        row = pl.multiple_of(t * Bp, Bp)                            # aligned sublane slice
        gi = gi_scr[pl.ds(row, Bp), :]                              # (Bp, 3Hp)
        gh = jnp.dot(h, enc_wh, preferred_element_type=jnp.float32)
        # Hp == 128 => gate slices are whole-vreg lane groups (no relayout).
        r = jax.nn.sigmoid(gi[:, :Hp] + gh[:, :Hp])
        z = jax.nn.sigmoid(gi[:, Hp:2 * Hp] + gh[:, Hp:2 * Hp])
        n = jnp.tanh(gi[:, 2 * Hp:] + r * (gh[:, 2 * Hp:] + enc_bhn))
        return (1.0 - z) * n + z * h

    h0 = jnp.zeros((Bp, Hp), jnp.float32)
    # TODO(synk): bound the unroll factor for realistic S (full unroll fine at S=8).
    h_n = jax.lax.fori_loop(0, S, enc_step, h0, unroll=True)

    # ---------------- Context-dependent projections (hoisted: context is constant) -------
    context = h_n                                                   # torch h_n.permute(1,0,2)
    gi_ctx = (jnp.dot(context, dec_wic_ref[...],
                      preferred_element_type=jnp.float32) + dec_bi_ref[...])   # (Bp, 3Hp)
    cls_ctx = (jnp.dot(context, cls_wc_ref[...],
                       preferred_element_type=jnp.float32) + cls_b_ref[...])   # (Bp, Vp)

    # ---------------- Decoder (resident operands loaded once) ----------------
    dec_wie = dec_wie_ref[...]
    dec_wh = dec_wh_ref[...]
    dec_bhn = dec_bhn_ref[...]
    cls_weh = cls_weh_ref[...]
    emb_tbl = emb_tbl_ref[...]
    iota_v = jax.lax.broadcasted_iota(jnp.int32, (Bp, Vp), 1)

    def dec_step(t, carry):
        x, h = carry                                                # (Bp,Ep), (Bp,Hp) vregs
        gi = jnp.dot(x, dec_wie, preferred_element_type=jnp.float32) + gi_ctx
        gh = jnp.dot(h, dec_wh, preferred_element_type=jnp.float32)
        r = jax.nn.sigmoid(gi[:, :Hp] + gh[:, :Hp])
        z = jax.nn.sigmoid(gi[:, Hp:2 * Hp] + gh[:, Hp:2 * Hp])
        n = jnp.tanh(gi[:, 2 * Hp:] + r * (gh[:, 2 * Hp:] + dec_bhn))
        h_new = (1.0 - z) * n + z * h

        # Fused classifier: one (Bp, Ep+Hp) x (Ep+Hp, Vp) dot; context part precomputed.
        logits = (jnp.dot(jnp.concatenate([x, h_new], axis=-1), cls_weh,
                          preferred_element_type=jnp.float32) + cls_ctx)
        logits_ref[pl.ds(t, 1)] = logits[None]                      # lane-dense store

        # Next-step input embedding: teacher token or greedy argmax feedback.
        mx = jnp.max(logits, axis=-1, keepdims=True)
        # first-index tie-break (== torch argmax); pad classes carry -1e9 bias.
        am = jnp.min(jnp.where(logits == mx, iota_v, Vp), axis=-1, keepdims=True)
        onehot = (iota_v == am).astype(jnp.float32)
        emb_greedy = jnp.dot(onehot, emb_tbl, preferred_element_type=jnp.float32)
        w = (teach_ref[t] > 0).astype(jnp.float32)                  # scalar 0/1 from SMEM
        x_next = w * trg_emb_ref[t] + (1.0 - w) * emb_greedy
        return (x_next, h_new)

    jax.lax.fori_loop(0, Sm1, dec_step, (emb0_ref[...], h_n), unroll=True)


def fused_translator(teach, x_flat, emb0, trg_emb, p):
    """Returns decoder logits (S-1, Bp, Vp) for steps t = 1 .. S-1 (time-major)."""
    Sm1, Bp, Ep = trg_emb.shape
    SB = x_flat.shape[0]
    S = SB // Bp
    Hp, Vp = p["Hp"], p["Vp"]

    args = (teach, x_flat, emb0, trg_emb,
            p["enc_wi"], p["enc_wh"], p["enc_bi"], p["enc_bhn"],
            p["dec_wie"], p["dec_wic"], p["dec_wh"], p["dec_bi"], p["dec_bhn"],
            p["cls_weh"], p["cls_wc"], p["cls_b"], p["dec_emb_pad"])

    flops = (2 * SB * Ep * 3 * Hp                       # encoder input projection (hoisted)
             + 2 * S * Bp * Hp * 3 * Hp                 # encoder recurrence
             + 2 * Bp * Hp * (3 * Hp + Vp)              # hoisted context projections
             + Sm1 * 2 * Bp * (Ep * 3 * Hp + Hp * 3 * Hp
                               + (Ep + Hp) * Vp + Vp * Ep))
    transcendentals = (S + Sm1) * 3 * Bp * Hp
    bytes_accessed = (sum(int(a.size) * a.dtype.itemsize for a in args)
                      + Sm1 * Bp * Vp * 4)

    return pl.pallas_call(
        _translator_kernel,
        out_shape=jax.ShapeDtypeStruct((Sm1, Bp, Vp), jnp.float32),
        in_specs=([pl.BlockSpec(memory_space=pltpu.MemorySpace.SMEM)]          # teach flags
                  + [pl.BlockSpec(memory_space=pltpu.MemorySpace.VMEM)] * (len(args) - 1)),
        out_specs=pl.BlockSpec(memory_space=pltpu.MemorySpace.VMEM),
        scratch_shapes=[pltpu.VMEM((SB, 3 * Hp), jnp.float32)],                # hoisted gi
        compiler_params=pltpu.CompilerParams(vmem_limit_bytes=32 * 1024 * 1024),
        cost_estimate=pl.CostEstimate(flops=flops, transcendentals=transcendentals,
                                      bytes_accessed=bytes_accessed),
    )(*args)


# ---------------------------------------------------------------------------
# Parameter construction (deterministic, matches nn.Module shapes; padded layout).
# ---------------------------------------------------------------------------
def init_params(key, src_vocab, trg_vocab, E, H):
    Ep = _round_up(E, LANE)
    Hp = _round_up(H, LANE)
    Vp = _round_up(trg_vocab, LANE)
    ks = jax.random.split(key, 12)
    kinv = H ** -0.5

    def unif(k, shape, scale):
        return jax.random.uniform(k, shape, jnp.float32, -scale, scale)

    def pad_rows(w, rows):
        return jnp.zeros((rows, w.shape[1]), jnp.float32).at[:w.shape[0]].set(w)

    def pad_cols(w, cols):
        return jnp.zeros((w.shape[0], cols), jnp.float32).at[:, :w.shape[1]].set(w)

    def pad_gate_cols(w):
        # (in, 3H) -> (in, 3Hp); each gate block placed at [k*Hp : k*Hp + H]
        out = jnp.zeros((w.shape[0], 3 * Hp), jnp.float32)
        for k in range(3):
            out = out.at[:, k * Hp:k * Hp + H].set(w[:, k * H:(k + 1) * H])
        return out

    # embeddings (padding_idx=2 rows zeroed)
    enc_emb = jax.random.normal(ks[0], (src_vocab, E), jnp.float32).at[2].set(0.0)
    dec_emb = jax.random.normal(ks[1], (trg_vocab, E), jnp.float32).at[2].set(0.0)

    # encoder GRU(E -> H); weights pre-transposed, gate order [r, z, n]
    enc_wi = unif(ks[2], (E, 3 * H), kinv)
    enc_wh = unif(ks[3], (H, 3 * H), kinv)
    enc_bi = unif(ks[4], (3 * H,), kinv)
    enc_bh = unif(ks[5], (3 * H,), kinv)
    enc_bi_fold = jnp.concatenate([enc_bi[:2 * H] + enc_bh[:2 * H], enc_bi[2 * H:]])

    # decoder GRU(E+H -> H); rows [0:E] act on the embedding, [E:E+H] on the context
    dec_wih = unif(ks[6], (E + H, 3 * H), kinv)
    dec_whh = unif(ks[7], (H, 3 * H), kinv)
    dec_bi = unif(ks[8], (3 * H,), kinv)
    dec_bh = unif(ks[9], (3 * H,), kinv)
    dec_bi_fold = jnp.concatenate([dec_bi[:2 * H] + dec_bh[:2 * H], dec_bi[2 * H:]])

    # classifier Linear(E + 2H -> trg_vocab); rows ordered [embed | context | h_new]
    # (torch: input = cat((embed, context)); logits = classify(cat((input, output))))
    lin_scale = (E + 2 * H) ** -0.5
    wc_full = unif(ks[10], (E + 2 * H, trg_vocab), lin_scale)
    cls_b = unif(ks[11], (trg_vocab,), lin_scale)

    cls_we = pad_cols(pad_rows(wc_full[:E], Ep), Vp)                 # (Ep, Vp)
    cls_wc = pad_cols(pad_rows(wc_full[E:E + H], Hp), Vp)            # (Hp, Vp) context rows
    cls_wh = pad_cols(pad_rows(wc_full[E + H:], Hp), Vp)             # (Hp, Vp) h_new rows
    cls_weh = jnp.concatenate([cls_we, cls_wh], axis=0)              # (Ep+Hp, Vp) fused

    return {
        "E": E, "Ep": Ep, "H": H, "Hp": Hp, "V": trg_vocab, "Vp": Vp,
        "enc_emb_pad": pad_cols(enc_emb, Ep),                        # (src_vocab, Ep)
        "dec_emb_pad": pad_cols(pad_rows(dec_emb, Vp), Ep),          # (Vp, Ep)
        # encoder
        "enc_wi": pad_gate_cols(pad_rows(enc_wi, Ep)),               # (Ep, 3Hp)
        "enc_wh": pad_gate_cols(pad_rows(enc_wh, Hp)),               # (Hp, 3Hp)
        "enc_bi": pad_gate_cols(enc_bi_fold[None, :]),               # (1, 3Hp)
        "enc_bhn": jnp.zeros((1, Hp), jnp.float32).at[0, :H].set(enc_bh[2 * H:]),
        # decoder GRU
        "dec_wie": pad_gate_cols(pad_rows(dec_wih[:E], Ep)),         # (Ep, 3Hp)
        "dec_wic": pad_gate_cols(pad_rows(dec_wih[E:], Hp)),         # (Hp, 3Hp)
        "dec_wh": pad_gate_cols(pad_rows(dec_whh, Hp)),              # (Hp, 3Hp)
        "dec_bi": pad_gate_cols(dec_bi_fold[None, :]),               # (1, 3Hp)
        "dec_bhn": jnp.zeros((1, Hp), jnp.float32).at[0, :H].set(dec_bh[2 * H:]),
        # classifier (fused [embed ; h_new] rows + separate context rows); padded vocab
        # columns get bias -1e9 so greedy argmax never selects them.
        "cls_weh": cls_weh,                                          # (Ep+Hp, Vp)
        "cls_wc": cls_wc,                                            # (Hp, Vp)
        "cls_b": jnp.full((1, Vp), -1e9, jnp.float32).at[0, :trg_vocab].set(cls_b),
    }


# ---------------------------------------------------------------------------
# Full GRUTranslator forward.
# ---------------------------------------------------------------------------
def gru_translator_forward(params, src, trg, teach_threshold=0.5):
    B, S = src.shape
    Ep, V, Vp = params["Ep"], params["V"], params["Vp"]
    Bp = _round_up(B, SUBLANE)

    src_p = jnp.pad(src, ((0, Bp - B), (0, 0)), constant_values=2)
    trg_p = jnp.pad(trg, ((0, Bp - B), (0, 0)), constant_values=2)

    # Embedding gathers stay in XLA (tiny); everything else runs in one fused kernel.
    x_emb = jnp.take(params["enc_emb_pad"], src_p, axis=0)                     # (Bp, S, Ep)
    x_flat = jnp.transpose(x_emb, (1, 0, 2)).reshape(S * Bp, Ep)               # time-major
    emb0 = jnp.take(params["dec_emb_pad"], trg_p[:, 0], axis=0)                # (Bp, Ep)
    trg_emb = jnp.transpose(
        jnp.take(params["dec_emb_pad"], trg_p[:, 1:], axis=0), (1, 0, 2))      # (S-1, Bp, Ep)

    # Teacher-forcing decisions: same python RNG draw order as the torch loop.
    teach = jnp.asarray(
        [1 if random.random() < teach_threshold else 0 for _ in range(1, S)],
        dtype=jnp.int32)

    logits = fused_translator(teach, x_flat, emb0, trg_emb, params)            # (S-1, Bp, Vp)

    out = jnp.transpose(logits, (1, 0, 2))[:B, :, :V]                          # (B, S-1, V)
    return jnp.concatenate([jnp.zeros((B, 1, V), jnp.float32), out], axis=1)


# ---------------------------------------------------------------------------
if __name__ == "__main__":
    SRC_VOCAB = 64
    TRG_VOCAB = 64
    EMBED = 32
    HIDDEN = 32
    B, S = 4, 8

    random.seed(0)  # determinize teacher-forcing choices
    key = jax.random.PRNGKey(0)
    kp, ks, kt = jax.random.split(key, 3)

    params = init_params(kp, SRC_VOCAB, TRG_VOCAB, EMBED, HIDDEN)
    src = jax.random.randint(ks, (B, S), 0, SRC_VOCAB, dtype=jnp.int32)
    trg = jax.random.randint(kt, (B, S), 0, TRG_VOCAB, dtype=jnp.int32)

    out = gru_translator_forward(params, src, trg, teach_threshold=0.5)
    jax.block_until_ready(out)
    assert out.shape == (B, S, TRG_VOCAB) and out.dtype == jnp.float32
    print("KERNEL_OK")
</pallas_src>

<mosaic_0001>
module attributes {stable_mosaic.version = 11 : i64} {
  func.func @_translator_kernel(%arg0: memref<7xi32, #tpu.memory_space<smem>>, %arg1: memref<64x128xf32, #tpu.memory_space<vmem>>, %arg2: memref<8x128xf32, #tpu.memory_space<vmem>>, %arg3: memref<7x8x128xf32, #tpu.memory_space<vmem>>, %arg4: memref<128x384xf32, #tpu.memory_space<vmem>>, %arg5: memref<128x384xf32, #tpu.memory_space<vmem>>, %arg6: memref<1x384xf32, #tpu.memory_space<vmem>>, %arg7: memref<1x128xf32, #tpu.memory_space<vmem>>, %arg8: memref<128x384xf32, #tpu.memory_space<vmem>>, %arg9: memref<128x384xf32, #tpu.memory_space<vmem>>, %arg10: memref<128x384xf32, #tpu.memory_space<vmem>>, %arg11: memref<1x384xf32, #tpu.memory_space<vmem>>, %arg12: memref<1x128xf32, #tpu.memory_space<vmem>>, %arg13: memref<256x128xf32, #tpu.memory_space<vmem>>, %arg14: memref<128x128xf32, #tpu.memory_space<vmem>>, %arg15: memref<1x128xf32, #tpu.memory_space<vmem>>, %arg16: memref<128x128xf32, #tpu.memory_space<vmem>>, %arg17: memref<7x8x128xf32, #tpu.memory_space<vmem>>, %arg18: memref<64x384xf32, #tpu.memory_space<vmem>>) attributes {dimension_semantics = [], scalar_prefetch = 0 : i64, scratch_operands = 1 : i64, tpu.core_type = #tpu.core_type<tc>} {
    %c0 = arith.constant 0 : index
    %c0_0 = arith.constant 0 : index
    %0 = vector.load %arg1[%c0, %c0_0] : memref<64x128xf32, #tpu.memory_space<vmem>>, vector<64x128xf32>
    %c0_1 = arith.constant 0 : index
    %c0_2 = arith.constant 0 : index
    %1 = vector.load %arg4[%c0_1, %c0_2] : memref<128x384xf32, #tpu.memory_space<vmem>>, vector<128x384xf32>
    %cst = arith.constant dense<0.000000e+00> : vector<64x384xf32>
    %2 = tpu.matmul %0, %1, %cst {dimension_numbers = #tpu.dot_dimension_numbers<[1], [0], [0], [1], [0, 0, 1, 1], [], []>} : vector<64x128xf32>, vector<128x384xf32>, vector<64x384xf32> -> vector<64x384xf32>
    %c0_3 = arith.constant 0 : index
    %c0_4 = arith.constant 0 : index
    %3 = vector.load %arg6[%c0_3, %c0_4] : memref<1x384xf32, #tpu.memory_space<vmem>>, vector<1x384xf32>
    %4 = vector.broadcast %3 : vector<1x384xf32> to vector<64x384xf32>
    %5 = arith.addf %2, %4 : vector<64x384xf32>
    %c0_5 = arith.constant 0 : index
    %c0_6 = arith.constant 0 : index
    %6 = vector.load %arg18[%c0_5, %c0_6] : memref<64x384xf32, #tpu.memory_space<vmem>>, vector<64x384xf32>
    tpu.vector_store %arg18[%c0_5, %c0_6], %5 {strides = array<i32>} : memref<64x384xf32, #tpu.memory_space<vmem>>, vector<64x384xf32>,
    %c0_7 = arith.constant 0 : index
    %c0_8 = arith.constant 0 : index
    %7 = vector.load %arg5[%c0_7, %c0_8] : memref<128x384xf32, #tpu.memory_space<vmem>>, vector<128x384xf32>
    %c0_9 = arith.constant 0 : index
    %c0_10 = arith.constant 0 : index
    %8 = vector.load %arg7[%c0_9, %c0_10] : memref<1x128xf32, #tpu.memory_space<vmem>>, vector<1x128xf32>
    %cst_11 = arith.constant 0.000000e+00 : f32
    %9 = vector.broadcast %cst_11 : f32 to vector<8x128xf32>
    %c0_i32 = arith.constant 0 : i32
    %c8_i32 = arith.constant 8 : i32
    %10 = arith.muli %c0_i32, %c8_i32 : i32
    %11 = tpu.assume_multiple %10, 8 : i32
    %12 = arith.index_cast %11 : i32 to index
    %c0_12 = arith.constant 0 : index
    %13 = vector.load %arg18[%12, %c0_12] : memref<64x384xf32, #tpu.memory_space<vmem>>, vector<8x384xf32>
    %cst_13 = arith.constant dense<0.000000e+00> : vector<8x384xf32>
    %14 = tpu.matmul %9, %7, %cst_13 {dimension_numbers = #tpu.dot_dimension_numbers<[1], [0], [0], [1], [0, 0, 1, 1], [], []>} : vector<8x128xf32>, vector<128x384xf32>, vector<8x384xf32> -> vector<8x384xf32>
    %15 = vector.extract_strided_slice %13 {offsets = [0, 0], sizes = [8, 128], strides = [1, 1]} : vector<8x384xf32> to vector<8x128xf32>
    %16 = vector.extract_strided_slice %14 {offsets = [0, 0], sizes = [8, 128], strides = [1, 1]} : vector<8x384xf32> to vector<8x128xf32>
    %17 = arith.addf %15, %16 : vector<8x128xf32>
    %18 = arith.negf %17 : vector<8x128xf32>
    %19 = math.exp %18 : vector<8x128xf32>
    %cst_14 = arith.constant 1.000000e+00 : f32
    %20 = vector.broadcast %cst_14 : f32 to vector<8x128xf32>
    %21 = arith.addf %20, %19 : vector<8x128xf32>
    %22 = arith.divf %20, %21 : vector<8x128xf32>
    %23 = vector.extract_strided_slice %13 {offsets = [0, 128], sizes = [8, 128], strides = [1, 1]} : vector<8x384xf32> to vector<8x128xf32>
    %24 = vector.extract_strided_slice %14 {offsets = [0, 128], sizes = [8, 128], strides = [1, 1]} : vector<8x384xf32> to vector<8x128xf32>
    %25 = arith.addf %23, %24 : vector<8x128xf32>
    %26 = arith.negf %25 : vector<8x128xf32>
    %27 = math.exp %26 : vector<8x128xf32>
    %cst_15 = arith.constant 1.000000e+00 : f32
    %28 = vector.broadcast %cst_15 : f32 to vector<8x128xf32>
    %29 = arith.addf %28, %27 : vector<8x128xf32>
    %30 = arith.divf %28, %29 : vector<8x128xf32>
    %31 = vector.extract_strided_slice %13 {offsets = [0, 256], sizes = [8, 128], strides = [1, 1]} : vector<8x384xf32> to vector<8x128xf32>
    %32 = vector.extract_strided_slice %14 {offsets = [0, 256], sizes = [8, 128], strides = [1, 1]} : vector<8x384xf32> to vector<8x128xf32>
    %33 = vector.broadcast %8 : vector<1x128xf32> to vector<8x128xf32>
    %34 = arith.addf %32, %33 : vector<8x128xf32>
    %35 = arith.mulf %22, %34 : vector<8x128xf32>
    %36 = arith.addf %31, %35 : vector<8x128xf32>
    %37 = math.tanh %36 : vector<8x128xf32>
    %cst_16 = arith.constant 1.000000e+00 : f32
    %38 = vector.broadcast %cst_16 : f32 to vector<8x128xf32>
    %39 = arith.subf %38, %30 : vector<8x128xf32>
    %40 = arith.mulf %39, %37 : vector<8x128xf32>
    %41 = arith.mulf %30, %9 : vector<8x128xf32>
    %42 = arith.addf %40, %41 : vector<8x128xf32>
    %c1_i32 = arith.constant 1 : i32
    %c8_i32_17 = arith.constant 8 : i32
    %43 = arith.muli %c1_i32, %c8_i32_17 : i32
    %44 = tpu.assume_multiple %43, 8 : i32
    %45 = arith.index_cast %44 : i32 to index
    %c0_18 = arith.constant 0 : index
    %46 = vector.load %arg18[%45, %c0_18] : memref<64x384xf32, #tpu.memory_space<vmem>>, vector<8x384xf32>
    %cst_19 = arith.constant dense<0.000000e+00> : vector<8x384xf32>
    %47 = tpu.matmul %42, %7, %cst_19 {dimension_numbers = #tpu.dot_dimension_numbers<[1], [0], [0], [1], [0, 0, 1, 1], [], []>} : vector<8x128xf32>, vector<128x384xf32>, vector<8x384xf32> -> vector<8x384xf32>
    %48 = vector.extract_strided_slice %46 {offsets = [0, 0], sizes = [8, 128], strides = [1, 1]} : vector<8x384xf32> to vector<8x128xf32>
    %49 = vector.extract_strided_slice %47 {offsets = [0, 0], sizes = [8, 128], strides = [1, 1]} : vector<8x384xf32> to vector<8x128xf32>
    %50 = arith.addf %48, %49 : vector<8x128xf32>
    %51 = arith.negf %50 : vector<8x128xf32>
    %52 = math.exp %51 : vector<8x128xf32>
    %cst_20 = arith.constant 1.000000e+00 : f32
    %53 = vector.broadcast %cst_20 : f32 to vector<8x128xf32>
    %54 = arith.addf %53, %52 : vector<8x128xf32>
    %55 = arith.divf %53, %54 : vector<8x128xf32>
    %56 = vector.extract_strided_slice %46 {offsets = [0, 128], sizes = [8, 128], strides = [1, 1]} : vector<8x384xf32> to vector<8x128xf32>
    %57 = vector.extract_strided_slice %47 {offsets = [0, 128], sizes = [8, 128], strides = [1, 1]} : vector<8x384xf32> to vector<8x128xf32>
    %58 = arith.addf %56, %57 : vector<8x128xf32>
    %59 = arith.negf %58 : vector<8x128xf32>
    %60 = math.exp %59 : vector<8x128xf32>
    %cst_21 = arith.constant 1.000000e+00 : f32
    %61 = vector.broadcast %cst_21 : f32 to vector<8x128xf32>
    %62 = arith.addf %61, %60 : vector<8x128xf32>
    %63 = arith.divf %61, %62 : vector<8x128xf32>
    %64 = vector.extract_strided_slice %46 {offsets = [0, 256], sizes = [8, 128], strides = [1, 1]} : vector<8x384xf32> to vector<8x128xf32>
    %65 = vector.extract_strided_slice %47 {offsets = [0, 256], sizes = [8, 128], strides = [1, 1]} : vector<8x384xf32> to vector<8x128xf32>
    %66 = vector.broadcast %8 : vector<1x128xf32> to vector<8x128xf32>
    %67 = arith.addf %65, %66 : vector<8x128xf32>
    %68 = arith.mulf %55, %67 : vector<8x128xf32>
    %69 = arith.addf %64, %68 : vector<8x128xf32>
    %70 = math.tanh %69 : vector<8x128xf32>
    %cst_22 = arith.constant 1.000000e+00 : f32
    %71 = vector.broadcast %cst_22 : f32 to vector<8x128xf32>
    %72 = arith.subf %71, %63 : vector<8x128xf32>
    %73 = arith.mulf %72, %70 : vector<8x128xf32>
    %74 = arith.mulf %63, %42 : vector<8x128xf32>
    %75 = arith.addf %73, %74 : vector<8x128xf32>
    %c2_i32 = arith.constant 2 : i32
    %c8_i32_23 = arith.constant 8 : i32
    %76 = arith.muli %c2_i32, %c8_i32_23 : i32
    %77 = tpu.assume_multiple %76, 8 : i32
    %78 = arith.index_cast %77 : i32 to index
    %c0_24 = arith.constant 0 : index
    %79 = vector.load %arg18[%78, %c0_24] : memref<64x384xf32, #tpu.memory_space<vmem>>, vector<8x384xf32>
    %cst_25 = arith.constant dense<0.000000e+00> : vector<8x384xf32>
    %80 = tpu.matmul %75, %7, %cst_25 {dimension_numbers = #tpu.dot_dimension_numbers<[1], [0], [0], [1], [0, 0, 1, 1], [], []>} : vector<8x128xf32>, vector<128x384xf32>, vector<8x384xf32> -> vector<8x384xf32>
    %81 = vector.extract_strided_slice %79 {offsets = [0, 0], sizes = [8, 128], strides = [1, 1]} : vector<8x384xf32> to vector<8x128xf32>
    %82 = vector.extract_strided_slice %80 {offsets = [0, 0], sizes = [8, 128], strides = [1, 1]} : vector<8x384xf32> to vector<8x128xf32>
    %83 = arith.addf %81, %82 : vector<8x128xf32>
    %84 = arith.negf %83 : vector<8x128xf32>
    %85 = math.exp %84 : vector<8x128xf32>
    %cst_26 = arith.constant 1.000000e+00 : f32
    %86 = vector.broadcast %cst_26 : f32 to vector<8x128xf32>
    %87 = arith.addf %86, %85 : vector<8x128xf32>
    %88 = arith.divf %86, %87 : vector<8x128xf32>
    %89 = vector.extract_strided_slice %79 {offsets = [0, 128], sizes = [8, 128], strides = [1, 1]} : vector<8x384xf32> to vector<8x128xf32>
    %90 = vector.extract_strided_slice %80 {offsets = [0, 128], sizes = [8, 128], strides = [1, 1]} : vector<8x384xf32> to vector<8x128xf32>
    %91 = arith.addf %89, %90 : vector<8x128xf32>
    %92 = arith.negf %91 : vector<8x128xf32>
    %93 = math.exp %92 : vector<8x128xf32>
    %cst_27 = arith.constant 1.000000e+00 : f32
    %94 = vector.broadcast %cst_27 : f32 to vector<8x128xf32>
    %95 = arith.addf %94, %93 : vector<8x128xf32>
    %96 = arith.divf %94, %95 : vector<8x128xf32>
    %97 = vector.extract_strided_slice %79 {offsets = [0, 256], sizes = [8, 128], strides = [1, 1]} : vector<8x384xf32> to vector<8x128xf32>
    %98 = vector.extract_strided_slice %80 {offsets = [0, 256], sizes = [8, 128], strides = [1, 1]} : vector<8x384xf32> to vector<8x128xf32>
    %99 = vector.broadcast %8 : vector<1x128xf32> to vector<8x128xf32>
    %100 = arith.addf %98, %99 : vector<8x128xf32>
    %101 = arith.mulf %88, %100 : vector<8x128xf32>
    %102 = arith.addf %97, %101 : vector<8x128xf32>
    %103 = math.tanh %102 : vector<8x128xf32>
    %cst_28 = arith.constant 1.000000e+00 : f32
    %104 = vector.broadcast %cst_28 : f32 to vector<8x128xf32>
    %105 = arith.subf %104, %96 : vector<8x128xf32>
    %106 = arith.mulf %105, %103 : vector<8x128xf32>
    %107 = arith.mulf %96, %75 : vector<8x128xf32>
    %108 = arith.addf %106, %107 : vector<8x128xf32>
    %c3_i32 = arith.constant 3 : i32
    %c8_i32_29 = arith.constant 8 : i32
    %109 = arith.muli %c3_i32, %c8_i32_29 : i32
    %110 = tpu.assume_multiple %109, 8 : i32
    %111 = arith.index_cast %110 : i32 to index
    %c0_30 = arith.constant 0 : index
    %112 = vector.load %arg18[%111, %c0_30] : memref<64x384xf32, #tpu.memory_space<vmem>>, vector<8x384xf32>
    %cst_31 = arith.constant dense<0.000000e+00> : vector<8x384xf32>
    %113 = tpu.matmul %108, %7, %cst_31 {dimension_numbers = #tpu.dot_dimension_numbers<[1], [0], [0], [1], [0, 0, 1, 1], [], []>} : vector<8x128xf32>, vector<128x384xf32>, vector<8x384xf32> -> vector<8x384xf32>
    %114 = vector.extract_strided_slice %112 {offsets = [0, 0], sizes = [8, 128], strides = [1, 1]} : vector<8x384xf32> to vector<8x128xf32>
    %115 = vector.extract_strided_slice %113 {offsets = [0, 0], sizes = [8, 128], strides = [1, 1]} : vector<8x384xf32> to vector<8x128xf32>
    %116 = arith.addf %114, %115 : vector<8x128xf32>
    %117 = arith.negf %116 : vector<8x128xf32>
    %118 = math.exp %117 : vector<8x128xf32>
    %cst_32 = arith.constant 1.000000e+00 : f32
    %119 = vector.broadcast %cst_32 : f32 to vector<8x128xf32>
    %120 = arith.addf %119, %118 : vector<8x128xf32>
    %121 = arith.divf %119, %120 : vector<8x128xf32>
    %122 = vector.extract_strided_slice %112 {offsets = [0, 128], sizes = [8, 128], strides = [1, 1]} : vector<8x384xf32> to vector<8x128xf32>
    %123 = vector.extract_strided_slice %113 {offsets = [0, 128], sizes = [8, 128], strides = [1, 1]} : vector<8x384xf32> to vector<8x128xf32>
    %124 = arith.addf %122, %123 : vector<8x128xf32>
    %125 = arith.negf %124 : vector<8x128xf32>
    %126 = math.exp %125 : vector<8x128xf32>
    %cst_33 = arith.constant 1.000000e+00 : f32
    %127 = vector.broadcast %cst_33 : f32 to vector<8x128xf32>
    %128 = arith.addf %127, %126 : vector<8x128xf32>
    %129 = arith.divf %127, %128 : vector<8x128xf32>
    %130 = vector.extract_strided_slice %112 {offsets = [0, 256], sizes = [8, 128], strides = [1, 1]} : vector<8x384xf32> to vector<8x128xf32>
    %131 = vector.extract_strided_slice %113 {offsets = [0, 256], sizes = [8, 128], strides = [1, 1]} : vector<8x384xf32> to vector<8x128xf32>
    %132 = vector.broadcast %8 : vector<1x128xf32> to vector<8x128xf32>
    %133 = arith.addf %131, %132 : vector<8x128xf32>
    %134 = arith.mulf %121, %133 : vector<8x128xf32>
    %135 = arith.addf %130, %134 : vector<8x128xf32>
    %136 = math.tanh %135 : vector<8x128xf32>
    %cst_34 = arith.constant 1.000000e+00 : f32
    %137 = vector.broadcast %cst_34 : f32 to vector<8x128xf32>
    %138 = arith.subf %137, %129 : vector<8x128xf32>
    %139 = arith.mulf %138, %136 : vector<8x128xf32>
    %140 = arith.mulf %129, %108 : vector<8x128xf32>
    %141 = arith.addf %139, %140 : vector<8x128xf32>
    %c4_i32 = arith.constant 4 : i32
    %c8_i32_35 = arith.constant 8 : i32
    %142 = arith.muli %c4_i32, %c8_i32_35 : i32
    %143 = tpu.assume_multiple %142, 8 : i32
    %144 = arith.index_cast %143 : i32 to index
    %c0_36 = arith.constant 0 : index
    %145 = vector.load %arg18[%144, %c0_36] : memref<64x384xf32, #tpu.memory_space<vmem>>, vector<8x384xf32>
    %cst_37 = arith.constant dense<0.000000e+00> : vector<8x384xf32>
    %146 = tpu.matmul %141, %7, %cst_37 {dimension_numbers = #tpu.dot_dimension_numbers<[1], [0], [0], [1], [0, 0, 1, 1], [], []>} : vector<8x128xf32>, vector<128x384xf32>, vector<8x384xf32> -> vector<8x384xf32>
    %147 = vector.extract_strided_slice %145 {offsets = [0, 0], sizes = [8, 128], strides = [1, 1]} : vector<8x384xf32> to vector<8x128xf32>
    %148 = vector.extract_strided_slice %146 {offsets = [0, 0], sizes = [8, 128], strides = [1, 1]} : vector<8x384xf32> to vector<8x128xf32>
    %149 = arith.addf %147, %148 : vector<8x128xf32>
    %150 = arith.negf %149 : vector<8x128xf32>
    %151 = math.exp %150 : vector<8x128xf32>
    %cst_38 = arith.constant 1.000000e+00 : f32
    %152 = vector.broadcast %cst_38 : f32 to vector<8x128xf32>
    %153 = arith.addf %152, %151 : vector<8x128xf32>
    %154 = arith.divf %152, %153 : vector<8x128xf32>
    %155 = vector.extract_strided_slice %145 {offsets = [0, 128], sizes = [8, 128], strides = [1, 1]} : vector<8x384xf32> to vector<8x128xf32>
    %156 = vector.extract_strided_slice %146 {offsets = [0, 128], sizes = [8, 128], strides = [1, 1]} : vector<8x384xf32> to vector<8x128xf32>
    %157 = arith.addf %155, %156 : vector<8x128xf32>
    %158 = arith.negf %157 : vector<8x128xf32>
    %159 = math.exp %158 : vector<8x128xf32>
    %cst_39 = arith.constant 1.000000e+00 : f32
    %160 = vector.broadcast %cst_39 : f32 to vector<8x128xf32>
    %161 = arith.addf %160, %159 : vector<8x128xf32>
    %162 = arith.divf %160, %161 : vector<8x128xf32>
    %163 = vector.extract_strided_slice %145 {offsets = [0, 256], sizes = [8, 128], strides = [1, 1]} : vector<8x384xf32> to vector<8x128xf32>
    %164 = vector.extract_strided_slice %146 {offsets = [0, 256], sizes = [8, 128], strides = [1, 1]} : vector<8x384xf32> to vector<8x128xf32>
    %165 = vector.broadcast %8 : vector<1x128xf32> to vector<8x128xf32>
    %166 = arith.addf %164, %165 : vector<8x128xf32>
    %167 = arith.mulf %154, %166 : vector<8x128xf32>
    %168 = arith.addf %163, %167 : vector<8x128xf32>
    %169 = math.tanh %168 : vector<8x128xf32>
    %cst_40 = arith.constant 1.000000e+00 : f32
    %170 = vector.broadcast %cst_40 : f32 to vector<8x128xf32>
    %171 = arith.subf %170, %162 : vector<8x128xf32>
    %172 = arith.mulf %171, %169 : vector<8x128xf32>
    %173 = arith.mulf %162, %141 : vector<8x128xf32>
    %174 = arith.addf %172, %173 : vector<8x128xf32>
    %c5_i32 = arith.constant 5 : i32
    %c8_i32_41 = arith.constant 8 : i32
    %175 = arith.muli %c5_i32, %c8_i32_41 : i32
    %176 = tpu.assume_multiple %175, 8 : i32
    %177 = arith.index_cast %176 : i32 to index
    %c0_42 = arith.constant 0 : index
    %178 = vector.load %arg18[%177, %c0_42] : memref<64x384xf32, #tpu.memory_space<vmem>>, vector<8x384xf32>
    %cst_43 = arith.constant dense<0.000000e+00> : vector<8x384xf32>
    %179 = tpu.matmul %174, %7, %cst_43 {dimension_numbers = #tpu.dot_dimension_numbers<[1], [0], [0], [1], [0, 0, 1, 1], [], []>} : vector<8x128xf32>, vector<128x384xf32>, vector<8x384xf32> -> vector<8x384xf32>
    %180 = vector.extract_strided_slice %178 {offsets = [0, 0], sizes = [8, 128], strides = [1, 1]} : vector<8x384xf32> to vector<8x128xf32>
    %181 = vector.extract_strided_slice %179 {offsets = [0, 0], sizes = [8, 128], strides = [1, 1]} : vector<8x384xf32> to vector<8x128xf32>
    %182 = arith.addf %180, %181 : vector<8x128xf32>
    %183 = arith.negf %182 : vector<8x128xf32>
    %184 = math.exp %183 : vector<8x128xf32>
    %cst_44 = arith.constant 1.000000e+00 : f32
    %185 = vector.broadcast %cst_44 : f32 to vector<8x128xf32>
    %186 = arith.addf %185, %184 : vector<8x128xf32>
    %187 = arith.divf %185, %186 : vector<8x128xf32>
    %188 = vector.extract_strided_slice %178 {offsets = [0, 128], sizes = [8, 128], strides = [1, 1]} : vector<8x384xf32> to vector<8x128xf32>
    %189 = vector.extract_strided_slice %179 {offsets = [0, 128], sizes = [8, 128], strides = [1, 1]} : vector<8x384xf32> to vector<8x128xf32>
    %190 = arith.addf %188, %189 : vector<8x128xf32>
    %191 = arith.negf %190 : vector<8x128xf32>
    %192 = math.exp %191 : vector<8x128xf32>
    %cst_45 = arith.constant 1.000000e+00 : f32
    %193 = vector.broadcast %cst_45 : f32 to vector<8x128xf32>
    %194 = arith.addf %193, %192 : vector<8x128xf32>
    %195 = arith.divf %193, %194 : vector<8x128xf32>
    %196 = vector.extract_strided_slice %178 {offsets = [0, 256], sizes = [8, 128], strides = [1, 1]} : vector<8x384xf32> to vector<8x128xf32>
    %197 = vector.extract_strided_slice %179 {offsets = [0, 256], sizes = [8, 128], strides = [1, 1]} : vector<8x384xf32> to vector<8x128xf32>
    %198 = vector.broadcast %8 : vector<1x128xf32> to vector<8x128xf32>
    %199 = arith.addf %197, %198 : vector<8x128xf32>
    %200 = arith.mulf %187, %199 : vector<8x128xf32>
    %201 = arith.addf %196, %200 : vector<8x128xf32>
    %202 = math.tanh %201 : vector<8x128xf32>
    %cst_46 = arith.constant 1.000000e+00 : f32
    %203 = vector.broadcast %cst_46 : f32 to vector<8x128xf32>
    %204 = arith.subf %203, %195 : vector<8x128xf32>
    %205 = arith.mulf %204, %202 : vector<8x128xf32>
    %206 = arith.mulf %195, %174 : vector<8x128xf32>
    %207 = arith.addf %205, %206 : vector<8x128xf32>
    %c6_i32 = arith.constant 6 : i32
    %c8_i32_47 = arith.constant 8 : i32
    %208 = arith.muli %c6_i32, %c8_i32_47 : i32
    %209 = tpu.assume_multiple %208, 8 : i32
    %210 = arith.index_cast %209 : i32 to index
    %c0_48 = arith.constant 0 : index
    %211 = vector.load %arg18[%210, %c0_48] : memref<64x384xf32, #tpu.memory_space<vmem>>, vector<8x384xf32>
    %cst_49 = arith.constant dense<0.000000e+00> : vector<8x384xf32>
    %212 = tpu.matmul %207, %7, %cst_49 {dimension_numbers = #tpu.dot_dimension_numbers<[1], [0], [0], [1], [0, 0, 1, 1], [], []>} : vector<8x128xf32>, vector<128x384xf32>, vector<8x384xf32> -> vector<8x384xf32>
    %213 = vector.extract_strided_slice %211 {offsets = [0, 0], sizes = [8, 128], strides = [1, 1]} : vector<8x384xf32> to vector<8x128xf32>
    %214 = vector.extract_strided_slice %212 {offsets = [0, 0], sizes = [8, 128], strides = [1, 1]} : vector<8x384xf32> to vector<8x128xf32>
    %215 = arith.addf %213, %214 : vector<8x128xf32>
    %216 = arith.negf %215 : vector<8x128xf32>
    %217 = math.exp %216 : vector<8x128xf32>
    %cst_50 = arith.constant 1.000000e+00 : f32
    %218 = vector.broadcast %cst_50 : f32 to vector<8x128xf32>
    %219 = arith.addf %218, %217 : vector<8x128xf32>
    %220 = arith.divf %218, %219 : vector<8x128xf32>
    %221 = vector.extract_strided_slice %211 {offsets = [0, 128], sizes = [8, 128], strides = [1, 1]} : vector<8x384xf32> to vector<8x128xf32>
    %222 = vector.extract_strided_slice %212 {offsets = [0, 128], sizes = [8, 128], strides = [1, 1]} : vector<8x384xf32> to vector<8x128xf32>
    %223 = arith.addf %221, %222 : vector<8x128xf32>
    %224 = arith.negf %223 : vector<8x128xf32>
    %225 = math.exp %224 : vector<8x128xf32>
    %cst_51 = arith.constant 1.000000e+00 : f32
    %226 = vector.broadcast %cst_51 : f32 to vector<8x128xf32>
    %227 = arith.addf %226, %225 : vector<8x128xf32>
    %228 = arith.divf %226, %227 : vector<8x128xf32>
    %229 = vector.extract_strided_slice %211 {offsets = [0, 256], sizes = [8, 128], strides = [1, 1]} : vector<8x384xf32> to vector<8x128xf32>
    %230 = vector.extract_strided_slice %212 {offsets = [0, 256], sizes = [8, 128], strides = [1, 1]} : vector<8x384xf32> to vector<8x128xf32>
    %231 = vector.broadcast %8 : vector<1x128xf32> to vector<8x128xf32>
    %232 = arith.addf %230, %231 : vector<8x128xf32>
    %233 = arith.mulf %220, %232 : vector<8x128xf32>
    %234 = arith.addf %229, %233 : vector<8x128xf32>
    %235 = math.tanh %234 : vector<8x128xf32>
    %cst_52 = arith.constant 1.000000e+00 : f32
    %236 = vector.broadcast %cst_52 : f32 to vector<8x128xf32>
    %237 = arith.subf %236, %228 : vector<8x128xf32>
    %238 = arith.mulf %237, %235 : vector<8x128xf32>
    %239 = arith.mulf %228, %207 : vector<8x128xf32>
    %240 = arith.addf %238, %239 : vector<8x128xf32>
    %c7_i32 = arith.constant 7 : i32
    %c8_i32_53 = arith.constant 8 : i32
    %241 = arith.muli %c7_i32, %c8_i32_53 : i32
    %242 = tpu.assume_multiple %241, 8 : i32
    %243 = arith.index_cast %242 : i32 to index
    %c0_54 = arith.constant 0 : index
    %244 = vector.load %arg18[%243, %c0_54] : memref<64x384xf32, #tpu.memory_space<vmem>>, vector<8x384xf32>
    %cst_55 = arith.constant dense<0.000000e+00> : vector<8x384xf32>
    %245 = tpu.matmul %240, %7, %cst_55 {dimension_numbers = #tpu.dot_dimension_numbers<[1], [0], [0], [1], [0, 0, 1, 1], [], []>} : vector<8x128xf32>, vector<128x384xf32>, vector<8x384xf32> -> vector<8x384xf32>
    %246 = vector.extract_strided_slice %244 {offsets = [0, 0], sizes = [8, 128], strides = [1, 1]} : vector<8x384xf32> to vector<8x128xf32>
    %247 = vector.extract_strided_slice %245 {offsets = [0, 0], sizes = [8, 128], strides = [1, 1]} : vector<8x384xf32> to vector<8x128xf32>
    %248 = arith.addf %246, %247 : vector<8x128xf32>
    %249 = arith.negf %248 : vector<8x128xf32>
    %250 = math.exp %249 : vector<8x128xf32>
    %cst_56 = arith.constant 1.000000e+00 : f32
    %251 = vector.broadcast %cst_56 : f32 to vector<8x128xf32>
    %252 = arith.addf %251, %250 : vector<8x128xf32>
    %253 = arith.divf %251, %252 : vector<8x128xf32>
    %254 = vector.extract_strided_slice %244 {offsets = [0, 128], sizes = [8, 128], strides = [1, 1]} : vector<8x384xf32> to vector<8x128xf32>
    %255 = vector.extract_strided_slice %245 {offsets = [0, 128], sizes = [8, 128], strides = [1, 1]} : vector<8x384xf32> to vector<8x128xf32>
    %256 = arith.addf %254, %255 : vector<8x128xf32>
    %257 = arith.negf %256 : vector<8x128xf32>
    %258 = math.exp %257 : vector<8x128xf32>
    %cst_57 = arith.constant 1.000000e+00 : f32
    %259 = vector.broadcast %cst_57 : f32 to vector<8x128xf32>
    %260 = arith.addf %259, %258 : vector<8x128xf32>
    %261 = arith.divf %259, %260 : vector<8x128xf32>
    %262 = vector.extract_strided_slice %244 {offsets = [0, 256], sizes = [8, 128], strides = [1, 1]} : vector<8x384xf32> to vector<8x128xf32>
    %263 = vector.extract_strided_slice %245 {offsets = [0, 256], sizes = [8, 128], strides = [1, 1]} : vector<8x384xf32> to vector<8x128xf32>
    %264 = vector.broadcast %8 : vector<1x128xf32> to vector<8x128xf32>
    %265 = arith.addf %263, %264 : vector<8x128xf32>
    %266 = arith.mulf %253, %265 : vector<8x128xf32>
    %267 = arith.addf %262, %266 : vector<8x128xf32>
    %268 = math.tanh %267 : vector<8x128xf32>
    %cst_58 = arith.constant 1.000000e+00 : f32
    %269 = vector.broadcast %cst_58 : f32 to vector<8x128xf32>
    %270 = arith.subf %269, %261 : vector<8x128xf32>
    %271 = arith.mulf %270, %268 : vector<8x128xf32>
    %272 = arith.mulf %261, %240 : vector<8x128xf32>
    %273 = arith.addf %271, %272 : vector<8x128xf32>
    %c8_i32_59 = arith.constant 8 : i32
    %c0_60 = arith.constant 0 : index
    %c0_61 = arith.constant 0 : index
    %274 = vector.load %arg9[%c0_60, %c0_61] : memref<128x384xf32, #tpu.memory_space<vmem>>, vector<128x384xf32>
    %cst_62 = arith.constant dense<0.000000e+00> : vector<8x384xf32>
    %275 = tpu.matmul %273, %274, %cst_62 {dimension_numbers = #tpu.dot_dimension_numbers<[1], [0], [0], [1], [0, 0, 1, 1], [], []>} : vector<8x128xf32>, vector<128x384xf32>, vector<8x384xf32> -> vector<8x384xf32>
    %c0_63 = arith.constant 0 : index
    %c0_64 = arith.constant 0 : index
    %276 = vector.load %arg11[%c0_63, %c0_64] : memref<1x384xf32, #tpu.memory_space<vmem>>, vector<1x384xf32>
    %277 = vector.broadcast %276 : vector<1x384xf32> to vector<8x384xf32>
    %278 = arith.addf %275, %277 : vector<8x384xf32>
    %c0_65 = arith.constant 0 : index
    %c0_66 = arith.constant 0 : index
    %279 = vector.load %arg14[%c0_65, %c0_66] : memref<128x128xf32, #tpu.memory_space<vmem>>, vector<128x128xf32>
    %cst_67 = arith.constant dense<0.000000e+00> : vector<8x128xf32>
    %280 = tpu.matmul %273, %279, %cst_67 {dimension_numbers = #tpu.dot_dimension_numbers<[1], [0], [0], [1], [0, 0, 1, 1], [], []>} : vector<8x128xf32>, vector<128x128xf32>, vector<8x128xf32> -> vector<8x128xf32>
    %c0_68 = arith.constant 0 : index
    %c0_69 = arith.constant 0 : index
    %281 = vector.load %arg15[%c0_68, %c0_69] : memref<1x128xf32, #tpu.memory_space<vmem>>, vector<1x128xf32>
    %282 = vector.broadcast %281 : vector<1x128xf32> to vector<8x128xf32>
    %283 = arith.addf %280, %282 : vector<8x128xf32>
    %c0_70 = arith.constant 0 : index
    %c0_71 = arith.constant 0 : index
    %284 = vector.load %arg8[%c0_70, %c0_71] : memref<128x384xf32, #tpu.memory_space<vmem>>, vector<128x384xf32>
    %c0_72 = arith.constant 0 : index
    %c0_73 = arith.constant 0 : index
    %285 = vector.load %arg10[%c0_72, %c0_73] : memref<128x384xf32, #tpu.memory_space<vmem>>, vector<128x384xf32>
    %c0_74 = arith.constant 0 : index
    %c0_75 = arith.constant 0 : index
    %286 = vector.load %arg12[%c0_74, %c0_75] : memref<1x128xf32, #tpu.memory_space<vmem>>, vector<1x128xf32>
    %c0_76 = arith.constant 0 : index
    %c0_77 = arith.constant 0 : index
    %287 = vector.load %arg13[%c0_76, %c0_77] : memref<256x128xf32, #tpu.memory_space<vmem>>, vector<256x128xf32>
    %c0_78 = arith.constant 0 : index
    %c0_79 = arith.constant 0 : index
    %288 = vector.load %arg16[%c0_78, %c0_79] : memref<128x128xf32, #tpu.memory_space<vmem>>, vector<128x128xf32>
    %289 = tpu.iota {dimensions = array<i32: 1>} : vector<8x128xi32>
    %c0_80 = arith.constant 0 : index
    %c0_81 = arith.constant 0 : index
    %290 = vector.load %arg2[%c0_80, %c0_81] : memref<8x128xf32, #tpu.memory_space<vmem>>, vector<8x128xf32>
    %c0_i32_82 = arith.constant 0 : i32
    %cst_83 = arith.constant dense<0.000000e+00> : vector<8x384xf32>
    %291 = tpu.matmul %290, %284, %cst_83 {dimension_numbers = #tpu.dot_dimension_numbers<[1], [0], [0], [1], [0, 0, 1, 1], [], []>} : vector<8x128xf32>, vector<128x384xf32>, vector<8x384xf32> -> vector<8x384xf32>
    %292 = arith.addf %291, %278 : vector<8x384xf32>
    %cst_84 = arith.constant dense<0.000000e+00> : vector<8x384xf32>
    %293 = tpu.matmul %273, %285, %cst_84 {dimension_numbers = #tpu.dot_dimension_numbers<[1], [0], [0], [1], [0, 0, 1, 1], [], []>} : vector<8x128xf32>, vector<128x384xf32>, vector<8x384xf32> -> vector<8x384xf32>
    %294 = vector.extract_strided_slice %292 {offsets = [0, 0], sizes = [8, 128], strides = [1, 1]} : vector<8x384xf32> to vector<8x128xf32>
    %295 = vector.extract_strided_slice %293 {offsets = [0, 0], sizes = [8, 128], strides = [1, 1]} : vector<8x384xf32> to vector<8x128xf32>
    %296 = arith.addf %294, %295 : vector<8x128xf32>
    %297 = arith.negf %296 : vector<8x128xf32>
    %298 = math.exp %297 : vector<8x128xf32>
    %cst_85 = arith.constant 1.000000e+00 : f32
    %299 = vector.broadcast %cst_85 : f32 to vector<8x128xf32>
    %300 = arith.addf %299, %298 : vector<8x128xf32>
    %301 = arith.divf %299, %300 : vector<8x128xf32>
    %302 = vector.extract_strided_slice %292 {offsets = [0, 128], sizes = [8, 128], strides = [1, 1]} : vector<8x384xf32> to vector<8x128xf32>
    %303 = vector.extract_strided_slice %293 {offsets = [0, 128], sizes = [8, 128], strides = [1, 1]} : vector<8x384xf32> to vector<8x128xf32>
    %304 = arith.addf %302, %303 : vector<8x128xf32>
    %305 = arith.negf %304 : vector<8x128xf32>
    %306 = math.exp %305 : vector<8x128xf32>
    %cst_86 = arith.constant 1.000000e+00 : f32
    %307 = vector.broadcast %cst_86 : f32 to vector<8x128xf32>
    %308 = arith.addf %307, %306 : vector<8x128xf32>
    %309 = arith.divf %307, %308 : vector<8x128xf32>
    %310 = vector.extract_strided_slice %292 {offsets = [0, 256], sizes = [8, 128], strides = [1, 1]} : vector<8x384xf32> to vector<8x128xf32>
    %311 = vector.extract_strided_slice %293 {offsets = [0, 256], sizes = [8, 128], strides = [1, 1]} : vector<8x384xf32> to vector<8x128xf32>
    %312 = vector.broadcast %286 : vector<1x128xf32> to vector<8x128xf32>
    %313 = arith.addf %311, %312 : vector<8x128xf32>
    %314 = arith.mulf %301, %313 : vector<8x128xf32>
    %315 = arith.addf %310, %314 : vector<8x128xf32>
    %316 = math.tanh %315 : vector<8x128xf32>
    %cst_87 = arith.constant 1.000000e+00 : f32
    %317 = vector.broadcast %cst_87 : f32 to vector<8x128xf32>
    %318 = arith.subf %317, %309 : vector<8x128xf32>
    %319 = arith.mulf %318, %316 : vector<8x128xf32>
    %320 = arith.mulf %309, %273 : vector<8x128xf32>
    %321 = arith.addf %319, %320 : vector<8x128xf32>
    %322 = tpu.concatenate %290, %321 in 1 : vector<8x128xf32>, vector<8x128xf32> -> vector<8x256xf32>
    %cst_88 = arith.constant dense<0.000000e+00> : vector<8x128xf32>
    %323 = tpu.matmul %322, %287, %cst_88 {dimension_numbers = #tpu.dot_dimension_numbers<[1], [0], [0], [1], [0, 0, 1, 1], [], []>} : vector<8x256xf32>, vector<256x128xf32>, vector<8x128xf32> -> vector<8x128xf32>
    %324 = arith.addf %323, %283 : vector<8x128xf32>
    %325 = vector.shape_cast %324 : vector<8x128xf32> to vector<1x8x128xf32>
    %326 = arith.index_cast %c0_i32_82 : i32 to index
    %c0_89 = arith.constant 0 : index
    %c0_90 = arith.constant 0 : index
    %327 = vector.load %arg17[%326, %c0_89, %c0_90] : memref<7x8x128xf32, #tpu.memory_space<vmem>>, vector<1x8x128xf32>
    tpu.vector_store %arg17[%326, %c0_89, %c0_90], %325 {strides = array<i32>} : memref<7x8x128xf32, #tpu.memory_space<vmem>>, vector<1x8x128xf32>,
    %cst_91 = arith.constant dense<0xFF800000> : vector<8xf32>
    %328 = vector.multi_reduction <maximumf>, %324, %cst_91 [1] : vector<8x128xf32> to vector<8xf32>
    %329 = vector.shape_cast %328 : vector<8xf32> to vector<8x1xf32>
    %330 = vector.broadcast %329 : vector<8x1xf32> to vector<8x128xf32>
    %331 = arith.cmpf oeq, %324, %330 : vector<8x128xf32>
    %c128_i32 = arith.constant 128 : i32
    %332 = vector.broadcast %c128_i32 : i32 to vector<8x128xi32>
    %333 = arith.select %331, %289, %332 : vector<8x128xi1>, vector<8x128xi32>
    %cst_92 = arith.constant dense<2147483647> : vector<8xi32>
    %334 = vector.multi_reduction <minsi>, %333, %cst_92 [1] : vector<8x128xi32> to vector<8xi32>
    %335 = vector.shape_cast %334 : vector<8xi32> to vector<8x1xi32>
    %336 = vector.broadcast %335 : vector<8x1xi32> to vector<8x128xi32>
    %337 = arith.cmpi eq, %289, %336 : vector<8x128xi32>
    %338 = arith.extui %337 : vector<8x128xi1> to vector<8x128xi32>
    %339 = arith.sitofp %338 : vector<8x128xi32> to vector<8x128xf32>
    %cst_93 = arith.constant dense<0.000000e+00> : vector<8x128xf32>
    %340 = tpu.matmul %339, %288, %cst_93 {dimension_numbers = #tpu.dot_dimension_numbers<[1], [0], [0], [1], [0, 0, 1, 1], [], []>} : vector<8x128xf32>, vector<128x128xf32>, vector<8x128xf32> -> vector<8x128xf32>
    %341 = arith.index_cast %c0_i32_82 : i32 to index
    %342 = memref.load %arg0[%341] : memref<7xi32, #tpu.memory_space<smem>>
    %c0_i32_94 = arith.constant 0 : i32
    %343 = arith.cmpi sgt, %342, %c0_i32_94 : i32
    %344 = arith.extui %343 : i1 to i32
    %345 = arith.sitofp %344 : i32 to f32
    %346 = arith.index_cast %c0_i32_82 : i32 to index
    %c0_95 = arith.constant 0 : index
    %c0_96 = arith.constant 0 : index
    %347 = vector.load %arg3[%346, %c0_95, %c0_96] : memref<7x8x128xf32, #tpu.memory_space<vmem>>, vector<1x8x128xf32>
    %348 = vector.shape_cast %347 : vector<1x8x128xf32> to vector<8x128xf32>
    %349 = vector.broadcast %345 : f32 to vector<8x128xf32>
    %350 = arith.mulf %349, %348 : vector<8x128xf32>
    %cst_97 = arith.constant 1.000000e+00 : f32
    %351 = arith.subf %cst_97, %345 : f32
    %352 = vector.broadcast %351 : f32 to vector<8x128xf32>
    %353 = arith.mulf %352, %340 : vector<8x128xf32>
    %354 = arith.addf %350, %353 : vector<8x128xf32>
    %c1_i32_98 = arith.constant 1 : i32
    %cst_99 = arith.constant dense<0.000000e+00> : vector<8x384xf32>
    %355 = tpu.matmul %354, %284, %cst_99 {dimension_numbers = #tpu.dot_dimension_numbers<[1], [0], [0], [1], [0, 0, 1, 1], [], []>} : vector<8x128xf32>, vector<128x384xf32>, vector<8x384xf32> -> vector<8x384xf32>
    %356 = arith.addf %355, %278 : vector<8x384xf32>
    %cst_100 = arith.constant dense<0.000000e+00> : vector<8x384xf32>
    %357 = tpu.matmul %321, %285, %cst_100 {dimension_numbers = #tpu.dot_dimension_numbers<[1], [0], [0], [1], [0, 0, 1, 1], [], []>} : vector<8x128xf32>, vector<128x384xf32>, vector<8x384xf32> -> vector<8x384xf32>
    %358 = vector.extract_strided_slice %356 {offsets = [0, 0], sizes = [8, 128], strides = [1, 1]} : vector<8x384xf32> to vector<8x128xf32>
    %359 = vector.extract_strided_slice %357 {offsets = [0, 0], sizes = [8, 128], strides = [1, 1]} : vector<8x384xf32> to vector<8x128xf32>
    %360 = arith.addf %358, %359 : vector<8x128xf32>
    %361 = arith.negf %360 : vector<8x128xf32>
    %362 = math.exp %361 : vector<8x128xf32>
    %cst_101 = arith.constant 1.000000e+00 : f32
    %363 = vector.broadcast %cst_101 : f32 to vector<8x128xf32>
    %364 = arith.addf %363, %362 : vector<8x128xf32>
    %365 = arith.divf %363, %364 : vector<8x128xf32>
    %366 = vector.extract_strided_slice %356 {offsets = [0, 128], sizes = [8, 128], strides = [1, 1]} : vector<8x384xf32> to vector<8x128xf32>
    %367 = vector.extract_strided_slice %357 {offsets = [0, 128], sizes = [8, 128], strides = [1, 1]} : vector<8x384xf32> to vector<8x128xf32>
    %368 = arith.addf %366, %367 : vector<8x128xf32>
    %369 = arith.negf %368 : vector<8x128xf32>
    %370 = math.exp %369 : vector<8x128xf32>
    %cst_102 = arith.constant 1.000000e+00 : f32
    %371 = vector.broadcast %cst_102 : f32 to vector<8x128xf32>
    %372 = arith.addf %371, %370 : vector<8x128xf32>
    %373 = arith.divf %371, %372 : vector<8x128xf32>
    %374 = vector.extract_strided_slice %356 {offsets = [0, 256], sizes = [8, 128], strides = [1, 1]} : vector<8x384xf32> to vector<8x128xf32>
    %375 = vector.extract_strided_slice %357 {offsets = [0, 256], sizes = [8, 128], strides = [1, 1]} : vector<8x384xf32> to vector<8x128xf32>
    %376 = vector.broadcast %286 : vector<1x128xf32> to vector<8x128xf32>
    %377 = arith.addf %375, %376 : vector<8x128xf32>
    %378 = arith.mulf %365, %377 : vector<8x128xf32>
    %379 = arith.addf %374, %378 : vector<8x128xf32>
    %380 = math.tanh %379 : vector<8x128xf32>
    %cst_103 = arith.constant 1.000000e+00 : f32
    %381 = vector.broadcast %cst_103 : f32 to vector<8x128xf32>
    %382 = arith.subf %381, %373 : vector<8x128xf32>
    %383 = arith.mulf %382, %380 : vector<8x128xf32>
    %384 = arith.mulf %373, %321 : vector<8x128xf32>
    %385 = arith.addf %383, %384 : vector<8x128xf32>
    %386 = tpu.concatenate %354, %385 in 1 : vector<8x128xf32>, vector<8x128xf32> -> vector<8x256xf32>
    %cst_104 = arith.constant dense<0.000000e+00> : vector<8x128xf32>
    %387 = tpu.matmul %386, %287, %cst_104 {dimension_numbers = #tpu.dot_dimension_numbers<[1], [0], [0], [1], [0, 0, 1, 1], [], []>} : vector<8x256xf32>, vector<256x128xf32>, vector<8x128xf32> -> vector<8x128xf32>
    %388 = arith.addf %387, %283 : vector<8x128xf32>
    %389 = vector.shape_cast %388 : vector<8x128xf32> to vector<1x8x128xf32>
    %390 = arith.index_cast %c1_i32_98 : i32 to index
    %c0_105 = arith.constant 0 : index
    %c0_106 = arith.constant 0 : index
    %391 = vector.load %arg17[%390, %c0_105, %c0_106] : memref<7x8x128xf32, #tpu.memory_space<vmem>>, vector<1x8x128xf32>
    tpu.vector_store %arg17[%390, %c0_105, %c0_106], %389 {strides = array<i32>} : memref<7x8x128xf32, #tpu.memory_space<vmem>>, vector<1x8x128xf32>,
    %cst_107 = arith.constant dense<0xFF800000> : vector<8xf32>
    %392 = vector.multi_reduction <maximumf>, %388, %cst_107 [1] : vector<8x128xf32> to vector<8xf32>
    %393 = vector.shape_cast %392 : vector<8xf32> to vector<8x1xf32>
    %394 = vector.broadcast %393 : vector<8x1xf32> to vector<8x128xf32>
    %395 = arith.cmpf oeq, %388, %394 : vector<8x128xf32>
    %c128_i32_108 = arith.constant 128 : i32
    %396 = vector.broadcast %c128_i32_108 : i32 to vector<8x128xi32>
    %397 = arith.select %395, %289, %396 : vector<8x128xi1>, vector<8x128xi32>
    %cst_109 = arith.constant dense<2147483647> : vector<8xi32>
    %398 = vector.multi_reduction <minsi>, %397, %cst_109 [1] : vector<8x128xi32> to vector<8xi32>
    %399 = vector.shape_cast %398 : vector<8xi32> to vector<8x1xi32>
    %400 = vector.broadcast %399 : vector<8x1xi32> to vector<8x128xi32>
    %401 = arith.cmpi eq, %289, %400 : vector<8x128xi32>
    %402 = arith.extui %401 : vector<8x128xi1> to vector<8x128xi32>
    %403 = arith.sitofp %402 : vector<8x128xi32> to vector<8x128xf32>
    %cst_110 = arith.constant dense<0.000000e+00> : vector<8x128xf32>
    %404 = tpu.matmul %403, %288, %cst_110 {dimension_numbers = #tpu.dot_dimension_numbers<[1], [0], [0], [1], [0, 0, 1, 1], [], []>} : vector<8x128xf32>, vector<128x128xf32>, vector<8x128xf32> -> vector<8x128xf32>
    %405 = arith.index_cast %c1_i32_98 : i32 to index
    %406 = memref.load %arg0[%405] : memref<7xi32, #tpu.memory_space<smem>>
    %c0_i32_111 = arith.constant 0 : i32
    %407 = arith.cmpi sgt, %406, %c0_i32_111 : i32
    %408 = arith.extui %407 : i1 to i32
    %409 = arith.sitofp %408 : i32 to f32
    %410 = arith.index_cast %c1_i32_98 : i32 to index
    %c0_112 = arith.constant 0 : index
    %c0_113 = arith.constant 0 : index
    %411 = vector.load %arg3[%410, %c0_112, %c0_113] : memref<7x8x128xf32, #tpu.memory_space<vmem>>, vector<1x8x128xf32>
    %412 = vector.shape_cast %411 : vector<1x8x128xf32> to vector<8x128xf32>
    %413 = vector.broadcast %409 : f32 to vector<8x128xf32>
    %414 = arith.mulf %413, %412 : vector<8x128xf32>
    %cst_114 = arith.constant 1.000000e+00 : f32
    %415 = arith.subf %cst_114, %409 : f32
    %416 = vector.broadcast %415 : f32 to vector<8x128xf32>
    %417 = arith.mulf %416, %404 : vector<8x128xf32>
    %418 = arith.addf %414, %417 : vector<8x128xf32>
    %c2_i32_115 = arith.constant 2 : i32
    %cst_116 = arith.constant dense<0.000000e+00> : vector<8x384xf32>
    %419 = tpu.matmul %418, %284, %cst_116 {dimension_numbers = #tpu.dot_dimension_numbers<[1], [0], [0], [1], [0, 0, 1, 1], [], []>} : vector<8x128xf32>, vector<128x384xf32>, vector<8x384xf32> -> vector<8x384xf32>
    %420 = arith.addf %419, %278 : vector<8x384xf32>
    %cst_117 = arith.constant dense<0.000000e+00> : vector<8x384xf32>
    %421 = tpu.matmul %385, %285, %cst_117 {dimension_numbers = #tpu.dot_dimension_numbers<[1], [0], [0], [1], [0, 0, 1, 1], [], []>} : vector<8x128xf32>, vector<128x384xf32>, vector<8x384xf32> -> vector<8x384xf32>
    %422 = vector.extract_strided_slice %420 {offsets = [0, 0], sizes = [8, 128], strides = [1, 1]} : vector<8x384xf32> to vector<8x128xf32>
    %423 = vector.extract_strided_slice %421 {offsets = [0, 0], sizes = [8, 128], strides = [1, 1]} : vector<8x384xf32> to vector<8x128xf32>
    %424 = arith.addf %422, %423 : vector<8x128xf32>
    %425 = arith.negf %424 : vector<8x128xf32>
    %426 = math.exp %425 : vector<8x128xf32>
    %cst_118 = arith.constant 1.000000e+00 : f32
    %427 = vector.broadcast %cst_118 : f32 to vector<8x128xf32>
    %428 = arith.addf %427, %426 : vector<8x128xf32>
    %429 = arith.divf %427, %428 : vector<8x128xf32>
    %430 = vector.extract_strided_slice %420 {offsets = [0, 128], sizes = [8, 128], strides = [1, 1]} : vector<8x384xf32> to vector<8x128xf32>
    %431 = vector.extract_strided_slice %421 {offsets = [0, 128], sizes = [8, 128], strides = [1, 1]} : vector<8x384xf32> to vector<8x128xf32>
    %432 = arith.addf %430, %431 : vector<8x128xf32>
    %433 = arith.negf %432 : vector<8x128xf32>
    %434 = math.exp %433 : vector<8x128xf32>
    %cst_119 = arith.constant 1.000000e+00 : f32
    %435 = vector.broadcast %cst_119 : f32 to vector<8x128xf32>
    %436 = arith.addf %435, %434 : vector<8x128xf32>
    %437 = arith.divf %435, %436 : vector<8x128xf32>
    %438 = vector.extract_strided_slice %420 {offsets = [0, 256], sizes = [8, 128], strides = [1, 1]} : vector<8x384xf32> to vector<8x128xf32>
    %439 = vector.extract_strided_slice %421 {offsets = [0, 256], sizes = [8, 128], strides = [1, 1]} : vector<8x384xf32> to vector<8x128xf32>
    %440 = vector.broadcast %286 : vector<1x128xf32> to vector<8x128xf32>
    %441 = arith.addf %439, %440 : vector<8x128xf32>
    %442 = arith.mulf %429, %441 : vector<8x128xf32>
    %443 = arith.addf %438, %442 : vector<8x128xf32>
    %444 = math.tanh %443 : vector<8x128xf32>
    %cst_120 = arith.constant 1.000000e+00 : f32
    %445 = vector.broadcast %cst_120 : f32 to vector<8x128xf32>
    %446 = arith.subf %445, %437 : vector<8x128xf32>
    %447 = arith.mulf %446, %444 : vector<8x128xf32>
    %448 = arith.mulf %437, %385 : vector<8x128xf32>
    %449 = arith.addf %447, %448 : vector<8x128xf32>
    %450 = tpu.concatenate %418, %449 in 1 : vector<8x128xf32>, vector<8x128xf32> -> vector<8x256xf32>
    %cst_121 = arith.constant dense<0.000000e+00> : vector<8x128xf32>
    %451 = tpu.matmul %450, %287, %cst_121 {dimension_numbers = #tpu.dot_dimension_numbers<[1], [0], [0], [1], [0, 0, 1, 1], [], []>} : vector<8x256xf32>, vector<256x128xf32>, vector<8x128xf32> -> vector<8x128xf32>
    %452 = arith.addf %451, %283 : vector<8x128xf32>
    %453 = vector.shape_cast %452 : vector<8x128xf32> to vector<1x8x128xf32>
    %454 = arith.index_cast %c2_i32_115 : i32 to index
    %c0_122 = arith.constant 0 : index
    %c0_123 = arith.constant 0 : index
    %455 = vector.load %arg17[%454, %c0_122, %c0_123] : memref<7x8x128xf32, #tpu.memory_space<vmem>>, vector<1x8x128xf32>
    tpu.vector_store %arg17[%454, %c0_122, %c0_123], %453 {strides = array<i32>} : memref<7x8x128xf32, #tpu.memory_space<vmem>>, vector<1x8x128xf32>,
    %cst_124 = arith.constant dense<0xFF800000> : vector<8xf32>
    %456 = vector.multi_reduction <maximumf>, %452, %cst_124 [1] : vector<8x128xf32> to vector<8xf32>
    %457 = vector.shape_cast %456 : vector<8xf32> to vector<8x1xf32>
    %458 = vector.broadcast %457 : vector<8x1xf32> to vector<8x128xf32>
    %459 = arith.cmpf oeq, %452, %458 : vector<8x128xf32>
    %c128_i32_125 = arith.constant 128 : i32
    %460 = vector.broadcast %c128_i32_125 : i32 to vector<8x128xi32>
    %461 = arith.select %459, %289, %460 : vector<8x128xi1>, vector<8x128xi32>
    %cst_126 = arith.constant dense<2147483647> : vector<8xi32>
    %462 = vector.multi_reduction <minsi>, %461, %cst_126 [1] : vector<8x128xi32> to vector<8xi32>
    %463 = vector.shape_cast %462 : vector<8xi32> to vector<8x1xi32>
    %464 = vector.broadcast %463 : vector<8x1xi32> to vector<8x128xi32>
    %465 = arith.cmpi eq, %289, %464 : vector<8x128xi32>
    %466 = arith.extui %465 : vector<8x128xi1> to vector<8x128xi32>
    %467 = arith.sitofp %466 : vector<8x128xi32> to vector<8x128xf32>
    %cst_127 = arith.constant dense<0.000000e+00> : vector<8x128xf32>
    %468 = tpu.matmul %467, %288, %cst_127 {dimension_numbers = #tpu.dot_dimension_numbers<[1], [0], [0], [1], [0, 0, 1, 1], [], []>} : vector<8x128xf32>, vector<128x128xf32>, vector<8x128xf32> -> vector<8x128xf32>
    %469 = arith.index_cast %c2_i32_115 : i32 to index
    %470 = memref.load %arg0[%469] : memref<7xi32, #tpu.memory_space<smem>>
    %c0_i32_128 = arith.constant 0 : i32
    %471 = arith.cmpi sgt, %470, %c0_i32_128 : i32
    %472 = arith.extui %471 : i1 to i32
    %473 = arith.sitofp %472 : i32 to f32
    %474 = arith.index_cast %c2_i32_115 : i32 to index
    %c0_129 = arith.constant 0 : index
    %c0_130 = arith.constant 0 : index
    %475 = vector.load %arg3[%474, %c0_129, %c0_130] : memref<7x8x128xf32, #tpu.memory_space<vmem>>, vector<1x8x128xf32>
    %476 = vector.shape_cast %475 : vector<1x8x128xf32> to vector<8x128xf32>
    %477 = vector.broadcast %473 : f32 to vector<8x128xf32>
    %478 = arith.mulf %477, %476 : vector<8x128xf32>
    %cst_131 = arith.constant 1.000000e+00 : f32
    %479 = arith.subf %cst_131, %473 : f32
    %480 = vector.broadcast %479 : f32 to vector<8x128xf32>
    %481 = arith.mulf %480, %468 : vector<8x128xf32>
    %482 = arith.addf %478, %481 : vector<8x128xf32>
    %c3_i32_132 = arith.constant 3 : i32
    %cst_133 = arith.constant dense<0.000000e+00> : vector<8x384xf32>
    %483 = tpu.matmul %482, %284, %cst_133 {dimension_numbers = #tpu.dot_dimension_numbers<[1], [0], [0], [1], [0, 0, 1, 1], [], []>} : vector<8x128xf32>, vector<128x384xf32>, vector<8x384xf32> -> vector<8x384xf32>
    %484 = arith.addf %483, %278 : vector<8x384xf32>
    %cst_134 = arith.constant dense<0.000000e+00> : vector<8x384xf32>
    %485 = tpu.matmul %449, %285, %cst_134 {dimension_numbers = #tpu.dot_dimension_numbers<[1], [0], [0], [1], [0, 0, 1, 1], [], []>} : vector<8x128xf32>, vector<128x384xf32>, vector<8x384xf32> -> vector<8x384xf32>
    %486 = vector.extract_strided_slice %484 {offsets = [0, 0], sizes = [8, 128], strides = [1, 1]} : vector<8x384xf32> to vector<8x128xf32>
    %487 = vector.extract_strided_slice %485 {offsets = [0, 0], sizes = [8, 128], strides = [1, 1]} : vector<8x384xf32> to vector<8x128xf32>
    %488 = arith.addf %486, %487 : vector<8x128xf32>
    %489 = arith.negf %488 : vector<8x128xf32>
    %490 = math.exp %489 : vector<8x128xf32>
    %cst_135 = arith.constant 1.000000e+00 : f32
    %491 = vector.broadcast %cst_135 : f32 to vector<8x128xf32>
    %492 = arith.addf %491, %490 : vector<8x128xf32>
    %493 = arith.divf %491, %492 : vector<8x128xf32>
    %494 = vector.extract_strided_slice %484 {offsets = [0, 128], sizes = [8, 128], strides = [1, 1]} : vector<8x384xf32> to vector<8x128xf32>
    %495 = vector.extract_strided_slice %485 {offsets = [0, 128], sizes = [8, 128], strides = [1, 1]} : vector<8x384xf32> to vector<8x128xf32>
    %496 = arith.addf %494, %495 : vector<8x128xf32>
    %497 = arith.negf %496 : vector<8x128xf32>
    %498 = math.exp %497 : vector<8x128xf32>
    %cst_136 = arith.constant 1.000000e+00 : f32
    %499 = vector.broadcast %cst_136 : f32 to vector<8x128xf32>
    %500 = arith.addf %499, %498 : vector<8x128xf32>
    %501 = arith.divf %499, %500 : vector<8x128xf32>
    %502 = vector.extract_strided_slice %484 {offsets = [0, 256], sizes = [8, 128], strides = [1, 1]} : vector<8x384xf32> to vector<8x128xf32>
    %503 = vector.extract_strided_slice %485 {offsets = [0, 256], sizes = [8, 128], strides = [1, 1]} : vector<8x384xf32> to vector<8x128xf32>
    %504 = vector.broadcast %286 : vector<1x128xf32> to vector<8x128xf32>
    %505 = arith.addf %503, %504 : vector<8x128xf32>
    %506 = arith.mulf %493, %505 : vector<8x128xf32>
    %507 = arith.addf %502, %506 : vector<8x128xf32>
    %508 = math.tanh %507 : vector<8x128xf32>
    %cst_137 = arith.constant 1.000000e+00 : f32
    %509 = vector.broadcast %cst_137 : f32 to vector<8x128xf32>
    %510 = arith.subf %509, %501 : vector<8x128xf32>
    %511 = arith.mulf %510, %508 : vector<8x128xf32>
    %512 = arith.mulf %501, %449 : vector<8x128xf32>
    %513 = arith.addf %511, %512 : vector<8x128xf32>
    %514 = tpu.concatenate %482, %513 in 1 : vector<8x128xf32>, vector<8x128xf32> -> vector<8x256xf32>
    %cst_138 = arith.constant dense<0.000000e+00> : vector<8x128xf32>
    %515 = tpu.matmul %514, %287, %cst_138 {dimension_numbers = #tpu.dot_dimension_numbers<[1], [0], [0], [1], [0, 0, 1, 1], [], []>} : vector<8x256xf32>, vector<256x128xf32>, vector<8x128xf32> -> vector<8x128xf32>
    %516 = arith.addf %515, %283 : vector<8x128xf32>
    %517 = vector.shape_cast %516 : vector<8x128xf32> to vector<1x8x128xf32>
    %518 = arith.index_cast %c3_i32_132 : i32 to index
    %c0_139 = arith.constant 0 : index
    %c0_140 = arith.constant 0 : index
    %519 = vector.load %arg17[%518, %c0_139, %c0_140] : memref<7x8x128xf32, #tpu.memory_space<vmem>>, vector<1x8x128xf32>
    tpu.vector_store %arg17[%518, %c0_139, %c0_140], %517 {strides = array<i32>} : memref<7x8x128xf32, #tpu.memory_space<vmem>>, vector<1x8x128xf32>,
    %cst_141 = arith.constant dense<0xFF800000> : vector<8xf32>
    %520 = vector.multi_reduction <maximumf>, %516, %cst_141 [1] : vector<8x128xf32> to vector<8xf32>
    %521 = vector.shape_cast %520 : vector<8xf32> to vector<8x1xf32>
    %522 = vector.broadcast %521 : vector<8x1xf32> to vector<8x128xf32>
    %523 = arith.cmpf oeq, %516, %522 : vector<8x128xf32>
    %c128_i32_142 = arith.constant 128 : i32
    %524 = vector.broadcast %c128_i32_142 : i32 to vector<8x128xi32>
    %525 = arith.select %523, %289, %524 : vector<8x128xi1>, vector<8x128xi32>
    %cst_143 = arith.constant dense<2147483647> : vector<8xi32>
    %526 = vector.multi_reduction <minsi>, %525, %cst_143 [1] : vector<8x128xi32> to vector<8xi32>
    %527 = vector.shape_cast %526 : vector<8xi32> to vector<8x1xi32>
    %528 = vector.broadcast %527 : vector<8x1xi32> to vector<8x128xi32>
    %529 = arith.cmpi eq, %289, %528 : vector<8x128xi32>
    %530 = arith.extui %529 : vector<8x128xi1> to vector<8x128xi32>
    %531 = arith.sitofp %530 : vector<8x128xi32> to vector<8x128xf32>
    %cst_144 = arith.constant dense<0.000000e+00> : vector<8x128xf32>
    %532 = tpu.matmul %531, %288, %cst_144 {dimension_numbers = #tpu.dot_dimension_numbers<[1], [0], [0], [1], [0, 0, 1, 1], [], []>} : vector<8x128xf32>, vector<128x128xf32>, vector<8x128xf32> -> vector<8x128xf32>
    %533 = arith.index_cast %c3_i32_132 : i32 to index
    %534 = memref.load %arg0[%533] : memref<7xi32, #tpu.memory_space<smem>>
    %c0_i32_145 = arith.constant 0 : i32
    %535 = arith.cmpi sgt, %534, %c0_i32_145 : i32
    %536 = arith.extui %535 : i1 to i32
    %537 = arith.sitofp %536 : i32 to f32
    %538 = arith.index_cast %c3_i32_132 : i32 to index
    %c0_146 = arith.constant 0 : index
    %c0_147 = arith.constant 0 : index
    %539 = vector.load %arg3[%538, %c0_146, %c0_147] : memref<7x8x128xf32, #tpu.memory_space<vmem>>, vector<1x8x128xf32>
    %540 = vector.shape_cast %539 : vector<1x8x128xf32> to vector<8x128xf32>
    %541 = vector.broadcast %537 : f32 to vector<8x128xf32>
    %542 = arith.mulf %541, %540 : vector<8x128xf32>
    %cst_148 = arith.constant 1.000000e+00 : f32
    %543 = arith.subf %cst_148, %537 : f32
    %544 = vector.broadcast %543 : f32 to vector<8x128xf32>
    %545 = arith.mulf %544, %532 : vector<8x128xf32>
    %546 = arith.addf %542, %545 : vector<8x128xf32>
    %c4_i32_149 = arith.constant 4 : i32
    %cst_150 = arith.constant dense<0.000000e+00> : vector<8x384xf32>
    %547 = tpu.matmul %546, %284, %cst_150 {dimension_numbers = #tpu.dot_dimension_numbers<[1], [0], [0], [1], [0, 0, 1, 1], [], []>} : vector<8x128xf32>, vector<128x384xf32>, vector<8x384xf32> -> vector<8x384xf32>
    %548 = arith.addf %547, %278 : vector<8x384xf32>
    %cst_151 = arith.constant dense<0.000000e+00> : vector<8x384xf32>
    %549 = tpu.matmul %513, %285, %cst_151 {dimension_numbers = #tpu.dot_dimension_numbers<[1], [0], [0], [1], [0, 0, 1, 1], [], []>} : vector<8x128xf32>, vector<128x384xf32>, vector<8x384xf32> -> vector<8x384xf32>
    %550 = vector.extract_strided_slice %548 {offsets = [0, 0], sizes = [8, 128], strides = [1, 1]} : vector<8x384xf32> to vector<8x128xf32>
    %551 = vector.extract_strided_slice %549 {offsets = [0, 0], sizes = [8, 128], strides = [1, 1]} : vector<8x384xf32> to vector<8x128xf32>
    %552 = arith.addf %550, %551 : vector<8x128xf32>
    %553 = arith.negf %552 : vector<8x128xf32>
    %554 = math.exp %553 : vector<8x128xf32>
    %cst_152 = arith.constant 1.000000e+00 : f32
    %555 = vector.broadcast %cst_152 : f32 to vector<8x128xf32>
    %556 = arith.addf %555, %554 : vector<8x128xf32>
    %557 = arith.divf %555, %556 : vector<8x128xf32>
    %558 = vector.extract_strided_slice %548 {offsets = [0, 128], sizes = [8, 128], strides = [1, 1]} : vector<8x384xf32> to vector<8x128xf32>
    %559 = vector.extract_strided_slice %549 {offsets = [0, 128], sizes = [8, 128], strides = [1, 1]} : vector<8x384xf32> to vector<8x128xf32>
    %560 = arith.addf %558, %559 : vector<8x128xf32>
    %561 = arith.negf %560 : vector<8x128xf32>
    %562 = math.exp %561 : vector<8x128xf32>
    %cst_153 = arith.constant 1.000000e+00 : f32
    %563 = vector.broadcast %cst_153 : f32 to vector<8x128xf32>
    %564 = arith.addf %563, %562 : vector<8x128xf32>
    %565 = arith.divf %563, %564 : vector<8x128xf32>
    %566 = vector.extract_strided_slice %548 {offsets = [0, 256], sizes = [8, 128], strides = [1, 1]} : vector<8x384xf32> to vector<8x128xf32>
    %567 = vector.extract_strided_slice %549 {offsets = [0, 256], sizes = [8, 128], strides = [1, 1]} : vector<8x384xf32> to vector<8x128xf32>
    %568 = vector.broadcast %286 : vector<1x128xf32> to vector<8x128xf32>
    %569 = arith.addf %567, %568 : vector<8x128xf32>
    %570 = arith.mulf %557, %569 : vector<8x128xf32>
    %571 = arith.addf %566, %570 : vector<8x128xf32>
    %572 = math.tanh %571 : vector<8x128xf32>
    %cst_154 = arith.constant 1.000000e+00 : f32
    %573 = vector.broadcast %cst_154 : f32 to vector<8x128xf32>
    %574 = arith.subf %573, %565 : vector<8x128xf32>
    %575 = arith.mulf %574, %572 : vector<8x128xf32>
    %576 = arith.mulf %565, %513 : vector<8x128xf32>
    %577 = arith.addf %575, %576 : vector<8x128xf32>
    %578 = tpu.concatenate %546, %577 in 1 : vector<8x128xf32>, vector<8x128xf32> -> vector<8x256xf32>
    %cst_155 = arith.constant dense<0.000000e+00> : vector<8x128xf32>
    %579 = tpu.matmul %578, %287, %cst_155 {dimension_numbers = #tpu.dot_dimension_numbers<[1], [0], [0], [1], [0, 0, 1, 1], [], []>} : vector<8x256xf32>, vector<256x128xf32>, vector<8x128xf32> -> vector<8x128xf32>
    %580 = arith.addf %579, %283 : vector<8x128xf32>
    %581 = vector.shape_cast %580 : vector<8x128xf32> to vector<1x8x128xf32>
    %582 = arith.index_cast %c4_i32_149 : i32 to index
    %c0_156 = arith.constant 0 : index
    %c0_157 = arith.constant 0 : index
    %583 = vector.load %arg17[%582, %c0_156, %c0_157] : memref<7x8x128xf32, #tpu.memory_space<vmem>>, vector<1x8x128xf32>
    tpu.vector_store %arg17[%582, %c0_156, %c0_157], %581 {strides = array<i32>} : memref<7x8x128xf32, #tpu.memory_space<vmem>>, vector<1x8x128xf32>,
    %cst_158 = arith.constant dense<0xFF800000> : vector<8xf32>
    %584 = vector.multi_reduction <maximumf>, %580, %cst_158 [1] : vector<8x128xf32> to vector<8xf32>
    %585 = vector.shape_cast %584 : vector<8xf32> to vector<8x1xf32>
    %586 = vector.broadcast %585 : vector<8x1xf32> to vector<8x128xf32>
    %587 = arith.cmpf oeq, %580, %586 : vector<8x128xf32>
    %c128_i32_159 = arith.constant 128 : i32
    %588 = vector.broadcast %c128_i32_159 : i32 to vector<8x128xi32>
    %589 = arith.select %587, %289, %588 : vector<8x128xi1>, vector<8x128xi32>
    %cst_160 = arith.constant dense<2147483647> : vector<8xi32>
    %590 = vector.multi_reduction <minsi>, %589, %cst_160 [1] : vector<8x128xi32> to vector<8xi32>
    %591 = vector.shape_cast %590 : vector<8xi32> to vector<8x1xi32>
    %592 = vector.broadcast %591 : vector<8x1xi32> to vector<8x128xi32>
    %593 = arith.cmpi eq, %289, %592 : vector<8x128xi32>
    %594 = arith.extui %593 : vector<8x128xi1> to vector<8x128xi32>
    %595 = arith.sitofp %594 : vector<8x128xi32> to vector<8x128xf32>
    %cst_161 = arith.constant dense<0.000000e+00> : vector<8x128xf32>
    %596 = tpu.matmul %595, %288, %cst_161 {dimension_numbers = #tpu.dot_dimension_numbers<[1], [0], [0], [1], [0, 0, 1, 1], [], []>} : vector<8x128xf32>, vector<128x128xf32>, vector<8x128xf32> -> vector<8x128xf32>
    %597 = arith.index_cast %c4_i32_149 : i32 to index
    %598 = memref.load %arg0[%597] : memref<7xi32, #tpu.memory_space<smem>>
    %c0_i32_162 = arith.constant 0 : i32
    %599 = arith.cmpi sgt, %598, %c0_i32_162 : i32
    %600 = arith.extui %599 : i1 to i32
    %601 = arith.sitofp %600 : i32 to f32
    %602 = arith.index_cast %c4_i32_149 : i32 to index
    %c0_163 = arith.constant 0 : index
    %c0_164 = arith.constant 0 : index
    %603 = vector.load %arg3[%602, %c0_163, %c0_164] : memref<7x8x128xf32, #tpu.memory_space<vmem>>, vector<1x8x128xf32>
    %604 = vector.shape_cast %603 : vector<1x8x128xf32> to vector<8x128xf32>
    %605 = vector.broadcast %601 : f32 to vector<8x128xf32>
    %606 = arith.mulf %605, %604 : vector<8x128xf32>
    %cst_165 = arith.constant 1.000000e+00 : f32
    %607 = arith.subf %cst_165, %601 : f32
    %608 = vector.broadcast %607 : f32 to vector<8x128xf32>
    %609 = arith.mulf %608, %596 : vector<8x128xf32>
    %610 = arith.addf %606, %609 : vector<8x128xf32>
    %c5_i32_166 = arith.constant 5 : i32
    %cst_167 = arith.constant dense<0.000000e+00> : vector<8x384xf32>
    %611 = tpu.matmul %610, %284, %cst_167 {dimension_numbers = #tpu.dot_dimension_numbers<[1], [0], [0], [1], [0, 0, 1, 1], [], []>} : vector<8x128xf32>, vector<128x384xf32>, vector<8x384xf32> -> vector<8x384xf32>
    %612 = arith.addf %611, %278 : vector<8x384xf32>
    %cst_168 = arith.constant dense<0.000000e+00> : vector<8x384xf32>
    %613 = tpu.matmul %577, %285, %cst_168 {dimension_numbers = #tpu.dot_dimension_numbers<[1], [0], [0], [1], [0, 0, 1, 1], [], []>} : vector<8x128xf32>, vector<128x384xf32>, vector<8x384xf32> -> vector<8x384xf32>
    %614 = vector.extract_strided_slice %612 {offsets = [0, 0], sizes = [8, 128], strides = [1, 1]} : vector<8x384xf32> to vector<8x128xf32>
    %615 = vector.extract_strided_slice %613 {offsets = [0, 0], sizes = [8, 128], strides = [1, 1]} : vector<8x384xf32> to vector<8x128xf32>
    %616 = arith.addf %614, %615 : vector<8x128xf32>
    %617 = arith.negf %616 : vector<8x128xf32>
    %618 = math.exp %617 : vector<8x128xf32>
    %cst_169 = arith.constant 1.000000e+00 : f32
    %619 = vector.broadcast %cst_169 : f32 to vector<8x128xf32>
    %620 = arith.addf %619, %618 : vector<8x128xf32>
    %621 = arith.divf %619, %620 : vector<8x128xf32>
    %622 = vector.extract_strided_slice %612 {offsets = [0, 128], sizes = [8, 128], strides = [1, 1]} : vector<8x384xf32> to vector<8x128xf32>
    %623 = vector.extract_strided_slice %613 {offsets = [0, 128], sizes = [8, 128], strides = [1, 1]} : vector<8x384xf32> to vector<8x128xf32>
    %624 = arith.addf %622, %623 : vector<8x128xf32>
    %625 = arith.negf %624 : vector<8x128xf32>
    %626 = math.exp %625 : vector<8x128xf32>
    %cst_170 = arith.constant 1.000000e+00 : f32
    %627 = vector.broadcast %cst_170 : f32 to vector<8x128xf32>
    %628 = arith.addf %627, %626 : vector<8x128xf32>
    %629 = arith.divf %627, %628 : vector<8x128xf32>
    %630 = vector.extract_strided_slice %612 {offsets = [0, 256], sizes = [8, 128], strides = [1, 1]} : vector<8x384xf32> to vector<8x128xf32>
    %631 = vector.extract_strided_slice %613 {offsets = [0, 256], sizes = [8, 128], strides = [1, 1]} : vector<8x384xf32> to vector<8x128xf32>
    %632 = vector.broadcast %286 : vector<1x128xf32> to vector<8x128xf32>
    %633 = arith.addf %631, %632 : vector<8x128xf32>
    %634 = arith.mulf %621, %633 : vector<8x128xf32>
    %635 = arith.addf %630, %634 : vector<8x128xf32>
    %636 = math.tanh %635 : vector<8x128xf32>
    %cst_171 = arith.constant 1.000000e+00 : f32
    %637 = vector.broadcast %cst_171 : f32 to vector<8x128xf32>
    %638 = arith.subf %637, %629 : vector<8x128xf32>
    %639 = arith.mulf %638, %636 : vector<8x128xf32>
    %640 = arith.mulf %629, %577 : vector<8x128xf32>
    %641 = arith.addf %639, %640 : vector<8x128xf32>
    %642 = tpu.concatenate %610, %641 in 1 : vector<8x128xf32>, vector<8x128xf32> -> vector<8x256xf32>
    %cst_172 = arith.constant dense<0.000000e+00> : vector<8x128xf32>
    %643 = tpu.matmul %642, %287, %cst_172 {dimension_numbers = #tpu.dot_dimension_numbers<[1], [0], [0], [1], [0, 0, 1, 1], [], []>} : vector<8x256xf32>, vector<256x128xf32>, vector<8x128xf32> -> vector<8x128xf32>
    %644 = arith.addf %643, %283 : vector<8x128xf32>
    %645 = vector.shape_cast %644 : vector<8x128xf32> to vector<1x8x128xf32>
    %646 = arith.index_cast %c5_i32_166 : i32 to index
    %c0_173 = arith.constant 0 : index
    %c0_174 = arith.constant 0 : index
    %647 = vector.load %arg17[%646, %c0_173, %c0_174] : memref<7x8x128xf32, #tpu.memory_space<vmem>>, vector<1x8x128xf32>
    tpu.vector_store %arg17[%646, %c0_173, %c0_174], %645 {strides = array<i32>} : memref<7x8x128xf32, #tpu.memory_space<vmem>>, vector<1x8x128xf32>,
    %cst_175 = arith.constant dense<0xFF800000> : vector<8xf32>
    %648 = vector.multi_reduction <maximumf>, %644, %cst_175 [1] : vector<8x128xf32> to vector<8xf32>
    %649 = vector.shape_cast %648 : vector<8xf32> to vector<8x1xf32>
    %650 = vector.broadcast %649 : vector<8x1xf32> to vector<8x128xf32>
    %651 = arith.cmpf oeq, %644, %650 : vector<8x128xf32>
    %c128_i32_176 = arith.constant 128 : i32
    %652 = vector.broadcast %c128_i32_176 : i32 to vector<8x128xi32>
    %653 = arith.select %651, %289, %652 : vector<8x128xi1>, vector<8x128xi32>
    %cst_177 = arith.constant dense<2147483647> : vector<8xi32>
    %654 = vector.multi_reduction <minsi>, %653, %cst_177 [1] : vector<8x128xi32> to vector<8xi32>
    %655 = vector.shape_cast %654 : vector<8xi32> to vector<8x1xi32>
    %656 = vector.broadcast %655 : vector<8x1xi32> to vector<8x128xi32>
    %657 = arith.cmpi eq, %289, %656 : vector<8x128xi32>
    %658 = arith.extui %657 : vector<8x128xi1> to vector<8x128xi32>
    %659 = arith.sitofp %658 : vector<8x128xi32> to vector<8x128xf32>
    %cst_178 = arith.constant dense<0.000000e+00> : vector<8x128xf32>
    %660 = tpu.matmul %659, %288, %cst_178 {dimension_numbers = #tpu.dot_dimension_numbers<[1], [0], [0], [1], [0, 0, 1, 1], [], []>} : vector<8x128xf32>, vector<128x128xf32>, vector<8x128xf32> -> vector<8x128xf32>
    %661 = arith.index_cast %c5_i32_166 : i32 to index
    %662 = memref.load %arg0[%661] : memref<7xi32, #tpu.memory_space<smem>>
    %c0_i32_179 = arith.constant 0 : i32
    %663 = arith.cmpi sgt, %662, %c0_i32_179 : i32
    %664 = arith.extui %663 : i1 to i32
    %665 = arith.sitofp %664 : i32 to f32
    %666 = arith.index_cast %c5_i32_166 : i32 to index
    %c0_180 = arith.constant 0 : index
    %c0_181 = arith.constant 0 : index
    %667 = vector.load %arg3[%666, %c0_180, %c0_181] : memref<7x8x128xf32, #tpu.memory_space<vmem>>, vector<1x8x128xf32>
    %668 = vector.shape_cast %667 : vector<1x8x128xf32> to vector<8x128xf32>
    %669 = vector.broadcast %665 : f32 to vector<8x128xf32>
    %670 = arith.mulf %669, %668 : vector<8x128xf32>
    %cst_182 = arith.constant 1.000000e+00 : f32
    %671 = arith.subf %cst_182, %665 : f32
    %672 = vector.broadcast %671 : f32 to vector<8x128xf32>
    %673 = arith.mulf %672, %660 : vector<8x128xf32>
    %674 = arith.addf %670, %673 : vector<8x128xf32>
    %c6_i32_183 = arith.constant 6 : i32
    %cst_184 = arith.constant dense<0.000000e+00> : vector<8x384xf32>
    %675 = tpu.matmul %674, %284, %cst_184 {dimension_numbers = #tpu.dot_dimension_numbers<[1], [0], [0], [1], [0, 0, 1, 1], [], []>} : vector<8x128xf32>, vector<128x384xf32>, vector<8x384xf32> -> vector<8x384xf32>
    %676 = arith.addf %675, %278 : vector<8x384xf32>
    %cst_185 = arith.constant dense<0.000000e+00> : vector<8x384xf32>
    %677 = tpu.matmul %641, %285, %cst_185 {dimension_numbers = #tpu.dot_dimension_numbers<[1], [0], [0], [1], [0, 0, 1, 1], [], []>} : vector<8x128xf32>, vector<128x384xf32>, vector<8x384xf32> -> vector<8x384xf32>
    %678 = vector.extract_strided_slice %676 {offsets = [0, 0], sizes = [8, 128], strides = [1, 1]} : vector<8x384xf32> to vector<8x128xf32>
    %679 = vector.extract_strided_slice %677 {offsets = [0, 0], sizes = [8, 128], strides = [1, 1]} : vector<8x384xf32> to vector<8x128xf32>
    %680 = arith.addf %678, %679 : vector<8x128xf32>
    %681 = arith.negf %680 : vector<8x128xf32>
    %682 = math.exp %681 : vector<8x128xf32>
    %cst_186 = arith.constant 1.000000e+00 : f32
    %683 = vector.broadcast %cst_186 : f32 to vector<8x128xf32>
    %684 = arith.addf %683, %682 : vector<8x128xf32>
    %685 = arith.divf %683, %684 : vector<8x128xf32>
    %686 = vector.extract_strided_slice %676 {offsets = [0, 128], sizes = [8, 128], strides = [1, 1]} : vector<8x384xf32> to vector<8x128xf32>
    %687 = vector.extract_strided_slice %677 {offsets = [0, 128], sizes = [8, 128], strides = [1, 1]} : vector<8x384xf32> to vector<8x128xf32>
    %688 = arith.addf %686, %687 : vector<8x128xf32>
    %689 = arith.negf %688 : vector<8x128xf32>
    %690 = math.exp %689 : vector<8x128xf32>
    %cst_187 = arith.constant 1.000000e+00 : f32
    %691 = vector.broadcast %cst_187 : f32 to vector<8x128xf32>
    %692 = arith.addf %691, %690 : vector<8x128xf32>
    %693 = arith.divf %691, %692 : vector<8x128xf32>
    %694 = vector.extract_strided_slice %676 {offsets = [0, 256], sizes = [8, 128], strides = [1, 1]} : vector<8x384xf32> to vector<8x128xf32>
    %695 = vector.extract_strided_slice %677 {offsets = [0, 256], sizes = [8, 128], strides = [1, 1]} : vector<8x384xf32> to vector<8x128xf32>
    %696 = vector.broadcast %286 : vector<1x128xf32> to vector<8x128xf32>
    %697 = arith.addf %695, %696 : vector<8x128xf32>
    %698 = arith.mulf %685, %697 : vector<8x128xf32>
    %699 = arith.addf %694, %698 : vector<8x128xf32>
    %700 = math.tanh %699 : vector<8x128xf32>
    %cst_188 = arith.constant 1.000000e+00 : f32
    %701 = vector.broadcast %cst_188 : f32 to vector<8x128xf32>
    %702 = arith.subf %701, %693 : vector<8x128xf32>
    %703 = arith.mulf %702, %700 : vector<8x128xf32>
    %704 = arith.mulf %693, %641 : vector<8x128xf32>
    %705 = arith.addf %703, %704 : vector<8x128xf32>
    %706 = tpu.concatenate %674, %705 in 1 : vector<8x128xf32>, vector<8x128xf32> -> vector<8x256xf32>
    %cst_189 = arith.constant dense<0.000000e+00> : vector<8x128xf32>
    %707 = tpu.matmul %706, %287, %cst_189 {dimension_numbers = #tpu.dot_dimension_numbers<[1], [0], [0], [1], [0, 0, 1, 1], [], []>} : vector<8x256xf32>, vector<256x128xf32>, vector<8x128xf32> -> vector<8x128xf32>
    %708 = arith.addf %707, %283 : vector<8x128xf32>
    %709 = vector.shape_cast %708 : vector<8x128xf32> to vector<1x8x128xf32>
    %710 = arith.index_cast %c6_i32_183 : i32 to index
    %c0_190 = arith.constant 0 : index
    %c0_191 = arith.constant 0 : index
    %711 = vector.load %arg17[%710, %c0_190, %c0_191] : memref<7x8x128xf32, #tpu.memory_space<vmem>>, vector<1x8x128xf32>
    tpu.vector_store %arg17[%710, %c0_190, %c0_191], %709 {strides = array<i32>} : memref<7x8x128xf32, #tpu.memory_space<vmem>>, vector<1x8x128xf32>,
    %cst_192 = arith.constant dense<0xFF800000> : vector<8xf32>
    %712 = vector.multi_reduction <maximumf>, %708, %cst_192 [1] : vector<8x128xf32> to vector<8xf32>
    %713 = vector.shape_cast %712 : vector<8xf32> to vector<8x1xf32>
    %714 = vector.broadcast %713 : vector<8x1xf32> to vector<8x128xf32>
    %715 = arith.cmpf oeq, %708, %714 : vector<8x128xf32>
    %c128_i32_193 = arith.constant 128 : i32
    %716 = vector.broadcast %c128_i32_193 : i32 to vector<8x128xi32>
    %717 = arith.select %715, %289, %716 : vector<8x128xi1>, vector<8x128xi32>
    %cst_194 = arith.constant dense<2147483647> : vector<8xi32>
    %718 = vector.multi_reduction <minsi>, %717, %cst_194 [1] : vector<8x128xi32> to vector<8xi32>
    %719 = vector.shape_cast %718 : vector<8xi32> to vector<8x1xi32>
    %720 = vector.broadcast %719 : vector<8x1xi32> to vector<8x128xi32>
    %721 = arith.cmpi eq, %289, %720 : vector<8x128xi32>
    %722 = arith.extui %721 : vector<8x128xi1> to vector<8x128xi32>
    %723 = arith.sitofp %722 : vector<8x128xi32> to vector<8x128xf32>
    %cst_195 = arith.constant dense<0.000000e+00> : vector<8x128xf32>
    %724 = tpu.matmul %723, %288, %cst_195 {dimension_numbers = #tpu.dot_dimension_numbers<[1], [0], [0], [1], [0, 0, 1, 1], [], []>} : vector<8x128xf32>, vector<128x128xf32>, vector<8x128xf32> -> vector<8x128xf32>
    %725 = arith.index_cast %c6_i32_183 : i32 to index
    %726 = memref.load %arg0[%725] : memref<7xi32, #tpu.memory_space<smem>>
    %c0_i32_196 = arith.constant 0 : i32
    %727 = arith.cmpi sgt, %726, %c0_i32_196 : i32
    %728 = arith.extui %727 : i1 to i32
    %729 = arith.sitofp %728 : i32 to f32
    %730 = arith.index_cast %c6_i32_183 : i32 to index
    %c0_197 = arith.constant 0 : index
    %c0_198 = arith.constant 0 : index
    %731 = vector.load %arg3[%730, %c0_197, %c0_198] : memref<7x8x128xf32, #tpu.memory_space<vmem>>, vector<1x8x128xf32>
    %732 = vector.shape_cast %731 : vector<1x8x128xf32> to vector<8x128xf32>
    %733 = vector.broadcast %729 : f32 to vector<8x128xf32>
    %734 = arith.mulf %733, %732 : vector<8x128xf32>
    %cst_199 = arith.constant 1.000000e+00 : f32
    %735 = arith.subf %cst_199, %729 : f32
    %736 = vector.broadcast %735 : f32 to vector<8x128xf32>
    %737 = arith.mulf %736, %724 : vector<8x128xf32>
    %738 = arith.addf %734, %737 : vector<8x128xf32>
    %c7_i32_200 = arith.constant 7 : i32
    return
  }
}

</mosaic_0001>

<bundles_post_ra>
// kernel: tpu_custom_call.1
= control target key start
LH: loop header
LB: loop body
LE: loop exit
PB: predicated region body
PF: predicated region fallthrough
CT: control target
= control target key end

     0   :  { %s7210_s0 = inlined_call_operand.hbm [shape: s32[7], index: 0, kind: input, shape index: {}]   ;;  %s7211_s1 = inlined_call_operand.hbm [shape: f32[64,128], index: 1, kind: input, shape index: {}]   ;;  %s7212_s2 = inlined_call_operand.hbm [shape: f32[8,128], index: 2, kind: input, shape index: {}]   ;;  %s7213_s3 = inlined_call_operand.hbm [shape: f32[7,8,128], index: 3, kind: input, shape index: {}]   ;;  %s7214_s4 = inlined_call_operand.hbm [shape: f32[128,384], index: 4, kind: input, shape index: {}]   ;;  %s7215_s5 = inlined_call_operand.hbm [shape: f32[128,384], index: 5, kind: input, shape index: {}]   ;;  %s7216_s6 = inlined_call_operand.vmem [shape: f32[1,384], index: 6, kind: input, shape index: {}]   ;;  %s7217_s7 = inlined_call_operand.hbm [shape: f32[1,128], index: 7, kind: input, shape index: {}]   ;;  %s7218_s8 = inlined_call_operand.hbm [shape: f32[128,384], index: 8, kind: input, shape index: {}]   ;;  %s7219_s9 = inlined_call_operand.hbm [shape: f32[128,384], index: 9, kind: input, shape index: {}]   ;;  %s7220_s10 = inlined_call_operand.hbm [shape: f32[128,384], index: 10, kind: input, shape index: {}]   ;;  %s7221_s11 = inlined_call_operand.vmem [shape: f32[1,384], index: 11, kind: input, shape index: {}]   ;;  %s7222_s12 = inlined_call_operand.vmem [shape: f32[1,128], index: 12, kind: input, shape index: {}]   ;;  %s7223_s13 = inlined_call_operand.hbm [shape: f32[256,128], index: 13, kind: input, shape index: {}]   ;;  %s7224_s14 = inlined_call_operand.hbm [shape: f32[128,128], index: 14, kind: input, shape index: {}]   ;;  %s7225_s15 = inlined_call_operand.vmem [shape: f32[1,128], index: 15, kind: input, shape index: {}]   ;;  %s7226_s16 = inlined_call_operand.hbm [shape: f32[128,128], index: 16, kind: input, shape index: {}]   ;;  %s7227_s17 = inlined_call_operand.hbm [shape: f32[7,8,128], index: 17, kind: output, shape index: {}]  }
   0x1   :  { %7595 = sst [smem:[#allocation113_spill]] %s7210_s0 }
   0x2   :  { %7596 = sst [smem:[#allocation114_spill]] %s7211_s1 }
   0x3   :  { %22 = vsyncpa [#allocation6], 0 }
   0x4   :  { %23 = vsyncpa [#allocation4], 0 }
   0x5   :  { %24 = vsyncpa [#allocation9], 0 }
   0x6   :  { %25 = vsyncpa [#allocation12], 0 }
   0x7   :  { %26 = vsyncpa [#allocation15], 0 }
   0x8   :  { %27 = vsyncpa [#allocation18], 0 }
   0x9   :  { %28 = vsyncpa [#allocation21], 0 }
   0xa   :  { %29 = vsyncpa [#allocation24], 0  ;;  %s58_s26 = sshll.u32 %s7212_s2, 4  ;;  %s59_s26 = int_to_ptr.hbm [resolvable:$true] %s58_s26 }
   0xb   :  { %30 = vsyncpa [#allocation5], 0  ;;  %s4439_s27 = smov [#allocation8]   ;;  %s81_s30 = sshll.u32 %s7214_s4, 4  ;;  %s82_s30 = int_to_ptr.hbm [resolvable:$true] %s81_s30 }
   0xc   :  { %s60_s28 = sshll.u32 %s4439_s27, 4  ;;  %s4440_s18 = smov [#allocation11]   ;;  %s61_s28 = int_to_ptr.vmem [resolvable:$true] %s60_s28 }
   0xd   :  { %63 = dma.hbm_to_vmem [thread:$0]  %s59_s26, 128, %s61_s28, [#allocation9]  }
   0xe   :  { %s83_s19 = sshll.u32 %s4440_s18, 4  ;;  %s4441_s1 = smov 384   ;;  %s84_s19 = int_to_ptr.vmem [resolvable:$true] %s83_s19 }
   0xf   :  { %s4442_s20 = smov 24   ;;  %s110_s22 = sshll.u32 %s7217_s7, 4  ;;  %s111_s22 = int_to_ptr.hbm [resolvable:$true] %s110_s22 }
  0x10   :  { %89 = dma.hbm_to_vmem [thread:$0]  %s82_s30, 6144, %s84_s19, [#allocation12], %s4441_s1, %s4441_s1, %s4442_s20  }
  0x11   :  { %s4443_s23 = smov [#allocation14]   ;;  %s133_s26 = sshll.u32 %s7219_s9, 4  ;;  %s134_s26 = int_to_ptr.hbm [resolvable:$true] %s133_s26 }
  0x12   :  { %s112_s24 = sshll.u32 %s4443_s23, 4  ;;  %s4444_s27 = smov [#allocation17]   ;;  %s113_s24 = int_to_ptr.vmem [resolvable:$true] %s112_s24 }
  0x13   :  { %115 = dma.hbm_to_vmem [thread:$0]  %s111_s22, 16, %s113_s24, [#allocation15]  }
  0x14   :  { %s135_s28 = sshll.u32 %s4444_s27, 4  ;;  %s163_s7 = sshll.u32 %s7223_s13, 4  ;;  %s136_s28 = int_to_ptr.vmem [resolvable:$true] %s135_s28  ;;  %s164_s7 = int_to_ptr.hbm [resolvable:$true] %s163_s7 }
  0x15   :  { %141 = dma.hbm_to_vmem [thread:$0]  %s134_s26, 6144, %s136_s28, [#allocation18], %s4441_s1, %s4441_s1, %s4442_s20  }
  0x16   :  { %s4445_s30 = smov [#allocation20]   ;;  %s7597_s9 = sld [smem:[#allocation113_spill]] }
  0x17   :  { %s165_s18 = sshll.u32 %s4445_s30, 4  ;;  %s4446_s22 = smov 128   ;;  %s166_s18 = int_to_ptr.vmem [resolvable:$true] %s165_s18 }
  0x18   :  { %s4447_s23 = smov 8   ;;  %s4448_s24 = smov [#allocation3]  }
  0x19   :  { %171 = dma.hbm_to_vmem [thread:$0]  %s164_s7, 4096, %s166_s18, [#allocation21], %s4446_s22, %s4446_s22, %s4447_s23  }
  0x1a   :  { %s7598_s13 = sld [smem:[#allocation114_spill]]  ;;  %s4449_s27 = smov [#allocation7]  }
  0x1b   :  { %s46_s28 = sshll.u32 %s4449_s27, 4  ;;  %s68_s30 = sshll.u32 %s7213_s3, 4  ;;  %s47_s28 = int_to_ptr.vmem [resolvable:$true] %s46_s28  ;;  %s69_s30 = int_to_ptr.hbm [resolvable:$true] %s68_s30 }
  0x1c   :  { %s36_s21 = sshll.u32 %s7597_s9, 4  ;;  %s4450_s7 = smov [#allocation10]   ;;  %s37_s21 = int_to_ptr.hbm [resolvable:$true] %s36_s21 }
  0x1d   :  { %39 = dma.hbm_to_smem %s37_s21, 16, %s4448_s24, [#allocation6]  }
  0x1e   :  { %s70_s18 = sshll.u32 %s4450_s7, 4  ;;  %s94_s9 = sshll.u32 %s7215_s5, 4  ;;  %s71_s18 = int_to_ptr.vmem [resolvable:$true] %s70_s18  ;;  %s95_s9 = int_to_ptr.hbm [resolvable:$true] %s94_s9 }
  0x1f   :  { %76 = dma.hbm_to_vmem [thread:$0]  %s69_s30, 896, %s71_s18, [#allocation9], %s4446_s22, %s4446_s22, %s4447_s23  }
  0x20   :  { %s44_s26 = sshll.u32 %s7598_s13, 4  ;;  %s120_s3 = sshll.u32 %s7218_s8, 4  ;;  %s45_s26 = int_to_ptr.hbm [resolvable:$true] %s44_s26  ;;  %s121_s3 = int_to_ptr.hbm [resolvable:$true] %s120_s3 }
  0x21   :  { %52 = dma.hbm_to_vmem [thread:$0]  %s45_s26, 1024, %s47_s28, [#allocation4], %s4446_s22, %s4446_s22, %s4447_s23  }
  0x22   :  { %s4451_s4 = smov [#allocation13]   ;;  %s4452_s13 = smov [#allocation16]  }
  0x23   :  { %s96_s25 = sshll.u32 %s4451_s4, 4  ;;  %s122_s5 = sshll.u32 %s4452_s13, 4  ;;  %s97_s25 = int_to_ptr.vmem [resolvable:$true] %s96_s25  ;;  %s123_s5 = int_to_ptr.vmem [resolvable:$true] %s122_s5 }
  0x24   :  { %102 = dma.hbm_to_vmem [thread:$0]  %s95_s9, 6144, %s97_s25, [#allocation12], %s4441_s1, %s4441_s1, %s4442_s20  }
  0x25   :  { %s146_s28 = sshll.u32 %s7220_s10, 4  ;;  %s176_s0 = sshll.u32 %s7224_s14, 4  ;;  %s147_s28 = int_to_ptr.hbm [resolvable:$true] %s146_s28  ;;  %s177_s0 = int_to_ptr.hbm [resolvable:$true] %s176_s0 }
  0x26   :  { %128 = dma.hbm_to_vmem [thread:$0]  %s121_s3, 6144, %s123_s5, [#allocation15], %s4441_s1, %s4441_s1, %s4442_s20  }
  0x27   :  { %s4453_s30 = smov [#allocation19]   ;;  %s4454_s18 = smov [#allocation22]  }
  0x28   :  { %s148_s7 = sshll.u32 %s4453_s30, 4  ;;  %s178_s10 = sshll.u32 %s4454_s18, 4  ;;  %s149_s7 = int_to_ptr.vmem [resolvable:$true] %s148_s7  ;;  %s179_s10 = int_to_ptr.vmem [resolvable:$true] %s178_s10 }
  0x29   :  { %154 = dma.hbm_to_vmem [thread:$0]  %s147_s28, 6144, %s149_s7, [#allocation18], %s4441_s1, %s4441_s1, %s4442_s20  }
  0x2a   :  { %s191_s9 = sshll.u32 %s7226_s16, 4  ;;  %s4455_s14 = smov [#allocation23]   ;;  %s192_s9 = int_to_ptr.hbm [resolvable:$true] %s191_s9 }
  0x2b   :  { %184 = dma.hbm_to_vmem [thread:$0]  %s177_s0, 2048, %s179_s10, [#allocation21], %s4446_s22, %s4446_s22, %s4447_s23  }
  0x2c   :  { %s193_s21 = sshll.u32 %s4455_s14, 4  ;;  %s194_s21 = int_to_ptr.vmem [resolvable:$true] %s193_s21 }
  0x2d   :  { %199 = dma.hbm_to_vmem [thread:$0]  %s192_s9, 2048, %s194_s21, [#allocation24], %s4446_s22, %s4446_s22, %s4447_s23  }
  0x2e   :  { %4421 = dma.done.wait [#allocation6], 16  }
  0x2f   :  { %4422 = vsyncadd [#allocation6], 4294967280 }
  0x30   :  { %4423 = dma.done.wait [#allocation4], 1024  }
  0x31   :  { %4424 = vsyncadd [#allocation4], 4294966272 }
  0x32   :  { %4425 = dma.done.wait [#allocation9], 1024  }
  0x33   :  { %4426 = vsyncadd [#allocation9], 4294966272 }
  0x34   :  { %4427 = dma.done.wait [#allocation12], 12288  }
  0x35   :  { %4428 = vsyncadd [#allocation12], 4294955008 }
  0x36   :  { %4429 = dma.done.wait [#allocation15], 6160  }
  0x37   :  { %4430 = vsyncadd [#allocation15], 4294961136 }
  0x38   :  { %4431 = dma.done.wait [#allocation18], 12288  }
  0x39   :  { %4432 = vsyncadd [#allocation18], 4294955008 }
  0x3a   :  { %4433 = dma.done.wait [#allocation21], 6144  }
  0x3b   :  { %4434 = vsyncadd [#allocation21], 4294961152 }
  0x3c   :  { %4435 = dma.done.wait [#allocation24], 2048  }
  0x3d   :  { %4436 = vsyncadd [#allocation24], 4294965248 }
  0x3e   :  { %252 = sfence }
  0x3f   :  { %v306_v0 = vld [vmem:[#allocation11 + $0x168] sm:$0xff]  ;;  %v303_v2 = vld [vmem:[#allocation11 + $0x150] sm:$0xff]  ;;  %v300_v4 = vld [vmem:[#allocation11 + $0x138] sm:$0xff]  ;;  %v4456_v47 = vmov 0.0   ;;  %s3578_s26 = sld [smem:[#allocation3 + $0x1]] }
  0x40   :  { %v4618_v1 = vld [vmem:[#allocation13 + $0x168] sm:$0xff]  ;;  %317 = vmatpush.msra.mxu0 %v306_v0  ;;  %v4621_v3 = vld [vmem:[#allocation13 + $0x150] sm:$0xff]  ;;  %v4623_v5 = vld [vmem:[#allocation13 + $0x138] sm:$0xff]  ;;  %s3583_s30 = sld [smem:[#allocation3 + $0x2]] }
  0x41   :  { %519 = vmatpush.msra.mxu3 %v4618_v1  ;;  %v297_v6 = vld [vmem:[#allocation11 + $0x120] sm:$0xff]  ;;  %v294_v8 = vld [vmem:[#allocation11 + $0x108] sm:$0xff]  ;;  %v291_v10 = vld [vmem:[#allocation11 + $0xf0] sm:$0xff]  ;;  %s3588_s19 = sld [smem:[#allocation3 + $0x3]] }
  0x42   :  { %318 = vmatpush.msra.mxu0 %v303_v2  ;;  %v4626_v7 = vld [vmem:[#allocation13 + $0x120] sm:$0xff]  ;;  %v4629_v9 = vld [vmem:[#allocation13 + $0x108] sm:$0xff]  ;;  %v4632_v11 = vld [vmem:[#allocation13 + $0xf0] sm:$0xff]  ;;  %s3593_s21 = sld [smem:[#allocation3 + $0x4]] }
  0x43   :  { %520 = vmatpush.msra.mxu3 %v4621_v3  ;;  %v288_v12 = vld [vmem:[#allocation11 + $0xd8] sm:$0xff]  ;;  %v285_v14 = vld [vmem:[#allocation11 + $0xc0] sm:$0xff]  ;;  %v307_v16 = vld [vmem:[#allocation11 + $0x170] sm:$0xff] }
  0x44   :  { %319 = vmatpush.msra.mxu0 %v300_v4  ;;  %v4635_v13 = vld [vmem:[#allocation13 + $0xd8] sm:$0xff]  ;;  %v4638_v15 = vld [vmem:[#allocation13 + $0xc0] sm:$0xff]  ;;  %v282_v18 = vld [vmem:[#allocation11 + $0xa8] sm:$0xff]  ;;  %358 = vmatpush.msra.mxu1 %v307_v16 }
  0x45   :  { %521 = vmatpush.msra.mxu3 %v4623_v5  ;;  %v304_v17 = vld [vmem:[#allocation11 + $0x158] sm:$0xff]  ;;  %v4641_v19 = vld [vmem:[#allocation13 + $0xa8] sm:$0xff]  ;;  %v301_v20 = vld [vmem:[#allocation11 + $0x140] sm:$0xff]  ;;  %p2248_p1 = scmp.gt.s32.totalorder %s3578_s26, 0  ;;  %s3527_s26 = sshll.u32 %s7227_s17, 4  ;;  %s3528_s26 = int_to_ptr.hbm [resolvable:$true] %s3527_s26 }
  0x46   :  { %320 = vmatpush.msra.mxu0 %v297_v6  ;;  %v279_v21 = vld [vmem:[#allocation11 + $0x90] sm:$0xff]  ;;  %359 = vmatpush.msra.mxu1 %v304_v17  ;;  %v298_v23 = vld [vmem:[#allocation11 + $0x128] sm:$0xff]  ;;  %v276_v24 = vld [vmem:[#allocation11 + $0x78] sm:$0xff]  ;;  %p2511_p2 = scmp.gt.s32.totalorder %s3583_s30, 0 }
  0x47   :  { %522 = vmatpush.msra.mxu3 %v4626_v7  ;;  %v4644_v22 = vld [vmem:[#allocation13 + $0x90] sm:$0xff]  ;;  %v4647_v25 = vld [vmem:[#allocation13 + $0x78] sm:$0xff]  ;;  %v273_v26 = vld [vmem:[#allocation11 + $0x60] sm:$0xff]  ;;  %s2249_s27 = scalar_select %p2248_p1, 1, 0 }
  0x48   :  { %321 = vmatpush.msra.mxu0 %v294_v8  ;;  %360 = vmatpush.msra.mxu1 %v301_v20  ;;  %v4650_v27 = vld [vmem:[#allocation13 + $0x60] sm:$0xff]  ;;  %v295_v28 = vld [vmem:[#allocation11 + $0x110] sm:$0xff]  ;;  %v292_v29 = vld [vmem:[#allocation11 + $0xf8] sm:$0xff]  ;;  %s2512_s7 = scalar_select %p2511_p2, 1, 0 }
  0x49   :  { %523 = vmatpush.msra.mxu3 %v4629_v9  ;;  %v270_v30 = vld [vmem:[#allocation11 + $0x48] sm:$0xff]  ;;  %v289_v32 = vld [vmem:[#allocation11 + $0xe0] sm:$0xff]  ;;  %v267_v33 = vld [vmem:[#allocation11 + $0x30] sm:$0xff]  ;;  %s2250_s28 = scvt.s32.f32 %s2249_s27  ;;  %p2774_p3 = scmp.gt.s32.totalorder %s3588_s19, 0 }
  0x4a   :  { %322 = vmatpush.msra.mxu0 %v291_v10  ;;  %361 = vmatpush.msra.mxu1 %v298_v23  ;;  %v4653_v31 = vld [vmem:[#allocation13 + $0x48] sm:$0xff]  ;;  %v4656_v34 = vld [vmem:[#allocation13 + $0x30] sm:$0xff]  ;;  %v264_v36 = vld [vmem:[#allocation11 + $0x18] sm:$0xff]  ;;  %s2513_s18 = scvt.s32.f32 %s2512_s7  ;;  %p3037_p4 = scmp.gt.s32.totalorder %s3593_s21, 0 }
  0x4b   :  { %524 = vmatpush.msra.mxu3 %v4632_v11  ;;  %v286_v35 = vld [vmem:[#allocation11 + $0xc8] sm:$0xff]  ;;  %v4659_v37 = vld [vmem:[#allocation13 + $0x18] sm:$0xff]  ;;  %v283_v38 = vld [vmem:[#allocation11 + $0xb0] sm:$0xff]  ;;  %s2255_s8 = ssub.f32 1.0, %s2250_s28 }
  0x4c   :  { %323 = vmatpush.msra.mxu0 %v288_v12  ;;  %362 = vmatpush.msra.mxu1 %v295_v28  ;;  %7599 = vst [vmem:[#allocation35_spill] sm:$0xff] %v4659_v37  ;;  %v261_v39 = vld [vmem:[#allocation11] sm:$0xff]  ;;  %v308_v42 = vld [vmem:[#allocation11 + $0x178] sm:$0xff]  ;;  %v4667_v43 = vld [vmem:[#allocation13 + $0x170] sm:$0xff]  ;;  %s2518_s10 = ssub.f32 1.0, %s2513_s18 }
  0x4d   :  { %525 = vmatpush.msra.mxu3 %v4635_v13  ;;  %v4662_v40 = vld [vmem:[#allocation13] sm:$0xff]  ;;  %v4669_v44 = vld [vmem:[#allocation13 + $0x178] sm:$0xff]  ;;  %399 = vmatpush.msra.mxu2 %v308_v42  ;;  %v302_v51 = vld [vmem:[#allocation11 + $0x148] sm:$0xff]  ;;  %s2775_s2 = scalar_select %p2774_p3, 1, 0 }
  0x4e   :  { %324 = vmatpush.msra.mxu0 %v285_v14  ;;  %363 = vmatpush.msra.mxu1 %v292_v29  ;;  %7600 = vst [vmem:[#allocation36_spill] sm:$0xff] %v4662_v40  ;;  %v4665_v41 = vld [vmem:[#allocation7] sm:$0xff]  ;;  %v280_v45 = vld [vmem:[#allocation11 + $0x98] sm:$0xff]  ;;  %v4682_v53 = vld [vmem:[#allocation13 + $0x148] sm:$0xff]  ;;  %s3038_s16 = scalar_select %p3037_p4, 1, 0 }
  0x4f   :  { %526 = vmatpush.msra.mxu3 %v4638_v15  ;;  %v305_v46 = vld [vmem:[#allocation11 + $0x160] sm:$0xff]  ;;  %v4674_v48 = vld [vmem:[#allocation13 + $0x158] sm:$0xff]  ;;  %v274_v54 = vld [vmem:[#allocation11 + $0x68] sm:$0xff]  ;;  %s2776_s9 = scvt.s32.f32 %s2775_s2 }
  0x50   :  { %325 = vmatpush.msra.mxu0 %v282_v18  ;;  %364 = vmatpush.msra.mxu1 %v289_v32  ;;  %v4676_v49 = vld [vmem:[#allocation13 + $0x160] sm:$0xff]  ;;  %v299_v55 = vld [vmem:[#allocation11 + $0x130] sm:$0xff]  ;;  %v4686_v56 = vld [vmem:[#allocation13 + $0x128] sm:$0xff]  ;;  %s3039_s1 = scvt.s32.f32 %s3038_s16 }
  0x51   :  { %527 = vmatpush.msra.mxu3 %v4641_v19  ;;  %v277_v50 = vld [vmem:[#allocation11 + $0x80] sm:$0xff]  ;;  %400 = vmatpush.msra.mxu2 %v305_v46  ;;  %v4688_v57 = vld [vmem:[#allocation13 + $0x130] sm:$0xff]  ;;  %v4691_v58 = vld [vmem:[#allocation7 + $0x8] sm:$0xff]  ;;  %s2781_s14 = ssub.f32 1.0, %s2776_s9 }
  0x52   :  { %326 = vmatpush.msra.mxu0 %v279_v21  ;;  %365 = vmatpush.msra.mxu1 %v286_v35  ;;  %v4680_v52 = vld [vmem:[#allocation13 + $0x140] sm:$0xff]  ;;  %v271_v59 = vld [vmem:[#allocation11 + $0x50] sm:$0xff]  ;;  %v4696_v61 = vld [vmem:[#allocation13 + $0x118] sm:$0xff] }
  0x53   :  { %528 = vmatpush.msra.mxu3 %v4644_v22  ;;  %401 = vmatpush.msra.mxu2 %v302_v51  ;;  %v4694_v60 = vld [vmem:[#allocation13 + $0x110] sm:$0xff]  ;;  %v268_v62 = vld [vmem:[#allocation11 + $0x38] sm:$0xff]  ;;  %v4703_v2 = vld [vmem:[#allocation13 + $0x100] sm:$0xff] }
  0x54   :  { %327 = vmatpush.msra.mxu0 %v276_v24  ;;  %366 = vmatpush.msra.mxu1 %v283_v38  ;;  %v296_v63 = vld [vmem:[#allocation11 + $0x118] sm:$0xff]  ;;  %v265_v4 = vld [vmem:[#allocation11 + $0x20] sm:$0xff]  ;;  %v4709_v10 = vld [vmem:[#allocation13 + $0xe8] sm:$0xff] }
  0x55   :  { %529 = vmatpush.msra.mxu3 %v4647_v25  ;;  %402 = vmatpush.msra.mxu2 %v299_v55  ;;  %v4701_v0 = vld [vmem:[#allocation13 + $0xf8] sm:$0xff]  ;;  %v293_v6 = vld [vmem:[#allocation11 + $0x100] sm:$0xff]  ;;  %v262_v12 = vld [vmem:[#allocation11 + $0x8] sm:$0xff] }
  0x56   :  { %328 = vmatpush.msra.mxu0 %v273_v26  ;;  %367 = vmatpush.msra.mxu1 %v280_v45  ;;  %v4707_v8 = vld [vmem:[#allocation13 + $0xe0] sm:$0xff]  ;;  %v290_v14 = vld [vmem:[#allocation11 + $0xe8] sm:$0xff]  ;;  %v4715_v17 = vld [vmem:[#allocation13 + $0xd0] sm:$0xff] }
  0x57   :  { %530 = vmatpush.msra.mxu3 %v4650_v27  ;;  %403 = vmatpush.msra.mxu2 %v296_v63  ;;  %v4713_v16 = vld [vmem:[#allocation13 + $0xc8] sm:$0xff]  ;;  %v4718_v18 = vld [vmem:[#allocation7 + $0x10] sm:$0xff]  ;;  %v4723_v21 = vld [vmem:[#allocation13 + $0xb8] sm:$0xff] }
  0x58   :  { %329 = vmatpush.msra.mxu0 %v270_v30  ;;  %368 = vmatpush.msra.mxu1 %v277_v50  ;;  %v4721_v20 = vld [vmem:[#allocation13 + $0xb0] sm:$0xff]  ;;  %v4728_v24 = vld [vmem:[#allocation13 + $0x98] sm:$0xff]  ;;  %v4731_v26 = vld [vmem:[#allocation13 + $0xa0] sm:$0xff] }
  0x59   :  { %531 = vmatpush.msra.mxu3 %v4653_v31  ;;  %404 = vmatpush.msra.mxu2 %v293_v6  ;;  %v287_v23 = vld [vmem:[#allocation11 + $0xd0] sm:$0xff]  ;;  %v284_v28 = vld [vmem:[#allocation11 + $0xb8] sm:$0xff]  ;;  %v4735_v29 = vld [vmem:[#allocation13 + $0x80] sm:$0xff] }
  0x5a   :  { %330 = vmatpush.msra.mxu0 %v267_v33  ;;  %369 = vmatpush.msra.mxu1 %v274_v54  ;;  %v4737_v30 = vld [vmem:[#allocation13 + $0x88] sm:$0xff]  ;;  %v281_v32 = vld [vmem:[#allocation11 + $0xa0] sm:$0xff]  ;;  %v4744_v35 = vld [vmem:[#allocation13 + $0x70] sm:$0xff] }
  0x5b   :  { %532 = vmatpush.msra.mxu3 %v4656_v34  ;;  %405 = vmatpush.msra.mxu2 %v290_v14  ;;  %v4742_v33 = vld [vmem:[#allocation13 + $0x68] sm:$0xff]  ;;  %v4753_v42 = vld [vmem:[#allocation13 + $0x58] sm:$0xff]  ;;  %v275_v45 = vld [vmem:[#allocation11 + $0x70] sm:$0xff] }
  0x5c   :  { %331 = vmatpush.msra.mxu0 %v264_v36  ;;  %370 = vmatpush.msra.mxu1 %v271_v59  ;;  %v4748_v36 = vld [vmem:[#allocation7 + $0x18] sm:$0xff]  ;;  %v278_v38 = vld [vmem:[#allocation11 + $0x88] sm:$0xff]  ;;  %v4761_v50 = vld [vmem:[#allocation13 + $0x40] sm:$0xff] }
  0x5d   :  { %533 = vmatpush.msra.mxu3 %v4659_v37  ;;  %406 = vmatpush.msra.mxu2 %v287_v23  ;;  %v4759_v46 = vld [vmem:[#allocation13 + $0x38] sm:$0xff]  ;;  %v4765_v54 = vld [vmem:[#allocation13 + $0x20] sm:$0xff]  ;;  %v4767_v55 = vld [vmem:[#allocation13 + $0x28] sm:$0xff] }
  0x5e   :  { %332 = vmatpush.msra.mxu0 %v261_v39  ;;  %371 = vmatpush.msra.mxu1 %v268_v62  ;;  %v4751_v39 = vld [vmem:[#allocation13 + $0x50] sm:$0xff]  ;;  %7601 = vst [vmem:[#allocation37_spill] sm:$0xff] %v4759_v46  ;;  %v272_v51 = vld [vmem:[#allocation11 + $0x58] sm:$0xff]  ;;  %v269_v59 = vld [vmem:[#allocation11 + $0x40] sm:$0xff] }
  0x5f   :  { %534 = vmatpush.msra.mxu3 %v4662_v40  ;;  %333 = vmatmul.f32.vlgmr.msra.gmra.mxu0 %v4665_v41  ;;  %7602 = vst [vmem:[#allocation38_spill] sm:$0xff] %v4765_v54  ;;  %v4772_v62 = vld [vmem:[#allocation13 + $0x8] sm:$0xff]  ;;  %v4774_v63 = vld [vmem:[#allocation13 + $0x10] sm:$0xff] }
  0x60   :  { %535 = vmatmul.f32.vlgmr.msra.gmra.mxu3 %v4456_v47  ;;  %559 = vmatpush.msrb.mxu0 %v4669_v44  ;;  %7603 = vst [vmem:[#allocation39_spill] sm:$0xff] %v4767_v55  ;;  %v266_v6 = vld [vmem:[#allocation11 + $0x28] sm:$0xff] }
  0x61   :  { %539 = vmatpush.msrb.mxu3 %v4667_v43  ;;  %372 = vmatpush.msra.mxu1 %v265_v4  ;;  %7604 = vst [vmem:[#allocation40_spill] sm:$0xff] %v4772_v62  ;;  %v4778_v4 = vld [vmem:[#allocation7 + $0x20] sm:$0xff]  ;;  %v4792_v14 = vld [vmem:[#allocation7 + $0x28] sm:$0xff] }
  0x62   :  { %560 = vmatpush.msrb.mxu0 %v4676_v49  ;;  %407 = vmatpush.msra.mxu2 %v284_v28  ;;  %7605 = vst [vmem:[#allocation41_spill] sm:$0xff] %v4774_v63 }
  0x63   :  { %540 = vmatpush.msrb.mxu3 %v4674_v48  ;;  %373 = vmatpush.msra.mxu1 %v262_v12  ;;  %v263_v12 = vld [vmem:[#allocation11 + $0x10] sm:$0xff] }
  0x64   :  { %561 = vmatpush.msrb.mxu0 %v4682_v53  ;;  %374 = vmatmul.f32.vlgmr.msra.gmra.mxu1 %v4665_v41 }
  0x65   :  { %541 = vmatpush.msrb.mxu3 %v4680_v52  ;;  %636 = vmatpush.msrb.mxu1 %v4618_v1 }
  0x66   :  { %562 = vmatpush.msrb.mxu0 %v4688_v57  ;;  %408 = vmatpush.msra.mxu2 %v281_v32 }
  0x67   :  { %542 = vmatpush.msrb.mxu3 %v4686_v56  ;;  %336 = vmatmul.f32.gmra.mxu0 %v4691_v58 }
  0x68   :  { %563 = vmatpush.msrb.mxu0 %v4696_v61  ;;  %637 = vmatpush.msrb.mxu1 %v4621_v3 }
  0x69   :  { %543 = vmatpush.msrb.mxu3 %v4694_v60  ;;  %409 = vmatpush.msra.mxu2 %v278_v38 }
  0x6a   :  { %564 = vmatpush.msrb.mxu0 %v4703_v2  ;;  %638 = vmatpush.msrb.mxu1 %v4623_v5 }
  0x6b   :  { %544 = vmatpush.msrb.mxu3 %v4701_v0  ;;  %410 = vmatpush.msra.mxu2 %v275_v45 }
  0x6c   :  { %565 = vmatpush.msrb.mxu0 %v4709_v10  ;;  %377 = vmatmul.f32.gmra.mxu1 %v4691_v58 }
  0x6d   :  { %545 = vmatpush.msrb.mxu3 %v4707_v8  ;;  %411 = vmatpush.msra.mxu2 %v272_v51 }
  0x6e   :  { %566 = vmatpush.msrb.mxu0 %v4715_v17  ;;  %639 = vmatpush.msrb.mxu1 %v4626_v7 }
  0x6f   :  { %546 = vmatpush.msrb.mxu3 %v4713_v16  ;;  %339 = vmatmul.f32.gmra.mxu0 %v4718_v18 }
  0x70   :  { %567 = vmatpush.msrb.mxu0 %v4723_v21  ;;  %412 = vmatpush.msra.mxu2 %v269_v59 }
  0x71   :  { %547 = vmatpush.msrb.mxu3 %v4721_v20  ;;  %640 = vmatpush.msrb.mxu1 %v4629_v9 }
  0x72   :  { %568 = vmatpush.msrb.mxu0 %v4731_v26  ;;  %413 = vmatpush.msra.mxu2 %v266_v6 }
  0x73   :  { %548 = vmatpush.msrb.mxu3 %v4728_v24  ;;  %641 = vmatpush.msrb.mxu1 %v4632_v11 }
  0x74   :  { %569 = vmatpush.msrb.mxu0 %v4737_v30  ;;  %380 = vmatmul.f32.gmra.mxu1 %v4718_v18 }
  0x75   :  { %549 = vmatpush.msrb.mxu3 %v4735_v29  ;;  %414 = vmatpush.msra.mxu2 %v263_v12 }
  0x76   :  { %570 = vmatpush.msrb.mxu0 %v4744_v35  ;;  %642 = vmatpush.msrb.mxu1 %v4635_v13 }
  0x77   :  { %550 = vmatpush.msrb.mxu3 %v4742_v33  ;;  %342 = vmatmul.f32.gmra.mxu0 %v4748_v36 }
  0x78   :  { %571 = vmatpush.msrb.mxu0 %v4753_v42  ;;  %415 = vmatmul.f32.vlgmr.msra.gmra.mxu2 %v4665_v41  ;;  %v4810_v41 = vld [vmem:[#allocation7 + $0x30] sm:$0xff] }
  0x79   :  { %551 = vmatpush.msrb.mxu3 %v4751_v39  ;;  %656 = vmatpush.msrb.mxu2 %v4667_v43 }
  0x7a   :  { %572 = vmatpush.msrb.mxu0 %v4761_v50  ;;  %643 = vmatpush.msrb.mxu1 %v4638_v15 }
  0x7b   :  { %552 = vmatpush.msrb.mxu3 %v4759_v46  ;;  %657 = vmatpush.msrb.mxu2 %v4674_v48 }
  0x7c   :  { %573 = vmatpush.msrb.mxu0 %v4767_v55  ;;  %644 = vmatpush.msrb.mxu1 %v4641_v19 }
  0x7d   :  { %553 = vmatpush.msrb.mxu3 %v4765_v54  ;;  %658 = vmatpush.msrb.mxu2 %v4680_v52 }
  0x7e   :  { %574 = vmatpush.msrb.mxu0 %v4774_v63  ;;  %645 = vmatpush.msrb.mxu1 %v4644_v22 }
  0x7f   :  { %554 = vmatpush.msrb.mxu3 %v4772_v62  ;;  %345 = vmatmul.f32.gmra.mxu0 %v4778_v4 }
  0x80   :  { %555 = vmatmul.f32.vlgmr.msrb.gmra.mxu3 %v4456_v47  ;;  %750 = vmatpush.msra.mxu0 %v4618_v1 }
  0x81   :  { %676 = vmatpush.msra.mxu3 %v4669_v44  ;;  %383 = vmatmul.f32.gmra.mxu1 %v4748_v36 }
  0x82   :  { %659 = vmatpush.msrb.mxu2 %v4686_v56  ;;  %646 = vmatpush.msrb.mxu1 %v4647_v25 }
  0x83   :  { %677 = vmatpush.msra.mxu3 %v4676_v49  ;;  %418 = vmatmul.f32.gmra.mxu2 %v4691_v58  ;;  %v4828_v58 = vld [vmem:[#allocation7 + $0x38] sm:$0xff] }
  0x84   :  { %660 = vmatpush.msrb.mxu2 %v4694_v60  ;;  %647 = vmatpush.msrb.mxu1 %v4650_v27 }
  0x85   :  { %678 = vmatpush.msra.mxu3 %v4682_v53  ;;  %751 = vmatpush.msra.mxu0 %v4621_v3 }
  0x86   :  { %661 = vmatpush.msrb.mxu2 %v4701_v0  ;;  %648 = vmatpush.msrb.mxu1 %v4653_v31 }
  0x87   :  { %348 = vmatmul.f32.gmra.mxu0 %v4792_v14  ;;  %679 = vmatpush.msra.mxu3 %v4688_v57 }
  0x88   :  { %662 = vmatpush.msrb.mxu2 %v4707_v8  ;;  %649 = vmatpush.msrb.mxu1 %v4656_v34 }
  0x89   :  { %680 = vmatpush.msra.mxu3 %v4696_v61  ;;  %386 = vmatmul.f32.gmra.mxu1 %v4778_v4 }
  0x8a   :  { %663 = vmatpush.msrb.mxu2 %v4713_v16  ;;  %650 = vmatpush.msrb.mxu1 %v4659_v37 }
  0x8b   :  { %681 = vmatpush.msra.mxu3 %v4703_v2  ;;  %421 = vmatmul.f32.gmra.mxu2 %v4718_v18  ;;  %v309_v18 = vld [vmem:[%s7216_s6] sm:$0x7]  ;;  %s3044_s6 = ssub.f32 1.0, %s3039_s1 }
  0x8c   :  { %664 = vmatpush.msrb.mxu2 %v4721_v20  ;;  %651 = vmatpush.msrb.mxu1 %v4662_v40  ;;  %v4938_v28 = vperm.slane %v309_v18, 0  ;;  %v4945_v6 = vperm.slane %v309_v18, 1 }
  0x8d   :  { %682 = vmatpush.msra.mxu3 %v4709_v10  ;;  %752 = vmatpush.msra.mxu0 %v4623_v5 }
  0x8e   :  { %770 = vmatpush.msra.mxu1 %v4667_v43  ;;  %665 = vmatpush.msrb.mxu2 %v4728_v24  ;;  %7607 = vst [vmem:[#allocation43_spill] sm:$0xff] %v4938_v28 }
  0x8f   :  { %351 = vmatmul.f32.gmra.mxu0 %v4810_v41  ;;  %683 = vmatpush.msra.mxu3 %v4715_v17  ;;  %7610 = vst [vmem:[#allocation46_spill] sm:$0xff] %v4945_v6 }
  0x90   :  { %666 = vmatpush.msrb.mxu2 %v4735_v29  ;;  %771 = vmatpush.msra.mxu1 %v4674_v48 }
  0x91   :  { %684 = vmatpush.msra.mxu3 %v4723_v21  ;;  %389 = vmatmul.f32.gmra.mxu1 %v4792_v14 }
  0x92   :  { %667 = vmatpush.msrb.mxu2 %v4742_v33  ;;  %772 = vmatpush.msra.mxu1 %v4680_v52 }
  0x93   :  { %685 = vmatpush.msra.mxu3 %v4731_v26  ;;  %424 = vmatmul.f32.gmra.mxu2 %v4748_v36 }
  0x94   :  { %668 = vmatpush.msrb.mxu2 %v4751_v39  ;;  %753 = vmatpush.msra.mxu0 %v4626_v7 }
  0x95   :  { %686 = vmatpush.msra.mxu3 %v4737_v30  ;;  %773 = vmatpush.msra.mxu1 %v4686_v56 }
  0x96   :  { %669 = vmatpush.msrb.mxu2 %v4759_v46  ;;  %754 = vmatpush.msra.mxu0 %v4629_v9 }
  0x97   :  { %354 = vmatmul.f32.gmra.mxu0 %v4828_v58  ;;  %687 = vmatpush.msra.mxu3 %v4744_v35 }
  0x98   :  { %670 = vmatpush.msrb.mxu2 %v4765_v54  ;;  %774 = vmatpush.msra.mxu1 %v4694_v60 }
  0x99   :  { %688 = vmatpush.msra.mxu3 %v4753_v42  ;;  %392 = vmatmul.f32.gmra.mxu1 %v4810_v41 }
  0x9a   :  { %755 = vmatpush.msra.mxu0 %v4632_v11  ;;  %671 = vmatpush.msrb.mxu2 %v4772_v62 }
  0x9b   :  { %689 = vmatpush.msra.mxu3 %v4761_v50  ;;  %775 = vmatpush.msra.mxu1 %v4701_v0 }
  0x9c   :  { %427 = vmatmul.f32.gmra.mxu2 %v4778_v4  ;;  %756 = vmatpush.msra.mxu0 %v4635_v13 }
  0x9d   :  { %690 = vmatpush.msra.mxu3 %v4767_v55  ;;  %790 = vmatpush.msra.mxu2 %v4669_v44 }
  0x9e   :  { %776 = vmatpush.msra.mxu1 %v4707_v8  ;;  %757 = vmatpush.msra.mxu0 %v4638_v15 }
  0x9f   :  { %575 = vmatmul.f32.vlgmr.msrb.gmra.mxu0 %v4456_v47  ;;  %691 = vmatpush.msra.mxu3 %v4774_v63 }
  0xa0   :  { %791 = vmatpush.msra.mxu2 %v4676_v49  ;;  %777 = vmatpush.msra.mxu1 %v4713_v16 }
  0xa1   :  { %864 = vmatpush.msrb.mxu3 %v4618_v1  ;;  %758 = vmatpush.msra.mxu0 %v4641_v19 }
  0xa2   :  { %792 = vmatpush.msra.mxu2 %v4682_v53  ;;  %778 = vmatpush.msra.mxu1 %v4721_v20 }
  0xa3   :  { %865 = vmatpush.msrb.mxu3 %v4621_v3  ;;  %395 = vmatmul.f32.gmra.mxu1 %v4828_v58 }
  0xa4   :  { %759 = vmatpush.msra.mxu0 %v4644_v22  ;;  %793 = vmatpush.msra.mxu2 %v4688_v57 }
  0xa5   :  { %779 = vmatpush.msra.mxu1 %v4728_v24  ;;  %430 = vmatmul.f32.gmra.mxu2 %v4792_v14 }
  0xa6   :  { %760 = vmatpush.msra.mxu0 %v4647_v25  ;;  %794 = vmatpush.msra.mxu2 %v4696_v61 }
  0xa7   :  { %780 = vmatpush.msra.mxu1 %v4735_v29  ;;  %866 = vmatpush.msrb.mxu3 %v4623_v5 }
  0xa8   :  { %761 = vmatpush.msra.mxu0 %v4650_v27  ;;  %795 = vmatpush.msra.mxu2 %v4703_v2 }
  0xa9   :  { %781 = vmatpush.msra.mxu1 %v4742_v33  ;;  %867 = vmatpush.msrb.mxu3 %v4626_v7 }
  0xaa   :  { %762 = vmatpush.msra.mxu0 %v4653_v31  ;;  %796 = vmatpush.msra.mxu2 %v4709_v10 }
  0xab   :  { %782 = vmatpush.msra.mxu1 %v4751_v39  ;;  %868 = vmatpush.msrb.mxu3 %v4629_v9 }
  0xac   :  { %763 = vmatpush.msra.mxu0 %v4656_v34  ;;  %797 = vmatpush.msra.mxu2 %v4715_v17 }
  0xad   :  { %783 = vmatpush.msra.mxu1 %v4759_v46  ;;  %433 = vmatmul.f32.gmra.mxu2 %v4810_v41 }
  0xae   :  { %764 = vmatpush.msra.mxu0 %v4659_v37  ;;  %798 = vmatpush.msra.mxu2 %v4723_v21 }
  0xaf   :  { %784 = vmatpush.msra.mxu1 %v4765_v54  ;;  %869 = vmatpush.msrb.mxu3 %v4632_v11 }
  0xb0   :  { %765 = vmatpush.msra.mxu0 %v4662_v40  ;;  %799 = vmatpush.msra.mxu2 %v4731_v26 }
  0xb1   :  { %785 = vmatpush.msra.mxu1 %v4772_v62  ;;  %870 = vmatpush.msrb.mxu3 %v4635_v13 }
  0xb2   :  { %884 = vmatpush.msrb.mxu0 %v4667_v43  ;;  %800 = vmatpush.msra.mxu2 %v4737_v30 }
  0xb3   :  { %871 = vmatpush.msrb.mxu3 %v4638_v15 }
  0xb4   :  { %885 = vmatpush.msrb.mxu0 %v4674_v48  ;;  %801 = vmatpush.msra.mxu2 %v4744_v35 }
  0xb5   :  { %436 = vmatmul.f32.gmra.mxu2 %v4828_v58  ;;  %872 = vmatpush.msrb.mxu3 %v4641_v19 }
  0xb6   :  { %886 = vmatpush.msrb.mxu0 %v4680_v52  ;;  %802 = vmatpush.msra.mxu2 %v4753_v42 }
  0xb7   :  { %873 = vmatpush.msrb.mxu3 %v4644_v22 }
  0xb8   :  { %887 = vmatpush.msrb.mxu0 %v4686_v56  ;;  %803 = vmatpush.msra.mxu2 %v4761_v50 }
  0xb9   :  { %874 = vmatpush.msrb.mxu3 %v4647_v25 }
  0xba   :  { %888 = vmatpush.msrb.mxu0 %v4694_v60  ;;  %804 = vmatpush.msra.mxu2 %v4767_v55 }
  0xbb   :  { %875 = vmatpush.msrb.mxu3 %v4650_v27 }
  0xbc   :  { %889 = vmatpush.msrb.mxu0 %v4701_v0  ;;  %805 = vmatpush.msra.mxu2 %v4774_v63 }
  0xbd   :  { %876 = vmatpush.msrb.mxu3 %v4653_v31 }
  0xbe   :  { %890 = vmatpush.msrb.mxu0 %v4707_v8 }
  0xbf   :  { %877 = vmatpush.msrb.mxu3 %v4656_v34 }
  0xc0   :  { %891 = vmatpush.msrb.mxu0 %v4713_v16 }
  0xc1   :  { %878 = vmatpush.msrb.mxu3 %v4659_v37 }
  0xc2   :  { %892 = vmatpush.msrb.mxu0 %v4721_v20 }
  0xc3   :  { %879 = vmatpush.msrb.mxu3 %v4662_v40 }
  0xc4   :  { %893 = vmatpush.msrb.mxu0 %v4728_v24 }
  0xc6   :  { %894 = vmatpush.msrb.mxu0 %v4735_v29 }
  0xc8   :  { %895 = vmatpush.msrb.mxu0 %v4742_v33 }
  0xca   :  { %896 = vmatpush.msrb.mxu0 %v4751_v39 }
  0xcc   :  { %897 = vmatpush.msrb.mxu0 %v4759_v46 }
  0xce   :  { %898 = vmatpush.msrb.mxu0 %v4765_v54 }
  0xd0   :  { %899 = vmatpush.msrb.mxu0 %v4772_v62 }
  0xdc   :  { %v334_v47 = vpop.f32.mrf.mxu0 }
  0xdd   :  { %v335_v36 = vadd.f32 %v334_v47, %v4938_v28 }
  0xe1   :  { %v375_v14 = vpop.f32.mrf.mxu1 }
  0xe2   :  { %v376_v58 = vadd.f32 %v375_v14, %v4945_v6 }
  0xe3   :  { %v536_v32 = vpop.f32.mrf.mxu3 }
  0xe4   :  { %v4936_v23 = vpop.f32.mrf.mxu0  ;;  %v579_v45 = vadd.f32 %v536_v32, %v335_v36 }
  0xe5   :  { %7606 = vst [vmem:[#allocation42_spill] sm:$0xff] %v4936_v23 }
  0xe6   :  { %v3554_v51 = vmul.f32 -1.442695, %v579_v45 }
  0xe8   :  { %3624 = vpow2.f32 %v3554_v51 }
  0xec   :  { %v4941_v38 = vpop.f32.mrf.mxu0 }
  0xed   :  { %7608 = vst [vmem:[#allocation44_spill] sm:$0xff] %v4941_v38 }
  0xee   :  { %v3625_v4 = vpop.eup %3624 }
  0xef   :  { %v583_v41 = vadd.f32 1.0, %v3625_v4 }
  0xf1   :  { %3626 = vrcp.f32 %v583_v41  ;;  %v595_v54 = vand.u32 2147483648, %v583_v41  ;;  %vm589_vm1 = vweird.f32 %v583_v41 }
  0xf4   :  { %v4943_v59 = vpop.f32.mrf.mxu0 }
  0xf5   :  { %7609 = vst [vmem:[#allocation45_spill] sm:$0xff] %v4943_v59 }
  0xf7   :  { %v3627_v36 = vpop.eup %3626 }
  0xf8   :  { %v585_v45 = vmul.f32 %v3627_v36, %v583_v41  ;;  %vm590_vm0 = vweird.f32 %v3627_v36 }
  0xf9   :  { %vm591_vm2 = vmor %vm589_vm1, %vm590_vm0 }
  0xfa   :  { %v586_v63 = vsub.f32 1.0, %v585_v45  ;;  %v4964_v45 = vperm.slane %v309_v18, 2 }
  0xfb   :  { %v416_v32 = vpop.f32.mrf.mxu2 }
  0xfc   :  { %v4947_v12 = vpop.f32.mrf.mxu0  ;;  %v587_v14 = vmul.f32 %v3627_v36, %v586_v63 }
  0xfd   :  { %7611 = vst [vmem:[#allocation47_spill] sm:$0xff] %v4947_v12 }
 0x103   :  { %v556_v23 = vpop.f32.mrf.mxu3 }
 0x104   :  { %v599_v62 = vadd.f32 %v556_v23, %v376_v58  ;;  %v4950_v47 = vpop.f32.mrf.mxu0  ;;  %v588_v58 = vadd.f32 %v3627_v36, %v587_v14  ;;  %v417_v14 = vadd.f32 %v416_v32, %v4964_v45 }
 0x105   :  { %7612 = vst [vmem:[#allocation48_spill] sm:$0xff] %v4950_v47 }
 0x106   :  { %v3555_v38 = vmul.f32 -1.442695, %v599_v62  ;;  %v4955_v4 = vpop.f32.mrf.mxu2 }
 0x107   :  { %7614 = vst [vmem:[#allocation50_spill] sm:$0xff] %v4955_v4 }
 0x108   :  { %3628 = vpow2.f32 %v3555_v38 }
 0x10c   :  { %v352_v51 = vpop.f32.mrf.mxu0 }
 0x10d   :  { %v4953_v40 = vadd.f32 %v352_v51, %v4938_v28  ;;  %v593_v51 = vand.u32 2147483647, %v583_v41 }
 0x10e   :  { %v3629_v59 = vpop.eup %3628  ;;  %v4960_v47 = vpop.f32.mrf.mxu2 }
 0x10f   :  { %7613 = vst [vmem:[#allocation49_spill] sm:$0xff] %v4953_v40  ;;  %v603_v12 = vadd.f32 1.0, %v3629_v59  ;;  %v4962_v59 = vld [vmem:[#allocation14] ss:$0 sm:$0xff]  ;;  %v592_v40 = vsel %vm591_vm2, %v3627_v36, %v588_v58  ;;  %vm594_vm3 = vcmp.eq.f32.partialorder %v593_v51, 8.507059e+37 }
 0x110   :  { %7616 = vst [vmem:[#allocation52_spill] sm:$0xff] %v4960_v47 }
 0x111   :  { %3630 = vrcp.f32 %v603_v12  ;;  %vm609_vm4 = vweird.f32 %v603_v12  ;;  %v615_v41 = vand.u32 2147483648, %v603_v12  ;;  %v613_v18 = vand.u32 2147483647, %v603_v12 }
 0x113   :  { %v616_v36 = vor.u32 1.1754944e-38, %v615_v41  ;;  %vm614_vm7 = vcmp.eq.f32.partialorder %v613_v18, 8.507059e+37  ;;  %v7634_v18 = vld [vmem:[#allocation46_spill] sm:$0xff] }
 0x114   :  { %v355_v6 = vpop.f32.mrf.mxu0 }
 0x115   :  { %v4958_v23 = vadd.f32 %v355_v6, %v4938_v28  ;;  %v596_v6 = vor.u32 1.1754944e-38, %v595_v54 }
 0x116   :  { %v4968_v55 = vpop.f32.mrf.mxu2 }
 0x117   :  { %7615 = vst [vmem:[#allocation51_spill] sm:$0xff] %v4958_v23  ;;  %v3631_v62 = vpop.eup %3630  ;;  %v597_v47 = vsel %vm594_vm3, %v596_v6, %v592_v40 }
 0x118   :  { %v605_v38 = vmul.f32 %v3631_v62, %v603_v12  ;;  %vm610_vm5 = vweird.f32 %v3631_v62 }
 0x119   :  { %vm611_vm6 = vmor %vm609_vm4, %vm610_vm5 }
 0x11a   :  { %v606_v37 = vsub.f32 1.0, %v605_v38 }
 0x11c   :  { %v607_v63 = vmul.f32 %v3631_v62, %v606_v37  ;;  %v576_v4 = vpop.f32.mrf.mxu0 }
 0x11d   :  { %v622_v23 = vadd.f32 %v4962_v59, %v576_v4 }
 0x11e   :  { %v608_v28 = vadd.f32 %v3631_v62, %v607_v63 }
 0x11f   :  { %v623_v38 = vmul.f32 %v622_v23, %v597_v47  ;;  %v4970_v58 = vpop.f32.mrf.mxu2  ;;  %v7632_v23 = vld [vmem:[#allocation43_spill] sm:$0xff] }
 0x120   :  { %v612_v37 = vsel %vm611_vm6, %v3631_v62, %v608_v28  ;;  %7617 = vst [vmem:[#allocation53_spill] sm:$0xff] %v4970_v58  ;;  %v7633_v62 = vld [vmem:[#allocation42_spill] sm:$0xff] }
 0x121   :  { %v624_v46 = vadd.f32 %v623_v38, %v417_v14  ;;  %v617_v54 = vsel %vm614_vm7, %v616_v36, %v612_v37  ;;  %v338_v6 = vadd.f32 %v7633_v62, %v7632_v23 }
 0x122   :  { %v626_v4 = vsub.f32 1.0, %v617_v54  ;;  %v628_v40 = vmul.f32 0.0, %v617_v54 }
 0x123   :  { %3632 = vtanh.f32 %v624_v46 }
 0x128   :  { %v4977_v12 = vpop.f32.mrf.mxu2 }
 0x129   :  { %v3633_v32 = vpop.eup %3632  ;;  %7618 = vst [vmem:[#allocation54_spill] sm:$0xff] %v4977_v12 }
 0x12a   :  { %v627_v51 = vmul.f32 %v3633_v32, %v626_v4 }
 0x12c   :  { %v4972_v63 = vadd.f32 %v628_v40, %v627_v51 }
 0x12e   :  { %652 = vmatmul.f32.vlgmr.msrb.gmra.mxu1 %v4972_v63  ;;  %672 = vmatmul.f32.vlgmr.msrb.gmra.mxu2 %v4972_v63 }
 0x12f   :  { %692 = vmatmul.f32.vlgmr.msra.gmra.mxu3 %v4972_v63  ;;  %904 = vmatpush.msrb.mxu1 %v4669_v44 }
 0x130   :  { %978 = vmatpush.msrb.mxu2 %v4618_v1  ;;  %998 = vmatpush.msra.mxu3 %v4667_v43  ;;  %v434_v1 = vpop.f32.mrf.mxu2 }
 0x131   :  { %905 = vmatpush.msrb.mxu1 %v4676_v49  ;;  %v4993_v46 = vadd.f32 %v434_v1, %v4964_v45 }
 0x132   :  { %979 = vmatpush.msrb.mxu2 %v4621_v3  ;;  %999 = vmatpush.msra.mxu3 %v4674_v48  ;;  %v7620_v3 = vld [vmem:[#allocation37_spill] sm:$0xff] }
 0x133   :  { %906 = vmatpush.msrb.mxu1 %v4682_v53  ;;  %7619 = vst [vmem:[#allocation55_spill] sm:$0xff] %v4993_v46 }
 0x134   :  { %980 = vmatpush.msrb.mxu2 %v4623_v5  ;;  %1000 = vmatpush.msra.mxu3 %v4680_v52  ;;  %v7621_v5 = vld [vmem:[#allocation39_spill] sm:$0xff] }
 0x135   :  { %907 = vmatpush.msrb.mxu1 %v4688_v57 }
 0x136   :  { %981 = vmatpush.msrb.mxu2 %v4626_v7  ;;  %1001 = vmatpush.msra.mxu3 %v4686_v56  ;;  %v7622_v7 = vld [vmem:[#allocation35_spill] sm:$0xff] }
 0x137   :  { %908 = vmatpush.msrb.mxu1 %v4696_v61 }
 0x138   :  { %982 = vmatpush.msrb.mxu2 %v4629_v9  ;;  %1002 = vmatpush.msra.mxu3 %v4694_v60  ;;  %v7623_v9 = vld [vmem:[#allocation38_spill] sm:$0xff]  ;;  %v5042_v47 = vpop.f32.mrf.mxu2 }
 0x139   :  { %909 = vmatpush.msrb.mxu1 %v4703_v2 }
 0x13a   :  { %983 = vmatpush.msrb.mxu2 %v4632_v11  ;;  %1003 = vmatpush.msra.mxu3 %v4701_v0  ;;  %v7624_v11 = vld [vmem:[#allocation41_spill] sm:$0xff] }
 0x13b   :  { %910 = vmatpush.msrb.mxu1 %v4709_v10  ;;  %7631 = vst [vmem:[#allocation41_spill] sm:$0xff] %v5042_v47 }
 0x13c   :  { %984 = vmatpush.msrb.mxu2 %v4635_v13  ;;  %1004 = vmatpush.msra.mxu3 %v4707_v8  ;;  %v7625_v13 = vld [vmem:[#allocation36_spill] sm:$0xff] }
 0x13d   :  { %911 = vmatpush.msrb.mxu1 %v4715_v17 }
 0x13e   :  { %985 = vmatpush.msrb.mxu2 %v4638_v15  ;;  %1005 = vmatpush.msra.mxu3 %v4713_v16  ;;  %v7626_v15 = vld [vmem:[#allocation40_spill] sm:$0xff] }
 0x13f   :  { %912 = vmatpush.msrb.mxu1 %v4723_v21 }
 0x140   :  { %986 = vmatpush.msrb.mxu2 %v4641_v19  ;;  %1006 = vmatpush.msra.mxu3 %v4721_v20  ;;  %v378_v19 = vpop.f32.mrf.mxu1 }
 0x141   :  { %913 = vmatpush.msrb.mxu1 %v4731_v26  ;;  %v379_v37 = vadd.f32 %v378_v19, %v7634_v18 }
 0x142   :  { %987 = vmatpush.msrb.mxu2 %v4644_v22  ;;  %1007 = vmatpush.msra.mxu3 %v4728_v24 }
 0x143   :  { %914 = vmatpush.msrb.mxu1 %v4737_v30 }
 0x144   :  { %988 = vmatpush.msrb.mxu2 %v4647_v25  ;;  %1008 = vmatpush.msra.mxu3 %v4735_v29 }
 0x145   :  { %915 = vmatpush.msrb.mxu1 %v4744_v35 }
 0x146   :  { %989 = vmatpush.msrb.mxu2 %v4650_v27  ;;  %1009 = vmatpush.msra.mxu3 %v4742_v33 }
 0x147   :  { %916 = vmatpush.msrb.mxu1 %v4753_v42 }
 0x148   :  { %990 = vmatpush.msrb.mxu2 %v4653_v31  ;;  %1010 = vmatpush.msra.mxu3 %v4751_v39  ;;  %v5030_v22 = vpop.f32.mrf.mxu1 }
 0x149   :  { %917 = vmatpush.msrb.mxu1 %v4761_v50 }
 0x14a   :  { %991 = vmatpush.msrb.mxu2 %v4656_v34  ;;  %1011 = vmatpush.msra.mxu3 %v7620_v3 }
 0x14b   :  { %918 = vmatpush.msrb.mxu1 %v7621_v5 }
 0x14c   :  { %992 = vmatpush.msrb.mxu2 %v7622_v7  ;;  %1012 = vmatpush.msra.mxu3 %v7623_v9 }
 0x14d   :  { %919 = vmatpush.msrb.mxu1 %v7624_v11 }
 0x14e   :  { %993 = vmatpush.msrb.mxu2 %v7625_v13  ;;  %1013 = vmatpush.msra.mxu3 %v7626_v15 }
 0x150   :  { %v5032_v25 = vpop.f32.mrf.mxu1 }
 0x158   :  { %v5034_v27 = vpop.f32.mrf.mxu1 }
 0x159   :  { %7627 = vst [vmem:[#allocation37_spill] sm:$0xff] %v5034_v27 }
 0x160   :  { %v5036_v31 = vpop.f32.mrf.mxu1 }
 0x161   :  { %7628 = vst [vmem:[#allocation39_spill] sm:$0xff] %v5036_v31 }
 0x168   :  { %v5038_v34 = vpop.f32.mrf.mxu1 }
 0x169   :  { %7629 = vst [vmem:[#allocation35_spill] sm:$0xff] %v5038_v34 }
 0x170   :  { %v5040_v28 = vpop.f32.mrf.mxu1 }
 0x171   :  { %7630 = vst [vmem:[#allocation38_spill] sm:$0xff] %v5040_v28 }
 0x1ab   :  { %v653_v14 = vpop.f32.mrf.mxu1 }
 0x1ac   :  { %v696_v38 = vadd.f32 %v653_v14, %v338_v6 }
 0x1ae   :  { %v3556_v41 = vmul.f32 -1.442695, %v696_v38 }
 0x1b0   :  { %3634 = vpow2.f32 %v3556_v41 }
 0x1b1   :  { %v673_v36 = vpop.f32.mrf.mxu2 }
 0x1b2   :  { %v716_v54 = vadd.f32 %v673_v36, %v379_v37  ;;  %v693_v19 = vpop.f32.mrf.mxu3 }
 0x1b4   :  { %v3557_v4 = vmul.f32 -1.442695, %v716_v54 }
 0x1b6   :  { %v3635_v32 = vpop.eup %3634  ;;  %3636 = vpow2.f32 %v3557_v4  ;;  %v736_v4 = vadd.f32 %v4962_v59, %v693_v19 }
 0x1b7   :  { %v700_v51 = vadd.f32 1.0, %v3635_v32  ;;  %v7635_v32 = vld [vmem:[#allocation50_spill] sm:$0xff] }
 0x1b9   :  { %3638 = vrcp.f32 %v700_v51  ;;  %v712_v62 = vand.u32 2147483648, %v700_v51  ;;  %v710_v6 = vand.u32 2147483647, %v700_v51  ;;  %vm706_vm9 = vweird.f32 %v700_v51 }
 0x1bb   :  { %v713_v37 = vor.u32 1.1754944e-38, %v712_v62  ;;  %vm711_vm11 = vcmp.eq.f32.partialorder %v710_v6, 8.507059e+37 }
 0x1bc   :  { %v3637_v40 = vpop.eup %3636 }
 0x1bd   :  { %v720_v1 = vadd.f32 1.0, %v3637_v40  ;;  %v420_v40 = vadd.f32 %v7635_v32, %v4964_v45 }
 0x1bf   :  { %v3639_v7 = vpop.eup %3638  ;;  %3640 = vrcp.f32 %v720_v1  ;;  %v732_v34 = vand.u32 2147483648, %v720_v1  ;;  %v730_v12 = vand.u32 2147483647, %v720_v1  ;;  %vm726_vm13 = vweird.f32 %v720_v1 }
 0x1c0   :  { %v702_v13 = vmul.f32 %v3639_v7, %v700_v51  ;;  %vm707_vm8 = vweird.f32 %v3639_v7 }
 0x1c1   :  { %vm708_vm10 = vmor %vm706_vm9, %vm707_vm8  ;;  %v733_v62 = vor.u32 1.1754944e-38, %v732_v34  ;;  %vm731_vm15 = vcmp.eq.f32.partialorder %v730_v12, 8.507059e+37  ;;  %v5062_v12 = vld [vmem:[#allocation13 + $0x150] sm:$0xff] }
 0x1c2   :  { %v703_v47 = vsub.f32 1.0, %v702_v13 }
 0x1c4   :  { %v704_v28 = vmul.f32 %v3639_v7, %v703_v47 }
 0x1c5   :  { %v3641_v14 = vpop.eup %3640 }
 0x1c6   :  { %v722_v38 = vmul.f32 %v3641_v14, %v720_v1  ;;  %v705_v41 = vadd.f32 %v3639_v7, %v704_v28  ;;  %vm727_vm12 = vweird.f32 %v3641_v14 }
 0x1c7   :  { %vm728_vm14 = vmor %vm726_vm13, %vm727_vm12 }
 0x1c8   :  { %v723_v36 = vsub.f32 1.0, %v722_v38  ;;  %v709_v54 = vsel %vm708_vm10, %v3639_v7, %v705_v41 }
 0x1c9   :  { %v714_v13 = vsel %vm711_vm11, %v713_v37, %v709_v54 }
 0x1ca   :  { %v724_v46 = vmul.f32 %v3641_v14, %v723_v36  ;;  %v737_v47 = vmul.f32 %v736_v4, %v714_v13 }
 0x1cc   :  { %v738_v31 = vadd.f32 %v737_v47, %v420_v40  ;;  %v725_v28 = vadd.f32 %v3641_v14, %v724_v46  ;;  %v5057_v46 = vld [vmem:[#allocation13 + $0x168] sm:$0xff] }
 0x1ce   :  { %3642 = vtanh.f32 %v738_v31  ;;  %v729_v51 = vsel %vm728_vm14, %v3641_v14, %v725_v28 }
 0x1cf   :  { %v734_v7 = vsel %vm731_vm15, %v733_v62, %v729_v51  ;;  %v7640_v62 = vld [vmem:[#allocation52_spill] sm:$0xff] }
 0x1d0   :  { %v740_v6 = vsub.f32 1.0, %v734_v7  ;;  %v742_v41 = vmul.f32 %v734_v7, %v4972_v63  ;;  %v5067_v63 = vld [vmem:[#allocation13 + $0x138] sm:$0xff]  ;;  %v423_v7 = vadd.f32 %v7640_v62, %v4964_v45  ;;  %v5230_v62 = vld [vmem:[#allocation13 + $0x68] sm:$0xff] }
 0x1d4   :  { %v3643_v19 = vpop.eup %3642 }
 0x1d5   :  { %v741_v38 = vmul.f32 %v3643_v19, %v740_v6 }
 0x1d7   :  { %v5051_v37 = vadd.f32 %v742_v41, %v741_v38 }
 0x1d9   :  { %766 = vmatmul.f32.vlgmr.msra.gmra.mxu0 %v5051_v37  ;;  %786 = vmatmul.f32.vlgmr.msra.gmra.mxu1 %v5051_v37 }
 0x1da   :  { %806 = vmatmul.f32.vlgmr.msra.gmra.mxu2 %v5051_v37  ;;  %1018 = vmatpush.msra.mxu0 %v4669_v44  ;;  %v5072_v44 = vld [vmem:[#allocation13 + $0x120] sm:$0xff] }
 0x1db   :  { %1092 = vmatpush.msra.mxu1 %v5057_v46  ;;  %1112 = vmatpush.msra.mxu2 %v4667_v43  ;;  %v5077_v43 = vld [vmem:[#allocation13 + $0x108] sm:$0xff] }
 0x1dc   :  { %1019 = vmatpush.msra.mxu0 %v4676_v49  ;;  %v5087_v49 = vld [vmem:[#allocation13 + $0xd8] sm:$0xff] }
 0x1dd   :  { %1093 = vmatpush.msra.mxu1 %v5062_v12  ;;  %1113 = vmatpush.msra.mxu2 %v4674_v48  ;;  %v5082_v48 = vld [vmem:[#allocation13 + $0xf0] sm:$0xff] }
 0x1de   :  { %1020 = vmatpush.msra.mxu0 %v4682_v53  ;;  %v5097_v53 = vld [vmem:[#allocation13 + $0xa8] sm:$0xff] }
 0x1df   :  { %1094 = vmatpush.msra.mxu1 %v5067_v63  ;;  %1114 = vmatpush.msra.mxu2 %v4680_v52  ;;  %v5092_v52 = vld [vmem:[#allocation13 + $0xc0] sm:$0xff] }
 0x1e0   :  { %1021 = vmatpush.msra.mxu0 %v4688_v57  ;;  %v5107_v57 = vld [vmem:[#allocation13 + $0x78] sm:$0xff] }
 0x1e1   :  { %1095 = vmatpush.msra.mxu1 %v5072_v44  ;;  %1115 = vmatpush.msra.mxu2 %v4686_v56  ;;  %v5102_v56 = vld [vmem:[#allocation13 + $0x90] sm:$0xff] }
 0x1e2   :  { %1022 = vmatpush.msra.mxu0 %v4696_v61  ;;  %v5117_v61 = vld [vmem:[#allocation13 + $0x48] sm:$0xff] }
 0x1e3   :  { %1096 = vmatpush.msra.mxu1 %v5077_v43  ;;  %1116 = vmatpush.msra.mxu2 %v4694_v60  ;;  %v5112_v60 = vld [vmem:[#allocation13 + $0x60] sm:$0xff] }
 0x1e4   :  { %1023 = vmatpush.msra.mxu0 %v4703_v2  ;;  %v5127_v2 = vld [vmem:[#allocation13 + $0x18] sm:$0xff] }
 0x1e5   :  { %1097 = vmatpush.msra.mxu1 %v5082_v48  ;;  %1117 = vmatpush.msra.mxu2 %v4701_v0  ;;  %v5122_v0 = vld [vmem:[#allocation13 + $0x30] sm:$0xff]  ;;  %7637 = vst [vmem:[#allocation40_spill] sm:$0xff] %v5127_v2 }
 0x1e6   :  { %1024 = vmatpush.msra.mxu0 %v4709_v10  ;;  %7636 = vst [vmem:[#allocation36_spill] sm:$0xff] %v5122_v0  ;;  %v7639_v10 = vld [vmem:[#allocation44_spill] sm:$0xff] }
 0x1e7   :  { %1098 = vmatpush.msra.mxu1 %v5087_v49  ;;  %1118 = vmatpush.msra.mxu2 %v4707_v8  ;;  %v5132_v8 = vld [vmem:[#allocation13] sm:$0xff] }
 0x1e8   :  { %1025 = vmatpush.msra.mxu0 %v4715_v17  ;;  %7638 = vst [vmem:[#allocation42_spill] sm:$0xff] %v5132_v8  ;;  %v382_v17 = vadd.f32 %v5030_v22, %v7634_v18 }
 0x1e9   :  { %1099 = vmatpush.msra.mxu1 %v5092_v52  ;;  %1119 = vmatpush.msra.mxu2 %v4713_v16  ;;  %v341_v16 = vadd.f32 %v7639_v10, %v7632_v23 }
 0x1ea   :  { %1026 = vmatpush.msra.mxu0 %v4723_v21 }
 0x1eb   :  { %1100 = vmatpush.msra.mxu1 %v5097_v53  ;;  %1120 = vmatpush.msra.mxu2 %v4721_v20 }
 0x1ec   :  { %1027 = vmatpush.msra.mxu0 %v4731_v26 }
 0x1ed   :  { %1101 = vmatpush.msra.mxu1 %v5102_v56  ;;  %1121 = vmatpush.msra.mxu2 %v4728_v24 }
 0x1ee   :  { %1028 = vmatpush.msra.mxu0 %v4737_v30 }
 0x1ef   :  { %1102 = vmatpush.msra.mxu1 %v5107_v57  ;;  %1122 = vmatpush.msra.mxu2 %v4735_v29 }
 0x1f0   :  { %1029 = vmatpush.msra.mxu0 %v4744_v35 }
 0x1f1   :  { %1103 = vmatpush.msra.mxu1 %v5112_v60  ;;  %1123 = vmatpush.msra.mxu2 %v4742_v33 }
 0x1f2   :  { %1030 = vmatpush.msra.mxu0 %v4753_v42 }
 0x1f3   :  { %1104 = vmatpush.msra.mxu1 %v5117_v61  ;;  %1124 = vmatpush.msra.mxu2 %v4751_v39 }
 0x1f4   :  { %1031 = vmatpush.msra.mxu0 %v4761_v50 }
 0x1f5   :  { %1105 = vmatpush.msra.mxu1 %v5122_v0  ;;  %1125 = vmatpush.msra.mxu2 %v7620_v3 }
 0x1f6   :  { %1032 = vmatpush.msra.mxu0 %v7621_v5 }
 0x1f7   :  { %1106 = vmatpush.msra.mxu1 %v5127_v2  ;;  %1126 = vmatpush.msra.mxu2 %v7623_v9 }
 0x1f8   :  { %1033 = vmatpush.msra.mxu0 %v7624_v11 }
 0x1f9   :  { %1107 = vmatpush.msra.mxu1 %v5132_v8  ;;  %1127 = vmatpush.msra.mxu2 %v7626_v15 }
 0x256   :  { %v767_v20 = vpop.f32.mrf.mxu0  ;;  %v787_v21 = vpop.f32.mrf.mxu1 }
 0x257   :  { %v810_v24 = vadd.f32 %v767_v20, %v341_v16  ;;  %v830_v26 = vadd.f32 %v787_v21, %v382_v17 }
 0x259   :  { %v3558_v29 = vmul.f32 -1.442695, %v810_v24  ;;  %v3559_v30 = vmul.f32 -1.442695, %v830_v26 }
 0x25b   :  { %3644 = vpow2.f32 %v3558_v29 }
 0x25c   :  { %3646 = vpow2.f32 %v3559_v30  ;;  %v5149_v30 = vld [vmem:[#allocation13 + $0x178] sm:$0xff] }
 0x25d   :  { %v807_v4 = vpop.f32.mrf.mxu2 }
 0x25e   :  { %v850_v47 = vadd.f32 %v4962_v59, %v807_v4  ;;  %v5205_v4 = vld [vmem:[#allocation13 + $0xb8] sm:$0xff] }
 0x261   :  { %v3645_v33 = vpop.eup %3644 }
 0x262   :  { %v3647_v35 = vpop.eup %3646  ;;  %v814_v39 = vadd.f32 1.0, %v3645_v33  ;;  %v5153_v33 = vld [vmem:[#allocation13 + $0x170] sm:$0xff] }
 0x263   :  { %v834_v42 = vadd.f32 1.0, %v3647_v35  ;;  %v5156_v35 = vld [vmem:[#allocation13 + $0x160] sm:$0xff] }
 0x264   :  { %3648 = vrcp.f32 %v814_v39  ;;  %v826_v1 = vand.u32 2147483648, %v814_v39  ;;  %v824_v36 = vand.u32 2147483647, %v814_v39  ;;  %vm820_vm1 = vweird.f32 %v814_v39 }
 0x265   :  { %3650 = vrcp.f32 %v834_v42  ;;  %v846_v19 = vand.u32 2147483648, %v834_v42  ;;  %vm840_vm5 = vweird.f32 %v834_v42  ;;  %v844_v38 = vand.u32 2147483647, %v834_v42 }
 0x266   :  { %v827_v40 = vor.u32 1.1754944e-38, %v826_v1  ;;  %vm825_vm3 = vcmp.eq.f32.partialorder %v824_v36, 8.507059e+37  ;;  %v5191_v1 = vld [vmem:[#allocation13 + $0xe8] sm:$0xff]  ;;  %v5198_v36 = vld [vmem:[#allocation13 + $0xd0] sm:$0xff] }
 0x267   :  { %v847_v16 = vor.u32 1.1754944e-38, %v846_v19  ;;  %vm845_vm7 = vcmp.eq.f32.partialorder %v844_v38, 8.507059e+37  ;;  %v5240_v19 = vld [vmem:[#allocation13 + $0x40] sm:$0xff]  ;;  %v5244_v38 = vld [vmem:[#allocation13 + $0x38] sm:$0xff] }
 0x268   :  { %7641 = vst [vmem:[#allocation50_spill] sm:$0xff] %v5244_v38 }
 0x26a   :  { %v3649_v50 = vpop.eup %3648 }
 0x26b   :  { %v3651_v3 = vpop.eup %3650  ;;  %v816_v9 = vmul.f32 %v3649_v50, %v814_v39  ;;  %vm821_vm0 = vweird.f32 %v3649_v50  ;;  %v5163_v39 = vld [vmem:[#allocation13 + $0x148] sm:$0xff] }
 0x26c   :  { %v836_v31 = vmul.f32 %v3651_v3, %v834_v42  ;;  %vm822_vm2 = vmor %vm820_vm1, %vm821_vm0  ;;  %vm841_vm4 = vweird.f32 %v3651_v3  ;;  %v5167_v42 = vld [vmem:[#allocation13 + $0x140] sm:$0xff] }
 0x26d   :  { %v817_v34 = vsub.f32 1.0, %v816_v9  ;;  %vm842_vm6 = vmor %vm840_vm5, %vm841_vm4  ;;  %v5177_v9 = vld [vmem:[#allocation13 + $0x118] sm:$0xff] }
 0x26e   :  { %v837_v22 = vsub.f32 1.0, %v836_v31  ;;  %v5181_v31 = vld [vmem:[#allocation13 + $0x110] sm:$0xff] }
 0x26f   :  { %v818_v14 = vmul.f32 %v3649_v50, %v817_v34  ;;  %v5184_v34 = vld [vmem:[#allocation13 + $0x100] sm:$0xff] }
 0x270   :  { %v838_v54 = vmul.f32 %v3651_v3, %v837_v22  ;;  %v5188_v22 = vld [vmem:[#allocation13 + $0xf8] sm:$0xff] }
 0x271   :  { %v819_v32 = vadd.f32 %v3649_v50, %v818_v14  ;;  %v5195_v14 = vld [vmem:[#allocation13 + $0xe0] sm:$0xff] }
 0x272   :  { %v839_v51 = vadd.f32 %v3651_v3, %v838_v54  ;;  %v5202_v54 = vld [vmem:[#allocation13 + $0xc8] sm:$0xff] }
 0x273   :  { %v823_v13 = vsel %vm822_vm2, %v3649_v50, %v819_v32  ;;  %v5170_v50 = vld [vmem:[#allocation13 + $0x130] sm:$0xff] }
 0x274   :  { %v828_v28 = vsel %vm825_vm3, %v827_v40, %v823_v13  ;;  %v843_v10 = vsel %vm842_vm6, %v3651_v3, %v839_v51  ;;  %v5174_v3 = vld [vmem:[#allocation13 + $0x128] sm:$0xff]  ;;  %v5209_v32 = vld [vmem:[#allocation13 + $0xb0] sm:$0xff]  ;;  %v5212_v40 = vld [vmem:[#allocation13 + $0xa0] sm:$0xff] }
 0x275   :  { %v851_v6 = vmul.f32 %v850_v47, %v828_v28  ;;  %v848_v17 = vsel %vm845_vm7, %v847_v16, %v843_v10  ;;  %v5216_v13 = vld [vmem:[#allocation13 + $0x98] sm:$0xff]  ;;  %v5219_v47 = vld [vmem:[#allocation13 + $0x88] sm:$0xff]  ;;  %v5223_v28 = vld [vmem:[#allocation13 + $0x80] sm:$0xff]  ;;  %v385_v10 = vadd.f32 %v5032_v25, %v7634_v18 }
 0x276   :  { %v854_v20 = vsub.f32 1.0, %v848_v17  ;;  %v856_v26 = vmul.f32 %v848_v17, %v5051_v37  ;;  %v5160_v37 = vld [vmem:[#allocation13 + $0x158] sm:$0xff]  ;;  %v5226_v51 = vld [vmem:[#allocation13 + $0x70] sm:$0xff] }
 0x277   :  { %v852_v41 = vadd.f32 %v851_v6, %v423_v7  ;;  %v5233_v7 = vld [vmem:[#allocation13 + $0x58] sm:$0xff]  ;;  %v5237_v6 = vld [vmem:[#allocation13 + $0x50] sm:$0xff] }
 0x279   :  { %3652 = vtanh.f32 %v852_v41  ;;  %v5249_v41 = vld [vmem:[#allocation13 + $0x20] sm:$0xff] }
 0x27a   :  { %7642 = vst [vmem:[#allocation44_spill] sm:$0xff] %v5249_v41 }
 0x27f   :  { %v3653_v21 = vpop.eup %3652 }
 0x280   :  { %v855_v24 = vmul.f32 %v3653_v21, %v854_v20 }
 0x282   :  { %v5144_v29 = vadd.f32 %v856_v26, %v855_v24 }
 0x284   :  { %880 = vmatmul.f32.vlgmr.msrb.gmra.mxu3 %v5144_v29  ;;  %900 = vmatmul.f32.vlgmr.msrb.gmra.mxu0 %v5144_v29 }
 0x285   :  { %920 = vmatmul.f32.vlgmr.msrb.gmra.mxu1 %v5144_v29  ;;  %1132 = vmatpush.msrb.mxu3 %v5149_v30 }
 0x286   :  { %1206 = vmatpush.msrb.mxu0 %v5057_v46  ;;  %1226 = vmatpush.msrb.mxu1 %v5153_v33 }
 0x287   :  { %1133 = vmatpush.msrb.mxu3 %v5156_v35 }
 0x288   :  { %1207 = vmatpush.msrb.mxu0 %v5062_v12  ;;  %1227 = vmatpush.msrb.mxu1 %v5160_v37 }
 0x289   :  { %1134 = vmatpush.msrb.mxu3 %v5163_v39 }
 0x28a   :  { %1208 = vmatpush.msrb.mxu0 %v5067_v63  ;;  %1228 = vmatpush.msrb.mxu1 %v5167_v42 }
 0x28b   :  { %1135 = vmatpush.msrb.mxu3 %v5170_v50 }
 0x28c   :  { %1209 = vmatpush.msrb.mxu0 %v5072_v44  ;;  %1229 = vmatpush.msrb.mxu1 %v5174_v3 }
 0x28d   :  { %1136 = vmatpush.msrb.mxu3 %v5177_v9 }
 0x28e   :  { %1210 = vmatpush.msrb.mxu0 %v5077_v43  ;;  %1230 = vmatpush.msrb.mxu1 %v5181_v31 }
 0x28f   :  { %1137 = vmatpush.msrb.mxu3 %v5184_v34 }
 0x290   :  { %1211 = vmatpush.msrb.mxu0 %v5082_v48  ;;  %1231 = vmatpush.msrb.mxu1 %v5188_v22 }
 0x291   :  { %1138 = vmatpush.msrb.mxu3 %v5191_v1 }
 0x292   :  { %1212 = vmatpush.msrb.mxu0 %v5087_v49  ;;  %1232 = vmatpush.msrb.mxu1 %v5195_v14 }
 0x293   :  { %1139 = vmatpush.msrb.mxu3 %v5198_v36 }
 0x294   :  { %1213 = vmatpush.msrb.mxu0 %v5092_v52  ;;  %1233 = vmatpush.msrb.mxu1 %v5202_v54 }
 0x295   :  { %1140 = vmatpush.msrb.mxu3 %v5205_v4 }
 0x296   :  { %1214 = vmatpush.msrb.mxu0 %v5097_v53  ;;  %1234 = vmatpush.msrb.mxu1 %v5209_v32 }
 0x297   :  { %1141 = vmatpush.msrb.mxu3 %v5212_v40 }
 0x298   :  { %1215 = vmatpush.msrb.mxu0 %v5102_v56  ;;  %1235 = vmatpush.msrb.mxu1 %v5216_v13 }
 0x299   :  { %1142 = vmatpush.msrb.mxu3 %v5219_v47 }
 0x29a   :  { %1216 = vmatpush.msrb.mxu0 %v5107_v57  ;;  %1236 = vmatpush.msrb.mxu1 %v5223_v28 }
 0x29b   :  { %1143 = vmatpush.msrb.mxu3 %v5226_v51 }
 0x29c   :  { %1217 = vmatpush.msrb.mxu0 %v5112_v60  ;;  %1237 = vmatpush.msrb.mxu1 %v5230_v62 }
 0x29d   :  { %1144 = vmatpush.msrb.mxu3 %v5233_v7 }
 0x29e   :  { %1218 = vmatpush.msrb.mxu0 %v5117_v61  ;;  %1238 = vmatpush.msrb.mxu1 %v5237_v6 }
 0x29f   :  { %1145 = vmatpush.msrb.mxu3 %v5240_v19 }
 0x2a0   :  { %1219 = vmatpush.msrb.mxu0 %v5122_v0  ;;  %1239 = vmatpush.msrb.mxu1 %v5244_v38 }
 0x2a1   :  { %1146 = vmatpush.msrb.mxu3 %v7621_v5  ;;  %v7643_v5 = vld [vmem:[#allocation45_spill] sm:$0xff] }
 0x2a2   :  { %1220 = vmatpush.msrb.mxu0 %v5127_v2  ;;  %1240 = vmatpush.msrb.mxu1 %v5249_v41  ;;  %v344_v21 = vadd.f32 %v7643_v5, %v7632_v23 }
 0x2a3   :  { %1147 = vmatpush.msrb.mxu3 %v7624_v11 }
 0x2a4   :  { %1221 = vmatpush.msrb.mxu0 %v5132_v8  ;;  %1241 = vmatpush.msrb.mxu1 %v7626_v15 }
 0x301   :  { %v901_v16 = vpop.f32.mrf.mxu0 }
 0x302   :  { %v944_v17 = vadd.f32 %v901_v16, %v385_v10 }
 0x304   :  { %v3561_v20 = vmul.f32 -1.442695, %v944_v17 }
 0x306   :  { %3654 = vpow2.f32 %v3561_v20 }
 0x307   :  { %v881_v24 = vpop.f32.mrf.mxu3 }
 0x308   :  { %v924_v26 = vadd.f32 %v881_v24, %v344_v21  ;;  %v921_v21 = vpop.f32.mrf.mxu1 }
 0x30a   :  { %v3560_v58 = vmul.f32 -1.442695, %v924_v26 }
 0x30c   :  { %v3655_v27 = vpop.eup %3654  ;;  %3656 = vpow2.f32 %v3560_v58 }
 0x30d   :  { %v948_v11 = vadd.f32 1.0, %v3655_v27  ;;  %v964_v27 = vadd.f32 %v4962_v59, %v921_v21 }
 0x30f   :  { %3658 = vrcp.f32 %v948_v11  ;;  %vm954_vm13 = vweird.f32 %v948_v11  ;;  %v958_v0 = vand.u32 2147483647, %v948_v11 }
 0x311   :  { %vm959_vm15 = vcmp.eq.f32.partialorder %v958_v0, 8.507059e+37 }
 0x312   :  { %v3657_v8 = vpop.eup %3656 }
 0x313   :  { %v928_v41 = vadd.f32 1.0, %v3657_v8 }
 0x315   :  { %3660 = vrcp.f32 %v928_v41  ;;  %v3659_v15 = vpop.eup %3658  ;;  %v940_v17 = vand.u32 2147483648, %v928_v41  ;;  %v938_v20 = vand.u32 2147483647, %v928_v41  ;;  %vm934_vm9 = vweird.f32 %v928_v41 }
 0x316   :  { %v950_v2 = vmul.f32 %v3659_v15, %v948_v11  ;;  %vm955_vm12 = vweird.f32 %v3659_v15 }
 0x317   :  { %v941_v58 = vor.u32 1.1754944e-38, %v940_v17  ;;  %vm939_vm11 = vcmp.eq.f32.partialorder %v938_v20, 8.507059e+37  ;;  %vm956_vm14 = vmor %vm954_vm13, %vm955_vm12 }
 0x318   :  { %v951_v10 = vsub.f32 1.0, %v950_v2  ;;  %v960_v2 = vand.u32 2147483648, %v948_v11 }
 0x31a   :  { %v952_v5 = vmul.f32 %v3659_v15, %v951_v10 }
 0x31b   :  { %v3661_v25 = vpop.eup %3660 }
 0x31c   :  { %v930_v18 = vmul.f32 %v3661_v25, %v928_v41  ;;  %vm935_vm8 = vweird.f32 %v3661_v25  ;;  %v953_v23 = vadd.f32 %v3659_v15, %v952_v5  ;;  %v961_v41 = vor.u32 1.1754944e-38, %v960_v2 }
 0x31d   :  { %vm936_vm10 = vmor %vm934_vm9, %vm935_vm8 }
 0x31e   :  { %v931_v16 = vsub.f32 1.0, %v930_v18  ;;  %v426_v18 = vadd.f32 %v4968_v55, %v4964_v45  ;;  %v7644_v55 = vld [vmem:[#allocation36_spill] sm:$0xff] }
 0x320   :  { %v932_v38 = vmul.f32 %v3661_v25, %v931_v16 }
 0x322   :  { %v933_v24 = vadd.f32 %v3661_v25, %v932_v38  ;;  %v957_v38 = vsel %vm956_vm14, %v3659_v15, %v953_v23  ;;  %v7645_v23 = vld [vmem:[#allocation50_spill] sm:$0xff] }
 0x323   :  { %v962_v17 = vsel %vm959_vm15, %v961_v41, %v957_v38  ;;  %v7653_v41 = vld [vmem:[#allocation53_spill] sm:$0xff] }
 0x324   :  { %v937_v8 = vsel %vm936_vm10, %v3661_v25, %v933_v24  ;;  %v968_v21 = vsub.f32 1.0, %v962_v17  ;;  %v970_v5 = vmul.f32 %v962_v17, %v5144_v29  ;;  %v429_v17 = vadd.f32 %v7653_v41, %v4964_v45 }
 0x325   :  { %v942_v26 = vsel %vm939_vm11, %v941_v58, %v937_v8 }
 0x326   :  { %v965_v16 = vmul.f32 %v964_v27, %v942_v26 }
 0x328   :  { %v966_v10 = vadd.f32 %v965_v16, %v426_v18 }
 0x32a   :  { %3662 = vtanh.f32 %v966_v10 }
 0x330   :  { %v3663_v25 = vpop.eup %3662 }
 0x331   :  { %v969_v20 = vmul.f32 %v3663_v25, %v968_v21 }
 0x333   :  { %v5263_v24 = vadd.f32 %v970_v5, %v969_v20 }
 0x335   :  { %994 = vmatmul.f32.vlgmr.msrb.gmra.mxu2 %v5263_v24  ;;  %1014 = vmatmul.f32.vlgmr.msra.gmra.mxu3 %v5263_v24 }
 0x336   :  { %1034 = vmatmul.f32.vlgmr.msra.gmra.mxu0 %v5263_v24  ;;  %1246 = vmatpush.msrb.mxu2 %v5149_v30 }
 0x337   :  { %1320 = vmatpush.msra.mxu3 %v5057_v46  ;;  %1340 = vmatpush.msra.mxu0 %v5153_v33  ;;  %v5310_v46 = vld [vmem:[#allocation13 + $0x28] sm:$0xff] }
 0x338   :  { %1247 = vmatpush.msrb.mxu2 %v5156_v35 }
 0x339   :  { %1321 = vmatpush.msra.mxu3 %v5062_v12  ;;  %1341 = vmatpush.msra.mxu0 %v5160_v37  ;;  %v7646_v12 = vld [vmem:[#allocation40_spill] sm:$0xff] }
 0x33a   :  { %1248 = vmatpush.msrb.mxu2 %v5163_v39 }
 0x33b   :  { %1322 = vmatpush.msra.mxu3 %v5067_v63  ;;  %1342 = vmatpush.msra.mxu0 %v5167_v42  ;;  %v7647_v63 = vld [vmem:[#allocation44_spill] sm:$0xff] }
 0x33c   :  { %1249 = vmatpush.msrb.mxu2 %v5170_v50 }
 0x33d   :  { %1323 = vmatpush.msra.mxu3 %v5072_v44  ;;  %1343 = vmatpush.msra.mxu0 %v5174_v3  ;;  %v5315_v44 = vld [vmem:[#allocation13 + $0x10] sm:$0xff] }
 0x33e   :  { %1250 = vmatpush.msrb.mxu2 %v5177_v9 }
 0x33f   :  { %1324 = vmatpush.msra.mxu3 %v5077_v43  ;;  %1344 = vmatpush.msra.mxu0 %v5181_v31  ;;  %v7648_v43 = vld [vmem:[#allocation42_spill] sm:$0xff] }
 0x340   :  { %1251 = vmatpush.msrb.mxu2 %v5184_v34 }
 0x341   :  { %1325 = vmatpush.msra.mxu3 %v5082_v48  ;;  %1345 = vmatpush.msra.mxu0 %v5188_v22  ;;  %v3821_v48 = vld [vmem:[#allocation13 + $0x8] sm:$0xff] }
 0x342   :  { %1252 = vmatpush.msrb.mxu2 %v5191_v1 }
 0x343   :  { %1326 = vmatpush.msra.mxu3 %v5087_v49  ;;  %1346 = vmatpush.msra.mxu0 %v5195_v14  ;;  %v7649_v49 = vld [vmem:[#allocation43_spill] sm:$0xff] }
 0x344   :  { %1253 = vmatpush.msrb.mxu2 %v5198_v36 }
 0x345   :  { %1327 = vmatpush.msra.mxu3 %v5092_v52  ;;  %1347 = vmatpush.msra.mxu0 %v5202_v54  ;;  %v7650_v52 = vld [vmem:[#allocation47_spill] sm:$0xff] }
 0x346   :  { %1254 = vmatpush.msrb.mxu2 %v5205_v4 }
 0x347   :  { %1328 = vmatpush.msra.mxu3 %v5097_v53  ;;  %1348 = vmatpush.msra.mxu0 %v5209_v32  ;;  %v347_v53 = vadd.f32 %v7650_v52, %v7649_v49 }
 0x348   :  { %1255 = vmatpush.msrb.mxu2 %v5212_v40 }
 0x349   :  { %1329 = vmatpush.msra.mxu3 %v5102_v56  ;;  %1349 = vmatpush.msra.mxu0 %v5216_v13  ;;  %v7651_v56 = vld [vmem:[#allocation46_spill] sm:$0xff] }
 0x34a   :  { %1256 = vmatpush.msrb.mxu2 %v5219_v47 }
 0x34b   :  { %1330 = vmatpush.msra.mxu3 %v5107_v57  ;;  %1350 = vmatpush.msra.mxu0 %v5223_v28  ;;  %v7652_v57 = vld [vmem:[#allocation37_spill] sm:$0xff] }
 0x34c   :  { %1257 = vmatpush.msrb.mxu2 %v5226_v51 }
 0x34d   :  { %1331 = vmatpush.msra.mxu3 %v5112_v60  ;;  %1351 = vmatpush.msra.mxu0 %v5230_v62  ;;  %v388_v60 = vadd.f32 %v7652_v57, %v7651_v56 }
 0x34e   :  { %1258 = vmatpush.msrb.mxu2 %v5233_v7 }
 0x34f   :  { %1332 = vmatpush.msra.mxu3 %v5117_v61  ;;  %1352 = vmatpush.msra.mxu0 %v5237_v6 }
 0x350   :  { %1259 = vmatpush.msrb.mxu2 %v5240_v19 }
 0x351   :  { %1333 = vmatpush.msra.mxu3 %v7644_v55  ;;  %1353 = vmatpush.msra.mxu0 %v7645_v23 }
 0x352   :  { %1260 = vmatpush.msrb.mxu2 %v5310_v46 }
 0x353   :  { %1334 = vmatpush.msra.mxu3 %v7646_v12  ;;  %1354 = vmatpush.msra.mxu0 %v7647_v63 }
 0x354   :  { %1261 = vmatpush.msrb.mxu2 %v5315_v44 }
 0x355   :  { %1335 = vmatpush.msra.mxu3 %v7648_v43  ;;  %1355 = vmatpush.msra.mxu0 %v3821_v48 }
 0x3b3   :  { %v1035_v27 = vpop.f32.mrf.mxu0 }
 0x3b4   :  { %v1078_v2 = vadd.f32 %v4962_v59, %v1035_v27 }
 0x3b8   :  { %v995_v61 = vpop.f32.mrf.mxu2  ;;  %v1015_v0 = vpop.f32.mrf.mxu3 }
 0x3b9   :  { %v1038_v29 = vadd.f32 %v995_v61, %v347_v53  ;;  %v1058_v33 = vadd.f32 %v1015_v0, %v388_v60 }
 0x3bb   :  { %v3562_v37 = vmul.f32 -1.442695, %v1038_v29  ;;  %v3563_v42 = vmul.f32 -1.442695, %v1058_v33 }
 0x3bd   :  { %3664 = vpow2.f32 %v3562_v37 }
 0x3be   :  { %3666 = vpow2.f32 %v3563_v42 }
 0x3c3   :  { %v3665_v3 = vpop.eup %3664 }
 0x3c4   :  { %v3667_v31 = vpop.eup %3666  ;;  %v1042_v22 = vadd.f32 1.0, %v3665_v3  ;;  %v5352_v3 = vld [vmem:[#allocation14] ss:$0 sm:$0xff] }
 0x3c5   :  { %v1062_v14 = vadd.f32 1.0, %v3667_v31 }
 0x3c6   :  { %3668 = vrcp.f32 %v1042_v22  ;;  %v1054_v6 = vand.u32 2147483648, %v1042_v22  ;;  %v1052_v58 = vand.u32 2147483647, %v1042_v22  ;;  %vm1048_vm1 = vweird.f32 %v1042_v22 }
 0x3c7   :  { %3670 = vrcp.f32 %v1062_v14  ;;  %v1074_v21 = vand.u32 2147483648, %v1062_v14  ;;  %vm1068_vm5 = vweird.f32 %v1062_v14  ;;  %v1072_v20 = vand.u32 2147483647, %v1062_v14 }
 0x3c8   :  { %v1055_v18 = vor.u32 1.1754944e-38, %v1054_v6  ;;  %vm1053_vm3 = vcmp.eq.f32.partialorder %v1052_v58, 8.507059e+37 }
 0x3c9   :  { %v1075_v23 = vor.u32 1.1754944e-38, %v1074_v21  ;;  %vm1073_vm7 = vcmp.eq.f32.partialorder %v1072_v20, 8.507059e+37  ;;  %v7658_v21 = vld [vmem:[#allocation49_spill] sm:$0xff] }
 0x3cc   :  { %v3669_v54 = vpop.eup %3668 }
 0x3cd   :  { %v3671_v32 = vpop.eup %3670  ;;  %v1044_v13 = vmul.f32 %v3669_v54, %v1042_v22  ;;  %vm1049_vm0 = vweird.f32 %v3669_v54  ;;  %v7656_v22 = vld [vmem:[#allocation54_spill] sm:$0xff] }
 0x3ce   :  { %v1064_v28 = vmul.f32 %v3671_v32, %v1062_v14  ;;  %vm1050_vm2 = vmor %vm1048_vm1, %vm1049_vm0  ;;  %vm1069_vm4 = vweird.f32 %v3671_v32  ;;  %v432_v14 = vadd.f32 %v7656_v22, %v4964_v45 }
 0x3cf   :  { %v1045_v62 = vsub.f32 1.0, %v1044_v13  ;;  %vm1070_vm6 = vmor %vm1068_vm5, %vm1069_vm4 }
 0x3d0   :  { %v1065_v11 = vsub.f32 1.0, %v1064_v28 }
 0x3d1   :  { %v1046_v15 = vmul.f32 %v3669_v54, %v1045_v62 }
 0x3d2   :  { %v1066_v8 = vmul.f32 %v3671_v32, %v1065_v11 }
 0x3d3   :  { %v1047_v26 = vadd.f32 %v3669_v54, %v1046_v15 }
 0x3d4   :  { %v1067_v38 = vadd.f32 %v3671_v32, %v1066_v8 }
 0x3d5   :  { %v1051_v16 = vsel %vm1050_vm2, %v3669_v54, %v1047_v26 }
 0x3d6   :  { %v1056_v10 = vsel %vm1053_vm3, %v1055_v18, %v1051_v16  ;;  %v1071_v55 = vsel %vm1070_vm6, %v3671_v32, %v1067_v38 }
 0x3d7   :  { %v1079_v25 = vmul.f32 %v1078_v2, %v1056_v10  ;;  %v1076_v12 = vsel %vm1073_vm7, %v1075_v23, %v1071_v55  ;;  %v7657_v10 = vld [vmem:[#allocation35_spill] sm:$0xff] }
 0x3d8   :  { %v1082_v59 = vsub.f32 1.0, %v1076_v12  ;;  %v1084_v48 = vmul.f32 %v1076_v12, %v5263_v24  ;;  %v394_v38 = vadd.f32 %v7657_v10, %v7651_v56  ;;  %v1459_v10 = vld [vmem:[#allocation17 + $0xf8] sm:$0xff] }
 0x3d9   :  { %v1080_v5 = vadd.f32 %v1079_v25, %v429_v17 }
 0x3db   :  { %3672 = vtanh.f32 %v1080_v5 }
 0x3e1   :  { %v3673_v63 = vpop.eup %3672 }
 0x3e2   :  { %v1083_v43 = vmul.f32 %v3673_v63, %v1082_v59 }
 0x3e4   :  { %v5327_v52 = vadd.f32 %v1084_v48, %v1083_v43  ;;  %v1473_v43 = vld [vmem:[#allocation17 + $0x168] sm:$0xff]  ;;  %v1474_v48 = vld [vmem:[#allocation17 + $0x170] sm:$0xff] }
 0x3e6   :  { %1108 = vmatmul.f32.vlgmr.msra.gmra.mxu1 %v5327_v52  ;;  %1128 = vmatmul.f32.vlgmr.msra.gmra.mxu2 %v5327_v52 }
 0x3e7   :  { %1148 = vmatmul.f32.vlgmr.msrb.gmra.mxu3 %v5327_v52  ;;  %1360 = vmatpush.msra.mxu1 %v5149_v30  ;;  %v7654_v30 = vld [vmem:[#allocation48_spill] sm:$0xff] }
 0x3e8   :  { %1484 = vmatpush.msra.mxu2 %v1473_v43  ;;  %1504 = vmatpush.msrb.mxu3 %v1474_v48  ;;  %v1555_v43 = vld [vmem:[#allocation22 + $0x58] sm:$0xff]  ;;  %v1446_v48 = vld [vmem:[#allocation17 + $0x90] sm:$0xff] }
 0x3e9   :  { %1361 = vmatpush.msra.mxu1 %v5156_v35  ;;  %v350_v35 = vadd.f32 %v7654_v30, %v7649_v49  ;;  %v1470_v30 = vld [vmem:[#allocation17 + $0x150] sm:$0xff] }
 0x3ea   :  { %1485 = vmatpush.msra.mxu2 %v1470_v30  ;;  %v1448_v30 = vld [vmem:[#allocation17 + $0xa0] sm:$0xff] }
 0x3eb   :  { %1362 = vmatpush.msra.mxu1 %v5163_v39 }
 0x3ed   :  { %1363 = vmatpush.msra.mxu1 %v5170_v50 }
 0x3ef   :  { %1364 = vmatpush.msra.mxu1 %v5177_v9 }
 0x3f1   :  { %1365 = vmatpush.msra.mxu1 %v5184_v34  ;;  %v7655_v34 = vld [vmem:[#allocation39_spill] sm:$0xff] }
 0x3f3   :  { %1366 = vmatpush.msra.mxu1 %v5191_v1  ;;  %v391_v1 = vadd.f32 %v7655_v34, %v7651_v56  ;;  %v1469_v34 = vld [vmem:[#allocation17 + $0x148] sm:$0xff] }
 0x3f5   :  { %1367 = vmatpush.msra.mxu1 %v5198_v36 }
 0x3f7   :  { %1368 = vmatpush.msra.mxu1 %v5205_v4 }
 0x3f9   :  { %1369 = vmatpush.msra.mxu1 %v5212_v40 }
 0x3fb   :  { %1370 = vmatpush.msra.mxu1 %v5219_v47 }
 0x3fd   :  { %1371 = vmatpush.msra.mxu1 %v5226_v51 }
 0x3ff   :  { %1372 = vmatpush.msra.mxu1 %v5233_v7 }
 0x401   :  { %1373 = vmatpush.msra.mxu1 %v5240_v19 }
 0x403   :  { %1374 = vmatpush.msra.mxu1 %v5310_v46 }
 0x405   :  { %1375 = vmatpush.msra.mxu1 %v5315_v44 }
 0x463   :  { %v1109_v39 = vpop.f32.mrf.mxu1 }
 0x464   :  { %v1152_v50 = vadd.f32 %v1109_v39, %v350_v35  ;;  %v1471_v35 = vld [vmem:[#allocation17 + $0x158] sm:$0xff]  ;;  %v1472_v39 = vld [vmem:[#allocation17 + $0x160] sm:$0xff] }
 0x465   :  { %1505 = vmatpush.msrb.mxu3 %v1471_v35  ;;  %v1554_v35 = vld [vmem:[#allocation22 + $0x50] sm:$0xff] }
 0x466   :  { %v3564_v9 = vmul.f32 -1.442695, %v1152_v50  ;;  %v1467_v50 = vld [vmem:[#allocation17 + $0x138] sm:$0xff] }
 0x467   :  { %1486 = vmatpush.msra.mxu2 %v1467_v50  ;;  %v1444_v50 = vld [vmem:[#allocation17 + $0x80] sm:$0xff] }
 0x468   :  { %3674 = vpow2.f32 %v3564_v9  ;;  %v1468_v9 = vld [vmem:[#allocation17 + $0x140] sm:$0xff] }
 0x469   :  { %v1129_v36 = vpop.f32.mrf.mxu2  ;;  %1506 = vmatpush.msrb.mxu3 %v1468_v9  ;;  %v1445_v9 = vld [vmem:[#allocation17 + $0x88] sm:$0xff] }
 0x46a   :  { %v1172_v4 = vadd.f32 %v1129_v36, %v391_v1  ;;  %v1149_v61 = vpop.f32.mrf.mxu3  ;;  %v1464_v1 = vld [vmem:[#allocation17 + $0x120] sm:$0xff]  ;;  %v1465_v36 = vld [vmem:[#allocation17 + $0x128] sm:$0xff] }
 0x46b   :  { %v1192_v31 = vadd.f32 %v5352_v3, %v1149_v61  ;;  %1487 = vmatpush.msra.mxu2 %v1464_v1  ;;  %1507 = vmatpush.msrb.mxu3 %v1465_v36  ;;  %v1440_v1 = vld [vmem:[#allocation17 + $0x60] sm:$0xff]  ;;  %v1441_v36 = vld [vmem:[#allocation17 + $0x68] sm:$0xff] }
 0x46c   :  { %v3565_v40 = vmul.f32 -1.442695, %v1172_v4 }
 0x46e   :  { %v3675_v47 = vpop.eup %3674  ;;  %3676 = vpow2.f32 %v3565_v40  ;;  %v1466_v40 = vld [vmem:[#allocation17 + $0x130] sm:$0xff] }
 0x46f   :  { %v1156_v51 = vadd.f32 1.0, %v3675_v47  ;;  %v1559_v47 = vld [vmem:[#allocation22 + $0x78] sm:$0xff] }
 0x471   :  { %3678 = vrcp.f32 %v1156_v51  ;;  %v1168_v49 = vand.u32 2147483648, %v1156_v51  ;;  %v1166_v57 = vand.u32 2147483647, %v1156_v51  ;;  %vm1162_vm9 = vweird.f32 %v1156_v51 }
 0x473   :  { %v1169_v33 = vor.u32 1.1754944e-38, %v1168_v49  ;;  %vm1167_vm11 = vcmp.eq.f32.partialorder %v1166_v57, 8.507059e+37 }
 0x474   :  { %v3677_v7 = vpop.eup %3676 }
 0x475   :  { %v1176_v19 = vadd.f32 1.0, %v3677_v7 }
 0x477   :  { %v3679_v24 = vpop.eup %3678  ;;  %3680 = vrcp.f32 %v1176_v19  ;;  %v1188_v28 = vand.u32 2147483648, %v1176_v19  ;;  %v1186_v62 = vand.u32 2147483647, %v1176_v19  ;;  %vm1182_vm13 = vweird.f32 %v1176_v19 }
 0x478   :  { %v1158_v46 = vmul.f32 %v3679_v24, %v1156_v51  ;;  %vm1163_vm8 = vweird.f32 %v3679_v24 }
 0x479   :  { %vm1164_vm10 = vmor %vm1162_vm9, %vm1163_vm8  ;;  %v1189_v58 = vor.u32 1.1754944e-38, %v1188_v28  ;;  %vm1187_vm15 = vcmp.eq.f32.partialorder %v1186_v62, 8.507059e+37  ;;  %v7659_v28 = vld [vmem:[#allocation55_spill] sm:$0xff] }
 0x47a   :  { %v1159_v44 = vsub.f32 1.0, %v1158_v46 }
 0x47c   :  { %v1160_v53 = vmul.f32 %v3679_v24, %v1159_v44  ;;  %v1463_v44 = vld [vmem:[#allocation17 + $0x118] sm:$0xff] }
 0x47d   :  { %v3681_v60 = vpop.eup %3680 }
 0x47e   :  { %v1178_v0 = vmul.f32 %v3681_v60, %v1176_v19  ;;  %v1161_v29 = vadd.f32 %v3679_v24, %v1160_v53  ;;  %vm1183_vm12 = vweird.f32 %v3681_v60  ;;  %v1461_v19 = vld [vmem:[#allocation17 + $0x108] sm:$0xff] }
 0x47f   :  { %vm1184_vm14 = vmor %vm1182_vm13, %vm1183_vm12  ;;  %1488 = vmatpush.msra.mxu2 %v1461_v19  ;;  %v1551_v19 = vld [vmem:[#allocation22 + $0x38] sm:$0xff] }
 0x480   :  { %v1179_v37 = vsub.f32 1.0, %v1178_v0  ;;  %v1165_v42 = vsel %vm1164_vm10, %v3679_v24, %v1161_v29  ;;  %v1462_v24 = vld [vmem:[#allocation17 + $0x110] sm:$0xff] }
 0x481   :  { %v1170_v54 = vsel %vm1167_vm11, %v1169_v33, %v1165_v42  ;;  %1508 = vmatpush.msrb.mxu3 %v1462_v24  ;;  %v1434_v24 = vld [vmem:[#allocation17 + $0x30] sm:$0xff] }
 0x482   :  { %v1180_v32 = vmul.f32 %v3681_v60, %v1179_v37  ;;  %v1193_v13 = vmul.f32 %v1192_v31, %v1170_v54 }
 0x483   :  { %1509 = vmatpush.msrb.mxu3 %v1459_v10  ;;  %v5418_v10 = vld [vmem:[#allocation16 + $0x110] sm:$0xff] }
 0x484   :  { %v1194_v6 = vadd.f32 %v1193_v13, %v432_v14  ;;  %v1181_v11 = vadd.f32 %v3681_v60, %v1180_v32 }
 0x486   :  { %3682 = vtanh.f32 %v1194_v6  ;;  %v1185_v15 = vsel %vm1184_vm14, %v3681_v60, %v1181_v11 }
 0x487   :  { %v1190_v27 = vsel %vm1187_vm15, %v1189_v58, %v1185_v15 }
 0x488   :  { %v1196_v8 = vsub.f32 1.0, %v1190_v27  ;;  %v1198_v2 = vmul.f32 %v1190_v27, %v5327_v52  ;;  %v1475_v52 = vld [vmem:[#allocation17 + $0x178] sm:$0xff] }
 0x48c   :  { %v3683_v26 = vpop.eup %3682 }
 0x48d   :  { %v1197_v18 = vmul.f32 %v3683_v26, %v1196_v8 }
 0x48f   :  { %v5358_v16 = vadd.f32 %v1198_v2, %v1197_v18  ;;  %v1458_v2 = vld [vmem:[#allocation17 + $0xf0] sm:$0xff] }
 0x490   :  { %1489 = vmatpush.msra.mxu2 %v1458_v2  ;;  %v5416_v2 = vld [vmem:[#allocation16 + $0x108] sm:$0xff] }
 0x491   :  { %1222 = vmatmul.f32.vlgmr.msrb.gmra.mxu0 %v5358_v16  ;;  %1242 = vmatmul.f32.vlgmr.msrb.gmra.mxu1 %v5358_v16 }
 0x492   :  { %1262 = vmatmul.f32.vlgmr.msrb.gmra.mxu2 %v5358_v16  ;;  %1524 = vmatpush.msrb.mxu0 %v1475_v52  ;;  %v1447_v52 = vld [vmem:[#allocation17 + $0x98] sm:$0xff] }
 0x493   :  { %1564 = vmatpush.msrb.mxu1 %v1559_v47  ;;  %v1437_v47 = vld [vmem:[#allocation17 + $0x48] sm:$0xff] }
 0x494   :  { %1525 = vmatpush.msrb.mxu0 %v1472_v39  ;;  %v1443_v39 = vld [vmem:[#allocation17 + $0x78] sm:$0xff] }
 0x496   :  { %1526 = vmatpush.msrb.mxu0 %v1469_v34  ;;  %v1553_v34 = vld [vmem:[#allocation22 + $0x48] sm:$0xff] }
 0x498   :  { %1527 = vmatpush.msrb.mxu0 %v1466_v40  ;;  %v1552_v40 = vld [vmem:[#allocation22 + $0x40] sm:$0xff] }
 0x49a   :  { %1528 = vmatpush.msrb.mxu0 %v1463_v44  ;;  %v1436_v44 = vld [vmem:[#allocation17 + $0x40] sm:$0xff] }
 0x50e   :  { %v1223_v41 = vpop.f32.mrf.mxu0  ;;  %v1243_v17 = vpop.f32.mrf.mxu1 }
 0x50f   :  { %v1266_v25 = vadd.f32 %v1223_v41, %v7658_v21  ;;  %v1286_v20 = vadd.f32 %v1243_v17, %v394_v38  ;;  %v1460_v38 = vld [vmem:[#allocation17 + $0x100] sm:$0xff]  ;;  %v1558_v41 = vld [vmem:[#allocation22 + $0x70] sm:$0xff]  ;;  %v1455_v17 = vld [vmem:[#allocation17 + $0xd8] sm:$0xff] }
 0x510   :  { %1529 = vmatpush.msrb.mxu0 %v1460_v38  ;;  %1565 = vmatpush.msrb.mxu1 %v1558_v41  ;;  %v1456_v21 = vld [vmem:[#allocation17 + $0xe0] sm:$0xff]  ;;  %v5420_v38 = vld [vmem:[#allocation16 + $0x118] sm:$0xff]  ;;  %v1677_v41 = vld [vmem:[#allocation19 + $0x168] sm:$0xff] }
 0x511   :  { %v3566_v5 = vmul.f32 -1.442695, %v1266_v25  ;;  %v3567_v55 = vmul.f32 -1.442695, %v1286_v20  ;;  %v1457_v25 = vld [vmem:[#allocation17 + $0xe8] sm:$0xff]  ;;  %1490 = vmatpush.msra.mxu2 %v1455_v17  ;;  %1510 = vmatpush.msrb.mxu3 %v1456_v21  ;;  %v1452_v20 = vld [vmem:[#allocation17 + $0xc0] sm:$0xff] }
 0x512   :  { %1530 = vmatpush.msrb.mxu0 %v1457_v25  ;;  %7664 = vst [vmem:[#allocation40_spill] sm:$0xff] %v5420_v38  ;;  %v7665_v17 = vld [vmem:[#allocation38_spill] sm:$0xff] }
 0x513   :  { %3684 = vpow2.f32 %v3566_v5  ;;  %v1453_v5 = vld [vmem:[#allocation17 + $0xc8] sm:$0xff]  ;;  %1491 = vmatpush.msra.mxu2 %v1452_v20  ;;  %v397_v21 = vadd.f32 %v7665_v17, %v7651_v56  ;;  %v5427_v25 = vld [vmem:[#allocation16 + $0xf0] sm:$0xff]  ;;  %v5431_v20 = vld [vmem:[#allocation16 + $0x100] sm:$0xff] }
 0x514   :  { %3686 = vpow2.f32 %v3567_v55  ;;  %v1454_v55 = vld [vmem:[#allocation17 + $0xd0] sm:$0xff]  ;;  %1511 = vmatpush.msrb.mxu3 %v1453_v5  ;;  %7666 = vst [vmem:[#allocation44_spill] sm:$0xff] %v5431_v20  ;;  %v5438_v56 = vld [vmem:[#allocation16 + $0xd8] sm:$0xff] }
 0x515   :  { %v1263_v29 = vpop.f32.mrf.mxu2  ;;  %1531 = vmatpush.msrb.mxu0 %v1454_v55  ;;  %v5434_v55 = vld [vmem:[#allocation19 + $0x150] sm:$0xff] }
 0x516   :  { %v1306_v31 = vadd.f32 %v5352_v3, %v1263_v29  ;;  %v1429_v29 = vld [vmem:[#allocation17 + $0x8] sm:$0xff]  ;;  %7667 = vst [vmem:[#allocation42_spill] sm:$0xff] %v5434_v55  ;;  %v5534_v17 = vld [vmem:[#allocation19 + $0x90] sm:$0xff] }
 0x517   :  { %7684 = vst [vmem:[#allocation58_spill] sm:$0xff] %v5534_v17 }
 0x519   :  { %v3685_v23 = vpop.eup %3684 }
 0x51a   :  { %v3687_v12 = vpop.eup %3686  ;;  %v1270_v59 = vadd.f32 1.0, %v3685_v23  ;;  %v1556_v23 = vld [vmem:[#allocation22 + $0x60] sm:$0xff] }
 0x51b   :  { %v5366_v63 = vadd.f32 1.0, %v3687_v12  ;;  %v1449_v12 = vld [vmem:[#allocation17 + $0xa8] sm:$0xff] }
 0x51c   :  { %3688 = vrcp.f32 %v1270_v59  ;;  %v1282_v57 = vand.u32 2147483648, %v1270_v59  ;;  %v1280_v61 = vand.u32 2147483647, %v1270_v59  ;;  %vm1276_vm1 = vweird.f32 %v1270_v59  ;;  %1492 = vmatpush.msra.mxu2 %v1449_v12  ;;  %v5440_v12 = vld [vmem:[#allocation16 + $0xe0] sm:$0xff] }
 0x51d   :  { %3690 = vrcp.f32 %v5366_v63  ;;  %v1302_v32 = vand.u32 2147483648, %v5366_v63  ;;  %vm1296_vm5 = vweird.f32 %v5366_v63  ;;  %v1300_v13 = vand.u32 2147483647, %v5366_v63 }
 0x51e   :  { %v1283_v37 = vor.u32 1.1754944e-38, %v1282_v57  ;;  %vm1281_vm3 = vcmp.eq.f32.partialorder %v1280_v61, 8.507059e+37  ;;  %1493 = vmatpush.msra.mxu2 %v1446_v48  ;;  %v1432_v57 = vld [vmem:[#allocation17 + $0x20] sm:$0xff]  ;;  %v1549_v61 = vld [vmem:[#allocation22 + $0x28] sm:$0xff] }
 0x51f   :  { %v1303_v11 = vor.u32 1.1754944e-38, %v1302_v32  ;;  %vm1301_vm7 = vcmp.eq.f32.partialorder %v1300_v13, 8.507059e+37  ;;  %v5391_v32 = vld [vmem:[#allocation16 + $0x158] sm:$0xff]  ;;  %v5393_v13 = vld [vmem:[#allocation16 + $0x160] sm:$0xff] }
 0x520   :  { %1494 = vmatpush.msra.mxu2 %v1443_v39  ;;  %7661 = vst [vmem:[#allocation45_spill] sm:$0xff] %v5393_v13  ;;  %v5450_v48 = vld [vmem:[#allocation16 + $0xc0] sm:$0xff]  ;;  %v5462_v39 = vld [vmem:[#allocation16 + $0xa8] sm:$0xff] }
 0x522   :  { %v3689_v4 = vpop.eup %3688  ;;  %1495 = vmatpush.msra.mxu2 %v1440_v1  ;;  %v5470_v1 = vld [vmem:[#allocation19 + $0x108] sm:$0xff] }
 0x523   :  { %v3691_v51 = vpop.eup %3690  ;;  %v1272_v7 = vmul.f32 %v3689_v4, %v1270_v59  ;;  %vm1277_vm0 = vweird.f32 %v3689_v4  ;;  %v1450_v59 = vld [vmem:[#allocation17 + $0xb0] sm:$0xff]  ;;  %7673 = vst [vmem:[#allocation48_spill] sm:$0xff] %v5470_v1 }
 0x524   :  { %v1292_v46 = vmul.f32 %v3691_v51, %v5366_v63  ;;  %vm1278_vm2 = vmor %vm1276_vm1, %vm1277_vm0  ;;  %vm1297_vm4 = vweird.f32 %v3691_v51  ;;  %v1451_v63 = vld [vmem:[#allocation17 + $0xb8] sm:$0xff]  ;;  %1512 = vmatpush.msrb.mxu3 %v1450_v59  ;;  %1496 = vmatpush.msra.mxu2 %v1437_v47  ;;  %v5442_v59 = vld [vmem:[#allocation16 + $0xe8] sm:$0xff] }
 0x525   :  { %v1273_v49 = vsub.f32 1.0, %v1272_v7  ;;  %vm1298_vm6 = vmor %vm1296_vm5, %vm1297_vm4  ;;  %1532 = vmatpush.msrb.mxu0 %v1451_v63  ;;  %v1439_v7 = vld [vmem:[#allocation17 + $0x58] sm:$0xff]  ;;  %7668 = vst [vmem:[#allocation43_spill] sm:$0xff] %v5442_v59 }
 0x526   :  { %v1293_v53 = vsub.f32 1.0, %v1292_v46  ;;  %1513 = vmatpush.msrb.mxu3 %v1447_v52  ;;  %v1435_v46 = vld [vmem:[#allocation17 + $0x38] sm:$0xff]  ;;  %1497 = vmatpush.msra.mxu2 %v1434_v24  ;;  %v5452_v52 = vld [vmem:[#allocation16 + $0xc8] sm:$0xff] }
 0x527   :  { %v1274_v60 = vmul.f32 %v3689_v4, %v1273_v49  ;;  %1533 = vmatpush.msrb.mxu0 %v1448_v30  ;;  %v1550_v49 = vld [vmem:[#allocation22 + $0x30] sm:$0xff]  ;;  %v5446_v63 = vld [vmem:[#allocation19 + $0x138] sm:$0xff] }
 0x528   :  { %v1294_v0 = vmul.f32 %v3691_v51, %v1293_v53  ;;  %1514 = vmatpush.msrb.mxu3 %v1444_v50  ;;  %v1431_v53 = vld [vmem:[#allocation17 + $0x18] sm:$0xff]  ;;  %7669 = vst [vmem:[#allocation47_spill] sm:$0xff] %v5446_v63  ;;  %v5454_v30 = vld [vmem:[#allocation16 + $0xd0] sm:$0xff] }
 0x529   :  { %v1275_v33 = vadd.f32 %v3689_v4, %v1274_v60  ;;  %1534 = vmatpush.msrb.mxu0 %v1445_v9  ;;  %v1433_v60 = vld [vmem:[#allocation17 + $0x28] sm:$0xff]  ;;  %1498 = vmatpush.msra.mxu2 %v1431_v53  ;;  %7670 = vst [vmem:[#allocation46_spill] sm:$0xff] %v5454_v30  ;;  %v5464_v50 = vld [vmem:[#allocation16 + $0xb0] sm:$0xff]  ;;  %v5466_v9 = vld [vmem:[#allocation16 + $0xb8] sm:$0xff] }
 0x52a   :  { %v1295_v14 = vadd.f32 %v3691_v51, %v1294_v0  ;;  %1515 = vmatpush.msrb.mxu3 %v1441_v36  ;;  %v1428_v0 = vld [vmem:[#allocation17] sm:$0xff]  ;;  %7672 = vst [vmem:[#allocation53_spill] sm:$0xff] %v5466_v9  ;;  %v7674_v36 = vld [vmem:[#allocation51_spill] sm:$0xff] }
 0x52b   :  { %v1279_v42 = vsel %vm1278_vm2, %v3689_v4, %v1275_v33  ;;  %v1442_v4 = vld [vmem:[#allocation17 + $0x70] sm:$0xff]  ;;  %1499 = vmatpush.msra.mxu2 %v1428_v0  ;;  %v5477_v47 = vld [vmem:[#allocation16 + $0x98] sm:$0xff] }
 0x52c   :  { %v1284_v22 = vsel %vm1281_vm3, %v1283_v37, %v1279_v42  ;;  %v1299_v6 = vsel %vm1298_vm6, %v3691_v51, %v1295_v14  ;;  %1535 = vmatpush.msrb.mxu0 %v1442_v4  ;;  %v1438_v51 = vld [vmem:[#allocation17 + $0x50] sm:$0xff]  ;;  %v1548_v37 = vld [vmem:[#allocation22 + $0x20] sm:$0xff]  ;;  %v5381_v42 = vld [vmem:[#allocation16 + $0x168] sm:$0xff] }
 0x52d   :  { %v1307_v54 = vmul.f32 %v1306_v31, %v1284_v22  ;;  %v1304_v15 = vsel %vm1301_vm7, %v1303_v11, %v1299_v6  ;;  %1516 = vmatpush.msrb.mxu3 %v1438_v51  ;;  %v1430_v33 = vld [vmem:[#allocation17 + $0x10] sm:$0xff]  ;;  %v5385_v22 = vld [vmem:[#allocation16 + $0x178] sm:$0xff]  ;;  %1732 = vmatpush.msrb.mxu2 %v5381_v42  ;;  %v5400_v6 = vld [vmem:[#allocation16 + $0x140] sm:$0xff] }
 0x52e   :  { %v1310_v58 = vsub.f32 1.0, %v1304_v15  ;;  %v1312_v26 = vmul.f32 %v1304_v15, %v5358_v16  ;;  %v1557_v16 = vld [vmem:[#allocation22 + $0x68] sm:$0xff]  ;;  %1536 = vmatpush.msrb.mxu0 %v1439_v7  ;;  %v5383_v31 = vld [vmem:[#allocation16 + $0x170] sm:$0xff]  ;;  %7660 = vst [vmem:[#allocation52_spill] sm:$0xff] %v5385_v22  ;;  %v1547_v14 = vld [vmem:[#allocation22 + $0x18] sm:$0xff] }
 0x52f   :  { %v1308_v62 = vadd.f32 %v1307_v54, %v7659_v28  ;;  %1566 = vmatpush.msrb.mxu1 %v1557_v16  ;;  %1517 = vmatpush.msrb.mxu3 %v1435_v46  ;;  %v5389_v54 = vld [vmem:[#allocation16 + $0x150] sm:$0xff]  ;;  %v5402_v11 = vld [vmem:[#allocation16 + $0x148] sm:$0xff]  ;;  %v5429_v16 = vld [vmem:[#allocation16 + $0xf8] sm:$0xff] }
 0x530   :  { %1537 = vmatpush.msrb.mxu0 %v1436_v44  ;;  %v1546_v28 = vld [vmem:[#allocation22 + $0x10] sm:$0xff]  ;;  %1733 = vmatpush.msrb.mxu2 %v5389_v54  ;;  %7662 = vst [vmem:[#allocation36_spill] sm:$0xff] %v5402_v11  ;;  %v1545_v15 = vld [vmem:[#allocation22 + $0x8] sm:$0xff]  ;;  %v5479_v51 = vld [vmem:[#allocation16 + $0xa0] sm:$0xff] }
 0x531   :  { %3692 = vtanh.f32 %v1308_v62  ;;  %1567 = vmatpush.msrb.mxu1 %v1556_v23  ;;  %1518 = vmatpush.msrb.mxu3 %v1432_v57  ;;  %v5398_v62 = vld [vmem:[#allocation16 + $0x138] sm:$0xff]  ;;  %7675 = vst [vmem:[#allocation39_spill] sm:$0xff] %v5479_v51  ;;  %v5483_v7 = vld [vmem:[#allocation19 + $0xf0] sm:$0xff]  ;;  %v5489_v46 = vld [vmem:[#allocation16 + $0x80] sm:$0xff] }
 0x532   :  { %1538 = vmatpush.msrb.mxu0 %v1433_v60  ;;  %1734 = vmatpush.msrb.mxu2 %v5398_v62  ;;  %7676 = vst [vmem:[#allocation54_spill] sm:$0xff] %v5483_v7  ;;  %v5487_v24 = vld [vmem:[#allocation16 + $0x78] sm:$0xff]  ;;  %v5491_v44 = vld [vmem:[#allocation16 + $0x88] sm:$0xff]  ;;  %v5499_v57 = vld [vmem:[#allocation16 + $0x60] sm:$0xff] }
 0x533   :  { %1568 = vmatpush.msrb.mxu1 %v1555_v43  ;;  %1519 = vmatpush.msrb.mxu3 %v1429_v29  ;;  %7677 = vst [vmem:[#allocation35_spill] sm:$0xff] %v5491_v44  ;;  %v5501_v60 = vld [vmem:[#allocation16 + $0x68] sm:$0xff]  ;;  %v5509_v29 = vld [vmem:[#allocation19 + $0xc0] sm:$0xff] }
 0x534   :  { %1539 = vmatpush.msrb.mxu0 %v1430_v33  ;;  %7680 = vst [vmem:[#allocation38_spill] sm:$0xff] %v5509_v29  ;;  %v5513_v33 = vld [vmem:[#allocation16 + $0x48] sm:$0xff] }
 0x535   :  { %1569 = vmatpush.msrb.mxu1 %v1554_v35  ;;  %v5458_v35 = vld [vmem:[#allocation19 + $0x120] sm:$0xff] }
 0x536   :  { %7671 = vst [vmem:[#allocation37_spill] sm:$0xff] %v5458_v35 }
 0x537   :  { %v3693_v27 = vpop.eup %3692  ;;  %1570 = vmatpush.msrb.mxu1 %v1553_v34 }
 0x538   :  { %v1311_v8 = vmul.f32 %v3693_v27, %v1310_v58  ;;  %v5407_v58 = vld [vmem:[#allocation16 + $0x120] sm:$0xff]  ;;  %v5409_v27 = vld [vmem:[#allocation16 + $0x128] sm:$0xff] }
 0x539   :  { %1571 = vmatpush.msrb.mxu1 %v1552_v40  ;;  %1735 = vmatpush.msrb.mxu2 %v5407_v58  ;;  %v5475_v40 = vld [vmem:[#allocation16 + $0x90] sm:$0xff] }
 0x53a   :  { %v5376_v18 = vadd.f32 %v1312_v26, %v1311_v8  ;;  %v5411_v8 = vld [vmem:[#allocation16 + $0x130] sm:$0xff]  ;;  %v1544_v26 = vld [vmem:[#allocation22] sm:$0xff] }
 0x53b   :  { %1572 = vmatpush.msrb.mxu1 %v1551_v19  ;;  %7663 = vst [vmem:[#allocation50_spill] sm:$0xff] %v5411_v8  ;;  %1736 = vmatpush.msrb.mxu2 %v5416_v2 }
 0x53c   :  { %1336 = vmatmul.f32.vlgmr.msra.gmra.mxu3 %v5376_v18  ;;  %1356 = vmatmul.f32.vlgmr.msra.gmra.mxu0 %v5376_v18 }
 0x53d   :  { %1376 = vmatmul.f32.vlgmr.msra.gmra.mxu1 %v5376_v18  ;;  %1752 = vmatpush.msra.mxu3 %v5383_v31 }
 0x53e   :  { %1573 = vmatpush.msrb.mxu1 %v1550_v49  ;;  %1772 = vmatpush.msra.mxu0 %v5385_v22  ;;  %v5495_v49 = vld [vmem:[#allocation19 + $0xd8] sm:$0xff] }
 0x53f   :  { %1753 = vmatpush.msra.mxu3 %v5391_v32  ;;  %1737 = vmatpush.msrb.mxu2 %v5427_v25  ;;  %7678 = vst [vmem:[#allocation49_spill] sm:$0xff] %v5495_v49  ;;  %v5706_v22 = vld [vmem:[#allocation20 + $0x18] sm:$0xff] }
 0x540   :  { %1574 = vmatpush.msrb.mxu1 %v1549_v61  ;;  %1773 = vmatpush.msra.mxu0 %v5393_v13  ;;  %v5503_v61 = vld [vmem:[#allocation16 + $0x70] sm:$0xff]  ;;  %v5704_v13 = vld [vmem:[#allocation19 + $0x58] sm:$0xff] }
 0x541   :  { %1754 = vmatpush.msra.mxu3 %v5400_v6  ;;  %1738 = vmatpush.msrb.mxu2 %v5438_v56  ;;  %7679 = vst [vmem:[#allocation55_spill] sm:$0xff] %v5503_v61 }
 0x542   :  { %1575 = vmatpush.msrb.mxu1 %v1548_v37  ;;  %1774 = vmatpush.msra.mxu0 %v5402_v11  ;;  %v5515_v37 = vld [vmem:[#allocation16 + $0x50] sm:$0xff]  ;;  %v5697_v11 = vld [vmem:[#allocation20 + $0x20] sm:$0xff]  ;;  %7721 = vst [vmem:[#allocation93_spill] sm:$0xff] %v5704_v13 }
 0x543   :  { %1755 = vmatpush.msra.mxu3 %v5409_v27  ;;  %1739 = vmatpush.msrb.mxu2 %v5450_v48  ;;  %7719 = vst [vmem:[#allocation91_spill] sm:$0xff] %v5697_v11 }
 0x544   :  { %1576 = vmatpush.msrb.mxu1 %v1547_v14  ;;  %1775 = vmatpush.msra.mxu0 %v5411_v8  ;;  %v5517_v14 = vld [vmem:[#allocation16 + $0x58] sm:$0xff]  ;;  %v5695_v8 = vld [vmem:[#allocation19 + $0x70] sm:$0xff] }
 0x545   :  { %1756 = vmatpush.msra.mxu3 %v5418_v10  ;;  %1740 = vmatpush.msrb.mxu2 %v5462_v39  ;;  %7681 = vst [vmem:[#allocation51_spill] sm:$0xff] %v5517_v14 }
 0x546   :  { %1577 = vmatpush.msrb.mxu1 %v1546_v28  ;;  %1776 = vmatpush.msra.mxu0 %v5420_v38  ;;  %v5521_v28 = vld [vmem:[#allocation19 + $0xa8] sm:$0xff]  ;;  %7718 = vst [vmem:[#allocation90_spill] sm:$0xff] %v5695_v8 }
 0x547   :  { %1757 = vmatpush.msra.mxu3 %v5429_v16  ;;  %1741 = vmatpush.msrb.mxu2 %v5475_v40  ;;  %7682 = vst [vmem:[#allocation56_spill] sm:$0xff] %v5521_v28  ;;  %v5688_v38 = vld [vmem:[#allocation20 + $0x28] sm:$0xff] }
 0x548   :  { %1578 = vmatpush.msrb.mxu1 %v1545_v15  ;;  %1777 = vmatpush.msra.mxu0 %v5431_v20  ;;  %v5526_v15 = vld [vmem:[#allocation16 + $0x30] sm:$0xff]  ;;  %v5686_v20 = vld [vmem:[#allocation19 + $0x88] sm:$0xff]  ;;  %7716 = vst [vmem:[#allocation88_spill] sm:$0xff] %v5688_v38 }
 0x549   :  { %1758 = vmatpush.msra.mxu3 %v5440_v12  ;;  %1742 = vmatpush.msrb.mxu2 %v5487_v24  ;;  %7715 = vst [vmem:[#allocation87_spill] sm:$0xff] %v5686_v20 }
 0x54a   :  { %1579 = vmatpush.msrb.mxu1 %v1544_v26  ;;  %1778 = vmatpush.msra.mxu0 %v5442_v59  ;;  %v5528_v26 = vld [vmem:[#allocation16 + $0x38] sm:$0xff]  ;;  %v5679_v59 = vld [vmem:[#allocation20 + $0x30] sm:$0xff] }
 0x54b   :  { %1759 = vmatpush.msra.mxu3 %v5452_v52  ;;  %1743 = vmatpush.msrb.mxu2 %v5499_v57  ;;  %7713 = vst [vmem:[#allocation85_spill] sm:$0xff] %v5679_v59 }
 0x54c   :  { %1792 = vmatpush.msra.mxu1 %v1677_v41  ;;  %1779 = vmatpush.msra.mxu0 %v5454_v30  ;;  %v5530_v41 = vld [vmem:[#allocation16 + $0x40] sm:$0xff] }
 0x54d   :  { %1760 = vmatpush.msra.mxu3 %v5464_v50  ;;  %1744 = vmatpush.msrb.mxu2 %v5513_v33  ;;  %7683 = vst [vmem:[#allocation57_spill] sm:$0xff] %v5530_v41  ;;  %v5677_v30 = vld [vmem:[#allocation19 + $0xa0] sm:$0xff] }
 0x54e   :  { %1793 = vmatpush.msra.mxu1 %v5434_v55  ;;  %1780 = vmatpush.msra.mxu0 %v5466_v9  ;;  %v5574_v55 = vld [vmem:[#allocation19] sm:$0xff]  ;;  %v5670_v9 = vld [vmem:[#allocation20 + $0x38] sm:$0xff]  ;;  %7712 = vst [vmem:[#allocation84_spill] sm:$0xff] %v5677_v30 }
 0x54f   :  { %1761 = vmatpush.msra.mxu3 %v5477_v47  ;;  %1745 = vmatpush.msrb.mxu2 %v5526_v15  ;;  %7692 = vst [vmem:[#allocation66_spill] sm:$0xff] %v5574_v55 }
 0x550   :  { %1794 = vmatpush.msra.mxu1 %v5446_v63  ;;  %1781 = vmatpush.msra.mxu0 %v5479_v51  ;;  %7710 = vst [vmem:[#allocation82_spill] sm:$0xff] %v5670_v9 }
 0x551   :  { %1762 = vmatpush.msra.mxu3 %v5489_v46 }
 0x552   :  { %1795 = vmatpush.msra.mxu1 %v5458_v35  ;;  %1782 = vmatpush.msra.mxu0 %v5491_v44  ;;  %v7693_v44 = vld [vmem:[#allocation41_spill] sm:$0xff] }
 0x553   :  { %1763 = vmatpush.msra.mxu3 %v5501_v60  ;;  %v438_v51 = vadd.f32 %v7693_v44, %v4964_v45  ;;  %v5586_v44 = vld [vmem:[#allocation19 + $0x170] sm:$0xff] }
 0x554   :  { %1796 = vmatpush.msra.mxu1 %v5470_v1  ;;  %1783 = vmatpush.msra.mxu0 %v5503_v61  ;;  %v5571_v1 = vld [vmem:[#allocation19 + $0x18] sm:$0xff] }
 0x555   :  { %1764 = vmatpush.msra.mxu3 %v5515_v37  ;;  %7691 = vst [vmem:[#allocation65_spill] sm:$0xff] %v5571_v1 }
 0x556   :  { %1797 = vmatpush.msra.mxu1 %v5483_v7  ;;  %1784 = vmatpush.msra.mxu0 %v5517_v14 }
 0x557   :  { %1765 = vmatpush.msra.mxu3 %v5528_v26 }
 0x558   :  { %1798 = vmatpush.msra.mxu1 %v5495_v49  ;;  %1785 = vmatpush.msra.mxu0 %v5530_v41  ;;  %v5568_v49 = vld [vmem:[#allocation19 + $0x30] sm:$0xff] }
 0x559   :  { %7690 = vst [vmem:[#allocation64_spill] sm:$0xff] %v5568_v49 }
 0x55a   :  { %1799 = vmatpush.msra.mxu1 %v5509_v29 }
 0x55c   :  { %1800 = vmatpush.msra.mxu1 %v5521_v28  ;;  %v5556_v28 = vld [vmem:[#allocation19 + $0x60] sm:$0xff] }
 0x55d   :  { %7688 = vst [vmem:[#allocation62_spill] sm:$0xff] %v5556_v28 }
 0x55e   :  { %1801 = vmatpush.msra.mxu1 %v5534_v17  ;;  %v5564_v17 = vld [vmem:[#allocation19 + $0x48] sm:$0xff] }
 0x55f   :  { %7689 = vst [vmem:[#allocation63_spill] sm:$0xff] %v5564_v17 }
 0x5b9   :  { %v1357_v5 = vpop.f32.mrf.mxu0 }
 0x5ba   :  { %v1400_v23 = vadd.f32 %v1357_v5, %v397_v21  ;;  %v5538_v5 = vld [vmem:[#allocation16 + $0x18] sm:$0xff]  ;;  %v1377_v41 = vpop.f32.mrf.mxu1 }
 0x5bb   :  { %1746 = vmatpush.msrb.mxu2 %v5538_v5  ;;  %v1420_v61 = vadd.f32 %v5352_v3, %v1377_v41 }
 0x5bc   :  { %v3569_v43 = vmul.f32 -1.442695, %v1400_v23  ;;  %v5540_v23 = vld [vmem:[#allocation16 + $0x20] sm:$0xff] }
 0x5bd   :  { %1766 = vmatpush.msra.mxu3 %v5540_v23 }
 0x5be   :  { %3694 = vpow2.f32 %v3569_v43  ;;  %v5542_v43 = vld [vmem:[#allocation16 + $0x28] sm:$0xff] }
 0x5bf   :  { %v1337_v34 = vpop.f32.mrf.mxu3  ;;  %7685 = vst [vmem:[#allocation59_spill] sm:$0xff] %v5542_v43  ;;  %1786 = vmatpush.msra.mxu0 %v5542_v43 }
 0x5c0   :  { %v1380_v4 = vadd.f32 %v1337_v34, %v7674_v36  ;;  %v5546_v36 = vld [vmem:[#allocation19 + $0x78] sm:$0xff] }
 0x5c1   :  { %7686 = vst [vmem:[#allocation60_spill] sm:$0xff] %v5546_v36  ;;  %1802 = vmatpush.msra.mxu1 %v5546_v36 }
 0x5c2   :  { %v3568_v19 = vmul.f32 -1.442695, %v1380_v4  ;;  %v5548_v4 = vld [vmem:[#allocation16] sm:$0xff] }
 0x5c3   :  { %1747 = vmatpush.msrb.mxu2 %v5548_v4  ;;  %1803 = vmatpush.msra.mxu1 %v5556_v28 }
 0x5c4   :  { %v3695_v53 = vpop.eup %3694  ;;  %3696 = vpow2.f32 %v3568_v19  ;;  %v5550_v19 = vld [vmem:[#allocation16 + $0x8] sm:$0xff] }
 0x5c5   :  { %v5505_v0 = vadd.f32 1.0, %v3695_v53  ;;  %v5554_v53 = vld [vmem:[#allocation16 + $0x10] sm:$0xff]  ;;  %1767 = vmatpush.msra.mxu3 %v5550_v19  ;;  %1804 = vmatpush.msra.mxu1 %v5564_v17 }
 0x5c6   :  { %7687 = vst [vmem:[#allocation61_spill] sm:$0xff] %v5554_v53  ;;  %1787 = vmatpush.msra.mxu0 %v5554_v53 }
 0x5c7   :  { %3698 = vrcp.f32 %v5505_v0  ;;  %1805 = vmatpush.msra.mxu1 %v5568_v49  ;;  %vm1410_vm13 = vweird.f32 %v5505_v0 }
 0x5c9   :  { %1806 = vmatpush.msra.mxu1 %v5571_v1 }
 0x5ca   :  { %v3697_v21 = vpop.eup %3696 }
 0x5cb   :  { %v1384_v34 = vadd.f32 1.0, %v3697_v21  ;;  %1807 = vmatpush.msra.mxu1 %v5574_v55 }
 0x5cd   :  { %3700 = vrcp.f32 %v1384_v34  ;;  %v3699_v21 = vpop.eup %3698  ;;  %v1396_v28 = vand.u32 2147483648, %v1384_v34  ;;  %v1394_v17 = vand.u32 2147483647, %v1384_v34  ;;  %vm1390_vm9 = vweird.f32 %v1384_v34 }
 0x5ce   :  { %v1406_v29 = vmul.f32 %v3699_v21, %v5505_v0  ;;  %vm1411_vm12 = vweird.f32 %v3699_v21 }
 0x5cf   :  { %v1397_v49 = vor.u32 1.1754944e-38, %v1396_v28  ;;  %vm1395_vm11 = vcmp.eq.f32.partialorder %v1394_v17, 8.507059e+37  ;;  %vm1412_vm14 = vmor %vm1410_vm13, %vm1411_vm12  ;;  %v5607_v17 = vld [vmem:[#allocation19 + $0x148] sm:$0xff] }
 0x5d0   :  { %v1407_v35 = vsub.f32 1.0, %v1406_v29 }
 0x5d2   :  { %v1408_v43 = vmul.f32 %v3699_v21, %v1407_v35  ;;  %v1414_v35 = vand.u32 2147483647, %v5505_v0 }
 0x5d3   :  { %v3701_v7 = vpop.eup %3700 }
 0x5d4   :  { %v1386_v36 = vmul.f32 %v3701_v7, %v1384_v34  ;;  %vm1391_vm8 = vweird.f32 %v3701_v7  ;;  %v1409_v1 = vadd.f32 %v3699_v21, %v1408_v43  ;;  %vm1415_vm15 = vcmp.eq.f32.partialorder %v1414_v35, 8.507059e+37  ;;  %v5611_v43 = vld [vmem:[#allocation20 + $0x68] sm:$0xff]  ;;  %v5627_v35 = vld [vmem:[#allocation19 + $0x110] sm:$0xff] }
 0x5d5   :  { %vm1392_vm10 = vmor %vm1390_vm9, %vm1391_vm8  ;;  %7696 = vst [vmem:[#allocation68_spill] sm:$0xff] %v5611_v43 }
 0x5d6   :  { %v1387_v63 = vsub.f32 1.0, %v1386_v36  ;;  %v1413_v28 = vsel %vm1412_vm14, %v3699_v21, %v1409_v1  ;;  %v5596_v1 = vld [vmem:[#allocation19 + $0x158] sm:$0xff]  ;;  %v5614_v21 = vld [vmem:[#allocation19 + $0x128] sm:$0xff] }
 0x5d8   :  { %v1388_v53 = vmul.f32 %v3701_v7, %v1387_v63  ;;  %v1416_v63 = vand.u32 2147483648, %v5505_v0  ;;  %v5605_v0 = vld [vmem:[#allocation19 + $0x140] sm:$0xff] }
 0x5da   :  { %v1389_v14 = vadd.f32 %v3701_v7, %v1388_v53  ;;  %v1417_v53 = vor.u32 1.1754944e-38, %v1416_v63  ;;  %v5622_v63 = vld [vmem:[#allocation8] sm:$0xff] }
 0x5dc   :  { %v1393_v29 = vsel %vm1392_vm10, %v3701_v7, %v1389_v14  ;;  %v1418_v3 = vsel %vm1415_vm15, %v1417_v53, %v1413_v28  ;;  %v5633_v28 = vld [vmem:[#allocation20 + $0x58] sm:$0xff] }
 0x5dd   :  { %v1398_v36 = vsel %vm1395_vm11, %v1397_v49, %v1393_v29  ;;  %v1424_v7 = vsub.f32 1.0, %v1418_v3  ;;  %v1426_v49 = vmul.f32 %v1418_v3, %v5376_v18  ;;  %v5598_v18 = vld [vmem:[#allocation19 + $0x160] sm:$0xff]  ;;  %v5616_v29 = vld [vmem:[#allocation19 + $0x130] sm:$0xff]  ;;  %7698 = vst [vmem:[#allocation70_spill] sm:$0xff] %v5633_v28  ;;  %v5637_v53 = vld [vmem:[#allocation19 + $0xf8] sm:$0xff] }
 0x5de   :  { %v1421_v55 = vmul.f32 %v1420_v61, %v1398_v36  ;;  %v5588_v61 = vld [vmem:[#allocation19 + $0x178] sm:$0xff]  ;;  %v5620_v36 = vld [vmem:[#allocation20 + $0x60] sm:$0xff]  ;;  %7699 = vst [vmem:[#allocation71_spill] sm:$0xff] %v5637_v53 }
 0x5df   :  { %7697 = vst [vmem:[#allocation69_spill] sm:$0xff] %v5620_v36  ;;  %v5641_v3 = vld [vmem:[#allocation19 + $0x100] sm:$0xff] }
 0x5e0   :  { %v1422_v34 = vadd.f32 %v1421_v55, %v438_v51  ;;  %v5592_v55 = vld [vmem:[#allocation20 + $0x78] sm:$0xff]  ;;  %v5602_v51 = vld [vmem:[#allocation20 + $0x70] sm:$0xff]  ;;  %7700 = vst [vmem:[#allocation72_spill] sm:$0xff] %v5641_v3 }
 0x5e1   :  { %7694 = vst [vmem:[#allocation41_spill] sm:$0xff] %v5592_v55 }
 0x5e2   :  { %3702 = vtanh.f32 %v1422_v34  ;;  %7695 = vst [vmem:[#allocation67_spill] sm:$0xff] %v5602_v51  ;;  %v5631_v34 = vld [vmem:[#allocation19 + $0x118] sm:$0xff] }
 0x5e8   :  { %v3703_v14 = vpop.eup %3702 }
 0x5e9   :  { %v1425_v41 = vmul.f32 %v3703_v14, %v1424_v7  ;;  %v5643_v7 = vld [vmem:[#allocation20 + $0x50] sm:$0xff]  ;;  %v5647_v14 = vld [vmem:[#allocation19 + $0xe0] sm:$0xff] }
 0x5ea   :  { %7701 = vst [vmem:[#allocation73_spill] sm:$0xff] %v5643_v7 }
 0x5eb   :  { %v5584_v45 = vadd.f32 %v1426_v49, %v1425_v41  ;;  %7702 = vst [vmem:[#allocation74_spill] sm:$0xff] %v5647_v14  ;;  %v5650_v49 = vld [vmem:[#allocation19 + $0xe8] sm:$0xff] }
 0x5ec   :  { %7703 = vst [vmem:[#allocation75_spill] sm:$0xff] %v5650_v49  ;;  %v5652_v41 = vld [vmem:[#allocation20 + $0x48] sm:$0xff] }
 0x5ed   :  { %1500 = vmatmul.f32.vlgmr.msra.gmra.mxu2 %v5584_v45  ;;  %1520 = vmatmul.f32.vlgmr.msrb.gmra.mxu3 %v5584_v45  ;;  %7704 = vst [vmem:[#allocation76_spill] sm:$0xff] %v5652_v41 }
 0x5ee   :  { %1540 = vmatmul.f32.vlgmr.msrb.gmra.mxu0 %v5584_v45  ;;  %1580 = vmatmul.f32.vlgmr.msrb.gmra.mxu1 %v5584_v45 }
 0x5ef   :  { %1812 = vmatpush.msra.mxu2 %v5586_v44  ;;  %1832 = vmatpush.msrb.mxu3 %v5588_v61 }
 0x5f0   :  { %1903 = vmatpush.msrb.mxu0 %v5592_v55  ;;  %v5668_v55 = vld [vmem:[#allocation19 + $0xb8] sm:$0xff] }
 0x5f1   :  { %1813 = vmatpush.msra.mxu2 %v5596_v1  ;;  %1833 = vmatpush.msrb.mxu3 %v5598_v18  ;;  %7709 = vst [vmem:[#allocation81_spill] sm:$0xff] %v5668_v55 }
 0x5f2   :  { %1904 = vmatpush.msrb.mxu0 %v5602_v51  ;;  %v5661_v51 = vld [vmem:[#allocation20 + $0x40] sm:$0xff] }
 0x5f3   :  { %1814 = vmatpush.msra.mxu2 %v5605_v0  ;;  %1834 = vmatpush.msrb.mxu3 %v5607_v17  ;;  %7707 = vst [vmem:[#allocation79_spill] sm:$0xff] %v5661_v51 }
 0x5f4   :  { %1905 = vmatpush.msrb.mxu0 %v5611_v43  ;;  %v5659_v43 = vld [vmem:[#allocation19 + $0xd0] sm:$0xff] }
 0x5f5   :  { %1815 = vmatpush.msra.mxu2 %v5614_v21  ;;  %1835 = vmatpush.msrb.mxu3 %v5616_v29  ;;  %7706 = vst [vmem:[#allocation78_spill] sm:$0xff] %v5659_v43 }
 0x5f6   :  { %1906 = vmatpush.msrb.mxu0 %v5620_v36  ;;  %1748 = vmatmul.f32.vlgmr.msrb.gmra.mxu2 %v5622_v63  ;;  %v5656_v36 = vld [vmem:[#allocation19 + $0xc8] sm:$0xff] }
 0x5f7   :  { %1768 = vmatmul.f32.vlgmr.msra.gmra.mxu3 %v5622_v63  ;;  %1788 = vmatmul.f32.vlgmr.msra.gmra.mxu0 %v5622_v63  ;;  %7705 = vst [vmem:[#allocation77_spill] sm:$0xff] %v5656_v36 }
 0x5f8   :  { %1808 = vmatmul.f32.vlgmr.msra.gmra.mxu1 %v5584_v45  ;;  %1816 = vmatpush.msra.mxu2 %v5627_v35 }
 0x5f9   :  { %1836 = vmatpush.msrb.mxu3 %v5631_v34  ;;  %1907 = vmatpush.msrb.mxu0 %v5633_v28  ;;  %v5665_v28 = vld [vmem:[#allocation19 + $0xb0] sm:$0xff] }
 0x5fa   :  { %1817 = vmatpush.msra.mxu2 %v5637_v53  ;;  %7708 = vst [vmem:[#allocation80_spill] sm:$0xff] %v5665_v28 }
 0x5fb   :  { %1837 = vmatpush.msrb.mxu3 %v5641_v3  ;;  %1908 = vmatpush.msrb.mxu0 %v5643_v7  ;;  %v5674_v7 = vld [vmem:[#allocation19 + $0x98] sm:$0xff] }
 0x5fc   :  { %1818 = vmatpush.msra.mxu2 %v5647_v14  ;;  %7711 = vst [vmem:[#allocation83_spill] sm:$0xff] %v5674_v7 }
 0x5fd   :  { %1838 = vmatpush.msrb.mxu3 %v5650_v49  ;;  %1909 = vmatpush.msrb.mxu0 %v5652_v41  ;;  %v5683_v41 = vld [vmem:[#allocation19 + $0x80] sm:$0xff] }
 0x5fe   :  { %1819 = vmatpush.msra.mxu2 %v5656_v36  ;;  %7714 = vst [vmem:[#allocation86_spill] sm:$0xff] %v5683_v41 }
 0x5ff   :  { %1839 = vmatpush.msrb.mxu3 %v5659_v43  ;;  %1910 = vmatpush.msrb.mxu0 %v5661_v51  ;;  %v5692_v51 = vld [vmem:[#allocation19 + $0x68] sm:$0xff] }
 0x600   :  { %1820 = vmatpush.msra.mxu2 %v5665_v28  ;;  %7717 = vst [vmem:[#allocation89_spill] sm:$0xff] %v5692_v51 }
 0x601   :  { %1840 = vmatpush.msrb.mxu3 %v5668_v55  ;;  %1911 = vmatpush.msrb.mxu0 %v5670_v9  ;;  %v5701_v9 = vld [vmem:[#allocation19 + $0x50] sm:$0xff] }
 0x602   :  { %1821 = vmatpush.msra.mxu2 %v5674_v7  ;;  %7720 = vst [vmem:[#allocation92_spill] sm:$0xff] %v5701_v9 }
 0x603   :  { %1841 = vmatpush.msrb.mxu3 %v5677_v30  ;;  %1912 = vmatpush.msrb.mxu0 %v5679_v59  ;;  %v5710_v59 = vld [vmem:[#allocation19 + $0x38] sm:$0xff] }
 0x604   :  { %1822 = vmatpush.msra.mxu2 %v5683_v41  ;;  %7722 = vst [vmem:[#allocation94_spill] sm:$0xff] %v5710_v59  ;;  %v5713_v41 = vld [vmem:[#allocation19 + $0x40] sm:$0xff] }
 0x605   :  { %1842 = vmatpush.msrb.mxu3 %v5686_v20  ;;  %1913 = vmatpush.msrb.mxu0 %v5688_v38  ;;  %7723 = vst [vmem:[#allocation95_spill] sm:$0xff] %v5713_v41  ;;  %v5715_v20 = vld [vmem:[#allocation20 + $0x10] sm:$0xff]  ;;  %v5719_v38 = vld [vmem:[#allocation19 + $0x20] sm:$0xff] }
 0x606   :  { %1823 = vmatpush.msra.mxu2 %v5692_v51  ;;  %7724 = vst [vmem:[#allocation96_spill] sm:$0xff] %v5719_v38  ;;  %v5722_v51 = vld [vmem:[#allocation19 + $0x28] sm:$0xff] }
 0x607   :  { %1843 = vmatpush.msrb.mxu3 %v5695_v8  ;;  %1914 = vmatpush.msrb.mxu0 %v5697_v11  ;;  %7725 = vst [vmem:[#allocation97_spill] sm:$0xff] %v5722_v51  ;;  %v5724_v8 = vld [vmem:[#allocation20 + $0x8] sm:$0xff] }
 0x608   :  { %1824 = vmatpush.msra.mxu2 %v5701_v9  ;;  %v5728_v11 = vld [vmem:[#allocation19 + $0x8] sm:$0xff]  ;;  %v5731_v9 = vld [vmem:[#allocation19 + $0x10] sm:$0xff] }
 0x609   :  { %1844 = vmatpush.msrb.mxu3 %v5704_v13  ;;  %1915 = vmatpush.msrb.mxu0 %v5706_v22  ;;  %7726 = vst [vmem:[#allocation98_spill] sm:$0xff] %v5728_v11  ;;  %v5733_v13 = vld [vmem:[#allocation20] sm:$0xff] }
 0x60a   :  { %1825 = vmatpush.msra.mxu2 %v5710_v59  ;;  %7727 = vst [vmem:[#allocation99_spill] sm:$0xff] %v5731_v9 }
 0x60b   :  { %1845 = vmatpush.msrb.mxu3 %v5713_v41  ;;  %1916 = vmatpush.msrb.mxu0 %v5715_v20  ;;  %7728 = vst [vmem:[#allocation100_spill] sm:$0xff] %v5733_v13 }
 0x60c   :  { %1826 = vmatpush.msra.mxu2 %v5719_v38 }
 0x60d   :  { %1846 = vmatpush.msrb.mxu3 %v5722_v51  ;;  %1917 = vmatpush.msrb.mxu0 %v5724_v8 }
 0x60e   :  { %1827 = vmatpush.msra.mxu2 %v5728_v11 }
 0x60f   :  { %1847 = vmatpush.msrb.mxu3 %v5731_v9  ;;  %1918 = vmatpush.msrb.mxu0 %v5733_v13 }
 0x610   :  { %1828 = vmatmul.f32.vlgmr.msra.gmra.mxu2 %v5584_v45  ;;  %1848 = vmatmul.f32.vlgmr.msrb.gmra.mxu3 %v5584_v45 }
 0x611   :  { %1919 = vmatmul.f32.vlgmr.msrb.gmra.mxu0 %v5622_v63  ;;  %1996 = vmatpush.msra.mxu3 %v5381_v42  ;;  %v7729_v42 = vld [vmem:[#allocation86_spill] sm:$0xff] }
 0x612   :  { %2016 = vmatpush.msra.mxu0 %v5383_v31  ;;  %v7730_v31 = vld [vmem:[#allocation87_spill] sm:$0xff] }
 0x613   :  { %1997 = vmatpush.msra.mxu3 %v5389_v54  ;;  %v7731_v54 = vld [vmem:[#allocation89_spill] sm:$0xff] }
 0x614   :  { %2017 = vmatpush.msra.mxu0 %v5391_v32  ;;  %v7732_v32 = vld [vmem:[#allocation90_spill] sm:$0xff] }
 0x615   :  { %1998 = vmatpush.msra.mxu3 %v5398_v62  ;;  %v7733_v62 = vld [vmem:[#allocation92_spill] sm:$0xff] }
 0x616   :  { %2018 = vmatpush.msra.mxu0 %v5400_v6  ;;  %v7734_v6 = vld [vmem:[#allocation93_spill] sm:$0xff] }
 0x617   :  { %1999 = vmatpush.msra.mxu3 %v5407_v58 }
 0x618   :  { %2019 = vmatpush.msra.mxu0 %v5409_v27 }
 0x619   :  { %2000 = vmatpush.msra.mxu3 %v5416_v2  ;;  %v5812_v2 = vld [vmem:[%s7221_s11] sm:$0x7] }
 0x61a   :  { %2020 = vmatpush.msra.mxu0 %v5418_v10  ;;  %v1478_v10 = vperm.slane %v5812_v2, 0 }
 0x61b   :  { %2001 = vmatpush.msra.mxu3 %v5427_v25 }
 0x61c   :  { %2021 = vmatpush.msra.mxu0 %v5429_v16 }
 0x61d   :  { %2002 = vmatpush.msra.mxu3 %v5438_v56  ;;  %v5817_v56 = vld [vmem:[#allocation20 + $0xf8] sm:$0xff] }
 0x61e   :  { %2022 = vmatpush.msra.mxu0 %v5440_v12  ;;  %1923 = vmatpush.msrb.mxu1 %v5817_v56 }
 0x61f   :  { %2003 = vmatpush.msra.mxu3 %v5450_v48 }
 0x620   :  { %2023 = vmatpush.msra.mxu0 %v5452_v52  ;;  %v5821_v52 = vld [vmem:[#allocation20 + $0xf0] sm:$0xff] }
 0x621   :  { %2004 = vmatpush.msra.mxu3 %v5462_v39  ;;  %1924 = vmatpush.msrb.mxu1 %v5821_v52 }
 0x622   :  { %2024 = vmatpush.msra.mxu0 %v5464_v50  ;;  %v5824_v50 = vld [vmem:[#allocation20 + $0xe8] sm:$0xff] }
 0x623   :  { %2005 = vmatpush.msra.mxu3 %v5475_v40  ;;  %1925 = vmatpush.msrb.mxu1 %v5824_v50 }
 0x624   :  { %2025 = vmatpush.msra.mxu0 %v5477_v47  ;;  %v5827_v47 = vld [vmem:[#allocation20 + $0xe0] sm:$0xff] }
 0x625   :  { %2006 = vmatpush.msra.mxu3 %v5487_v24  ;;  %1926 = vmatpush.msrb.mxu1 %v5827_v47  ;;  %v5830_v24 = vld [vmem:[#allocation20 + $0xd8] sm:$0xff] }
 0x626   :  { %2026 = vmatpush.msra.mxu0 %v5489_v46  ;;  %v5833_v46 = vld [vmem:[#allocation20 + $0xd0] sm:$0xff] }
 0x627   :  { %2007 = vmatpush.msra.mxu3 %v5499_v57  ;;  %1927 = vmatpush.msrb.mxu1 %v5830_v24 }
 0x628   :  { %2027 = vmatpush.msra.mxu0 %v5501_v60  ;;  %v5836_v60 = vld [vmem:[#allocation20 + $0xc8] sm:$0xff] }
 0x629   :  { %2008 = vmatpush.msra.mxu3 %v5513_v33  ;;  %1928 = vmatpush.msrb.mxu1 %v5833_v46 }
 0x62a   :  { %2028 = vmatpush.msra.mxu0 %v5515_v37 }
 0x62b   :  { %2009 = vmatpush.msra.mxu3 %v5526_v15  ;;  %1929 = vmatpush.msrb.mxu1 %v5836_v60  ;;  %v5839_v15 = vld [vmem:[#allocation20 + $0xc0] sm:$0xff] }
 0x62c   :  { %2029 = vmatpush.msra.mxu0 %v5528_v26  ;;  %v5842_v26 = vld [vmem:[#allocation20 + $0xb8] sm:$0xff] }
 0x62d   :  { %2010 = vmatpush.msra.mxu3 %v5538_v5  ;;  %1930 = vmatpush.msrb.mxu1 %v5839_v15  ;;  %v5845_v5 = vld [vmem:[#allocation20 + $0xb0] sm:$0xff] }
 0x62e   :  { %2030 = vmatpush.msra.mxu0 %v5540_v23  ;;  %v1479_v23 = vperm.slane %v5812_v2, 1 }
 0x62f   :  { %2011 = vmatpush.msra.mxu3 %v5548_v4  ;;  %1931 = vmatpush.msrb.mxu1 %v5842_v26  ;;  %v5849_v4 = vld [vmem:[#allocation20 + $0xa8] sm:$0xff] }
 0x630   :  { %2031 = vmatpush.msra.mxu0 %v5550_v19 }
 0x631   :  { %2076 = vmatpush.msrb.mxu3 %v5586_v44  ;;  %1932 = vmatpush.msrb.mxu1 %v5845_v5 }
 0x632   :  { %2096 = vmatpush.msrb.mxu0 %v5588_v61 }
 0x633   :  { %2077 = vmatpush.msrb.mxu3 %v5596_v1  ;;  %1933 = vmatpush.msrb.mxu1 %v5849_v4 }
 0x634   :  { %2097 = vmatpush.msrb.mxu0 %v5598_v18 }
 0x635   :  { %2078 = vmatpush.msrb.mxu3 %v5605_v0 }
 0x636   :  { %2098 = vmatpush.msrb.mxu0 %v5607_v17 }
 0x637   :  { %2079 = vmatpush.msrb.mxu3 %v5614_v21 }
 0x638   :  { %2099 = vmatpush.msrb.mxu0 %v5616_v29 }
 0x639   :  { %2080 = vmatpush.msrb.mxu3 %v5627_v35 }
 0x63a   :  { %2100 = vmatpush.msrb.mxu0 %v5631_v34 }
 0x63b   :  { %2081 = vmatpush.msrb.mxu3 %v5637_v53 }
 0x63c   :  { %2101 = vmatpush.msrb.mxu0 %v5641_v3 }
 0x63d   :  { %2082 = vmatpush.msrb.mxu3 %v5647_v14  ;;  %v7790_v14 = vld [vmem:[#allocation62_spill] sm:$0xff] }
 0x63e   :  { %2102 = vmatpush.msrb.mxu0 %v5650_v49  ;;  %v7789_v49 = vld [vmem:[#allocation60_spill] sm:$0xff] }
 0x63f   :  { %2083 = vmatpush.msrb.mxu3 %v5656_v36  ;;  %v7785_v36 = vld [vmem:[#allocation49_spill] sm:$0xff] }
 0x640   :  { %2103 = vmatpush.msrb.mxu0 %v5659_v43  ;;  %v7783_v43 = vld [vmem:[#allocation48_spill] sm:$0xff] }
 0x641   :  { %2084 = vmatpush.msrb.mxu3 %v5665_v28  ;;  %v7782_v28 = vld [vmem:[#allocation37_spill] sm:$0xff] }
 0x642   :  { %2104 = vmatpush.msrb.mxu0 %v5668_v55  ;;  %v7781_v55 = vld [vmem:[#allocation47_spill] sm:$0xff] }
 0x643   :  { %2085 = vmatpush.msrb.mxu3 %v5674_v7  ;;  %v5974_v7 = vld [vmem:[#allocation19 + $0x168] sm:$0xff] }
 0x644   :  { %2105 = vmatpush.msrb.mxu0 %v5677_v30 }
 0x645   :  { %2086 = vmatpush.msrb.mxu3 %v7729_v42 }
 0x646   :  { %2106 = vmatpush.msrb.mxu0 %v7730_v31  ;;  %v7747_v31 = vld [vmem:[#allocation53_spill] sm:$0xff] }
 0x647   :  { %2087 = vmatpush.msrb.mxu3 %v7731_v54  ;;  %v7746_v54 = vld [vmem:[#allocation46_spill] sm:$0xff] }
 0x648   :  { %2107 = vmatpush.msrb.mxu0 %v7732_v32  ;;  %v7745_v32 = vld [vmem:[#allocation43_spill] sm:$0xff] }
 0x649   :  { %2088 = vmatpush.msrb.mxu3 %v7733_v62 }
 0x64a   :  { %2108 = vmatpush.msrb.mxu0 %v7734_v6 }
 0x64b   :  { %2089 = vmatpush.msrb.mxu3 %v5710_v59 }
 0x64c   :  { %2109 = vmatpush.msrb.mxu0 %v5713_v41 }
 0x64d   :  { %2090 = vmatpush.msrb.mxu3 %v5719_v38  ;;  %v7739_v38 = vld [vmem:[#allocation36_spill] sm:$0xff] }
 0x64e   :  { %2110 = vmatpush.msrb.mxu0 %v5722_v51  ;;  %v7738_v51 = vld [vmem:[#allocation45_spill] sm:$0xff] }
 0x64f   :  { %2091 = vmatpush.msrb.mxu3 %v5728_v11 }
 0x650   :  { %2111 = vmatpush.msrb.mxu0 %v5731_v9  ;;  %v5864_v9 = vld [vmem:[#allocation20 + $0x88] sm:$0xff] }
 0x66b   :  { %v5807_v27 = vpop.f32.mrf.mxu1 }
 0x670   :  { %v1501_v58 = vpop.f32.mrf.mxu2  ;;  %v1521_v57 = vpop.f32.mrf.mxu3 }
 0x671   :  { %v5815_v25 = vadd.f32 %v1501_v58, %v1478_v10  ;;  %v5852_v58 = vld [vmem:[#allocation20 + $0xa0] sm:$0xff]  ;;  %v5854_v10 = vadd.f32 %v1521_v57, %v1479_v23 }
 0x672   :  { %1934 = vmatpush.msrb.mxu1 %v5852_v58  ;;  %v5866_v57 = vld [vmem:[#allocation20 + $0x80] sm:$0xff] }
 0x673   :  { %7735 = vst [vmem:[#allocation101_spill] sm:$0xff] %v5815_v25 }
 0x674   :  { %7736 = vst [vmem:[#allocation102_spill] sm:$0xff] %v5854_v10 }
 0x675   :  { %v1809_v48 = vpop.f32.mrf.mxu1 }
 0x679   :  { %v1749_v16 = vpop.f32.mrf.mxu2 }
 0x67a   :  { %v1750_v12 = vadd.f32 %v1749_v16, %v5815_v25  ;;  %v1769_v63 = vpop.f32.mrf.mxu3 }
 0x67c   :  { %v1852_v39 = vadd.f32 %v1809_v48, %v1750_v12  ;;  %v5857_v12 = vld [vmem:[#allocation20 + $0x98] sm:$0xff]  ;;  %v1770_v48 = vadd.f32 %v1769_v63, %v5854_v10  ;;  %v7737_v63 = vld [vmem:[#allocation52_spill] sm:$0xff]  ;;  %v1541_v10 = vpop.f32.mrf.mxu0 }
 0x67d   :  { %1935 = vmatpush.msrb.mxu1 %v5857_v12 }
 0x67e   :  { %v3570_v40 = vmul.f32 -1.442695, %v1852_v39 }
 0x680   :  { %3704 = vpow2.f32 %v3570_v40 }
 0x686   :  { %v3705_v33 = vpop.eup %3704 }
 0x687   :  { %v1856_v37 = vadd.f32 1.0, %v3705_v33  ;;  %v5861_v33 = vld [vmem:[#allocation20 + $0x90] sm:$0xff] }
 0x688   :  { %1936 = vmatpush.msrb.mxu1 %v5861_v33 }
 0x689   :  { %3706 = vrcp.f32 %v1856_v37  ;;  %vm1862_vm1 = vweird.f32 %v1856_v37 }
 0x68a   :  { %1937 = vmatpush.msrb.mxu1 %v5864_v9 }
 0x68c   :  { %1938 = vmatpush.msrb.mxu1 %v5866_v57 }
 0x68e   :  { %2036 = vmatpush.msra.mxu1 %v7737_v63 }
 0x68f   :  { %v3707_v19 = vpop.eup %3706 }
 0x690   :  { %v1858_v16 = vmul.f32 %v3707_v19, %v1856_v37  ;;  %vm1863_vm0 = vweird.f32 %v3707_v19  ;;  %2037 = vmatpush.msra.mxu1 %v7738_v51  ;;  %v1480_v51 = vperm.slane %v5812_v2, 2 }
 0x691   :  { %vm1864_vm2 = vmor %vm1862_vm1, %vm1863_vm0 }
 0x692   :  { %v1859_v40 = vsub.f32 1.0, %v1858_v16  ;;  %2038 = vmatpush.msra.mxu1 %v7739_v38 }
 0x693   :  { %v1829_v39 = vpop.f32.mrf.mxu2 }
 0x694   :  { %v1872_v25 = vadd.f32 %v1829_v39, %v1770_v48  ;;  %v1860_v11 = vmul.f32 %v3707_v19, %v1859_v40  ;;  %v1868_v48 = vand.u32 2147483648, %v1856_v37  ;;  %v1866_v39 = vand.u32 2147483647, %v1856_v37  ;;  %v5876_v40 = vld [vmem:[%s7222_s12] ss:$0 sm:$0xff]  ;;  %v7742_v37 = vld [vmem:[#allocation40_spill] sm:$0xff] }
 0x695   :  { %7740 = vst [vmem:[#allocation52_spill] sm:$0xff] %v5876_v40 }
 0x696   :  { %v3571_v23 = vmul.f32 -1.442695, %v1872_v25  ;;  %v1861_v16 = vadd.f32 %v3707_v19, %v1860_v11  ;;  %v1849_v11 = vpop.f32.mrf.mxu3  ;;  %v1869_v63 = vor.u32 1.1754944e-38, %v1868_v48  ;;  %vm1867_vm3 = vcmp.eq.f32.partialorder %v1866_v39, 8.507059e+37 }
 0x697   :  { %v1895_v6 = vadd.f32 %v5876_v40, %v1849_v11  ;;  %v7748_v11 = vld [vmem:[#allocation39_spill] sm:$0xff] }
 0x698   :  { %3708 = vpow2.f32 %v3571_v23  ;;  %v1865_v59 = vsel %vm1864_vm2, %v3707_v19, %v1861_v16  ;;  %v7741_v23 = vld [vmem:[#allocation50_spill] sm:$0xff]  ;;  %v1789_v19 = vpop.f32.mrf.mxu0  ;;  %v5883_v16 = vadd.f32 %v1541_v10, %v1480_v51 }
 0x699   :  { %2039 = vmatpush.msra.mxu1 %v7741_v23  ;;  %v1870_v38 = vsel %vm1867_vm3, %v1869_v63, %v1865_v59 }
 0x69a   :  { %7744 = vst [vmem:[#allocation45_spill] sm:$0xff] %v5883_v16  ;;  %v1896_v62 = vmul.f32 %v1895_v6, %v1870_v38  ;;  %v1790_v48 = vadd.f32 %v1789_v19, %v5883_v16  ;;  %v7749_v6 = vld [vmem:[#allocation35_spill] sm:$0xff]  ;;  %v5970_v16 = vld [vmem:[#allocation23] sm:$0xff] }
 0x69b   :  { %2040 = vmatpush.msra.mxu1 %v7742_v37  ;;  %v7750_v38 = vld [vmem:[#allocation55_spill] sm:$0xff] }
 0x69c   :  { %v1897_v39 = vadd.f32 %v1896_v62, %v1790_v48  ;;  %v7752_v48 = vld [vmem:[#allocation57_spill] sm:$0xff] }
 0x69d   :  { %7778 = vst [vmem:[#allocation57_spill] sm:$0xff] %v5970_v16 }
 0x69e   :  { %v3709_v41 = vpop.eup %3708 }
 0x69f   :  { %v1876_v25 = vadd.f32 1.0, %v3709_v41  ;;  %v7743_v41 = vld [vmem:[#allocation44_spill] sm:$0xff] }
 0x6a0   :  { %2041 = vmatpush.msra.mxu1 %v7743_v41 }
 0x6a1   :  { %3710 = vrcp.f32 %v1876_v25  ;;  %v1888_v63 = vand.u32 2147483648, %v1876_v25  ;;  %v1886_v10 = vand.u32 2147483647, %v1876_v25  ;;  %vm1882_vm5 = vweird.f32 %v1876_v25 }
 0x6a2   :  { %2042 = vmatpush.msra.mxu1 %v7745_v32  ;;  %3712 = vtanh.f32 %v1897_v39 }
 0x6a3   :  { %v1889_v51 = vor.u32 1.1754944e-38, %v1888_v63  ;;  %vm1887_vm7 = vcmp.eq.f32.partialorder %v1886_v10, 8.507059e+37  ;;  %v7755_v63 = vld [vmem:[#allocation41_spill] sm:$0xff] }
 0x6a4   :  { %2043 = vmatpush.msra.mxu1 %v7746_v54  ;;  %v7758_v10 = vld [vmem:[#allocation69_spill] sm:$0xff] }
 0x6a6   :  { %2044 = vmatpush.msra.mxu1 %v7747_v31  ;;  %v7751_v31 = vld [vmem:[#allocation51_spill] sm:$0xff] }
 0x6a7   :  { %v3711_v23 = vpop.eup %3710 }
 0x6a8   :  { %v1878_v2 = vmul.f32 %v3711_v23, %v1876_v25  ;;  %2045 = vmatpush.msra.mxu1 %v7748_v11  ;;  %vm1883_vm4 = vweird.f32 %v3711_v23  ;;  %v3713_v19 = vpop.eup %3712  ;;  %v7754_v25 = vld [vmem:[#allocation61_spill] sm:$0xff] }
 0x6a9   :  { %vm1884_vm6 = vmor %vm1882_vm5, %vm1883_vm4 }
 0x6aa   :  { %v1879_v59 = vsub.f32 1.0, %v1878_v2  ;;  %2046 = vmatpush.msra.mxu1 %v7749_v6  ;;  %v7759_v6 = vld [vmem:[#allocation70_spill] sm:$0xff] }
 0x6ac   :  { %v1880_v37 = vmul.f32 %v3711_v23, %v1879_v59  ;;  %2047 = vmatpush.msra.mxu1 %v7750_v38  ;;  %v7753_v59 = vld [vmem:[#allocation59_spill] sm:$0xff] }
 0x6ad   :  { %7779 = vst [vmem:[#allocation59_spill] sm:$0xff] %v5974_v7 }
 0x6ae   :  { %v1881_v32 = vadd.f32 %v3711_v23, %v1880_v37  ;;  %2048 = vmatpush.msra.mxu1 %v7751_v31  ;;  %v7757_v37 = vld [vmem:[#allocation68_spill] sm:$0xff] }
 0x6b0   :  { %v1885_v54 = vsel %vm1884_vm6, %v3711_v23, %v1881_v32  ;;  %2049 = vmatpush.msra.mxu1 %v7752_v48  ;;  %v7756_v23 = vld [vmem:[#allocation67_spill] sm:$0xff]  ;;  %v7760_v32 = vld [vmem:[#allocation73_spill] sm:$0xff] }
 0x6b1   :  { %v1890_v62 = vsel %vm1887_vm7, %v1889_v51, %v1885_v54  ;;  %v7762_v51 = vld [vmem:[#allocation79_spill] sm:$0xff]  ;;  %v7763_v54 = vld [vmem:[#allocation82_spill] sm:$0xff] }
 0x6b2   :  { %v1899_v41 = vsub.f32 1.0, %v1890_v62  ;;  %v1901_v39 = vmul.f32 %v1890_v62, %v5584_v45  ;;  %2050 = vmatpush.msra.mxu1 %v7753_v59  ;;  %v7761_v45 = vld [vmem:[#allocation76_spill] sm:$0xff]  ;;  %v7764_v62 = vld [vmem:[#allocation85_spill] sm:$0xff] }
 0x6b4   :  { %v1900_v2 = vmul.f32 %v3713_v19, %v1899_v41  ;;  %2051 = vmatpush.msra.mxu1 %v7754_v25  ;;  %v7765_v41 = vld [vmem:[#allocation88_spill] sm:$0xff]  ;;  %v7766_v19 = vld [vmem:[#allocation91_spill] sm:$0xff] }
 0x6b6   :  { %v5896_v11 = vadd.f32 %v1901_v39, %v1900_v2  ;;  %v3622_v2 = vld [vmem:[%s7225_s15] ss:$0 sm:$0xff]  ;;  %v1920_v39 = vpop.f32.mrf.mxu0  ;;  %s1985_s15 = sld [smem:[#allocation3]] }
 0x6b8   :  { %1939 = vmatmul.f32.vlgmr.msrb.gmra.mxu1 %v5896_v11 }
 0x6b9   :  { %2164 = vmatpush.msrb.mxu1 %v7755_v63  ;;  %v5920_v63 = vadd.f32 %v3622_v2, %v5807_v27  ;;  %v5928_v27 = vld [vmem:[#allocation23 + $0x70] sm:$0xff]  ;;  %v5943_v2 = vld [vmem:[#allocation23 + $0x48] sm:$0xff] }
 0x6ba   :  { %7769 = vst [vmem:[#allocation40_spill] sm:$0xff] %v5943_v2 }
 0x6bb   :  { %2165 = vmatpush.msrb.mxu1 %v7756_v23  ;;  %7767 = vst [vmem:[#allocation36_spill] sm:$0xff] %v5920_v63  ;;  %v1921_v23 = vadd.f32 %v1920_v39, %v5920_v63  ;;  %v5946_v39 = vld [vmem:[#allocation23 + $0x40] sm:$0xff] }
 0x6bc   :  { %7770 = vst [vmem:[#allocation44_spill] sm:$0xff] %v5946_v39  ;;  %p1986_p0 = scmp.gt.s32.totalorder %s1985_s15, 0  ;;  %s4458_s15 = smov [#allocation25]  }
 0x6bd   :  { %2166 = vmatpush.msrb.mxu1 %v7757_v37 }
 0x6be   :  { %s1987_s25 = scalar_select %p1986_p0, 1, 0 }
 0x6bf   :  { %2167 = vmatpush.msrb.mxu1 %v7758_v10 }
 0x6c0   :  { %s1988_s13 = scvt.s32.f32 %s1987_s25  ;;  %s3525_s25 = sshll.u32 %s4458_s15, 4  ;;  %s3526_s25 = int_to_ptr.vmem [resolvable:$true] %s3525_s25 }
 0x6c1   :  { %2168 = vmatpush.msrb.mxu1 %v7759_v6 }
 0x6c2   :  { %s1992_s5 = ssub.f32 1.0, %s1988_s13 }
 0x6c3   :  { %2169 = vmatpush.msrb.mxu1 %v7760_v32 }
 0x6c5   :  { %2170 = vmatpush.msrb.mxu1 %v7761_v45 }
 0x6c7   :  { %2171 = vmatpush.msrb.mxu1 %v7762_v51  ;;  %v5926_v51 = vld [vmem:[#allocation23 + $0x78] sm:$0xff] }
 0x6c8   :  { %1965 = vmatpush.msrb.mxu2 %v5926_v51 }
 0x6c9   :  { %2172 = vmatpush.msrb.mxu1 %v7763_v54  ;;  %v5931_v54 = vld [vmem:[#allocation23 + $0x68] sm:$0xff] }
 0x6ca   :  { %1966 = vmatpush.msrb.mxu2 %v5928_v27 }
 0x6cb   :  { %2173 = vmatpush.msrb.mxu1 %v7764_v62  ;;  %v5934_v62 = vld [vmem:[#allocation23 + $0x60] sm:$0xff] }
 0x6cc   :  { %1967 = vmatpush.msrb.mxu2 %v5931_v54 }
 0x6cd   :  { %2174 = vmatpush.msrb.mxu1 %v7765_v41  ;;  %v5937_v41 = vld [vmem:[#allocation23 + $0x58] sm:$0xff] }
 0x6ce   :  { %1968 = vmatpush.msrb.mxu2 %v5934_v62 }
 0x6cf   :  { %2175 = vmatpush.msrb.mxu1 %v7766_v19  ;;  %v5940_v19 = vld [vmem:[#allocation23 + $0x50] sm:$0xff] }
 0x6d0   :  { %7768 = vst [vmem:[#allocation50_spill] sm:$0xff] %v5940_v19  ;;  %1969 = vmatpush.msrb.mxu2 %v5937_v41 }
 0x6d1   :  { %2176 = vmatpush.msrb.mxu1 %v5706_v22  ;;  %v1729_v22 = vlaneseq }
 0x6d2   :  { %1970 = vmatpush.msrb.mxu2 %v5940_v19 }
 0x6d3   :  { %2177 = vmatpush.msrb.mxu1 %v5715_v20  ;;  %v5923_v20 = vand.u32 127, %v1729_v22  ;;  %v5958_v22 = vld [vmem:[#allocation23 + $0x20] sm:$0xff] }
 0x6d4   :  { %1971 = vmatpush.msrb.mxu2 %v5943_v2  ;;  %7774 = vst [vmem:[#allocation39_spill] sm:$0xff] %v5958_v22 }
 0x6d5   :  { %2178 = vmatpush.msrb.mxu1 %v5724_v8 }
 0x6d6   :  { %1972 = vmatpush.msrb.mxu2 %v5946_v39 }
 0x6d7   :  { %2179 = vmatpush.msrb.mxu1 %v5733_v13  ;;  %v5967_v13 = vld [vmem:[#allocation23 + $0x8] sm:$0xff] }
 0x6d8   :  { %7777 = vst [vmem:[#allocation51_spill] sm:$0xff] %v5967_v13 }
 0x735   :  { %v1940_v37 = vpop.f32.mrf.mxu1 }
 0x736   :  { %v1941_v10 = vadd.f32 %v1940_v37, %v1921_v23  ;;  %v5949_v23 = vld [vmem:[#allocation23 + $0x38] sm:$0xff]  ;;  %v5952_v37 = vld [vmem:[#allocation23 + $0x30] sm:$0xff] }
 0x737   :  { %7771 = vst [vmem:[#allocation43_spill] sm:$0xff] %v5949_v23  ;;  %1973 = vmatpush.msrb.mxu2 %v5949_v23 }
 0x738   :  { %1943 = vst [vmem:[#allocation25] sm:$0xff] %v1941_v10  ;;  %1944 = vmax.xlane.f32.xlu0 %v1941_v10 }
 0x739   :  { %7772 = vst [vmem:[#allocation46_spill] sm:$0xff] %v5952_v37  ;;  %1974 = vmatpush.msrb.mxu2 %v5952_v37 }
 0x7ab   :  { %v1945_v8 = vpop.xlane.xlu0 %1944 }
 0x7ac   :  { %vm1946_vm8 = vcmp.eq.f32.partialorder %v1941_v10, %v1945_v8  ;;  %v5955_v10 = vld [vmem:[#allocation23 + $0x28] sm:$0xff]  ;;  %v5961_v8 = vld [vmem:[#allocation23 + $0x18] sm:$0xff] }
 0x7ad   :  { %v1947_v6 = vsel %vm1946_vm8, %v5923_v20, 128  ;;  %7773 = vst [vmem:[#allocation53_spill] sm:$0xff] %v5955_v10  ;;  %1975 = vmatpush.msrb.mxu2 %v5955_v10 }
 0x7ae   :  { %v1949_v32 = vshra.s32 %v1947_v6, 16  ;;  %7775 = vst [vmem:[#allocation35_spill] sm:$0xff] %v5961_v8  ;;  %v1948_v63 = vand.u32 65535, %v1947_v6  ;;  %v7780_v6 = vld [vmem:[#allocation42_spill] sm:$0xff] }
 0x7af   :  { %1976 = vmatpush.msrb.mxu2 %v5958_v22 }
 0x7b0   :  { %v1951_v45 = vcvt.s32.f32 %v1949_v32  ;;  %v5964_v32 = vld [vmem:[#allocation23 + $0x10] sm:$0xff]  ;;  %v1950_v42 = vcvt.s32.f32 %v1948_v63 }
 0x7b1   :  { %7776 = vst [vmem:[#allocation55_spill] sm:$0xff] %v5964_v32  ;;  %1977 = vmatpush.msrb.mxu2 %v5961_v8  ;;  %v7784_v63 = vld [vmem:[#allocation54_spill] sm:$0xff] }
 0x7b2   :  { %1952 = vmin.xlane.f32.xlu0 %v1951_v45 }
 0x7b3   :  { %1978 = vmatpush.msrb.mxu2 %v5964_v32 }
 0x7b5   :  { %1979 = vmatpush.msrb.mxu2 %v5967_v13 }
 0x7b7   :  { %1980 = vmatpush.msrb.mxu2 %v5970_v16 }
 0x7b9   :  { %2056 = vmatpush.msra.mxu2 %v5974_v7 }
 0x7bb   :  { %2057 = vmatpush.msra.mxu2 %v7780_v6  ;;  %v7791_v6 = vld [vmem:[#allocation63_spill] sm:$0xff] }
 0x7bd   :  { %2058 = vmatpush.msra.mxu2 %v7781_v55  ;;  %v7792_v55 = vld [vmem:[#allocation64_spill] sm:$0xff] }
 0x7bf   :  { %2059 = vmatpush.msra.mxu2 %v7782_v28  ;;  %v7793_v28 = vld [vmem:[#allocation65_spill] sm:$0xff] }
 0x7c1   :  { %2060 = vmatpush.msra.mxu2 %v7783_v43  ;;  %v7794_v43 = vld [vmem:[#allocation66_spill] sm:$0xff] }
 0x7c3   :  { %2061 = vmatpush.msra.mxu2 %v7784_v63 }
 0x7c5   :  { %2062 = vmatpush.msra.mxu2 %v7785_v36 }
 0x825   :  { %v1953_v40 = vpop.xlane.xlu0 %1952 }
 0x826   :  { %vm1954_vm9 = vcmp.eq.f32.partialorder %v1951_v45, %v1953_v40  ;;  %v7787_v45 = vld [vmem:[#allocation56_spill] sm:$0xff]  ;;  %v1959_v63 = vcvt.f32.s32 %v1953_v40  ;;  %v6023_v40 = vld [vmem:[#allocation16 + $0x118] sm:$0xff] }
 0x827   :  { %v1955_v30 = vsel %vm1954_vm9, %v1950_v42, inf  ;;  %v7786_v42 = vld [vmem:[#allocation38_spill] sm:$0xff] }
 0x828   :  { %1956 = vmin.xlane.f32.xlu1 %v1955_v30  ;;  %2063 = vmatpush.msra.mxu2 %v7786_v42  ;;  %v7788_v30 = vld [vmem:[#allocation58_spill] sm:$0xff]  ;;  %v1960_v3 = vshll.u32 %v1959_v63, 16  ;;  %v6041_v63 = vld [vmem:[#allocation16 + $0x88] sm:$0xff] }
 0x829   :  { %7797 = vst [vmem:[#allocation67_spill] sm:$0xff] %v6041_v63 }
 0x82a   :  { %2064 = vmatpush.msra.mxu2 %v7787_v45  ;;  %v7337_v45 = vmov 1.0  }
 0x82c   :  { %2065 = vmatpush.msra.mxu2 %v7788_v30  ;;  %v6026_v30 = vld [vmem:[#allocation16 + $0x100] sm:$0xff] }
 0x82e   :  { %2066 = vmatpush.msra.mxu2 %v7789_v49  ;;  %v6020_v49 = vld [vmem:[#allocation16 + $0x130] sm:$0xff] }
 0x830   :  { %2067 = vmatpush.msra.mxu2 %v7790_v14  ;;  %v6017_v14 = vld [vmem:[#allocation16 + $0x148] sm:$0xff] }
 0x832   :  { %2068 = vmatpush.msra.mxu2 %v7791_v6  ;;  %v6029_v6 = vld [vmem:[#allocation16 + $0xe8] sm:$0xff] }
 0x834   :  { %2069 = vmatpush.msra.mxu2 %v7792_v55  ;;  %v6032_v55 = vld [vmem:[#allocation16 + $0xd0] sm:$0xff] }
 0x836   :  { %2070 = vmatpush.msra.mxu2 %v7793_v28  ;;  %v6035_v28 = vld [vmem:[#allocation16 + $0xb8] sm:$0xff] }
 0x837   :  { %7795 = vst [vmem:[#allocation61_spill] sm:$0xff] %v6035_v28 }
 0x838   :  { %2071 = vmatpush.msra.mxu2 %v7794_v43  ;;  %v6038_v43 = vld [vmem:[#allocation16 + $0xa0] sm:$0xff] }
 0x839   :  { %7796 = vst [vmem:[#allocation41_spill] sm:$0xff] %v6038_v43 }
 0x89b   :  { %v1957_v36 = vpop.xlane.xlu1 %1956 }
 0x89c   :  { %v1958_v42 = vcvt.f32.s32 %v1957_v36  ;;  %v1989_v36 = vld [vmem:[#allocation10] sm:$0xff] }
 0x89e   :  { %v1961_v53 = vadd.s32 %v1960_v3, %v1958_v42  ;;  %v6014_v3 = vld [vmem:[#allocation16 + $0x160] sm:$0xff]  ;;  %v1990_v42 = vstv %s1988_s13 }
 0x8a0   :  { %vm1962_vm10 = vcmp.eq.s32.totalorder %v5923_v20, %v1961_v53  ;;  %v6011_v53 = vld [vmem:[#allocation16 + $0x178] sm:$0xff] }
 0x8a1   :  { %3573 = vmatmul.msk.f32.vlgmr.msrb.gmra.mxu2 %vm1962_vm10, %v7337_v45  ;;  %v1993_v45 = vstv %s1992_s5 }
 0x8a2   :  { %2184 = vmatpush.msrb.mxu2 %v5817_v56 }
 0x8a4   :  { %2185 = vmatpush.msrb.mxu2 %v5821_v52 }
 0x8a6   :  { %2186 = vmatpush.msrb.mxu2 %v5824_v50 }
 0x8a8   :  { %2187 = vmatpush.msrb.mxu2 %v5827_v47 }
 0x8a9   :  { %2072 = vmatmul.f32.vlgmr.msra.gmra.mxu2 %v5896_v11 }
 0x8aa   :  { %2188 = vmatpush.msrb.mxu2 %v5830_v24 }
 0x8ac   :  { %2189 = vmatpush.msrb.mxu2 %v5833_v46 }
 0x8ae   :  { %2190 = vmatpush.msrb.mxu2 %v5836_v60 }
 0x8b0   :  { %2191 = vmatpush.msrb.mxu2 %v5839_v15 }
 0x8b2   :  { %2192 = vmatpush.msrb.mxu2 %v5842_v26 }
 0x8b4   :  { %2193 = vmatpush.msrb.mxu2 %v5845_v5 }
 0x8b6   :  { %2194 = vmatpush.msrb.mxu2 %v5849_v4 }
 0x8b8   :  { %2195 = vmatpush.msrb.mxu2 %v5852_v58 }
 0x8ba   :  { %2196 = vmatpush.msrb.mxu2 %v5857_v12 }
 0x8bc   :  { %2197 = vmatpush.msrb.mxu2 %v5861_v33 }
 0x8be   :  { %2198 = vmatpush.msrb.mxu2 %v5864_v9 }
 0x8c0   :  { %2199 = vmatpush.msrb.mxu2 %v5866_v57 }
 0x8c2   :  { %2299 = vmatpush.msra.mxu2 %v6011_v53 }
 0x8c4   :  { %2300 = vmatpush.msra.mxu2 %v6014_v3 }
 0x8c6   :  { %2301 = vmatpush.msra.mxu2 %v6017_v14 }
 0x8c8   :  { %2302 = vmatpush.msra.mxu2 %v6020_v49 }
 0x8ca   :  { %2303 = vmatpush.msra.mxu2 %v6023_v40 }
 0x8cc   :  { %2304 = vmatpush.msra.mxu2 %v6026_v30 }
 0x8ce   :  { %2305 = vmatpush.msra.mxu2 %v6029_v6 }
 0x8d0   :  { %2306 = vmatpush.msra.mxu2 %v6032_v55 }
 0x8d2   :  { %2307 = vmatpush.msra.mxu2 %v6035_v28 }
 0x8d4   :  { %2308 = vmatpush.msra.mxu2 %v6038_v43  ;;  %v1991_v43 = vmul.f32 %v1990_v42, %v1989_v36  ;;  %v6081_v36 = vld [vmem:[#allocation16 + $0x108] sm:$0xff]  ;;  %v6084_v42 = vld [vmem:[#allocation16 + $0x110] sm:$0xff] }
 0x8d5   :  { %7799 = vst [vmem:[#allocation69_spill] sm:$0xff] %v6081_v36 }
 0x8d6   :  { %2309 = vmatpush.msra.mxu2 %v6041_v63 }
 0x8d8   :  { %2310 = vmatpush.msra.mxu2 %v7750_v38 }
 0x8da   :  { %2311 = vmatpush.msra.mxu2 %v7751_v31  ;;  %v6050_v31 = vld [vmem:[#allocation16 + $0x168] sm:$0xff] }
 0x8dc   :  { %2312 = vmatpush.msra.mxu2 %v7752_v48  ;;  %v6053_v48 = vld [vmem:[#allocation16 + $0x170] sm:$0xff] }
 0x8de   :  { %2313 = vmatpush.msra.mxu2 %v7753_v59  ;;  %v6057_v59 = vld [vmem:[#allocation16 + $0x150] sm:$0xff] }
 0x8e0   :  { %2314 = vmatpush.msra.mxu2 %v7754_v25  ;;  %v6060_v25 = vld [vmem:[#allocation16 + $0x158] sm:$0xff] }
 0x924   :  { %v1982_v63 = vpop.f32.mrf.mxu2 }
 0x925   :  { %v1994_v28 = vmul.f32 %v1993_v45, %v1982_v63  ;;  %v6064_v45 = vld [vmem:[#allocation16 + $0x138] sm:$0xff]  ;;  %v6077_v63 = vld [vmem:[#allocation16 + $0x128] sm:$0xff] }
 0x927   :  { %v1995_v38 = vadd.f32 %v1994_v28, %v1991_v43  ;;  %v6067_v28 = vld [vmem:[#allocation16 + $0x140] sm:$0xff] }
 0x928   :  { %v6074_v43 = vld [vmem:[#allocation16 + $0x120] sm:$0xff] }
 0x929   :  { %2012 = vmatmul.f32.vlgmr.msra.gmra.mxu3 %v1995_v38  ;;  %2032 = vmatmul.f32.vlgmr.msra.gmra.mxu0 %v1995_v38  ;;  %7798 = vst [vmem:[#allocation68_spill] sm:$0xff] %v6074_v43 }
 0x92a   :  { %2052 = vmatmul.f32.vlgmr.msra.gmra.mxu1 %v1995_v38  ;;  %2227 = vmatpush.msra.mxu3 %v5926_v51 }
 0x92b   :  { %2259 = vmatpush.msra.mxu0 %v6050_v31  ;;  %2279 = vmatpush.msra.mxu1 %v6053_v48 }
 0x92c   :  { %2228 = vmatpush.msra.mxu3 %v5928_v27 }
 0x92d   :  { %2260 = vmatpush.msra.mxu0 %v6057_v59  ;;  %2280 = vmatpush.msra.mxu1 %v6060_v25 }
 0x92e   :  { %2229 = vmatpush.msra.mxu3 %v5931_v54 }
 0x92f   :  { %2261 = vmatpush.msra.mxu0 %v6064_v45  ;;  %2281 = vmatpush.msra.mxu1 %v6067_v28 }
 0x930   :  { %2230 = vmatpush.msra.mxu3 %v5934_v62 }
 0x931   :  { %2092 = vmatmul.f32.vlgmr.msrb.gmra.mxu3 %v5896_v11  ;;  %2112 = vmatmul.f32.vlgmr.msrb.gmra.mxu0 %v5896_v11 }
 0x932   :  { %2180 = vmatmul.f32.vlgmr.msrb.gmra.mxu1 %v1995_v38  ;;  %2231 = vmatpush.msra.mxu3 %v5937_v41  ;;  %v6088_v38 = vld [vmem:[#allocation16 + $0xf0] sm:$0xff] }
 0x933   :  { %2262 = vmatpush.msra.mxu0 %v6074_v43  ;;  %2282 = vmatpush.msra.mxu1 %v6077_v63  ;;  %7800 = vst [vmem:[#allocation70_spill] sm:$0xff] %v6088_v38  ;;  %v6091_v43 = vld [vmem:[#allocation16 + $0xf8] sm:$0xff] }
 0x934   :  { %2232 = vmatpush.msra.mxu3 %v5940_v19  ;;  %7801 = vst [vmem:[#allocation73_spill] sm:$0xff] %v6091_v43  ;;  %v6095_v19 = vld [vmem:[#allocation16 + $0xd8] sm:$0xff] }
 0x935   :  { %2263 = vmatpush.msra.mxu0 %v6081_v36  ;;  %2283 = vmatpush.msra.mxu1 %v6084_v42  ;;  %7802 = vst [vmem:[#allocation76_spill] sm:$0xff] %v6095_v19  ;;  %v6098_v36 = vld [vmem:[#allocation16 + $0xe0] sm:$0xff] }
 0x936   :  { %2233 = vmatpush.msra.mxu3 %v5943_v2  ;;  %7803 = vst [vmem:[#allocation79_spill] sm:$0xff] %v6098_v36  ;;  %v6102_v2 = vld [vmem:[#allocation16 + $0xc0] sm:$0xff] }
 0x937   :  { %2264 = vmatpush.msra.mxu0 %v6088_v38  ;;  %2284 = vmatpush.msra.mxu1 %v6091_v43  ;;  %7804 = vst [vmem:[#allocation82_spill] sm:$0xff] %v6102_v2  ;;  %v6105_v38 = vld [vmem:[#allocation16 + $0xc8] sm:$0xff] }
 0x938   :  { %2234 = vmatpush.msra.mxu3 %v5946_v39  ;;  %7805 = vst [vmem:[#allocation85_spill] sm:$0xff] %v6105_v38  ;;  %v6109_v39 = vld [vmem:[#allocation16 + $0xa8] sm:$0xff] }
 0x939   :  { %2265 = vmatpush.msra.mxu0 %v6095_v19  ;;  %2285 = vmatpush.msra.mxu1 %v6098_v36  ;;  %7806 = vst [vmem:[#allocation88_spill] sm:$0xff] %v6109_v39  ;;  %v6112_v19 = vld [vmem:[#allocation16 + $0xb0] sm:$0xff] }
 0x93a   :  { %2235 = vmatpush.msra.mxu3 %v5949_v23  ;;  %7807 = vst [vmem:[#allocation91_spill] sm:$0xff] %v6112_v19  ;;  %v6116_v23 = vld [vmem:[#allocation16 + $0x90] sm:$0xff] }
 0x93b   :  { %2266 = vmatpush.msra.mxu0 %v6102_v2  ;;  %2286 = vmatpush.msra.mxu1 %v6105_v38  ;;  %7808 = vst [vmem:[#allocation42_spill] sm:$0xff] %v6116_v23  ;;  %v6119_v2 = vld [vmem:[#allocation16 + $0x98] sm:$0xff] }
 0x93c   :  { %2236 = vmatpush.msra.mxu3 %v5952_v37  ;;  %7809 = vst [vmem:[#allocation47_spill] sm:$0xff] %v6119_v2  ;;  %v6123_v37 = vld [vmem:[#allocation16 + $0x78] sm:$0xff] }
 0x93d   :  { %2267 = vmatpush.msra.mxu0 %v6109_v39  ;;  %2287 = vmatpush.msra.mxu1 %v6112_v19  ;;  %7810 = vst [vmem:[#allocation37_spill] sm:$0xff] %v6123_v37  ;;  %v6126_v39 = vld [vmem:[#allocation16 + $0x80] sm:$0xff] }
 0x93e   :  { %2237 = vmatpush.msra.mxu3 %v5955_v10  ;;  %7811 = vst [vmem:[#allocation48_spill] sm:$0xff] %v6126_v39  ;;  %v6130_v10 = vld [vmem:[#allocation16 + $0x60] sm:$0xff] }
 0x93f   :  { %2268 = vmatpush.msra.mxu0 %v6116_v23  ;;  %2288 = vmatpush.msra.mxu1 %v6119_v2  ;;  %7812 = vst [vmem:[#allocation54_spill] sm:$0xff] %v6130_v10  ;;  %v6133_v23 = vld [vmem:[#allocation16 + $0x68] sm:$0xff] }
 0x940   :  { %2238 = vmatpush.msra.mxu3 %v5958_v22  ;;  %7813 = vst [vmem:[#allocation49_spill] sm:$0xff] %v6133_v23  ;;  %v6137_v22 = vld [vmem:[#allocation16 + $0x48] sm:$0xff] }
 0x941   :  { %2269 = vmatpush.msra.mxu0 %v6123_v37  ;;  %2289 = vmatpush.msra.mxu1 %v6126_v39  ;;  %7814 = vst [vmem:[#allocation38_spill] sm:$0xff] %v6137_v22  ;;  %v6140_v37 = vld [vmem:[#allocation16 + $0x50] sm:$0xff] }
 0x942   :  { %2239 = vmatpush.msra.mxu3 %v5961_v8  ;;  %7815 = vst [vmem:[#allocation56_spill] sm:$0xff] %v6140_v37  ;;  %v6144_v8 = vld [vmem:[#allocation16 + $0x30] sm:$0xff] }
 0x943   :  { %2270 = vmatpush.msra.mxu0 %v6130_v10  ;;  %2290 = vmatpush.msra.mxu1 %v6133_v23  ;;  %7816 = vst [vmem:[#allocation58_spill] sm:$0xff] %v6144_v8  ;;  %v6147_v10 = vld [vmem:[#allocation16 + $0x38] sm:$0xff]  ;;  %v7862_v23 = vld [vmem:[#allocation45_spill] sm:$0xff] }
 0x944   :  { %2240 = vmatpush.msra.mxu3 %v5964_v32  ;;  %7817 = vst [vmem:[#allocation60_spill] sm:$0xff] %v6147_v10  ;;  %v6152_v32 = vld [vmem:[#allocation16 + $0x18] sm:$0xff] }
 0x945   :  { %2271 = vmatpush.msra.mxu0 %v6137_v22  ;;  %2291 = vmatpush.msra.mxu1 %v6140_v37  ;;  %7818 = vst [vmem:[#allocation62_spill] sm:$0xff] %v6152_v32  ;;  %v6155_v22 = vld [vmem:[#allocation16 + $0x20] sm:$0xff] }
 0x946   :  { %2241 = vmatpush.msra.mxu3 %v5967_v13  ;;  %7819 = vst [vmem:[#allocation63_spill] sm:$0xff] %v6155_v22  ;;  %v6158_v13 = vld [vmem:[#allocation19 + $0x150] sm:$0xff] }
 0x947   :  { %2272 = vmatpush.msra.mxu0 %v6144_v8  ;;  %2292 = vmatpush.msra.mxu1 %v6147_v10  ;;  %7820 = vst [vmem:[#allocation64_spill] sm:$0xff] %v6158_v13  ;;  %v6161_v8 = vld [vmem:[#allocation16] sm:$0xff]  ;;  %v6164_v10 = vld [vmem:[#allocation16 + $0x8] sm:$0xff] }
 0x948   :  { %2242 = vmatpush.msra.mxu3 %v5970_v16  ;;  %7821 = vst [vmem:[#allocation65_spill] sm:$0xff] %v6161_v8 }
 0x949   :  { %2273 = vmatpush.msra.mxu0 %v6152_v32  ;;  %2293 = vmatpush.msra.mxu1 %v6155_v22  ;;  %7822 = vst [vmem:[#allocation66_spill] sm:$0xff] %v6164_v10  ;;  %v6173_v22 = vld [vmem:[#allocation19 + $0x120] sm:$0xff] }
 0x94a   :  { %2319 = vmatpush.msrb.mxu3 %v5974_v7  ;;  %v6168_v7 = vld [vmem:[#allocation19 + $0x138] sm:$0xff]  ;;  %7824 = vst [vmem:[#allocation104_spill] sm:$0xff] %v6173_v22 }
 0x94b   :  { %2274 = vmatpush.msra.mxu0 %v6161_v8  ;;  %2294 = vmatpush.msra.mxu1 %v6164_v10  ;;  %7823 = vst [vmem:[#allocation103_spill] sm:$0xff] %v6168_v7  ;;  %v6178_v8 = vld [vmem:[#allocation19 + $0x108] sm:$0xff]  ;;  %v7860_v10 = vld [vmem:[#allocation102_spill] sm:$0xff] }
 0x94c   :  { %2320 = vmatpush.msrb.mxu3 %v6158_v13  ;;  %7825 = vst [vmem:[#allocation105_spill] sm:$0xff] %v6178_v8 }
 0x94d   :  { %2339 = vmatpush.msrb.mxu0 %v5586_v44  ;;  %2359 = vmatpush.msrb.mxu1 %v5588_v61  ;;  %v6183_v44 = vld [vmem:[#allocation19 + $0xf0] sm:$0xff]  ;;  %v6188_v61 = vld [vmem:[#allocation19 + $0xd8] sm:$0xff] }
 0x94e   :  { %2321 = vmatpush.msrb.mxu3 %v6168_v7  ;;  %7826 = vst [vmem:[#allocation106_spill] sm:$0xff] %v6183_v44 }
 0x94f   :  { %2340 = vmatpush.msrb.mxu0 %v5596_v1  ;;  %2360 = vmatpush.msrb.mxu1 %v5598_v18  ;;  %7827 = vst [vmem:[#allocation107_spill] sm:$0xff] %v6188_v61  ;;  %v7828_v1 = vld [vmem:[#allocation71_spill] sm:$0xff]  ;;  %v6193_v18 = vld [vmem:[#allocation19 + $0xc0] sm:$0xff] }
 0x950   :  { %2322 = vmatpush.msrb.mxu3 %v6173_v22  ;;  %7829 = vst [vmem:[#allocation71_spill] sm:$0xff] %v6193_v18 }
 0x951   :  { %2341 = vmatpush.msrb.mxu0 %v5605_v0  ;;  %2361 = vmatpush.msrb.mxu1 %v5607_v17  ;;  %v7830_v0 = vld [vmem:[#allocation72_spill] sm:$0xff]  ;;  %v7831_v17 = vld [vmem:[#allocation74_spill] sm:$0xff] }
 0x952   :  { %2323 = vmatpush.msrb.mxu3 %v6178_v8 }
 0x953   :  { %2342 = vmatpush.msrb.mxu0 %v5614_v21  ;;  %2362 = vmatpush.msrb.mxu1 %v5616_v29  ;;  %v6198_v21 = vld [vmem:[#allocation19 + $0xa8] sm:$0xff]  ;;  %v7833_v29 = vld [vmem:[#allocation75_spill] sm:$0xff] }
 0x954   :  { %2324 = vmatpush.msrb.mxu3 %v6183_v44  ;;  %7832 = vst [vmem:[#allocation72_spill] sm:$0xff] %v6198_v21 }
 0x955   :  { %2343 = vmatpush.msrb.mxu0 %v5627_v35  ;;  %2363 = vmatpush.msrb.mxu1 %v5631_v34  ;;  %v7834_v35 = vld [vmem:[#allocation77_spill] sm:$0xff]  ;;  %v7836_v34 = vld [vmem:[#allocation78_spill] sm:$0xff] }
 0x956   :  { %2325 = vmatpush.msrb.mxu3 %v6188_v61  ;;  %v6203_v61 = vld [vmem:[#allocation19 + $0x90] sm:$0xff] }
 0x957   :  { %2344 = vmatpush.msrb.mxu0 %v7828_v1  ;;  %2364 = vmatpush.msrb.mxu1 %v7830_v0  ;;  %7835 = vst [vmem:[#allocation74_spill] sm:$0xff] %v6203_v61  ;;  %v7837_v1 = vld [vmem:[#allocation80_spill] sm:$0xff]  ;;  %v7839_v0 = vld [vmem:[#allocation81_spill] sm:$0xff] }
 0x958   :  { %2326 = vmatpush.msrb.mxu3 %v6193_v18  ;;  %v6208_v18 = vld [vmem:[#allocation19 + $0x78] sm:$0xff] }
 0x959   :  { %2345 = vmatpush.msrb.mxu0 %v7831_v17  ;;  %2365 = vmatpush.msrb.mxu1 %v7833_v29  ;;  %7838 = vst [vmem:[#allocation75_spill] sm:$0xff] %v6208_v18  ;;  %v7840_v17 = vld [vmem:[#allocation83_spill] sm:$0xff]  ;;  %v7842_v29 = vld [vmem:[#allocation84_spill] sm:$0xff] }
 0x95a   :  { %2327 = vmatpush.msrb.mxu3 %v6198_v21  ;;  %v6213_v21 = vld [vmem:[#allocation19 + $0x60] sm:$0xff] }
 0x95b   :  { %2346 = vmatpush.msrb.mxu0 %v7834_v35  ;;  %2366 = vmatpush.msrb.mxu1 %v7836_v34  ;;  %7841 = vst [vmem:[#allocation77_spill] sm:$0xff] %v6213_v21  ;;  %v7843_v35 = vld [vmem:[#allocation86_spill] sm:$0xff]  ;;  %v7845_v34 = vld [vmem:[#allocation87_spill] sm:$0xff] }
 0x95c   :  { %2328 = vmatpush.msrb.mxu3 %v6203_v61  ;;  %v6218_v61 = vld [vmem:[#allocation19 + $0x48] sm:$0xff] }
 0x95d   :  { %2347 = vmatpush.msrb.mxu0 %v7837_v1  ;;  %2367 = vmatpush.msrb.mxu1 %v7839_v0  ;;  %7844 = vst [vmem:[#allocation78_spill] sm:$0xff] %v6218_v61  ;;  %v7846_v1 = vld [vmem:[#allocation89_spill] sm:$0xff]  ;;  %v7848_v0 = vld [vmem:[#allocation90_spill] sm:$0xff] }
 0x95e   :  { %2329 = vmatpush.msrb.mxu3 %v6208_v18  ;;  %v6223_v18 = vld [vmem:[#allocation19 + $0x30] sm:$0xff] }
 0x95f   :  { %2348 = vmatpush.msrb.mxu0 %v7840_v17  ;;  %2368 = vmatpush.msrb.mxu1 %v7842_v29  ;;  %7847 = vst [vmem:[#allocation80_spill] sm:$0xff] %v6223_v18  ;;  %v7849_v17 = vld [vmem:[#allocation92_spill] sm:$0xff]  ;;  %v7851_v29 = vld [vmem:[#allocation93_spill] sm:$0xff] }
 0x960   :  { %2330 = vmatpush.msrb.mxu3 %v6213_v21  ;;  %v6228_v21 = vld [vmem:[#allocation19 + $0x18] sm:$0xff] }
 0x961   :  { %2349 = vmatpush.msrb.mxu0 %v7843_v35  ;;  %2369 = vmatpush.msrb.mxu1 %v7845_v34  ;;  %7850 = vst [vmem:[#allocation81_spill] sm:$0xff] %v6228_v21  ;;  %v7852_v35 = vld [vmem:[#allocation94_spill] sm:$0xff]  ;;  %v7854_v34 = vld [vmem:[#allocation95_spill] sm:$0xff] }
 0x962   :  { %2331 = vmatpush.msrb.mxu3 %v6218_v61  ;;  %v6233_v61 = vld [vmem:[#allocation19] sm:$0xff] }
 0x963   :  { %2350 = vmatpush.msrb.mxu0 %v7846_v1  ;;  %2370 = vmatpush.msrb.mxu1 %v7848_v0  ;;  %7853 = vst [vmem:[#allocation83_spill] sm:$0xff] %v6233_v61  ;;  %v7855_v1 = vld [vmem:[#allocation96_spill] sm:$0xff]  ;;  %v7857_v0 = vld [vmem:[#allocation98_spill] sm:$0xff] }
 0x964   :  { %2332 = vmatpush.msrb.mxu3 %v6223_v18  ;;  %v7856_v18 = vld [vmem:[#allocation97_spill] sm:$0xff] }
 0x965   :  { %2351 = vmatpush.msrb.mxu0 %v7849_v17  ;;  %2371 = vmatpush.msrb.mxu1 %v7851_v29  ;;  %v7858_v17 = vld [vmem:[#allocation99_spill] sm:$0xff]  ;;  %v2073_v29 = vpop.f32.mrf.mxu2 }
 0x966   :  { %2333 = vmatpush.msrb.mxu3 %v6228_v21  ;;  %v7859_v21 = vld [vmem:[#allocation101_spill] sm:$0xff] }
 0x967   :  { %2352 = vmatpush.msrb.mxu0 %v7852_v35  ;;  %2372 = vmatpush.msrb.mxu1 %v7854_v34 }
 0x968   :  { %2334 = vmatpush.msrb.mxu3 %v6233_v61 }
 0x969   :  { %2353 = vmatpush.msrb.mxu0 %v7855_v1  ;;  %2373 = vmatpush.msrb.mxu1 %v7856_v18 }
 0x96b   :  { %2354 = vmatpush.msrb.mxu0 %v7857_v0  ;;  %2374 = vmatpush.msrb.mxu1 %v7858_v17 }
 0x9a6   :  { %v2033_v35 = vpop.f32.mrf.mxu0 }
 0x9a7   :  { %v2034_v13 = vadd.f32 %v2033_v35, %v7860_v10 }
 0x9ac   :  { %v2013_v44 = vpop.f32.mrf.mxu3 }
 0x9ad   :  { %v2014_v8 = vadd.f32 %v2013_v44, %v7859_v21 }
 0x9ae   :  { %v2113_v35 = vpop.f32.mrf.mxu0 }
 0x9af   :  { %v2116_v22 = vadd.f32 %v2073_v29, %v2014_v8 }
 0x9b1   :  { %v3574_v7 = vmul.f32 -1.442695, %v2116_v22 }
 0x9b3   :  { %3714 = vpow2.f32 %v3574_v7  ;;  %v2053_v7 = vpop.f32.mrf.mxu1 }
 0x9b4   :  { %v2093_v61 = vpop.f32.mrf.mxu3  ;;  %v2054_v39 = vadd.f32 %v2053_v7, %v7862_v23 }
 0x9b5   :  { %v2136_v34 = vadd.f32 %v2093_v61, %v2034_v13 }
 0x9b7   :  { %v3575_v32 = vmul.f32 -1.442695, %v2136_v34  ;;  %v7861_v34 = vld [vmem:[#allocation52_spill] sm:$0xff] }
 0x9b9   :  { %v3715_v1 = vpop.eup %3714  ;;  %3716 = vpow2.f32 %v3575_v32 }
 0x9ba   :  { %v2120_v18 = vadd.f32 1.0, %v3715_v1  ;;  %v2156_v1 = vadd.f32 %v7861_v34, %v2113_v35  ;;  %v6285_v34 = vld [vmem:[#allocation20 + $0x18] sm:$0xff] }
 0x9bb   :  { %7866 = vst [vmem:[#allocation89_spill] sm:$0xff] %v6285_v34 }
 0x9bc   :  { %3718 = vrcp.f32 %v2120_v18  ;;  %v2132_v21 = vand.u32 2147483648, %v2120_v18  ;;  %v2130_v22 = vand.u32 2147483647, %v2120_v18  ;;  %vm2126_vm12 = vweird.f32 %v2120_v18 }
 0x9be   :  { %v2133_v32 = vor.u32 1.1754944e-38, %v2132_v21  ;;  %vm2131_vm14 = vcmp.eq.f32.partialorder %v2130_v22, 8.507059e+37 }
 0x9bf   :  { %v3717_v0 = vpop.eup %3716 }
 0x9c0   :  { %v2140_v16 = vadd.f32 1.0, %v3717_v0 }
 0x9c2   :  { %v3719_v17 = vpop.eup %3718  ;;  %3720 = vrcp.f32 %v2140_v16  ;;  %v2152_v19 = vand.u32 2147483648, %v2140_v16  ;;  %v2150_v38 = vand.u32 2147483647, %v2140_v16  ;;  %vm2146_vm0 = vweird.f32 %v2140_v16 }
 0x9c3   :  { %v2122_v37 = vmul.f32 %v3719_v17, %v2120_v18  ;;  %vm2127_vm11 = vweird.f32 %v3719_v17 }
 0x9c4   :  { %vm2128_vm13 = vmor %vm2126_vm12, %vm2127_vm11  ;;  %v2153_v18 = vor.u32 1.1754944e-38, %v2152_v19  ;;  %vm2151_vm2 = vcmp.eq.f32.partialorder %v2150_v38, 8.507059e+37  ;;  %v6255_v19 = vld [vmem:[#allocation20 + $0x68] sm:$0xff]  ;;  %v6273_v38 = vld [vmem:[#allocation20 + $0x38] sm:$0xff] }
 0x9c5   :  { %v2123_v44 = vsub.f32 1.0, %v2122_v37 }
 0x9c7   :  { %v2124_v8 = vmul.f32 %v3719_v17, %v2123_v44 }
 0x9c8   :  { %v3721_v29 = vpop.eup %3720 }
 0x9c9   :  { %v2125_v10 = vadd.f32 %v3719_v17, %v2124_v8  ;;  %v2142_v13 = vmul.f32 %v3721_v29, %v2140_v16  ;;  %vm2147_vm15 = vweird.f32 %v3721_v29  ;;  %v6252_v16 = vld [vmem:[#allocation20 + $0x70] sm:$0xff] }
 0x9ca   :  { %vm2148_vm1 = vmor %vm2146_vm0, %vm2147_vm15 }
 0x9cb   :  { %v2129_v61 = vsel %vm2128_vm13, %v3719_v17, %v2125_v10  ;;  %v2143_v0 = vsub.f32 1.0, %v2142_v13  ;;  %v6249_v13 = vld [vmem:[#allocation20 + $0x78] sm:$0xff] }
 0x9cc   :  { %v2134_v37 = vsel %vm2131_vm14, %v2133_v32, %v2129_v61  ;;  %v6279_v32 = vld [vmem:[#allocation20 + $0x28] sm:$0xff]  ;;  %v6282_v61 = vld [vmem:[#allocation20 + $0x20] sm:$0xff] }
 0x9cd   :  { %v2157_v2 = vmul.f32 %v2156_v1, %v2134_v37  ;;  %v2144_v44 = vmul.f32 %v3721_v29, %v2143_v0  ;;  %7864 = vst [vmem:[#allocation86_spill] sm:$0xff] %v6279_v32  ;;  %v6288_v1 = vld [vmem:[#allocation20 + $0x10] sm:$0xff]  ;;  %v6291_v0 = vld [vmem:[#allocation20 + $0x8] sm:$0xff]  ;;  %v7869_v37 = vld [vmem:[#allocation100_spill] sm:$0xff] }
 0x9ce   :  { %7865 = vst [vmem:[#allocation87_spill] sm:$0xff] %v6282_v61 }
 0x9cf   :  { %v2158_v36 = vadd.f32 %v2157_v2, %v2054_v39  ;;  %v2145_v43 = vadd.f32 %v3721_v29, %v2144_v44  ;;  %v6258_v2 = vld [vmem:[#allocation20 + $0x60] sm:$0xff]  ;;  %v6264_v39 = vld [vmem:[#allocation20 + $0x50] sm:$0xff]  ;;  %7867 = vst [vmem:[#allocation90_spill] sm:$0xff] %v6288_v1  ;;  %v2181_v44 = vpop.f32.mrf.mxu1 }
 0x9d0   :  { %7868 = vst [vmem:[#allocation92_spill] sm:$0xff] %v6291_v0 }
 0x9d1   :  { %3722 = vtanh.f32 %v2158_v36  ;;  %v2149_v21 = vsel %vm2148_vm1, %v3721_v29, %v2145_v43  ;;  %v6267_v43 = vld [vmem:[#allocation20 + $0x48] sm:$0xff]  ;;  %v6270_v36 = vld [vmem:[#allocation20 + $0x40] sm:$0xff]  ;;  %v6276_v29 = vld [vmem:[#allocation20 + $0x30] sm:$0xff] }
 0x9d2   :  { %v2154_v10 = vsel %vm2151_vm2, %v2153_v18, %v2149_v21  ;;  %7863 = vst [vmem:[#allocation84_spill] sm:$0xff] %v6276_v29  ;;  %v7870_v18 = vld [vmem:[#allocation36_spill] sm:$0xff] }
 0x9d3   :  { %v2160_v17 = vsub.f32 1.0, %v2154_v10  ;;  %v2162_v35 = vmul.f32 %v2154_v10, %v5896_v11  ;;  %v6261_v11 = vld [vmem:[#allocation20 + $0x58] sm:$0xff]  ;;  %v2182_v21 = vadd.f32 %v2181_v44, %v7870_v18 }
 0x9d7   :  { %v3723_v8 = vpop.eup %3722 }
 0x9d8   :  { %v2161_v22 = vmul.f32 %v3723_v8, %v2160_v17 }
 0x9da   :  { %v6246_v7 = vadd.f32 %v2162_v35, %v2161_v22 }
 0x9dc   :  { %2200 = vmatmul.f32.vlgmr.msrb.gmra.mxu2 %v6246_v7 }
 0x9dd   :  { %2427 = vmatpush.msrb.mxu2 %v6249_v13 }
 0x9df   :  { %2428 = vmatpush.msrb.mxu2 %v6252_v16 }
 0x9e1   :  { %2429 = vmatpush.msrb.mxu2 %v6255_v19 }
 0x9e3   :  { %2430 = vmatpush.msrb.mxu2 %v6258_v2 }
 0x9e5   :  { %2431 = vmatpush.msrb.mxu2 %v6261_v11 }
 0x9e7   :  { %2432 = vmatpush.msrb.mxu2 %v6264_v39 }
 0x9e9   :  { %2433 = vmatpush.msrb.mxu2 %v6267_v43 }
 0x9eb   :  { %2434 = vmatpush.msrb.mxu2 %v6270_v36 }
 0x9ed   :  { %2435 = vmatpush.msrb.mxu2 %v6273_v38 }
 0x9ef   :  { %2436 = vmatpush.msrb.mxu2 %v6276_v29 }
 0x9f1   :  { %2437 = vmatpush.msrb.mxu2 %v6279_v32 }
 0x9f3   :  { %2438 = vmatpush.msrb.mxu2 %v6282_v61 }
 0x9f5   :  { %2439 = vmatpush.msrb.mxu2 %v6285_v34 }
 0x9f7   :  { %2440 = vmatpush.msrb.mxu2 %v6288_v1 }
 0x9f9   :  { %2441 = vmatpush.msrb.mxu2 %v6291_v0 }
 0x9fb   :  { %2442 = vmatpush.msrb.mxu2 %v7869_v37 }
 0xa5f   :  { %v2201_v10 = vpop.f32.mrf.mxu2 }
 0xa60   :  { %v2202_v17 = vadd.f32 %v2201_v10, %v2182_v21  ;;  %v7871_v10 = vmov 1.0  }
 0xa62   :  { %2205 = vst [vmem:[#allocation25 + $0x8] sm:$0xff] %v2202_v17  ;;  %2206 = vmax.xlane.f32.xlu1 %v2202_v17 }
 0xad5   :  { %v2207_v8 = vpop.xlane.xlu1 %2206 }
 0xad6   :  { %vm2208_vm3 = vcmp.eq.f32.partialorder %v2202_v17, %v2207_v8  ;;  %v7888_v17 = vld [vmem:[#allocation88_spill] sm:$0xff]  ;;  %v7889_v8 = vld [vmem:[#allocation91_spill] sm:$0xff] }
 0xad7   :  { %v2209_v22 = vsel %vm2208_vm3, %v5923_v20, 128 }
 0xad8   :  { %v2211_v35 = vshra.s32 %v2209_v22, 16  ;;  %v2210_v1 = vand.u32 65535, %v2209_v22  ;;  %v7890_v22 = vld [vmem:[#allocation53_spill] sm:$0xff] }
 0xada   :  { %v2213_v34 = vcvt.s32.f32 %v2211_v35  ;;  %v2212_v32 = vcvt.s32.f32 %v2210_v1  ;;  %v7885_v1 = vld [vmem:[#allocation82_spill] sm:$0xff] }
 0xadb   :  { %v7891_v35 = vld [vmem:[#allocation42_spill] sm:$0xff] }
 0xadc   :  { %2214 = vmin.xlane.f32.xlu2 %v2213_v34 }
 0xb4f   :  { %v2215_v61 = vpop.xlane.xlu2 %2214 }
 0xb50   :  { %vm2216_vm4 = vcmp.eq.f32.partialorder %v2213_v34, %v2215_v61  ;;  %v2221_v37 = vcvt.f32.s32 %v2215_v61  ;;  %v7882_v61 = vld [vmem:[#allocation76_spill] sm:$0xff]  ;;  %v7884_v34 = vld [vmem:[#allocation43_spill] sm:$0xff] }
 0xb51   :  { %v2217_v0 = vsel %vm2216_vm4, %v2212_v32, inf  ;;  %v7881_v32 = vld [vmem:[#allocation44_spill] sm:$0xff] }
 0xb52   :  { %2218 = vmin.xlane.f32.xlu2 %v2217_v0  ;;  %v2222_v44 = vshll.u32 %v2221_v37, 16  ;;  %v7886_v0 = vld [vmem:[#allocation85_spill] sm:$0xff]  ;;  %v7892_v37 = vld [vmem:[#allocation47_spill] sm:$0xff] }
 0xbc5   :  { %v2219_v29 = vpop.xlane.xlu2 %2218 }
 0xbc6   :  { %v2220_v18 = vcvt.f32.s32 %v2219_v29  ;;  %v7880_v29 = vld [vmem:[#allocation73_spill] sm:$0xff] }
 0xbc8   :  { %v2223_v21 = vadd.s32 %v2222_v44, %v2220_v18  ;;  %v7887_v18 = vld [vmem:[#allocation46_spill] sm:$0xff]  ;;  %v7893_v44 = vld [vmem:[#allocation39_spill] sm:$0xff] }
 0xbca   :  { %vm2224_vm5 = vcmp.eq.s32.totalorder %v5923_v20, %v2223_v21  ;;  %v7894_v21 = vld [vmem:[#allocation37_spill] sm:$0xff] }
 0xbcb   :  { %3577 = vmatmul.msk.f32.vlgmr.msra.gmra.mxu3 %vm2224_vm5, %v7871_v10 }
 0xbcc   :  { %2447 = vmatpush.msra.mxu3 %v5817_v56  ;;  %v7872_v56 = vld [vmem:[#allocation61_spill] sm:$0xff] }
 0xbce   :  { %2448 = vmatpush.msra.mxu3 %v5821_v52  ;;  %v7874_v52 = vld [vmem:[#allocation67_spill] sm:$0xff] }
 0xbd0   :  { %2449 = vmatpush.msra.mxu3 %v5824_v50  ;;  %v6327_v50 = vld [vmem:[#allocation16 + $0x70] sm:$0xff] }
 0xbd2   :  { %2450 = vmatpush.msra.mxu3 %v5827_v47  ;;  %v6330_v47 = vld [vmem:[#allocation16 + $0x58] sm:$0xff] }
 0xbd3   :  { %2335 = vmatmul.f32.vlgmr.msrb.gmra.mxu3 %v6246_v7 }
 0xbd4   :  { %2451 = vmatpush.msra.mxu3 %v5830_v24  ;;  %v6333_v24 = vld [vmem:[#allocation16 + $0x40] sm:$0xff] }
 0xbd6   :  { %2452 = vmatpush.msra.mxu3 %v5833_v46  ;;  %v6336_v46 = vld [vmem:[#allocation16 + $0x28] sm:$0xff] }
 0xbd8   :  { %2453 = vmatpush.msra.mxu3 %v5836_v60  ;;  %v6339_v60 = vld [vmem:[#allocation16 + $0x10] sm:$0xff] }
 0xbda   :  { %2454 = vmatpush.msra.mxu3 %v5839_v15  ;;  %v2252_v15 = vld [vmem:[#allocation10 + $0x8] sm:$0xff] }
 0xbdc   :  { %2455 = vmatpush.msra.mxu3 %v5842_v26  ;;  %v2253_v26 = vstv %s2250_s28 }
 0xbde   :  { %2456 = vmatpush.msra.mxu3 %v5845_v5  ;;  %v2256_v5 = vstv %s2255_s8 }
 0xbe0   :  { %2457 = vmatpush.msra.mxu3 %v5849_v4  ;;  %v2254_v4 = vmul.f32 %v2253_v26, %v2252_v15  ;;  %v7895_v15 = vld [vmem:[#allocation48_spill] sm:$0xff]  ;;  %v7896_v26 = vld [vmem:[#allocation35_spill] sm:$0xff] }
 0xbe2   :  { %2458 = vmatpush.msra.mxu3 %v5852_v58 }
 0xbe4   :  { %2459 = vmatpush.msra.mxu3 %v5857_v12 }
 0xbe6   :  { %2460 = vmatpush.msra.mxu3 %v5861_v33 }
 0xbe8   :  { %2461 = vmatpush.msra.mxu3 %v5864_v9  ;;  %v7873_v9 = vld [vmem:[#allocation41_spill] sm:$0xff] }
 0xbea   :  { %2462 = vmatpush.msra.mxu3 %v5866_v57  ;;  %v7875_v57 = vld [vmem:[#allocation68_spill] sm:$0xff] }
 0xbec   :  { %2562 = vmatpush.msrb.mxu3 %v6011_v53 }
 0xbee   :  { %2563 = vmatpush.msrb.mxu3 %v6014_v3 }
 0xbf0   :  { %2564 = vmatpush.msrb.mxu3 %v6017_v14 }
 0xbf2   :  { %2565 = vmatpush.msrb.mxu3 %v6020_v49 }
 0xbf4   :  { %2566 = vmatpush.msrb.mxu3 %v6023_v40 }
 0xbf6   :  { %2567 = vmatpush.msrb.mxu3 %v6026_v30 }
 0xbf8   :  { %2568 = vmatpush.msrb.mxu3 %v6029_v6 }
 0xbfa   :  { %2569 = vmatpush.msrb.mxu3 %v6032_v55 }
 0xbfc   :  { %2570 = vmatpush.msrb.mxu3 %v7872_v56 }
 0xbfe   :  { %2571 = vmatpush.msrb.mxu3 %v7873_v9 }
 0xc00   :  { %2572 = vmatpush.msrb.mxu3 %v7874_v52 }
 0xc02   :  { %2573 = vmatpush.msrb.mxu3 %v6327_v50 }
 0xc04   :  { %2574 = vmatpush.msrb.mxu3 %v6330_v47 }
 0xc06   :  { %2575 = vmatpush.msrb.mxu3 %v6333_v24 }
 0xc08   :  { %2576 = vmatpush.msrb.mxu3 %v6336_v46 }
 0xc0a   :  { %2577 = vmatpush.msrb.mxu3 %v6339_v60 }
 0xc4e   :  { %v2244_v58 = vpop.f32.mrf.mxu3 }
 0xc4f   :  { %v2257_v12 = vmul.f32 %v2256_v5, %v2244_v58  ;;  %v7897_v5 = vld [vmem:[#allocation54_spill] sm:$0xff]  ;;  %v7899_v58 = vld [vmem:[#allocation55_spill] sm:$0xff] }
 0xc51   :  { %v2258_v33 = vadd.f32 %v2257_v12, %v2254_v4  ;;  %v7898_v4 = vld [vmem:[#allocation49_spill] sm:$0xff]  ;;  %v7900_v12 = vld [vmem:[#allocation38_spill] sm:$0xff] }
 0xc53   :  { %2275 = vmatmul.f32.vlgmr.msra.gmra.mxu0 %v2258_v33  ;;  %2295 = vmatmul.f32.vlgmr.msra.gmra.mxu1 %v2258_v33 }
 0xc54   :  { %2315 = vmatmul.f32.vlgmr.msra.gmra.mxu2 %v2258_v33  ;;  %2490 = vmatpush.msra.mxu0 %v5926_v51  ;;  %v7876_v51 = vld [vmem:[#allocation50_spill] sm:$0xff] }
 0xc55   :  { %2522 = vmatpush.msra.mxu1 %v6050_v31  ;;  %2542 = vmatpush.msra.mxu2 %v6053_v48 }
 0xc56   :  { %2491 = vmatpush.msra.mxu0 %v5928_v27  ;;  %v7877_v27 = vld [vmem:[#allocation69_spill] sm:$0xff] }
 0xc57   :  { %2523 = vmatpush.msra.mxu1 %v6057_v59  ;;  %2543 = vmatpush.msra.mxu2 %v6060_v25 }
 0xc58   :  { %2492 = vmatpush.msra.mxu0 %v5931_v54  ;;  %v7878_v54 = vld [vmem:[#allocation40_spill] sm:$0xff] }
 0xc59   :  { %2524 = vmatpush.msra.mxu1 %v6064_v45  ;;  %2544 = vmatpush.msra.mxu2 %v6067_v28 }
 0xc5a   :  { %2493 = vmatpush.msra.mxu0 %v5934_v62  ;;  %v7879_v62 = vld [vmem:[#allocation70_spill] sm:$0xff] }
 0xc5b   :  { %2355 = vmatmul.f32.vlgmr.msrb.gmra.mxu0 %v6246_v7  ;;  %2375 = vmatmul.f32.vlgmr.msrb.gmra.mxu1 %v6246_v7 }
 0xc5c   :  { %2443 = vmatmul.f32.vlgmr.msrb.gmra.mxu2 %v2258_v33  ;;  %2494 = vmatpush.msra.mxu0 %v5937_v41  ;;  %v7883_v41 = vld [vmem:[#allocation79_spill] sm:$0xff]  ;;  %v7901_v33 = vld [vmem:[#allocation56_spill] sm:$0xff] }
 0xc5d   :  { %2525 = vmatpush.msra.mxu1 %v7875_v57  ;;  %2545 = vmatpush.msra.mxu2 %v6077_v63 }
 0xc5e   :  { %2495 = vmatpush.msra.mxu0 %v7876_v51  ;;  %v7902_v51 = vld [vmem:[#allocation51_spill] sm:$0xff] }
 0xc5f   :  { %2526 = vmatpush.msra.mxu1 %v7877_v27  ;;  %2546 = vmatpush.msra.mxu2 %v6084_v42 }
 0xc60   :  { %2496 = vmatpush.msra.mxu0 %v7878_v54  ;;  %v7903_v54 = vld [vmem:[#allocation58_spill] sm:$0xff] }
 0xc61   :  { %2527 = vmatpush.msra.mxu1 %v7879_v62  ;;  %2547 = vmatpush.msra.mxu2 %v7880_v29 }
 0xc62   :  { %2497 = vmatpush.msra.mxu0 %v7881_v32  ;;  %v7904_v32 = vld [vmem:[#allocation60_spill] sm:$0xff] }
 0xc63   :  { %2528 = vmatpush.msra.mxu1 %v7882_v61  ;;  %2548 = vmatpush.msra.mxu2 %v7883_v41 }
 0xc64   :  { %2498 = vmatpush.msra.mxu0 %v7884_v34  ;;  %v7905_v34 = vld [vmem:[#allocation57_spill] sm:$0xff] }
 0xc65   :  { %2529 = vmatpush.msra.mxu1 %v7885_v1  ;;  %2549 = vmatpush.msra.mxu2 %v7886_v0 }
 0xc66   :  { %2499 = vmatpush.msra.mxu0 %v7887_v18  ;;  %v7906_v18 = vld [vmem:[#allocation59_spill] sm:$0xff] }
 0xc67   :  { %2530 = vmatpush.msra.mxu1 %v7888_v17  ;;  %2550 = vmatpush.msra.mxu2 %v7889_v8 }
 0xc68   :  { %2500 = vmatpush.msra.mxu0 %v7890_v22  ;;  %v7907_v22 = vld [vmem:[#allocation62_spill] sm:$0xff] }
 0xc69   :  { %2531 = vmatpush.msra.mxu1 %v7891_v35  ;;  %2551 = vmatpush.msra.mxu2 %v7892_v37 }
 0xc6a   :  { %2501 = vmatpush.msra.mxu0 %v7893_v44  ;;  %v7908_v44 = vld [vmem:[#allocation63_spill] sm:$0xff] }
 0xc6b   :  { %2532 = vmatpush.msra.mxu1 %v7894_v21  ;;  %2552 = vmatpush.msra.mxu2 %v7895_v15 }
 0xc6c   :  { %2502 = vmatpush.msra.mxu0 %v7896_v26  ;;  %v7909_v26 = vld [vmem:[#allocation64_spill] sm:$0xff] }
 0xc6d   :  { %2533 = vmatpush.msra.mxu1 %v7897_v5  ;;  %2553 = vmatpush.msra.mxu2 %v7898_v4 }
 0xc6e   :  { %2503 = vmatpush.msra.mxu0 %v7899_v58  ;;  %v7910_v58 = vld [vmem:[#allocation65_spill] sm:$0xff] }
 0xc6f   :  { %2534 = vmatpush.msra.mxu1 %v7900_v12  ;;  %2554 = vmatpush.msra.mxu2 %v7901_v33  ;;  %v7911_v12 = vld [vmem:[#allocation66_spill] sm:$0xff] }
 0xc70   :  { %2504 = vmatpush.msra.mxu0 %v7902_v51  ;;  %v6394_v33 = vld [vmem:[#allocation19 + $0x170] sm:$0xff]  ;;  %v7913_v51 = vld [vmem:[#allocation103_spill] sm:$0xff] }
 0xc71   :  { %2535 = vmatpush.msra.mxu1 %v7903_v54  ;;  %2555 = vmatpush.msra.mxu2 %v7904_v32  ;;  %7912 = vst [vmem:[#allocation93_spill] sm:$0xff] %v6394_v33  ;;  %v6398_v32 = vld [vmem:[#allocation19 + $0x178] sm:$0xff] }
 0xc72   :  { %2505 = vmatpush.msra.mxu0 %v7905_v34  ;;  %7914 = vst [vmem:[#allocation94_spill] sm:$0xff] %v6398_v32  ;;  %v6401_v34 = vld [vmem:[#allocation19 + $0x158] sm:$0xff] }
 0xc73   :  { %2536 = vmatpush.msra.mxu1 %v7907_v22  ;;  %2556 = vmatpush.msra.mxu2 %v7908_v44  ;;  %7915 = vst [vmem:[#allocation95_spill] sm:$0xff] %v6401_v34 }
 0xc74   :  { %2582 = vmatpush.msrb.mxu0 %v7906_v18  ;;  %v7916_v18 = vld [vmem:[#allocation104_spill] sm:$0xff] }
 0xc75   :  { %2537 = vmatpush.msra.mxu1 %v7910_v58  ;;  %2557 = vmatpush.msra.mxu2 %v7911_v12  ;;  %v6408_v12 = vld [vmem:[#allocation19 + $0x140] sm:$0xff] }
 0xc76   :  { %2583 = vmatpush.msrb.mxu0 %v7909_v26  ;;  %v6405_v26 = vld [vmem:[#allocation19 + $0x160] sm:$0xff]  ;;  %7918 = vst [vmem:[#allocation97_spill] sm:$0xff] %v6408_v12 }
 0xc77   :  { %2602 = vmatpush.msrb.mxu1 %v6394_v33  ;;  %2622 = vmatpush.msrb.mxu2 %v6398_v32  ;;  %7917 = vst [vmem:[#allocation96_spill] sm:$0xff] %v6405_v26  ;;  %v7919_v33 = vld [vmem:[#allocation105_spill] sm:$0xff] }
 0xc78   :  { %2584 = vmatpush.msrb.mxu0 %v7913_v51  ;;  %v6412_v51 = vld [vmem:[#allocation19 + $0x148] sm:$0xff] }
 0xc79   :  { %2603 = vmatpush.msrb.mxu1 %v6401_v34  ;;  %2623 = vmatpush.msrb.mxu2 %v6405_v26  ;;  %7920 = vst [vmem:[#allocation98_spill] sm:$0xff] %v6412_v51  ;;  %v6415_v32 = vld [vmem:[#allocation19 + $0x128] sm:$0xff]  ;;  %v7922_v34 = vld [vmem:[#allocation106_spill] sm:$0xff] }
 0xc7a   :  { %2585 = vmatpush.msrb.mxu0 %v7916_v18  ;;  %7921 = vst [vmem:[#allocation99_spill] sm:$0xff] %v6415_v32  ;;  %v6419_v18 = vld [vmem:[#allocation19 + $0x130] sm:$0xff] }
 0xc7b   :  { %2604 = vmatpush.msrb.mxu1 %v6408_v12  ;;  %2624 = vmatpush.msrb.mxu2 %v6412_v51  ;;  %7923 = vst [vmem:[#allocation52_spill] sm:$0xff] %v6419_v18  ;;  %v6422_v26 = vld [vmem:[#allocation19 + $0x110] sm:$0xff]  ;;  %v7925_v12 = vld [vmem:[#allocation107_spill] sm:$0xff] }
 0xc7c   :  { %2586 = vmatpush.msrb.mxu0 %v7919_v33  ;;  %7924 = vst [vmem:[#allocation45_spill] sm:$0xff] %v6422_v26  ;;  %v6426_v33 = vld [vmem:[#allocation19 + $0x118] sm:$0xff] }
 0xc7d   :  { %2605 = vmatpush.msrb.mxu1 %v6415_v32  ;;  %2625 = vmatpush.msrb.mxu2 %v6419_v18  ;;  %7926 = vst [vmem:[#allocation100_spill] sm:$0xff] %v6426_v33  ;;  %v6429_v51 = vld [vmem:[#allocation19 + $0xf8] sm:$0xff]  ;;  %v6436_v18 = vld [vmem:[#allocation19 + $0xe0] sm:$0xff] }
 0xc7e   :  { %2587 = vmatpush.msrb.mxu0 %v7922_v34  ;;  %7927 = vst [vmem:[#allocation61_spill] sm:$0xff] %v6429_v51  ;;  %v7928_v32 = vld [vmem:[#allocation71_spill] sm:$0xff]  ;;  %v6433_v34 = vld [vmem:[#allocation19 + $0x100] sm:$0xff] }
 0xc7f   :  { %2606 = vmatpush.msrb.mxu1 %v6422_v26  ;;  %2626 = vmatpush.msrb.mxu2 %v6426_v33  ;;  %7929 = vst [vmem:[#allocation41_spill] sm:$0xff] %v6433_v34  ;;  %v7931_v26 = vld [vmem:[#allocation72_spill] sm:$0xff]  ;;  %v6443_v33 = vld [vmem:[#allocation19 + $0xc8] sm:$0xff] }
 0xc80   :  { %2588 = vmatpush.msrb.mxu0 %v7925_v12  ;;  %7930 = vst [vmem:[#allocation67_spill] sm:$0xff] %v6436_v18  ;;  %v6440_v12 = vld [vmem:[#allocation19 + $0xe8] sm:$0xff] }
 0xc81   :  { %2607 = vmatpush.msrb.mxu1 %v6429_v51  ;;  %2627 = vmatpush.msrb.mxu2 %v6433_v34  ;;  %7932 = vst [vmem:[#allocation68_spill] sm:$0xff] %v6440_v12  ;;  %v7934_v51 = vld [vmem:[#allocation74_spill] sm:$0xff] }
 0xc82   :  { %2589 = vmatpush.msrb.mxu0 %v7928_v32  ;;  %7933 = vst [vmem:[#allocation50_spill] sm:$0xff] %v6443_v33  ;;  %v6447_v32 = vld [vmem:[#allocation19 + $0xd0] sm:$0xff] }
 0xc83   :  { %2608 = vmatpush.msrb.mxu1 %v6436_v18  ;;  %2628 = vmatpush.msrb.mxu2 %v6440_v12  ;;  %7935 = vst [vmem:[#allocation69_spill] sm:$0xff] %v6447_v32  ;;  %v6450_v34 = vld [vmem:[#allocation19 + $0xb0] sm:$0xff]  ;;  %v7937_v18 = vld [vmem:[#allocation75_spill] sm:$0xff] }
 0xc84   :  { %2590 = vmatpush.msrb.mxu0 %v7931_v26  ;;  %7936 = vst [vmem:[#allocation40_spill] sm:$0xff] %v6450_v34  ;;  %v6454_v26 = vld [vmem:[#allocation19 + $0xb8] sm:$0xff] }
 0xc85   :  { %2609 = vmatpush.msrb.mxu1 %v6443_v33  ;;  %2629 = vmatpush.msrb.mxu2 %v6447_v32  ;;  %7938 = vst [vmem:[#allocation70_spill] sm:$0xff] %v6454_v26  ;;  %v6457_v12 = vld [vmem:[#allocation19 + $0x98] sm:$0xff]  ;;  %v7940_v33 = vld [vmem:[#allocation77_spill] sm:$0xff]  ;;  %v6464_v32 = vld [vmem:[#allocation19 + $0x80] sm:$0xff] }
 0xc86   :  { %2591 = vmatpush.msrb.mxu0 %v7934_v51  ;;  %7939 = vst [vmem:[#allocation73_spill] sm:$0xff] %v6457_v12  ;;  %v6461_v51 = vld [vmem:[#allocation19 + $0xa0] sm:$0xff] }
 0xc87   :  { %2610 = vmatpush.msrb.mxu1 %v6450_v34  ;;  %2630 = vmatpush.msrb.mxu2 %v6454_v26  ;;  %7941 = vst [vmem:[#allocation44_spill] sm:$0xff] %v6461_v51  ;;  %v7943_v34 = vld [vmem:[#allocation78_spill] sm:$0xff]  ;;  %v6471_v26 = vld [vmem:[#allocation19 + $0x68] sm:$0xff] }
 0xc88   :  { %2592 = vmatpush.msrb.mxu0 %v7937_v18  ;;  %7942 = vst [vmem:[#allocation76_spill] sm:$0xff] %v6464_v32  ;;  %v6468_v18 = vld [vmem:[#allocation19 + $0x88] sm:$0xff] }
 0xc89   :  { %2611 = vmatpush.msrb.mxu1 %v6457_v12  ;;  %2631 = vmatpush.msrb.mxu2 %v6461_v51  ;;  %7944 = vst [vmem:[#allocation43_spill] sm:$0xff] %v6468_v18  ;;  %v7946_v12 = vld [vmem:[#allocation80_spill] sm:$0xff]  ;;  %v6478_v51 = vld [vmem:[#allocation19 + $0x50] sm:$0xff] }
 0xc8a   :  { %2593 = vmatpush.msrb.mxu0 %v7940_v33  ;;  %7945 = vst [vmem:[#allocation46_spill] sm:$0xff] %v6471_v26  ;;  %v6475_v33 = vld [vmem:[#allocation19 + $0x70] sm:$0xff] }
 0xc8b   :  { %2612 = vmatpush.msrb.mxu1 %v6464_v32  ;;  %2632 = vmatpush.msrb.mxu2 %v6468_v18  ;;  %7947 = vst [vmem:[#allocation53_spill] sm:$0xff] %v6475_v33  ;;  %v7949_v32 = vld [vmem:[#allocation81_spill] sm:$0xff]  ;;  %v6485_v18 = vld [vmem:[#allocation19 + $0x38] sm:$0xff] }
 0xc8c   :  { %2594 = vmatpush.msrb.mxu0 %v7943_v34  ;;  %7948 = vst [vmem:[#allocation39_spill] sm:$0xff] %v6478_v51  ;;  %v6482_v34 = vld [vmem:[#allocation19 + $0x58] sm:$0xff] }
 0xc8d   :  { %2613 = vmatpush.msrb.mxu1 %v6471_v26  ;;  %2633 = vmatpush.msrb.mxu2 %v6475_v33  ;;  %7950 = vst [vmem:[#allocation35_spill] sm:$0xff] %v6482_v34  ;;  %v7952_v26 = vld [vmem:[#allocation83_spill] sm:$0xff]  ;;  %v6492_v33 = vld [vmem:[#allocation19 + $0x20] sm:$0xff] }
 0xc8e   :  { %2595 = vmatpush.msrb.mxu0 %v7946_v12  ;;  %7951 = vst [vmem:[#allocation55_spill] sm:$0xff] %v6485_v18  ;;  %v6489_v12 = vld [vmem:[#allocation19 + $0x40] sm:$0xff] }
 0xc8f   :  { %2614 = vmatpush.msrb.mxu1 %v6478_v51  ;;  %2634 = vmatpush.msrb.mxu2 %v6482_v34  ;;  %7953 = vst [vmem:[#allocation51_spill] sm:$0xff] %v6489_v12  ;;  %v6495_v51 = vld [vmem:[#allocation19 + $0x28] sm:$0xff]  ;;  %v6501_v34 = vld [vmem:[#allocation19 + $0x10] sm:$0xff] }
 0xc90   :  { %2596 = vmatpush.msrb.mxu0 %v7949_v32  ;;  %7954 = vst [vmem:[#allocation57_spill] sm:$0xff] %v6492_v33  ;;  %v6498_v32 = vld [vmem:[#allocation19 + $0x8] sm:$0xff] }
 0xc91   :  { %2615 = vmatpush.msrb.mxu1 %v6485_v18  ;;  %2635 = vmatpush.msrb.mxu2 %v6489_v12  ;;  %7955 = vst [vmem:[#allocation59_spill] sm:$0xff] %v6495_v51  ;;  %v7958_v18 = vld [vmem:[#allocation101_spill] sm:$0xff]  ;;  %v2336_v12 = vpop.f32.mrf.mxu3 }
 0xc92   :  { %2597 = vmatpush.msrb.mxu0 %v7952_v26  ;;  %7956 = vst [vmem:[#allocation108_spill] sm:$0xff] %v6498_v32 }
 0xc93   :  { %2616 = vmatpush.msrb.mxu1 %v6492_v33  ;;  %2636 = vmatpush.msrb.mxu2 %v6495_v51  ;;  %7957 = vst [vmem:[#allocation109_spill] sm:$0xff] %v6501_v34  ;;  %v7959_v33 = vld [vmem:[#allocation102_spill] sm:$0xff] }
 0xc95   :  { %2617 = vmatpush.msrb.mxu1 %v6498_v32  ;;  %2637 = vmatpush.msrb.mxu2 %v6501_v34 }
 0xcd0   :  { %v2276_v26 = vpop.f32.mrf.mxu0  ;;  %v2296_v22 = vpop.f32.mrf.mxu1 }
 0xcd1   :  { %v2277_v58 = vadd.f32 %v2276_v26, %v7958_v18  ;;  %v2297_v4 = vadd.f32 %v2296_v22, %v7959_v33 }
 0xcd3   :  { %v2379_v44 = vadd.f32 %v2336_v12, %v2277_v58 }
 0xcd5   :  { %v3579_v54 = vmul.f32 -1.442695, %v2379_v44 }
 0xcd7   :  { %3724 = vpow2.f32 %v3579_v54  ;;  %v2316_v22 = vpop.f32.mrf.mxu2 }
 0xcd8   :  { %v2356_v5 = vpop.f32.mrf.mxu0  ;;  %v2376_v58 = vpop.f32.mrf.mxu1 }
 0xcd9   :  { %v2399_v51 = vadd.f32 %v2356_v5, %v2297_v4 }
 0xcdb   :  { %v3580_v15 = vmul.f32 -1.442695, %v2399_v51  ;;  %v2317_v51 = vadd.f32 %v2316_v22, %v7862_v23 }
 0xcdd   :  { %v3725_v21 = vpop.eup %3724  ;;  %3726 = vpow2.f32 %v3580_v15 }
 0xcde   :  { %v2383_v32 = vadd.f32 1.0, %v3725_v21 }
 0xce0   :  { %3728 = vrcp.f32 %v2383_v32  ;;  %v2395_v18 = vand.u32 2147483648, %v2383_v32  ;;  %v2393_v44 = vand.u32 2147483647, %v2383_v32  ;;  %vm2389_vm7 = vweird.f32 %v2383_v32 }
 0xce2   :  { %v2396_v15 = vor.u32 1.1754944e-38, %v2395_v18  ;;  %vm2394_vm9 = vcmp.eq.f32.partialorder %v2393_v44, 8.507059e+37 }
 0xce3   :  { %v3727_v37 = vpop.eup %3726 }
 0xce4   :  { %v2403_v35 = vadd.f32 1.0, %v3727_v37  ;;  %v6509_v37 = vld [vmem:[%s7222_s12] ss:$0 sm:$0xff] }
 0xce6   :  { %v3729_v34 = vpop.eup %3728  ;;  %3730 = vrcp.f32 %v2403_v35  ;;  %v2415_v0 = vand.u32 2147483648, %v2403_v35  ;;  %vm2409_vm11 = vweird.f32 %v2403_v35 }
 0xce7   :  { %v2385_v8 = vmul.f32 %v3729_v34, %v2383_v32  ;;  %vm2390_vm6 = vweird.f32 %v3729_v34  ;;  %v2413_v32 = vand.u32 2147483647, %v2403_v35 }
 0xce8   :  { %vm2391_vm8 = vmor %vm2389_vm7, %vm2390_vm6 }
 0xce9   :  { %v2386_v26 = vsub.f32 1.0, %v2385_v8  ;;  %v2419_v8 = vadd.f32 %v6509_v37, %v2376_v58  ;;  %vm2414_vm13 = vcmp.eq.f32.partialorder %v2413_v32, 8.507059e+37 }
 0xceb   :  { %v2387_v12 = vmul.f32 %v3729_v34, %v2386_v26 }
 0xcec   :  { %v3731_v54 = vpop.eup %3730 }
 0xced   :  { %v2405_v33 = vmul.f32 %v3731_v54, %v2403_v35  ;;  %v2388_v5 = vadd.f32 %v3729_v34, %v2387_v12  ;;  %vm2410_vm10 = vweird.f32 %v3731_v54  ;;  %v7965_v35 = vld [vmem:[#allocation92_spill] sm:$0xff] }
 0xcee   :  { %vm2411_vm12 = vmor %vm2409_vm11, %vm2410_vm10 }
 0xcef   :  { %v2406_v21 = vsub.f32 1.0, %v2405_v33  ;;  %v2392_v4 = vsel %vm2391_vm8, %v3729_v34, %v2388_v5  ;;  %v2416_v34 = vor.u32 1.1754944e-38, %v2415_v0  ;;  %v7963_v0 = vld [vmem:[#allocation89_spill] sm:$0xff] }
 0xcf0   :  { %v2397_v26 = vsel %vm2394_vm9, %v2396_v15, %v2392_v4  ;;  %v7967_v4 = vld [vmem:[#allocation36_spill] sm:$0xff] }
 0xcf1   :  { %v2407_v17 = vmul.f32 %v3731_v54, %v2406_v21  ;;  %v2420_v12 = vmul.f32 %v2419_v8, %v2397_v26  ;;  %v2444_v21 = vpop.f32.mrf.mxu2 }
 0xcf2   :  { %v2445_v8 = vadd.f32 %v2444_v21, %v7967_v4 }
 0xcf3   :  { %v2408_v1 = vadd.f32 %v3731_v54, %v2407_v17  ;;  %v2421_v33 = vadd.f32 %v2420_v12, %v2317_v51  ;;  %v7964_v17 = vld [vmem:[#allocation90_spill] sm:$0xff] }
 0xcf5   :  { %v2412_v18 = vsel %vm2411_vm12, %v3731_v54, %v2408_v1  ;;  %3732 = vtanh.f32 %v2421_v33  ;;  %v7962_v1 = vld [vmem:[#allocation87_spill] sm:$0xff]  ;;  %v6532_v54 = vld [vmem:[#allocation20] sm:$0xff] }
 0xcf6   :  { %v2417_v44 = vsel %vm2414_vm13, %v2416_v34, %v2412_v18 }
 0xcf7   :  { %v2423_v5 = vsub.f32 1.0, %v2417_v44  ;;  %v2425_v22 = vmul.f32 %v2417_v44, %v6246_v7  ;;  %v7960_v7 = vld [vmem:[#allocation84_spill] sm:$0xff] }
 0xcf8   :  { %7966 = vst [vmem:[#allocation84_spill] sm:$0xff] %v6532_v54 }
 0xcfb   :  { %v3733_v41 = vpop.eup %3732 }
 0xcfc   :  { %v2424_v58 = vmul.f32 %v3733_v41, %v2423_v5  ;;  %v7961_v41 = vld [vmem:[#allocation86_spill] sm:$0xff] }
 0xcfe   :  { %v6514_v15 = vadd.f32 %v2425_v22, %v2424_v58 }
 0xd00   :  { %2463 = vmatmul.f32.vlgmr.msra.gmra.mxu3 %v6514_v15 }
 0xd01   :  { %2690 = vmatpush.msra.mxu3 %v6249_v13 }
 0xd03   :  { %2691 = vmatpush.msra.mxu3 %v6252_v16 }
 0xd05   :  { %2692 = vmatpush.msra.mxu3 %v6255_v19 }
 0xd07   :  { %2693 = vmatpush.msra.mxu3 %v6258_v2 }
 0xd09   :  { %2694 = vmatpush.msra.mxu3 %v6261_v11 }
 0xd0b   :  { %2695 = vmatpush.msra.mxu3 %v6264_v39 }
 0xd0d   :  { %2696 = vmatpush.msra.mxu3 %v6267_v43 }
 0xd0f   :  { %2697 = vmatpush.msra.mxu3 %v6270_v36 }
 0xd11   :  { %2698 = vmatpush.msra.mxu3 %v6273_v38 }
 0xd13   :  { %2699 = vmatpush.msra.mxu3 %v7960_v7 }
 0xd15   :  { %2700 = vmatpush.msra.mxu3 %v7961_v41 }
 0xd17   :  { %2701 = vmatpush.msra.mxu3 %v7962_v1 }
 0xd19   :  { %2702 = vmatpush.msra.mxu3 %v7963_v0 }
 0xd1b   :  { %2703 = vmatpush.msra.mxu3 %v7964_v17 }
 0xd1d   :  { %2704 = vmatpush.msra.mxu3 %v7965_v35 }
 0xd1f   :  { %2705 = vmatpush.msra.mxu3 %v6532_v54 }
 0xd83   :  { %v2464_v51 = vpop.f32.mrf.mxu3 }
 0xd84   :  { %v2465_v26 = vadd.f32 %v2464_v51, %v2445_v8  ;;  %v6539_v51 = vld [vmem:[#allocation20 + $0xf8] sm:$0xff] }
 0xd86   :  { %2468 = vst [vmem:[#allocation25 + $0x10] sm:$0xff] %v2465_v26  ;;  %2469 = vmax.xlane.f32.xlu0 %v2465_v26 }
 0xdf9   :  { %v2470_v12 = vpop.xlane.xlu0 %2469 }
 0xdfa   :  { %vm2471_vm14 = vcmp.eq.f32.partialorder %v2465_v26, %v2470_v12  ;;  %v6542_v26 = vld [vmem:[#allocation20 + $0xf0] sm:$0xff]  ;;  %v6545_v12 = vld [vmem:[#allocation20 + $0xe8] sm:$0xff] }
 0xdfb   :  { %v2472_v32 = vsel %vm2471_vm14, %v5923_v20, 128 }
 0xdfc   :  { %v2474_v33 = vshra.s32 %v2472_v32, 16  ;;  %v2473_v18 = vand.u32 65535, %v2472_v32  ;;  %v6548_v32 = vld [vmem:[#allocation20 + $0xe0] sm:$0xff] }
 0xdfe   :  { %v2476_v34 = vcvt.s32.f32 %v2474_v33  ;;  %v2475_v5 = vcvt.s32.f32 %v2473_v18  ;;  %v6558_v33 = vld [vmem:[#allocation20 + $0xc8] sm:$0xff]  ;;  %v6564_v18 = vld [vmem:[#allocation20 + $0xb8] sm:$0xff] }
 0xe00   :  { %2477 = vmin.xlane.f32.xlu1 %v2476_v34 }
 0xe73   :  { %v2478_v44 = vpop.xlane.xlu1 %2477 }
 0xe74   :  { %vm2479_vm15 = vcmp.eq.f32.partialorder %v2476_v34, %v2478_v44  ;;  %v2484_v22 = vcvt.f32.s32 %v2478_v44  ;;  %v6561_v34 = vld [vmem:[#allocation20 + $0xc0] sm:$0xff]  ;;  %v6567_v44 = vld [vmem:[#allocation20 + $0xb0] sm:$0xff] }
 0xe75   :  { %v2480_v58 = vsel %vm2479_vm15, %v2475_v5, inf  ;;  %7968 = vst [vmem:[#allocation86_spill] sm:$0xff] %v6567_v44  ;;  %v6570_v5 = vld [vmem:[#allocation20 + $0xa8] sm:$0xff] }
 0xe76   :  { %2481 = vmin.xlane.f32.xlu2 %v2480_v58  ;;  %v2485_v21 = vshll.u32 %v2484_v22, 16  ;;  %v6573_v58 = vld [vmem:[#allocation20 + $0xa0] sm:$0xff]  ;;  %v6576_v22 = vld [vmem:[#allocation20 + $0x98] sm:$0xff] }
 0xee9   :  { %v2482_v54 = vpop.xlane.xlu2 %2481 }
 0xeea   :  { %v2483_v4 = vcvt.f32.s32 %v2482_v54  ;;  %v6552_v54 = vld [vmem:[#allocation20 + $0xd8] sm:$0xff] }
 0xeec   :  { %v2486_v8 = vadd.s32 %v2485_v21, %v2483_v4  ;;  %v6555_v4 = vld [vmem:[#allocation20 + $0xd0] sm:$0xff] }
 0xeed   :  { %v6579_v21 = vld [vmem:[#allocation20 + $0x90] sm:$0xff] }
 0xeee   :  { %vm2487_vm0 = vcmp.eq.s32.totalorder %v5923_v20, %v2486_v8  ;;  %v6582_v8 = vld [vmem:[#allocation20 + $0x88] sm:$0xff] }
 0xeef   :  { %3582 = vmatmul.msk.f32.vlgmr.msra.gmra.mxu0 %vm2487_vm0, %v7871_v10 }
 0xef0   :  { %2710 = vmatpush.msra.mxu0 %v6539_v51 }
 0xef2   :  { %2711 = vmatpush.msra.mxu0 %v6542_v26 }
 0xef4   :  { %2712 = vmatpush.msra.mxu0 %v6545_v12 }
 0xef6   :  { %2713 = vmatpush.msra.mxu0 %v6548_v32 }
 0xef7   :  { %2598 = vmatmul.f32.vlgmr.msrb.gmra.mxu0 %v6514_v15 }
 0xef8   :  { %2714 = vmatpush.msra.mxu0 %v6552_v54 }
 0xefa   :  { %2715 = vmatpush.msra.mxu0 %v6555_v4 }
 0xefc   :  { %2716 = vmatpush.msra.mxu0 %v6558_v33 }
 0xefe   :  { %2717 = vmatpush.msra.mxu0 %v6561_v34 }
 0xf00   :  { %2718 = vmatpush.msra.mxu0 %v6564_v18 }
 0xf02   :  { %2719 = vmatpush.msra.mxu0 %v6567_v44  ;;  %v6585_v44 = vld [vmem:[#allocation20 + $0x80] sm:$0xff] }
 0xf04   :  { %2720 = vmatpush.msra.mxu0 %v6570_v5 }
 0xf06   :  { %2721 = vmatpush.msra.mxu0 %v6573_v58 }
 0xf08   :  { %2722 = vmatpush.msra.mxu0 %v6576_v22 }
 0xf0a   :  { %2723 = vmatpush.msra.mxu0 %v6579_v21 }
 0xf0c   :  { %2724 = vmatpush.msra.mxu0 %v6582_v8 }
 0xf0e   :  { %2725 = vmatpush.msra.mxu0 %v6585_v44 }
 0xf10   :  { %2825 = vmatpush.msrb.mxu0 %v6011_v53  ;;  %v2515_v53 = vld [vmem:[#allocation10 + $0x10] sm:$0xff] }
 0xf12   :  { %2826 = vmatpush.msrb.mxu0 %v6014_v3  ;;  %v2516_v3 = vstv %s2513_s18 }
 0xf14   :  { %2827 = vmatpush.msrb.mxu0 %v6017_v14  ;;  %v2519_v14 = vstv %s2518_s10 }
 0xf16   :  { %2828 = vmatpush.msrb.mxu0 %v6020_v49  ;;  %v2517_v49 = vmul.f32 %v2516_v3, %v2515_v53  ;;  %v7985_v53 = vld [vmem:[#allocation47_spill] sm:$0xff]  ;;  %v6659_v3 = vld [vmem:[#allocation23 + $0x20] sm:$0xff] }
 0xf18   :  { %2829 = vmatpush.msrb.mxu0 %v6023_v40 }
 0xf1a   :  { %2830 = vmatpush.msrb.mxu0 %v6026_v30 }
 0xf1c   :  { %2831 = vmatpush.msrb.mxu0 %v6029_v6 }
 0xf1e   :  { %2832 = vmatpush.msrb.mxu0 %v6032_v55  ;;  %v6604_v55 = vld [vmem:[#allocation23 + $0x78] sm:$0xff] }
 0xf20   :  { %2833 = vmatpush.msrb.mxu0 %v7872_v56  ;;  %v6609_v56 = vld [vmem:[#allocation23 + $0x70] sm:$0xff] }
 0xf21   :  { %7969 = vst [vmem:[#allocation87_spill] sm:$0xff] %v6609_v56 }
 0xf22   :  { %2834 = vmatpush.msrb.mxu0 %v7873_v9  ;;  %v6614_v9 = vld [vmem:[#allocation23 + $0x68] sm:$0xff] }
 0xf23   :  { %7970 = vst [vmem:[#allocation89_spill] sm:$0xff] %v6614_v9 }
 0xf24   :  { %2835 = vmatpush.msrb.mxu0 %v7874_v52  ;;  %v6619_v52 = vld [vmem:[#allocation23 + $0x60] sm:$0xff] }
 0xf25   :  { %7971 = vst [vmem:[#allocation90_spill] sm:$0xff] %v6619_v52 }
 0xf26   :  { %2836 = vmatpush.msrb.mxu0 %v6327_v50 }
 0xf28   :  { %2837 = vmatpush.msrb.mxu0 %v6330_v47 }
 0xf2a   :  { %2838 = vmatpush.msrb.mxu0 %v6333_v24 }
 0xf2c   :  { %2839 = vmatpush.msrb.mxu0 %v6336_v46 }
 0xf2e   :  { %2840 = vmatpush.msrb.mxu0 %v6339_v60 }
 0xf6c   :  { %v2507_v40 = vpop.f32.mrf.mxu0 }
 0xf6d   :  { %v2520_v30 = vmul.f32 %v2519_v14, %v2507_v40  ;;  %v7987_v14 = vld [vmem:[#allocation37_spill] sm:$0xff]  ;;  %v6664_v40 = vld [vmem:[#allocation23 + $0x18] sm:$0xff] }
 0xf6f   :  { %v2521_v6 = vadd.f32 %v2520_v30, %v2517_v49  ;;  %v7988_v49 = vld [vmem:[#allocation48_spill] sm:$0xff]  ;;  %v7990_v30 = vld [vmem:[#allocation54_spill] sm:$0xff] }
 0xf71   :  { %2538 = vmatmul.f32.vlgmr.msra.gmra.mxu1 %v2521_v6  ;;  %2558 = vmatmul.f32.vlgmr.msra.gmra.mxu2 %v2521_v6 }
 0xf72   :  { %2578 = vmatmul.f32.vlgmr.msrb.gmra.mxu3 %v2521_v6  ;;  %2753 = vmatpush.msra.mxu1 %v6604_v55 }
 0xf73   :  { %2785 = vmatpush.msra.mxu2 %v6050_v31  ;;  %2805 = vmatpush.msrb.mxu3 %v6053_v48  ;;  %v6624_v31 = vld [vmem:[#allocation23 + $0x58] sm:$0xff]  ;;  %v6629_v48 = vld [vmem:[#allocation23 + $0x50] sm:$0xff] }
 0xf74   :  { %2754 = vmatpush.msra.mxu1 %v6609_v56  ;;  %7972 = vst [vmem:[#allocation92_spill] sm:$0xff] %v6624_v31 }
 0xf75   :  { %2786 = vmatpush.msra.mxu2 %v6057_v59  ;;  %2806 = vmatpush.msrb.mxu3 %v6060_v25  ;;  %7973 = vst [vmem:[#allocation110_spill] sm:$0xff] %v6629_v48  ;;  %v6634_v59 = vld [vmem:[#allocation23 + $0x48] sm:$0xff]  ;;  %v6639_v25 = vld [vmem:[#allocation23 + $0x40] sm:$0xff] }
 0xf76   :  { %2755 = vmatpush.msra.mxu1 %v6614_v9  ;;  %7974 = vst [vmem:[#allocation111_spill] sm:$0xff] %v6634_v59 }
 0xf77   :  { %2787 = vmatpush.msra.mxu2 %v6064_v45  ;;  %2807 = vmatpush.msrb.mxu3 %v6067_v28  ;;  %7975 = vst [vmem:[#allocation112_spill] sm:$0xff] %v6639_v25  ;;  %v7976_v45 = vld [vmem:[#allocation79_spill] sm:$0xff] }
 0xf78   :  { %2756 = vmatpush.msra.mxu1 %v6619_v52  ;;  %v6644_v28 = vld [vmem:[#allocation23 + $0x38] sm:$0xff] }
 0xf79   :  { %2618 = vmatmul.f32.vlgmr.msrb.gmra.mxu1 %v6514_v15  ;;  %2638 = vmatmul.f32.vlgmr.msrb.gmra.mxu2 %v6514_v15  ;;  %7977 = vst [vmem:[#allocation79_spill] sm:$0xff] %v6644_v28 }
 0xf7a   :  { %2706 = vmatmul.f32.vlgmr.msra.gmra.mxu3 %v2521_v6  ;;  %2757 = vmatpush.msra.mxu1 %v6624_v31  ;;  %v7991_v6 = vld [vmem:[#allocation49_spill] sm:$0xff] }
 0xf7b   :  { %2788 = vmatpush.msra.mxu2 %v7875_v57  ;;  %2808 = vmatpush.msrb.mxu3 %v6077_v63  ;;  %v7978_v63 = vld [vmem:[#allocation82_spill] sm:$0xff] }
 0xf7c   :  { %2758 = vmatpush.msra.mxu1 %v6629_v48  ;;  %v6649_v57 = vld [vmem:[#allocation23 + $0x30] sm:$0xff] }
 0xf7d   :  { %2789 = vmatpush.msra.mxu2 %v7877_v27  ;;  %2809 = vmatpush.msrb.mxu3 %v6084_v42  ;;  %v7979_v42 = vld [vmem:[#allocation85_spill] sm:$0xff]  ;;  %7980 = vst [vmem:[#allocation82_spill] sm:$0xff] %v6649_v57  ;;  %v7981_v27 = vld [vmem:[#allocation88_spill] sm:$0xff] }
 0xf7e   :  { %2759 = vmatpush.msra.mxu1 %v6634_v59  ;;  %7986 = vst [vmem:[#allocation88_spill] sm:$0xff] %v6659_v3 }
 0xf7f   :  { %2790 = vmatpush.msra.mxu2 %v7879_v62  ;;  %2810 = vmatpush.msrb.mxu3 %v7880_v29  ;;  %v7982_v62 = vld [vmem:[#allocation91_spill] sm:$0xff]  ;;  %v6654_v29 = vld [vmem:[#allocation23 + $0x28] sm:$0xff] }
 0xf80   :  { %2760 = vmatpush.msra.mxu1 %v6639_v25  ;;  %7983 = vst [vmem:[#allocation85_spill] sm:$0xff] %v6654_v29 }
 0xf81   :  { %2791 = vmatpush.msra.mxu2 %v7882_v61  ;;  %2811 = vmatpush.msrb.mxu3 %v7976_v45  ;;  %v7984_v61 = vld [vmem:[#allocation42_spill] sm:$0xff]  ;;  %7989 = vst [vmem:[#allocation91_spill] sm:$0xff] %v6664_v40 }
 0xf82   :  { %2761 = vmatpush.msra.mxu1 %v6644_v28  ;;  %v6669_v45 = vld [vmem:[#allocation23 + $0x10] sm:$0xff] }
 0xf83   :  { %2792 = vmatpush.msra.mxu2 %v7978_v63  ;;  %2812 = vmatpush.msrb.mxu3 %v7979_v42  ;;  %7992 = vst [vmem:[#allocation42_spill] sm:$0xff] %v6669_v45  ;;  %v7993_v63 = vld [vmem:[#allocation38_spill] sm:$0xff]  ;;  %v7994_v42 = vld [vmem:[#allocation56_spill] sm:$0xff] }
 0xf84   :  { %2762 = vmatpush.msra.mxu1 %v6649_v57 }
 0xf85   :  { %2793 = vmatpush.msra.mxu2 %v7981_v27  ;;  %2813 = vmatpush.msrb.mxu3 %v7982_v62  ;;  %v6674_v27 = vld [vmem:[#allocation23 + $0x8] sm:$0xff]  ;;  %v7996_v62 = vld [vmem:[#allocation58_spill] sm:$0xff] }
 0xf86   :  { %2763 = vmatpush.msra.mxu1 %v6654_v29  ;;  %7995 = vst [vmem:[#allocation47_spill] sm:$0xff] %v6674_v27 }
 0xf87   :  { %2794 = vmatpush.msra.mxu2 %v7984_v61  ;;  %2814 = vmatpush.msrb.mxu3 %v7985_v53  ;;  %v7997_v61 = vld [vmem:[#allocation60_spill] sm:$0xff] }
 0xf88   :  { %2764 = vmatpush.msra.mxu1 %v6659_v3  ;;  %v6679_v53 = vld [vmem:[#allocation23] sm:$0xff] }
 0xf89   :  { %2795 = vmatpush.msra.mxu2 %v7987_v14  ;;  %2815 = vmatpush.msrb.mxu3 %v7988_v49  ;;  %7998 = vst [vmem:[#allocation37_spill] sm:$0xff] %v6679_v53  ;;  %v6682_v14 = vld [vmem:[#allocation19 + $0x168] sm:$0xff]  ;;  %v8000_v49 = vld [vmem:[#allocation62_spill] sm:$0xff] }
 0xf8a   :  { %2765 = vmatpush.msra.mxu1 %v6664_v40  ;;  %7999 = vst [vmem:[#allocation48_spill] sm:$0xff] %v6682_v14 }
 0xf8b   :  { %2796 = vmatpush.msra.mxu2 %v7990_v30  ;;  %2816 = vmatpush.msrb.mxu3 %v7991_v6  ;;  %v8001_v30 = vld [vmem:[#allocation63_spill] sm:$0xff]  ;;  %v8002_v6 = vld [vmem:[#allocation64_spill] sm:$0xff] }
 0xf8c   :  { %2766 = vmatpush.msra.mxu1 %v6669_v45  ;;  %v8009_v45 = vld [vmem:[#allocation104_spill] sm:$0xff] }
 0xf8d   :  { %2797 = vmatpush.msra.mxu2 %v7993_v63  ;;  %2817 = vmatpush.msrb.mxu3 %v7994_v42  ;;  %v8003_v63 = vld [vmem:[#allocation65_spill] sm:$0xff]  ;;  %v8004_v42 = vld [vmem:[#allocation66_spill] sm:$0xff] }
 0xf8e   :  { %2767 = vmatpush.msra.mxu1 %v6674_v27  ;;  %v8007_v27 = vld [vmem:[#allocation94_spill] sm:$0xff] }
 0xf8f   :  { %2798 = vmatpush.msra.mxu2 %v7996_v62  ;;  %2818 = vmatpush.msrb.mxu3 %v7997_v61  ;;  %v8005_v62 = vld [vmem:[#allocation93_spill] sm:$0xff]  ;;  %v8006_v61 = vld [vmem:[#allocation103_spill] sm:$0xff] }
 0xf90   :  { %2768 = vmatpush.msra.mxu1 %v6679_v53  ;;  %v8008_v53 = vld [vmem:[#allocation95_spill] sm:$0xff] }
 0xf91   :  { %2799 = vmatpush.msra.mxu2 %v8000_v49  ;;  %2819 = vmatpush.msrb.mxu3 %v8001_v30  ;;  %v8011_v49 = vld [vmem:[#allocation97_spill] sm:$0xff] }
 0xf92   :  { %2845 = vmatpush.msrb.mxu1 %v6682_v14  ;;  %v8010_v14 = vld [vmem:[#allocation96_spill] sm:$0xff]  ;;  %v8012_v30 = vld [vmem:[#allocation105_spill] sm:$0xff] }
 0xf93   :  { %2800 = vmatpush.msra.mxu2 %v8003_v63  ;;  %2820 = vmatpush.msrb.mxu3 %v8004_v42  ;;  %v8014_v63 = vld [vmem:[#allocation99_spill] sm:$0xff]  ;;  %v8015_v42 = vld [vmem:[#allocation106_spill] sm:$0xff] }
 0xf94   :  { %2846 = vmatpush.msrb.mxu1 %v8002_v6  ;;  %v8013_v6 = vld [vmem:[#allocation98_spill] sm:$0xff] }
 0xf95   :  { %2865 = vmatpush.msrb.mxu2 %v8005_v62  ;;  %2885 = vmatpush.msra.mxu3 %v8007_v27  ;;  %v8016_v62 = vld [vmem:[#allocation52_spill] sm:$0xff]  ;;  %v8018_v27 = vld [vmem:[#allocation107_spill] sm:$0xff] }
 0xf96   :  { %2847 = vmatpush.msrb.mxu1 %v8006_v61  ;;  %v8017_v61 = vld [vmem:[#allocation45_spill] sm:$0xff] }
 0xf97   :  { %2866 = vmatpush.msrb.mxu2 %v8008_v53  ;;  %2886 = vmatpush.msra.mxu3 %v8010_v14  ;;  %v8019_v53 = vld [vmem:[#allocation100_spill] sm:$0xff]  ;;  %v8021_v14 = vld [vmem:[#allocation71_spill] sm:$0xff] }
 0xf98   :  { %2848 = vmatpush.msrb.mxu1 %v8009_v45  ;;  %v8020_v45 = vld [vmem:[#allocation61_spill] sm:$0xff] }
 0xf99   :  { %2867 = vmatpush.msrb.mxu2 %v8011_v49  ;;  %2887 = vmatpush.msra.mxu3 %v8013_v6  ;;  %v8022_v49 = vld [vmem:[#allocation41_spill] sm:$0xff]  ;;  %v8024_v6 = vld [vmem:[#allocation72_spill] sm:$0xff] }
 0xf9a   :  { %2849 = vmatpush.msrb.mxu1 %v8012_v30  ;;  %v8023_v30 = vld [vmem:[#allocation67_spill] sm:$0xff] }
 0xf9b   :  { %2868 = vmatpush.msrb.mxu2 %v8014_v63  ;;  %2888 = vmatpush.msra.mxu3 %v8016_v62  ;;  %v8025_v63 = vld [vmem:[#allocation68_spill] sm:$0xff]  ;;  %v8027_v62 = vld [vmem:[#allocation74_spill] sm:$0xff] }
 0xf9c   :  { %2850 = vmatpush.msrb.mxu1 %v8015_v42  ;;  %v8026_v42 = vld [vmem:[#allocation50_spill] sm:$0xff] }
 0xf9d   :  { %2869 = vmatpush.msrb.mxu2 %v8017_v61  ;;  %2889 = vmatpush.msra.mxu3 %v8019_v53  ;;  %v8028_v61 = vld [vmem:[#allocation69_spill] sm:$0xff]  ;;  %v8030_v53 = vld [vmem:[#allocation75_spill] sm:$0xff] }
 0xf9e   :  { %2851 = vmatpush.msrb.mxu1 %v8018_v27  ;;  %v8029_v27 = vld [vmem:[#allocation40_spill] sm:$0xff] }
 0xf9f   :  { %2870 = vmatpush.msrb.mxu2 %v8020_v45  ;;  %2890 = vmatpush.msra.mxu3 %v8022_v49  ;;  %v8031_v45 = vld [vmem:[#allocation70_spill] sm:$0xff]  ;;  %v8033_v49 = vld [vmem:[#allocation77_spill] sm:$0xff] }
 0xfa0   :  { %2852 = vmatpush.msrb.mxu1 %v8021_v14  ;;  %v8032_v14 = vld [vmem:[#allocation73_spill] sm:$0xff] }
 0xfa1   :  { %2871 = vmatpush.msrb.mxu2 %v8023_v30  ;;  %2891 = vmatpush.msra.mxu3 %v8025_v63  ;;  %v8034_v30 = vld [vmem:[#allocation44_spill] sm:$0xff]  ;;  %v8036_v63 = vld [vmem:[#allocation78_spill] sm:$0xff] }
 0xfa2   :  { %2853 = vmatpush.msrb.mxu1 %v8024_v6  ;;  %v8035_v6 = vld [vmem:[#allocation76_spill] sm:$0xff] }
 0xfa3   :  { %2872 = vmatpush.msrb.mxu2 %v8026_v42  ;;  %2892 = vmatpush.msra.mxu3 %v8028_v61  ;;  %v8037_v42 = vld [vmem:[#allocation43_spill] sm:$0xff]  ;;  %v8039_v61 = vld [vmem:[#allocation80_spill] sm:$0xff] }
 0xfa4   :  { %2854 = vmatpush.msrb.mxu1 %v8027_v62  ;;  %v8038_v62 = vld [vmem:[#allocation46_spill] sm:$0xff] }
 0xfa5   :  { %2873 = vmatpush.msrb.mxu2 %v8029_v27  ;;  %2893 = vmatpush.msra.mxu3 %v8031_v45  ;;  %v8040_v27 = vld [vmem:[#allocation53_spill] sm:$0xff] }
 0xfa6   :  { %2855 = vmatpush.msrb.mxu1 %v8030_v53  ;;  %v8041_v53 = vld [vmem:[#allocation39_spill] sm:$0xff]  ;;  %v8042_v45 = vld [vmem:[#allocation81_spill] sm:$0xff] }
 0xfa7   :  { %2874 = vmatpush.msrb.mxu2 %v8032_v14  ;;  %2894 = vmatpush.msra.mxu3 %v8034_v30  ;;  %v8043_v14 = vld [vmem:[#allocation35_spill] sm:$0xff] }
 0xfa8   :  { %2856 = vmatpush.msrb.mxu1 %v8033_v49  ;;  %v8044_v49 = vld [vmem:[#allocation55_spill] sm:$0xff] }
 0xfa9   :  { %2875 = vmatpush.msrb.mxu2 %v8035_v6  ;;  %2895 = vmatpush.msra.mxu3 %v8037_v42  ;;  %v8045_v30 = vld [vmem:[#allocation83_spill] sm:$0xff] }
 0xfaa   :  { %2857 = vmatpush.msrb.mxu1 %v8036_v63  ;;  %v8046_v6 = vld [vmem:[#allocation51_spill] sm:$0xff]  ;;  %v8047_v63 = vld [vmem:[#allocation57_spill] sm:$0xff] }
 0xfab   :  { %2876 = vmatpush.msrb.mxu2 %v8038_v62  ;;  %2896 = vmatpush.msra.mxu3 %v8040_v27  ;;  %v8048_v42 = vld [vmem:[#allocation59_spill] sm:$0xff]  ;;  %v8049_v62 = vld [vmem:[#allocation108_spill] sm:$0xff] }
 0xfac   :  { %2858 = vmatpush.msrb.mxu1 %v8039_v61  ;;  %v8050_v61 = vld [vmem:[#allocation109_spill] sm:$0xff] }
 0xfad   :  { %2877 = vmatpush.msrb.mxu2 %v8041_v53  ;;  %2897 = vmatpush.msra.mxu3 %v8043_v14  ;;  %v8051_v53 = vld [vmem:[#allocation101_spill] sm:$0xff] }
 0xfae   :  { %2859 = vmatpush.msrb.mxu1 %v8042_v45  ;;  %v2599_v45 = vpop.f32.mrf.mxu0 }
 0xfaf   :  { %2878 = vmatpush.msrb.mxu2 %v8044_v49  ;;  %2898 = vmatpush.msra.mxu3 %v8046_v6  ;;  %v8052_v49 = vld [vmem:[#allocation102_spill] sm:$0xff] }
 0xfb0   :  { %2860 = vmatpush.msrb.mxu1 %v8045_v30 }
 0xfb1   :  { %2879 = vmatpush.msrb.mxu2 %v8047_v63  ;;  %2899 = vmatpush.msra.mxu3 %v8048_v42 }
 0xfb3   :  { %2880 = vmatpush.msrb.mxu2 %v8049_v62  ;;  %2900 = vmatpush.msra.mxu3 %v8050_v61 }
 0xfee   :  { %v2539_v27 = vpop.f32.mrf.mxu1 }
 0xfef   :  { %v2540_v40 = vadd.f32 %v2539_v27, %v8051_v53 }
 0xff1   :  { %v2642_v3 = vadd.f32 %v2599_v45, %v2540_v40 }
 0xff3   :  { %v3584_v14 = vmul.f32 -1.442695, %v2642_v3 }
 0xff4   :  { %v2559_v29 = vpop.f32.mrf.mxu2 }
 0xff5   :  { %3734 = vpow2.f32 %v3584_v14  ;;  %v2560_v30 = vadd.f32 %v2559_v29, %v8052_v49  ;;  %v2579_v29 = vpop.f32.mrf.mxu3 }
 0xff6   :  { %v2619_v57 = vpop.f32.mrf.mxu1 }
 0xff7   :  { %v2662_v6 = vadd.f32 %v2619_v57, %v2560_v30  ;;  %v2580_v30 = vadd.f32 %v2579_v29, %v7862_v23 }
 0xff9   :  { %v3585_v28 = vmul.f32 -1.442695, %v2662_v6 }
 0xffb   :  { %v3735_v63 = vpop.eup %3734  ;;  %3736 = vpow2.f32 %v3585_v28 }
 0xffc   :  { %v2646_v42 = vadd.f32 1.0, %v3735_v63  ;;  %v2639_v45 = vpop.f32.mrf.mxu2 }
 0xffe   :  { %3738 = vrcp.f32 %v2646_v42  ;;  %v2658_v53 = vand.u32 2147483648, %v2646_v42  ;;  %v2656_v3 = vand.u32 2147483647, %v2646_v42  ;;  %vm2652_vm2 = vweird.f32 %v2646_v42 }
0x1000   :  { %v2659_v28 = vor.u32 1.1754944e-38, %v2658_v53  ;;  %vm2657_vm4 = vcmp.eq.f32.partialorder %v2656_v3, 8.507059e+37 }
0x1001   :  { %v3737_v62 = vpop.eup %3736 }
0x1002   :  { %v2666_v25 = vadd.f32 1.0, %v3737_v62  ;;  %v2682_v62 = vadd.f32 %v6509_v37, %v2639_v45 }
0x1004   :  { %v3739_v61 = vpop.eup %3738  ;;  %3740 = vrcp.f32 %v2666_v25  ;;  %v2676_v52 = vand.u32 2147483647, %v2666_v25  ;;  %vm2672_vm6 = vweird.f32 %v2666_v25 }
0x1005   :  { %v2648_v59 = vmul.f32 %v3739_v61, %v2646_v42  ;;  %vm2653_vm1 = vweird.f32 %v3739_v61 }
0x1006   :  { %vm2654_vm3 = vmor %vm2652_vm2, %vm2653_vm1  ;;  %vm2677_vm8 = vcmp.eq.f32.partialorder %v2676_v52, 8.507059e+37 }
0x1007   :  { %v2649_v27 = vsub.f32 1.0, %v2648_v59 }
0x1009   :  { %v2650_v40 = vmul.f32 %v3739_v61, %v2649_v27  ;;  %v2678_v27 = vand.u32 2147483648, %v2666_v25 }
0x100a   :  { %v3741_v14 = vpop.eup %3740 }
0x100b   :  { %v2668_v49 = vmul.f32 %v3741_v14, %v2666_v25  ;;  %v2651_v57 = vadd.f32 %v3739_v61, %v2650_v40  ;;  %vm2673_vm5 = vweird.f32 %v3741_v14  ;;  %v2679_v42 = vor.u32 1.1754944e-38, %v2678_v27  ;;  %v6784_v25 = vld [vmem:[#allocation16 + $0x160] sm:$0xff]  ;;  %v6811_v27 = vld [vmem:[#allocation16 + $0x88] sm:$0xff] }
0x100c   :  { %vm2674_vm7 = vmor %vm2672_vm6, %vm2673_vm5 }
0x100d   :  { %v2669_v6 = vsub.f32 1.0, %v2668_v49  ;;  %v2655_v63 = vsel %vm2654_vm3, %v3739_v61, %v2651_v57  ;;  %v6790_v57 = vld [vmem:[#allocation16 + $0x130] sm:$0xff] }
0x100e   :  { %v2660_v59 = vsel %vm2657_vm4, %v2659_v28, %v2655_v63  ;;  %v6793_v28 = vld [vmem:[#allocation16 + $0x118] sm:$0xff]  ;;  %v6799_v63 = vld [vmem:[#allocation16 + $0xe8] sm:$0xff] }
0x100f   :  { %v2670_v48 = vmul.f32 %v3741_v14, %v2669_v6  ;;  %v2683_v31 = vmul.f32 %v2682_v62, %v2660_v59  ;;  %v6796_v6 = vld [vmem:[#allocation16 + $0x100] sm:$0xff]  ;;  %v6802_v62 = vld [vmem:[#allocation16 + $0xd0] sm:$0xff] }
0x1010   :  { %v6808_v59 = vld [vmem:[#allocation16 + $0xa0] sm:$0xff] }
0x1011   :  { %v2671_v9 = vadd.f32 %v3741_v14, %v2670_v48  ;;  %v2684_v56 = vadd.f32 %v2683_v31, %v2580_v30  ;;  %v8055_v31 = vld [vmem:[#allocation86_spill] sm:$0xff]  ;;  %v6781_v48 = vld [vmem:[#allocation16 + $0x178] sm:$0xff] }
0x1012   :  { %v6805_v30 = vld [vmem:[#allocation16 + $0xb8] sm:$0xff] }
0x1013   :  { %v2675_v40 = vsel %vm2674_vm7, %v3741_v14, %v2671_v9  ;;  %3742 = vtanh.f32 %v2684_v56  ;;  %v6787_v14 = vld [vmem:[#allocation16 + $0x148] sm:$0xff] }
0x1014   :  { %v2680_v53 = vsel %vm2677_vm8, %v2679_v42, %v2675_v40  ;;  %v2778_v42 = vld [vmem:[#allocation10 + $0x18] sm:$0xff]  ;;  %v2779_v40 = vstv %s2776_s9 }
0x1015   :  { %v2686_v49 = vsub.f32 1.0, %v2680_v53  ;;  %v2688_v45 = vmul.f32 %v2680_v53, %v6514_v15  ;;  %v2782_v53 = vstv %s2781_s14 }
0x1019   :  { %v3743_v61 = vpop.eup %3742 }
0x101a   :  { %v2687_v3 = vmul.f32 %v3743_v61, %v2686_v49  ;;  %v2780_v49 = vmul.f32 %v2779_v40, %v2778_v42  ;;  %v6872_v42 = vld [vmem:[#allocation16 + $0xc0] sm:$0xff]  ;;  %v6875_v40 = vld [vmem:[#allocation16 + $0xc8] sm:$0xff] }
0x101b   :  { %8074 = vst [vmem:[#allocation66_spill] sm:$0xff] %v6872_v42 }
0x101c   :  { %v6741_v29 = vadd.f32 %v2688_v45, %v2687_v3  ;;  %v6830_v45 = vld [vmem:[#allocation16 + $0x158] sm:$0xff]  ;;  %8075 = vst [vmem:[#allocation103_spill] sm:$0xff] %v6875_v40 }
0x101e   :  { %2726 = vmatmul.f32.vlgmr.msra.gmra.mxu0 %v6741_v29 }
0x101f   :  { %2953 = vmatpush.msra.mxu0 %v6249_v13  ;;  %v8053_v13 = vld [vmem:[#allocation84_spill] sm:$0xff] }
0x1021   :  { %2954 = vmatpush.msra.mxu0 %v6252_v16  ;;  %v2707_v16 = vpop.f32.mrf.mxu3 }
0x1023   :  { %2955 = vmatpush.msra.mxu0 %v6255_v19  ;;  %v8054_v19 = vld [vmem:[#allocation36_spill] sm:$0xff] }
0x1025   :  { %2956 = vmatpush.msra.mxu0 %v6258_v2  ;;  %v2708_v2 = vadd.f32 %v2707_v16, %v8054_v19  ;;  %v8057_v16 = vld [vmem:[#allocation89_spill] sm:$0xff] }
0x1027   :  { %2957 = vmatpush.msra.mxu0 %v6261_v11 }
0x1029   :  { %2958 = vmatpush.msra.mxu0 %v6264_v39 }
0x102b   :  { %2959 = vmatpush.msra.mxu0 %v6267_v43 }
0x102d   :  { %2960 = vmatpush.msra.mxu0 %v6270_v36 }
0x102f   :  { %2961 = vmatpush.msra.mxu0 %v6273_v38 }
0x1031   :  { %2962 = vmatpush.msra.mxu0 %v7960_v7 }
0x1033   :  { %2963 = vmatpush.msra.mxu0 %v7961_v41 }
0x1035   :  { %2964 = vmatpush.msra.mxu0 %v7962_v1 }
0x1037   :  { %2965 = vmatpush.msra.mxu0 %v7963_v0 }
0x1039   :  { %2966 = vmatpush.msra.mxu0 %v7964_v17 }
0x103b   :  { %2967 = vmatpush.msra.mxu0 %v7965_v35 }
0x103d   :  { %2968 = vmatpush.msra.mxu0 %v8053_v13 }
0x109b   :  { %v2727_v11 = vpop.f32.mrf.mxu0 }
0x109c   :  { %v2728_v39 = vadd.f32 %v2727_v11, %v2708_v2  ;;  %v6834_v2 = vld [vmem:[#allocation16 + $0x138] sm:$0xff]  ;;  %v6837_v11 = vld [vmem:[#allocation16 + $0x140] sm:$0xff] }
0x109d   :  { %8058 = vst [vmem:[#allocation54_spill] sm:$0xff] %v6834_v2 }
0x109e   :  { %2731 = vst [vmem:[#allocation25 + $0x18] sm:$0xff] %v2728_v39  ;;  %2732 = vmax.xlane.f32.xlu0 %v2728_v39 }
0x109f   :  { %8059 = vst [vmem:[#allocation49_spill] sm:$0xff] %v6837_v11 }
0x1111   :  { %v2733_v43 = vpop.xlane.xlu0 %2732 }
0x1112   :  { %vm2734_vm9 = vcmp.eq.f32.partialorder %v2728_v39, %v2733_v43  ;;  %v8060_v39 = vld [vmem:[#allocation90_spill] sm:$0xff]  ;;  %v8061_v43 = vld [vmem:[#allocation92_spill] sm:$0xff] }
0x1113   :  { %v2735_v36 = vsel %vm2734_vm9, %v5923_v20, 128 }
0x1114   :  { %v2737_v38 = vshra.s32 %v2735_v36, 16  ;;  %v2736_v7 = vand.u32 65535, %v2735_v36  ;;  %v6844_v36 = vld [vmem:[#allocation16 + $0x120] sm:$0xff] }
0x1115   :  { %8062 = vst [vmem:[#allocation38_spill] sm:$0xff] %v6844_v36 }
0x1116   :  { %v2739_v15 = vcvt.s32.f32 %v2737_v38  ;;  %v2738_v1 = vcvt.s32.f32 %v2736_v7  ;;  %v6847_v38 = vld [vmem:[#allocation16 + $0x128] sm:$0xff] }
0x1117   :  { %8063 = vst [vmem:[#allocation56_spill] sm:$0xff] %v6847_v38  ;;  %v6851_v7 = vld [vmem:[#allocation16 + $0x108] sm:$0xff] }
0x1118   :  { %2740 = vmin.xlane.f32.xlu1 %v2739_v15  ;;  %8065 = vst [vmem:[#allocation58_spill] sm:$0xff] %v6851_v7 }
0x118b   :  { %v2741_v41 = vpop.xlane.xlu1 %2740 }
0x118c   :  { %vm2742_vm10 = vcmp.eq.f32.partialorder %v2739_v15, %v2741_v41  ;;  %v2747_v17 = vcvt.f32.s32 %v2741_v41  ;;  %v8064_v15 = vld [vmem:[#allocation110_spill] sm:$0xff] }
0x118d   :  { %v2743_v0 = vsel %vm2742_vm10, %v2738_v1, inf  ;;  %v6854_v41 = vld [vmem:[#allocation16 + $0x110] sm:$0xff]  ;;  %v8067_v1 = vld [vmem:[#allocation111_spill] sm:$0xff] }
0x118e   :  { %2744 = vmin.xlane.f32.xlu2 %v2743_v0  ;;  %v2748_v56 = vshll.u32 %v2747_v17, 16  ;;  %8066 = vst [vmem:[#allocation60_spill] sm:$0xff] %v6854_v41  ;;  %v6858_v0 = vld [vmem:[#allocation16 + $0xf0] sm:$0xff]  ;;  %v6861_v17 = vld [vmem:[#allocation16 + $0xf8] sm:$0xff] }
0x118f   :  { %8068 = vst [vmem:[#allocation62_spill] sm:$0xff] %v6858_v0 }
0x1190   :  { %8069 = vst [vmem:[#allocation63_spill] sm:$0xff] %v6861_v17 }
0x1201   :  { %v2745_v35 = vpop.xlane.xlu2 %2744 }
0x1202   :  { %v2746_v9 = vcvt.f32.s32 %v2745_v35  ;;  %v8070_v35 = vld [vmem:[#allocation112_spill] sm:$0xff] }
0x1204   :  { %v2749_v52 = vadd.s32 %v2748_v56, %v2746_v9  ;;  %v6865_v56 = vld [vmem:[#allocation16 + $0xd8] sm:$0xff]  ;;  %v6868_v9 = vld [vmem:[#allocation16 + $0xe0] sm:$0xff] }
0x1205   :  { %8071 = vst [vmem:[#allocation64_spill] sm:$0xff] %v6865_v56 }
0x1206   :  { %vm2750_vm11 = vcmp.eq.s32.totalorder %v5923_v20, %v2749_v52  ;;  %8072 = vst [vmem:[#allocation65_spill] sm:$0xff] %v6868_v9  ;;  %v8073_v52 = vld [vmem:[#allocation79_spill] sm:$0xff] }
0x1207   :  { %3587 = vmatmul.msk.f32.vlgmr.msra.gmra.mxu1 %vm2750_vm11, %v7871_v10 }
0x1208   :  { %2973 = vmatpush.msra.mxu1 %v6539_v51 }
0x120a   :  { %2974 = vmatpush.msra.mxu1 %v6542_v26 }
0x120c   :  { %2975 = vmatpush.msra.mxu1 %v6545_v12 }
0x120e   :  { %2976 = vmatpush.msra.mxu1 %v6548_v32 }
0x120f   :  { %2861 = vmatmul.f32.vlgmr.msrb.gmra.mxu1 %v6741_v29 }
0x1210   :  { %2977 = vmatpush.msra.mxu1 %v6552_v54 }
0x1212   :  { %2978 = vmatpush.msra.mxu1 %v6555_v4 }
0x1214   :  { %2979 = vmatpush.msra.mxu1 %v6558_v33 }
0x1216   :  { %2980 = vmatpush.msra.mxu1 %v6561_v34 }
0x1218   :  { %2981 = vmatpush.msra.mxu1 %v6564_v18 }
0x121a   :  { %2982 = vmatpush.msra.mxu1 %v8055_v31 }
0x121c   :  { %2983 = vmatpush.msra.mxu1 %v6570_v5 }
0x121e   :  { %2984 = vmatpush.msra.mxu1 %v6573_v58 }
0x1220   :  { %2985 = vmatpush.msra.mxu1 %v6576_v22 }
0x1222   :  { %2986 = vmatpush.msra.mxu1 %v6579_v21 }
0x1224   :  { %2987 = vmatpush.msra.mxu1 %v6582_v8 }
0x1226   :  { %2988 = vmatpush.msra.mxu1 %v6585_v44 }
0x1228   :  { %3088 = vmatpush.msrb.mxu1 %v6781_v48 }
0x122a   :  { %3089 = vmatpush.msrb.mxu1 %v6784_v25 }
0x122c   :  { %3090 = vmatpush.msrb.mxu1 %v6787_v14 }
0x122e   :  { %3091 = vmatpush.msrb.mxu1 %v6790_v57 }
0x1230   :  { %3092 = vmatpush.msrb.mxu1 %v6793_v28 }
0x1232   :  { %3093 = vmatpush.msrb.mxu1 %v6796_v6 }
0x1234   :  { %3094 = vmatpush.msrb.mxu1 %v6799_v63 }
0x1236   :  { %3095 = vmatpush.msrb.mxu1 %v6802_v62 }
0x1238   :  { %3096 = vmatpush.msrb.mxu1 %v6805_v30 }
0x123a   :  { %3097 = vmatpush.msrb.mxu1 %v6808_v59 }
0x123c   :  { %3098 = vmatpush.msrb.mxu1 %v6811_v27 }
0x123e   :  { %3099 = vmatpush.msrb.mxu1 %v6327_v50 }
0x1240   :  { %3100 = vmatpush.msrb.mxu1 %v6330_v47  ;;  %v6820_v47 = vld [vmem:[#allocation16 + $0x168] sm:$0xff] }
0x1242   :  { %3101 = vmatpush.msrb.mxu1 %v6333_v24  ;;  %v6823_v24 = vld [vmem:[#allocation16 + $0x170] sm:$0xff] }
0x1244   :  { %3102 = vmatpush.msrb.mxu1 %v6336_v46  ;;  %v8056_v46 = vld [vmem:[#allocation87_spill] sm:$0xff] }
0x1246   :  { %3103 = vmatpush.msrb.mxu1 %v6339_v60  ;;  %v6827_v60 = vld [vmem:[#allocation16 + $0x150] sm:$0xff] }
0x1284   :  { %v2770_v61 = vpop.f32.mrf.mxu1 }
0x1285   :  { %v2783_v3 = vmul.f32 %v2782_v53, %v2770_v61  ;;  %v8076_v53 = vld [vmem:[#allocation82_spill] sm:$0xff] }
0x1286   :  { %v6882_v61 = vld [vmem:[#allocation16 + $0xb0] sm:$0xff] }
0x1287   :  { %v2784_v50 = vadd.f32 %v2783_v3, %v2780_v49  ;;  %v6879_v49 = vld [vmem:[#allocation16 + $0xa8] sm:$0xff]  ;;  %8078 = vst [vmem:[#allocation105_spill] sm:$0xff] %v6882_v61 }
0x1288   :  { %8077 = vst [vmem:[#allocation104_spill] sm:$0xff] %v6879_v49  ;;  %v8079_v3 = vld [vmem:[#allocation85_spill] sm:$0xff] }
0x1289   :  { %2801 = vmatmul.f32.vlgmr.msra.gmra.mxu2 %v2784_v50  ;;  %2821 = vmatmul.f32.vlgmr.msrb.gmra.mxu3 %v2784_v50 }
0x128a   :  { %2841 = vmatmul.f32.vlgmr.msrb.gmra.mxu0 %v2784_v50  ;;  %3016 = vmatpush.msra.mxu2 %v6604_v55 }
0x128b   :  { %3048 = vmatpush.msrb.mxu3 %v6820_v47  ;;  %3068 = vmatpush.msrb.mxu0 %v6823_v24 }
0x128c   :  { %3017 = vmatpush.msra.mxu2 %v8056_v46 }
0x128d   :  { %3049 = vmatpush.msrb.mxu3 %v6827_v60  ;;  %3069 = vmatpush.msrb.mxu0 %v6830_v45 }
0x128e   :  { %3018 = vmatpush.msra.mxu2 %v8057_v16 }
0x128f   :  { %3050 = vmatpush.msrb.mxu3 %v6834_v2  ;;  %3070 = vmatpush.msrb.mxu0 %v6837_v11 }
0x1290   :  { %3019 = vmatpush.msra.mxu2 %v8060_v39 }
0x1291   :  { %2881 = vmatmul.f32.vlgmr.msrb.gmra.mxu2 %v6741_v29  ;;  %2901 = vmatmul.f32.vlgmr.msra.gmra.mxu3 %v6741_v29 }
0x1292   :  { %2969 = vmatmul.f32.vlgmr.msra.gmra.mxu0 %v2784_v50  ;;  %3020 = vmatpush.msra.mxu2 %v8061_v43  ;;  %v6886_v50 = vld [vmem:[#allocation16 + $0x90] sm:$0xff] }
0x1293   :  { %3051 = vmatpush.msrb.mxu3 %v6844_v36  ;;  %3071 = vmatpush.msrb.mxu0 %v6847_v38  ;;  %8080 = vst [vmem:[#allocation106_spill] sm:$0xff] %v6886_v50 }
0x1294   :  { %3021 = vmatpush.msra.mxu2 %v8064_v15 }
0x1295   :  { %3052 = vmatpush.msrb.mxu3 %v6851_v7  ;;  %3072 = vmatpush.msrb.mxu0 %v6854_v41 }
0x1296   :  { %3022 = vmatpush.msra.mxu2 %v8067_v1  ;;  %v8148_v1 = vld [vmem:[#allocation102_spill] sm:$0xff] }
0x1297   :  { %3053 = vmatpush.msrb.mxu3 %v6858_v0  ;;  %3073 = vmatpush.msrb.mxu0 %v6861_v17 }
0x1298   :  { %3023 = vmatpush.msra.mxu2 %v8070_v35 }
0x1299   :  { %3054 = vmatpush.msrb.mxu3 %v6865_v56  ;;  %3074 = vmatpush.msrb.mxu0 %v6868_v9  ;;  %v6948_v9 = vld [vmem:[#allocation19 + $0x108] sm:$0xff] }
0x129a   :  { %3024 = vmatpush.msra.mxu2 %v8073_v52  ;;  %v6922_v52 = vld [vmem:[#allocation16 + $0x18] sm:$0xff] }
0x129b   :  { %3055 = vmatpush.msrb.mxu3 %v6872_v42  ;;  %3075 = vmatpush.msrb.mxu0 %v6875_v40  ;;  %v6889_v42 = vld [vmem:[#allocation16 + $0x98] sm:$0xff]  ;;  %v8082_v40 = vld [vmem:[#allocation88_spill] sm:$0xff]  ;;  %8096 = vst [vmem:[#allocation83_spill] sm:$0xff] %v6922_v52 }
0x129c   :  { %3025 = vmatpush.msra.mxu2 %v8076_v53  ;;  %8081 = vst [vmem:[#allocation107_spill] sm:$0xff] %v6889_v42  ;;  %v6893_v53 = vld [vmem:[#allocation16 + $0x78] sm:$0xff] }
0x129d   :  { %3056 = vmatpush.msrb.mxu3 %v6879_v49  ;;  %3076 = vmatpush.msrb.mxu0 %v6882_v61  ;;  %8083 = vst [vmem:[#allocation71_spill] sm:$0xff] %v6893_v53  ;;  %v6896_v49 = vld [vmem:[#allocation16 + $0x80] sm:$0xff]  ;;  %v8085_v61 = vld [vmem:[#allocation91_spill] sm:$0xff] }
0x129e   :  { %3026 = vmatpush.msra.mxu2 %v8079_v3  ;;  %8084 = vst [vmem:[#allocation72_spill] sm:$0xff] %v6896_v49  ;;  %v6900_v3 = vld [vmem:[#allocation16 + $0x60] sm:$0xff] }
0x129f   :  { %3057 = vmatpush.msrb.mxu3 %v6886_v50  ;;  %3077 = vmatpush.msrb.mxu0 %v6889_v42  ;;  %8086 = vst [vmem:[#allocation74_spill] sm:$0xff] %v6900_v3  ;;  %v6903_v50 = vld [vmem:[#allocation16 + $0x68] sm:$0xff]  ;;  %v8088_v42 = vld [vmem:[#allocation42_spill] sm:$0xff] }
0x12a0   :  { %3027 = vmatpush.msra.mxu2 %v8082_v40  ;;  %8087 = vst [vmem:[#allocation75_spill] sm:$0xff] %v6903_v50  ;;  %v6907_v40 = vld [vmem:[#allocation16 + $0x48] sm:$0xff] }
0x12a1   :  { %3058 = vmatpush.msrb.mxu3 %v6893_v53  ;;  %3078 = vmatpush.msrb.mxu0 %v6896_v49  ;;  %8089 = vst [vmem:[#allocation77_spill] sm:$0xff] %v6907_v40  ;;  %v6910_v53 = vld [vmem:[#allocation16 + $0x50] sm:$0xff]  ;;  %v8091_v49 = vld [vmem:[#allocation47_spill] sm:$0xff] }
0x12a2   :  { %3028 = vmatpush.msra.mxu2 %v8085_v61  ;;  %8090 = vst [vmem:[#allocation78_spill] sm:$0xff] %v6910_v53  ;;  %v6914_v61 = vld [vmem:[#allocation16 + $0x30] sm:$0xff] }
0x12a3   :  { %3059 = vmatpush.msrb.mxu3 %v6900_v3  ;;  %3079 = vmatpush.msrb.mxu0 %v6903_v50  ;;  %8092 = vst [vmem:[#allocation80_spill] sm:$0xff] %v6914_v61  ;;  %v6917_v3 = vld [vmem:[#allocation16 + $0x38] sm:$0xff]  ;;  %v8094_v50 = vld [vmem:[#allocation37_spill] sm:$0xff] }
0x12a4   :  { %3029 = vmatpush.msra.mxu2 %v8088_v42  ;;  %8093 = vst [vmem:[#allocation81_spill] sm:$0xff] %v6917_v3  ;;  %v8095_v42 = vld [vmem:[#allocation48_spill] sm:$0xff] }
0x12a5   :  { %3060 = vmatpush.msrb.mxu3 %v6907_v40  ;;  %3080 = vmatpush.msrb.mxu0 %v6910_v53  ;;  %v6925_v40 = vld [vmem:[#allocation16 + $0x20] sm:$0xff] }
0x12a6   :  { %3030 = vmatpush.msra.mxu2 %v8091_v49  ;;  %8097 = vst [vmem:[#allocation84_spill] sm:$0xff] %v6925_v40  ;;  %v6928_v49 = vld [vmem:[#allocation19 + $0x150] sm:$0xff]  ;;  %v6943_v53 = vld [vmem:[#allocation19 + $0x120] sm:$0xff] }
0x12a7   :  { %3061 = vmatpush.msrb.mxu3 %v6914_v61  ;;  %3081 = vmatpush.msrb.mxu0 %v6917_v3  ;;  %8098 = vst [vmem:[#allocation86_spill] sm:$0xff] %v6928_v49  ;;  %v6931_v61 = vld [vmem:[#allocation16] sm:$0xff]  ;;  %v6934_v3 = vld [vmem:[#allocation16 + $0x8] sm:$0xff] }
0x12a8   :  { %3031 = vmatpush.msra.mxu2 %v8094_v50  ;;  %8099 = vst [vmem:[#allocation87_spill] sm:$0xff] %v6931_v61  ;;  %v6938_v50 = vld [vmem:[#allocation19 + $0x138] sm:$0xff] }
0x12a9   :  { %3062 = vmatpush.msrb.mxu3 %v6922_v52  ;;  %3082 = vmatpush.msrb.mxu0 %v6925_v40  ;;  %8100 = vst [vmem:[#allocation89_spill] sm:$0xff] %v6934_v3  ;;  %v8103_v52 = vld [vmem:[#allocation94_spill] sm:$0xff]  ;;  %v8104_v40 = vld [vmem:[#allocation95_spill] sm:$0xff] }
0x12aa   :  { %3108 = vmatpush.msrb.mxu2 %v8095_v42  ;;  %v8101_v42 = vld [vmem:[#allocation93_spill] sm:$0xff]  ;;  %8105 = vst [vmem:[#allocation94_spill] sm:$0xff] %v6943_v53 }
0x12ab   :  { %3063 = vmatpush.msrb.mxu3 %v6931_v61  ;;  %3083 = vmatpush.msrb.mxu0 %v6934_v3  ;;  %8102 = vst [vmem:[#allocation93_spill] sm:$0xff] %v6938_v50  ;;  %v8107_v61 = vld [vmem:[#allocation97_spill] sm:$0xff]  ;;  %v8110_v3 = vld [vmem:[#allocation99_spill] sm:$0xff] }
0x12ac   :  { %3109 = vmatpush.msrb.mxu2 %v6928_v49  ;;  %v8106_v49 = vld [vmem:[#allocation96_spill] sm:$0xff]  ;;  %8108 = vst [vmem:[#allocation95_spill] sm:$0xff] %v6948_v9 }
0x12ad   :  { %3128 = vmatpush.msra.mxu3 %v8101_v42  ;;  %3148 = vmatpush.msra.mxu0 %v8103_v52  ;;  %v8109_v42 = vld [vmem:[#allocation98_spill] sm:$0xff]  ;;  %v8112_v52 = vld [vmem:[#allocation52_spill] sm:$0xff] }
0x12ae   :  { %3110 = vmatpush.msrb.mxu2 %v6938_v50  ;;  %v6953_v50 = vld [vmem:[#allocation19 + $0xf0] sm:$0xff] }
0x12af   :  { %3129 = vmatpush.msra.mxu3 %v8104_v40  ;;  %3149 = vmatpush.msra.mxu0 %v8106_v49  ;;  %8111 = vst [vmem:[#allocation96_spill] sm:$0xff] %v6953_v50  ;;  %v8113_v40 = vld [vmem:[#allocation45_spill] sm:$0xff]  ;;  %v8115_v49 = vld [vmem:[#allocation100_spill] sm:$0xff] }
0x12b0   :  { %3111 = vmatpush.msrb.mxu2 %v6943_v53  ;;  %v6958_v53 = vld [vmem:[#allocation19 + $0xd8] sm:$0xff] }
0x12b1   :  { %3130 = vmatpush.msra.mxu3 %v8107_v61  ;;  %3150 = vmatpush.msra.mxu0 %v8109_v42  ;;  %8114 = vst [vmem:[#allocation97_spill] sm:$0xff] %v6958_v53  ;;  %v8116_v61 = vld [vmem:[#allocation61_spill] sm:$0xff]  ;;  %v8119_v42 = vld [vmem:[#allocation67_spill] sm:$0xff] }
0x12b2   :  { %3112 = vmatpush.msrb.mxu2 %v6948_v9  ;;  %v6963_v9 = vld [vmem:[#allocation19 + $0xc0] sm:$0xff] }
0x12b3   :  { %3131 = vmatpush.msra.mxu3 %v8110_v3  ;;  %3151 = vmatpush.msra.mxu0 %v8112_v52  ;;  %8117 = vst [vmem:[#allocation98_spill] sm:$0xff] %v6963_v9  ;;  %v8118_v3 = vld [vmem:[#allocation41_spill] sm:$0xff]  ;;  %v8121_v52 = vld [vmem:[#allocation68_spill] sm:$0xff] }
0x12b4   :  { %3113 = vmatpush.msrb.mxu2 %v6953_v50  ;;  %v6968_v50 = vld [vmem:[#allocation19 + $0xa8] sm:$0xff] }
0x12b5   :  { %3132 = vmatpush.msra.mxu3 %v8113_v40  ;;  %3152 = vmatpush.msra.mxu0 %v8115_v49  ;;  %8120 = vst [vmem:[#allocation99_spill] sm:$0xff] %v6968_v50  ;;  %v8122_v40 = vld [vmem:[#allocation50_spill] sm:$0xff]  ;;  %v8124_v49 = vld [vmem:[#allocation69_spill] sm:$0xff] }
0x12b6   :  { %3114 = vmatpush.msrb.mxu2 %v6958_v53  ;;  %v6973_v53 = vld [vmem:[#allocation19 + $0x90] sm:$0xff] }
0x12b7   :  { %3133 = vmatpush.msra.mxu3 %v8116_v61  ;;  %3153 = vmatpush.msra.mxu0 %v8118_v3  ;;  %8123 = vst [vmem:[#allocation52_spill] sm:$0xff] %v6973_v53  ;;  %v8125_v61 = vld [vmem:[#allocation40_spill] sm:$0xff]  ;;  %v8127_v3 = vld [vmem:[#allocation70_spill] sm:$0xff] }
0x12b8   :  { %3115 = vmatpush.msrb.mxu2 %v6963_v9  ;;  %v6978_v9 = vld [vmem:[#allocation19 + $0x78] sm:$0xff] }
0x12b9   :  { %3134 = vmatpush.msra.mxu3 %v8119_v42  ;;  %3154 = vmatpush.msra.mxu0 %v8121_v52  ;;  %8126 = vst [vmem:[#allocation45_spill] sm:$0xff] %v6978_v9  ;;  %v8128_v42 = vld [vmem:[#allocation73_spill] sm:$0xff]  ;;  %v8130_v52 = vld [vmem:[#allocation44_spill] sm:$0xff] }
0x12ba   :  { %3116 = vmatpush.msrb.mxu2 %v6968_v50  ;;  %v6983_v50 = vld [vmem:[#allocation19 + $0x60] sm:$0xff] }
0x12bb   :  { %3135 = vmatpush.msra.mxu3 %v8122_v40  ;;  %3155 = vmatpush.msra.mxu0 %v8124_v49  ;;  %8129 = vst [vmem:[#allocation100_spill] sm:$0xff] %v6983_v50  ;;  %v8131_v40 = vld [vmem:[#allocation76_spill] sm:$0xff]  ;;  %v8133_v49 = vld [vmem:[#allocation43_spill] sm:$0xff] }
0x12bc   :  { %3117 = vmatpush.msrb.mxu2 %v6973_v53  ;;  %v6988_v53 = vld [vmem:[#allocation19 + $0x48] sm:$0xff] }
0x12bd   :  { %3136 = vmatpush.msra.mxu3 %v8125_v61  ;;  %3156 = vmatpush.msra.mxu0 %v8127_v3  ;;  %8132 = vst [vmem:[#allocation61_spill] sm:$0xff] %v6988_v53  ;;  %v8134_v61 = vld [vmem:[#allocation46_spill] sm:$0xff]  ;;  %v8136_v3 = vld [vmem:[#allocation53_spill] sm:$0xff] }
0x12be   :  { %3118 = vmatpush.msrb.mxu2 %v6978_v9  ;;  %v6993_v9 = vld [vmem:[#allocation19 + $0x30] sm:$0xff] }
0x12bf   :  { %3137 = vmatpush.msra.mxu3 %v8128_v42  ;;  %3157 = vmatpush.msra.mxu0 %v8130_v52  ;;  %8135 = vst [vmem:[#allocation41_spill] sm:$0xff] %v6993_v9  ;;  %v8137_v42 = vld [vmem:[#allocation39_spill] sm:$0xff] }
0x12c0   :  { %3119 = vmatpush.msrb.mxu2 %v6983_v50  ;;  %v6998_v50 = vld [vmem:[#allocation19 + $0x18] sm:$0xff] }
0x12c1   :  { %3138 = vmatpush.msra.mxu3 %v8131_v40  ;;  %3158 = vmatpush.msra.mxu0 %v8133_v49  ;;  %8138 = vst [vmem:[#allocation67_spill] sm:$0xff] %v6998_v50  ;;  %v8139_v52 = vld [vmem:[#allocation35_spill] sm:$0xff] }
0x12c2   :  { %3120 = vmatpush.msrb.mxu2 %v6988_v53  ;;  %v8140_v40 = vld [vmem:[#allocation55_spill] sm:$0xff]  ;;  %v7003_v53 = vld [vmem:[#allocation19] sm:$0xff] }
0x12c3   :  { %3139 = vmatpush.msra.mxu3 %v8134_v61  ;;  %3159 = vmatpush.msra.mxu0 %v8136_v3  ;;  %8141 = vst [vmem:[#allocation68_spill] sm:$0xff] %v7003_v53  ;;  %v8142_v49 = vld [vmem:[#allocation51_spill] sm:$0xff]  ;;  %v8143_v61 = vld [vmem:[#allocation57_spill] sm:$0xff]  ;;  %v8145_v3 = vld [vmem:[#allocation108_spill] sm:$0xff] }
0x12c4   :  { %3121 = vmatpush.msrb.mxu2 %v6993_v9  ;;  %v8144_v9 = vld [vmem:[#allocation59_spill] sm:$0xff] }
0x12c5   :  { %3140 = vmatpush.msra.mxu3 %v8137_v42  ;;  %3160 = vmatpush.msra.mxu0 %v8139_v52  ;;  %v8146_v42 = vld [vmem:[#allocation109_spill] sm:$0xff]  ;;  %v2862_v52 = vpop.f32.mrf.mxu1 }
0x12c6   :  { %3122 = vmatpush.msrb.mxu2 %v6998_v50  ;;  %v8147_v50 = vld [vmem:[#allocation101_spill] sm:$0xff] }
0x12c7   :  { %3141 = vmatpush.msra.mxu3 %v8140_v40  ;;  %3161 = vmatpush.msra.mxu0 %v8142_v49 }
0x12c8   :  { %3123 = vmatpush.msrb.mxu2 %v7003_v53 }
0x12c9   :  { %3142 = vmatpush.msra.mxu3 %v8143_v61  ;;  %3162 = vmatpush.msra.mxu0 %v8144_v9 }
0x12cb   :  { %3143 = vmatpush.msra.mxu3 %v8145_v3  ;;  %3163 = vmatpush.msra.mxu0 %v8146_v42 }
0x130c   :  { %v2802_v56 = vpop.f32.mrf.mxu2  ;;  %v2822_v40 = vpop.f32.mrf.mxu3 }
0x130d   :  { %v2803_v35 = vadd.f32 %v2802_v56, %v8147_v50  ;;  %v2823_v53 = vadd.f32 %v2822_v40, %v8148_v1  ;;  %v2842_v40 = vpop.f32.mrf.mxu0 }
0x130f   :  { %v2905_v17 = vadd.f32 %v2862_v52, %v2803_v35 }
0x1311   :  { %v3589_v0 = vmul.f32 -1.442695, %v2905_v17 }
0x1313   :  { %3744 = vpow2.f32 %v3589_v0 }
0x1314   :  { %v2882_v41 = vpop.f32.mrf.mxu2  ;;  %v2902_v52 = vpop.f32.mrf.mxu3 }
0x1315   :  { %v2925_v49 = vadd.f32 %v2882_v41, %v2823_v53 }
0x1317   :  { %v3590_v7 = vmul.f32 -1.442695, %v2925_v49 }
0x1319   :  { %v3745_v61 = vpop.eup %3744  ;;  %3746 = vpow2.f32 %v3590_v7 }
0x131a   :  { %v2909_v9 = vadd.f32 1.0, %v3745_v61  ;;  %v2945_v61 = vadd.f32 %v6509_v37, %v2902_v52 }
0x131c   :  { %3748 = vrcp.f32 %v2909_v9  ;;  %v2921_v50 = vand.u32 2147483648, %v2909_v9  ;;  %v2919_v17 = vand.u32 2147483647, %v2909_v9  ;;  %vm2915_vm13 = vweird.f32 %v2909_v9 }
0x131e   :  { %v2922_v7 = vor.u32 1.1754944e-38, %v2921_v50  ;;  %vm2920_vm15 = vcmp.eq.f32.partialorder %v2919_v17, 8.507059e+37 }
0x131f   :  { %v3747_v3 = vpop.eup %3746 }
0x1320   :  { %v2929_v15 = vadd.f32 1.0, %v3747_v3  ;;  %v2843_v3 = vadd.f32 %v2842_v40, %v7862_v23  ;;  %v7019_v40 = vld [vmem:[#allocation20 + $0x78] sm:$0xff] }
0x1322   :  { %v3749_v42 = vpop.eup %3748  ;;  %3750 = vrcp.f32 %v2929_v15  ;;  %v2939_v39 = vand.u32 2147483647, %v2929_v15  ;;  %vm2935_vm1 = vweird.f32 %v2929_v15 }
0x1323   :  { %v2911_v38 = vmul.f32 %v3749_v42, %v2909_v9  ;;  %vm2916_vm12 = vweird.f32 %v3749_v42 }
0x1324   :  { %vm2917_vm14 = vmor %vm2915_vm13, %vm2916_vm12  ;;  %vm2940_vm3 = vcmp.eq.f32.partialorder %v2939_v39, 8.507059e+37  ;;  %v7034_v39 = vld [vmem:[#allocation20 + $0x50] sm:$0xff] }
0x1325   :  { %v2912_v56 = vsub.f32 1.0, %v2911_v38 }
0x1327   :  { %v2913_v35 = vmul.f32 %v3749_v42, %v2912_v56  ;;  %v2941_v56 = vand.u32 2147483648, %v2929_v15 }
0x1328   :  { %v3751_v0 = vpop.eup %3750 }
0x1329   :  { %v2931_v1 = vmul.f32 %v3751_v0, %v2929_v15  ;;  %v2914_v41 = vadd.f32 %v3749_v42, %v2913_v35  ;;  %vm2936_vm0 = vweird.f32 %v3751_v0  ;;  %v2942_v9 = vor.u32 1.1754944e-38, %v2941_v56  ;;  %v7040_v15 = vld [vmem:[#allocation20 + $0x40] sm:$0xff] }
0x132a   :  { %vm2937_vm2 = vmor %vm2935_vm1, %vm2936_vm0 }
0x132b   :  { %v2932_v53 = vsub.f32 1.0, %v2931_v1  ;;  %v2918_v49 = vsel %vm2917_vm14, %v3749_v42, %v2914_v41  ;;  %v7046_v41 = vld [vmem:[#allocation20 + $0x30] sm:$0xff] }
0x132c   :  { %v2923_v38 = vsel %vm2920_vm15, %v2922_v7, %v2918_v49  ;;  %v7049_v7 = vld [vmem:[#allocation20 + $0x28] sm:$0xff]  ;;  %v7055_v49 = vld [vmem:[#allocation20 + $0x18] sm:$0xff] }
0x132d   :  { %v2933_v36 = vmul.f32 %v3751_v0, %v2932_v53  ;;  %v2946_v43 = vmul.f32 %v2945_v61, %v2923_v38  ;;  %v7052_v53 = vld [vmem:[#allocation20 + $0x20] sm:$0xff]  ;;  %8150 = vst [vmem:[#allocation69_spill] sm:$0xff] %v7055_v49  ;;  %v7058_v61 = vld [vmem:[#allocation20 + $0x10] sm:$0xff]  ;;  %v2970_v38 = vpop.f32.mrf.mxu0 }
0x132e   :  { %8149 = vst [vmem:[#allocation50_spill] sm:$0xff] %v7052_v53  ;;  %v2971_v56 = vadd.f32 %v2970_v38, %v8054_v19 }
0x132f   :  { %v2934_v11 = vadd.f32 %v3751_v0, %v2933_v36  ;;  %v2947_v2 = vadd.f32 %v2946_v43, %v2843_v3  ;;  %v7022_v43 = vld [vmem:[#allocation20 + $0x70] sm:$0xff]  ;;  %v7037_v36 = vld [vmem:[#allocation20 + $0x48] sm:$0xff]  ;;  %8151 = vst [vmem:[#allocation40_spill] sm:$0xff] %v7058_v61 }
0x1330   :  { %v7061_v3 = vld [vmem:[#allocation20 + $0x8] sm:$0xff] }
0x1331   :  { %v2938_v35 = vsel %vm2937_vm2, %v3751_v0, %v2934_v11  ;;  %3752 = vtanh.f32 %v2947_v2  ;;  %v7025_v2 = vld [vmem:[#allocation20 + $0x68] sm:$0xff]  ;;  %v7028_v11 = vld [vmem:[#allocation20 + $0x60] sm:$0xff]  ;;  %v7043_v0 = vld [vmem:[#allocation20 + $0x38] sm:$0xff]  ;;  %8152 = vst [vmem:[#allocation70_spill] sm:$0xff] %v7061_v3 }
0x1332   :  { %v2943_v1 = vsel %vm2940_vm3, %v2942_v9, %v2938_v35 }
0x1333   :  { %v2949_v50 = vsub.f32 1.0, %v2943_v1  ;;  %v2951_v17 = vmul.f32 %v2943_v1, %v6741_v29  ;;  %v7031_v29 = vld [vmem:[#allocation20 + $0x58] sm:$0xff] }
0x1337   :  { %v3753_v42 = vpop.eup %3752 }
0x1338   :  { %v2950_v37 = vmul.f32 %v3753_v42, %v2949_v50 }
0x133a   :  { %v7016_v52 = vadd.f32 %v2951_v17, %v2950_v37 }
0x133c   :  { %2989 = vmatmul.f32.vlgmr.msra.gmra.mxu1 %v7016_v52 }
0x133d   :  { %3216 = vmatpush.msra.mxu1 %v7019_v40 }
0x133f   :  { %3217 = vmatpush.msra.mxu1 %v7022_v43 }
0x1341   :  { %3218 = vmatpush.msra.mxu1 %v7025_v2 }
0x1343   :  { %3219 = vmatpush.msra.mxu1 %v7028_v11 }
0x1345   :  { %3220 = vmatpush.msra.mxu1 %v7031_v29 }
0x1347   :  { %3221 = vmatpush.msra.mxu1 %v7034_v39 }
0x1349   :  { %3222 = vmatpush.msra.mxu1 %v7037_v36 }
0x134b   :  { %3223 = vmatpush.msra.mxu1 %v7040_v15 }
0x134d   :  { %3224 = vmatpush.msra.mxu1 %v7043_v0 }
0x134f   :  { %3225 = vmatpush.msra.mxu1 %v7046_v41 }
0x1351   :  { %3226 = vmatpush.msra.mxu1 %v7049_v7 }
0x1353   :  { %3227 = vmatpush.msra.mxu1 %v7052_v53 }
0x1355   :  { %3228 = vmatpush.msra.mxu1 %v7055_v49 }
0x1357   :  { %3229 = vmatpush.msra.mxu1 %v7058_v61 }
0x1359   :  { %3230 = vmatpush.msra.mxu1 %v7061_v3 }
0x135b   :  { %3231 = vmatpush.msra.mxu1 %v8053_v13 }
0x13b9   :  { %v2990_v9 = vpop.f32.mrf.mxu1 }
0x13ba   :  { %v2991_v35 = vadd.f32 %v2990_v9, %v2971_v56  ;;  %v8180_v9 = vld [vmem:[#allocation91_spill] sm:$0xff] }
0x13bc   :  { %2994 = vst [vmem:[#allocation25 + $0x20] sm:$0xff] %v2991_v35  ;;  %2995 = vmax.xlane.f32.xlu0 %v2991_v35 }
0x142f   :  { %v2996_v1 = vpop.xlane.xlu0 %2995 }
0x1430   :  { %vm2997_vm4 = vcmp.eq.f32.partialorder %v2991_v35, %v2996_v1  ;;  %v8181_v35 = vld [vmem:[#allocation74_spill] sm:$0xff]  ;;  %v8182_v1 = vld [vmem:[#allocation75_spill] sm:$0xff] }
0x1431   :  { %v2998_v50 = vsel %vm2997_vm4, %v5923_v20, 128 }
0x1432   :  { %v3000_v42 = vshra.s32 %v2998_v50, 16  ;;  %v2999_v17 = vand.u32 65535, %v2998_v50  ;;  %v8183_v50 = vld [vmem:[#allocation42_spill] sm:$0xff] }
0x1434   :  { %v3002_v37 = vcvt.s32.f32 %v3000_v42  ;;  %v3001_v49 = vcvt.s32.f32 %v2999_v17  ;;  %v8184_v42 = vld [vmem:[#allocation77_spill] sm:$0xff]  ;;  %v8186_v17 = vld [vmem:[#allocation47_spill] sm:$0xff] }
0x1436   :  { %3003 = vmin.xlane.f32.xlu1 %v3002_v37 }
0x14a9   :  { %v3004_v61 = vpop.xlane.xlu1 %3003 }
0x14aa   :  { %vm3005_vm5 = vcmp.eq.f32.partialorder %v3002_v37, %v3004_v61  ;;  %v3010_v13 = vcvt.f32.s32 %v3004_v61  ;;  %v8178_v61 = vld [vmem:[#allocation71_spill] sm:$0xff]  ;;  %v8185_v37 = vld [vmem:[#allocation78_spill] sm:$0xff] }
0x14ab   :  { %v3006_v3 = vsel %vm3005_vm5, %v3001_v49, inf  ;;  %v8177_v49 = vld [vmem:[#allocation88_spill] sm:$0xff] }
0x14ac   :  { %3007 = vmin.xlane.f32.xlu2 %v3006_v3  ;;  %v3011_v38 = vshll.u32 %v3010_v13, 16  ;;  %v8179_v3 = vld [vmem:[#allocation72_spill] sm:$0xff] }
0x14ad   :  { %v8187_v13 = vld [vmem:[#allocation80_spill] sm:$0xff] }
0x151f   :  { %v3008_v53 = vpop.xlane.xlu2 %3007 }
0x1520   :  { %v3009_v19 = vcvt.f32.s32 %v3008_v53  ;;  %v8176_v53 = vld [vmem:[#allocation107_spill] sm:$0xff] }
0x1522   :  { %v3012_v56 = vadd.s32 %v3011_v38, %v3009_v19  ;;  %v8157_v19 = vld [vmem:[#allocation38_spill] sm:$0xff]  ;;  %v8188_v38 = vld [vmem:[#allocation81_spill] sm:$0xff] }
0x1524   :  { %vm3013_vm6 = vcmp.eq.s32.totalorder %v5923_v20, %v3012_v56  ;;  %v8189_v56 = vld [vmem:[#allocation37_spill] sm:$0xff] }
0x1525   :  { %3592 = vmatmul.msk.f32.vlgmr.msra.gmra.mxu2 %vm3013_vm6, %v7871_v10 }
0x1526   :  { %3236 = vmatpush.msra.mxu2 %v6539_v51  ;;  %v4042_v51 = vld [vmem:[#allocation16 + $0x70] sm:$0xff] }
0x1528   :  { %3237 = vmatpush.msra.mxu2 %v6542_v26  ;;  %v4043_v26 = vld [vmem:[#allocation16 + $0x58] sm:$0xff] }
0x152a   :  { %3238 = vmatpush.msra.mxu2 %v6545_v12  ;;  %v4044_v12 = vld [vmem:[#allocation16 + $0x40] sm:$0xff] }
0x152c   :  { %3239 = vmatpush.msra.mxu2 %v6548_v32  ;;  %v4045_v32 = vld [vmem:[#allocation16 + $0x28] sm:$0xff] }
0x152d   :  { %3124 = vmatmul.f32.vlgmr.msrb.gmra.mxu2 %v7016_v52 }
0x152e   :  { %3240 = vmatpush.msra.mxu2 %v6552_v54  ;;  %v4046_v54 = vld [vmem:[#allocation16 + $0x10] sm:$0xff] }
0x1530   :  { %3241 = vmatpush.msra.mxu2 %v6555_v4  ;;  %v3041_v4 = vld [vmem:[#allocation10 + $0x20] sm:$0xff] }
0x1532   :  { %3242 = vmatpush.msra.mxu2 %v6558_v33  ;;  %v3042_v33 = vstv %s3039_s1 }
0x1534   :  { %3243 = vmatpush.msra.mxu2 %v6561_v34  ;;  %v3045_v34 = vstv %s3044_s6 }
0x1536   :  { %3244 = vmatpush.msra.mxu2 %v6564_v18  ;;  %v3043_v18 = vmul.f32 %v3042_v33, %v3041_v4  ;;  %v8195_v4 = vld [vmem:[#allocation89_spill] sm:$0xff]  ;;  %v4047_v33 = vld [vmem:[#allocation19 + $0x170] sm:$0xff] }
0x1538   :  { %3245 = vmatpush.msra.mxu2 %v8055_v31  ;;  %v8158_v31 = vld [vmem:[#allocation56_spill] sm:$0xff] }
0x153a   :  { %3246 = vmatpush.msra.mxu2 %v6570_v5 }
0x153c   :  { %3247 = vmatpush.msra.mxu2 %v6573_v58 }
0x153e   :  { %3248 = vmatpush.msra.mxu2 %v6576_v22  ;;  %v8153_v22 = vld [vmem:[#allocation54_spill] sm:$0xff] }
0x1540   :  { %3249 = vmatpush.msra.mxu2 %v6579_v21  ;;  %v8154_v21 = vld [vmem:[#allocation49_spill] sm:$0xff] }
0x1542   :  { %3250 = vmatpush.msra.mxu2 %v6582_v8  ;;  %v8155_v8 = vld [vmem:[#allocation90_spill] sm:$0xff] }
0x1544   :  { %3251 = vmatpush.msra.mxu2 %v6585_v44 }
0x1546   :  { %3351 = vmatpush.msrb.mxu2 %v6781_v48  ;;  %v8159_v48 = vld [vmem:[#allocation110_spill] sm:$0xff] }
0x1548   :  { %3352 = vmatpush.msrb.mxu2 %v6784_v25  ;;  %v8160_v25 = vld [vmem:[#allocation58_spill] sm:$0xff] }
0x154a   :  { %3353 = vmatpush.msrb.mxu2 %v6787_v14  ;;  %v8161_v14 = vld [vmem:[#allocation60_spill] sm:$0xff] }
0x154c   :  { %3354 = vmatpush.msrb.mxu2 %v6790_v57  ;;  %v8162_v57 = vld [vmem:[#allocation111_spill] sm:$0xff] }
0x154e   :  { %3355 = vmatpush.msrb.mxu2 %v6793_v28  ;;  %v8163_v28 = vld [vmem:[#allocation62_spill] sm:$0xff] }
0x1550   :  { %3356 = vmatpush.msrb.mxu2 %v6796_v6  ;;  %v8164_v6 = vld [vmem:[#allocation63_spill] sm:$0xff] }
0x1552   :  { %3357 = vmatpush.msrb.mxu2 %v6799_v63  ;;  %v8165_v63 = vld [vmem:[#allocation112_spill] sm:$0xff] }
0x1554   :  { %3358 = vmatpush.msrb.mxu2 %v6802_v62  ;;  %v8166_v62 = vld [vmem:[#allocation64_spill] sm:$0xff] }
0x1556   :  { %3359 = vmatpush.msrb.mxu2 %v6805_v30  ;;  %v8167_v30 = vld [vmem:[#allocation65_spill] sm:$0xff] }
0x1558   :  { %3360 = vmatpush.msrb.mxu2 %v6808_v59  ;;  %v8168_v59 = vld [vmem:[#allocation79_spill] sm:$0xff] }
0x155a   :  { %3361 = vmatpush.msrb.mxu2 %v6811_v27  ;;  %v8169_v27 = vld [vmem:[#allocation66_spill] sm:$0xff] }
0x155c   :  { %3362 = vmatpush.msrb.mxu2 %v4042_v51  ;;  %v8190_v51 = vld [vmem:[#allocation48_spill] sm:$0xff] }
0x155e   :  { %3363 = vmatpush.msrb.mxu2 %v4043_v26  ;;  %v8191_v26 = vld [vmem:[#allocation83_spill] sm:$0xff] }
0x1560   :  { %3364 = vmatpush.msrb.mxu2 %v4044_v12  ;;  %v8192_v12 = vld [vmem:[#allocation84_spill] sm:$0xff] }
0x1562   :  { %3365 = vmatpush.msrb.mxu2 %v4045_v32  ;;  %v8193_v32 = vld [vmem:[#allocation86_spill] sm:$0xff] }
0x1564   :  { %3366 = vmatpush.msrb.mxu2 %v4046_v54  ;;  %v8194_v54 = vld [vmem:[#allocation87_spill] sm:$0xff] }
0x15a8   :  { %v3033_v44 = vpop.f32.mrf.mxu2 }
0x15a9   :  { %v3046_v5 = vmul.f32 %v3045_v34, %v3033_v44  ;;  %v8196_v34 = vld [vmem:[#allocation93_spill] sm:$0xff]  ;;  %v4049_v44 = vld [vmem:[#allocation19 + $0x158] sm:$0xff] }
0x15ab   :  { %v3047_v58 = vadd.f32 %v3046_v5, %v3043_v18  ;;  %v4048_v18 = vld [vmem:[#allocation19 + $0x178] sm:$0xff]  ;;  %v8197_v5 = vld [vmem:[#allocation94_spill] sm:$0xff] }
0x15ad   :  { %3064 = vmatmul.f32.vlgmr.msrb.gmra.mxu3 %v3047_v58  ;;  %3084 = vmatmul.f32.vlgmr.msrb.gmra.mxu0 %v3047_v58 }
0x15ae   :  { %3104 = vmatmul.f32.vlgmr.msrb.gmra.mxu1 %v3047_v58  ;;  %3279 = vmatpush.msrb.mxu3 %v6604_v55  ;;  %v8156_v55 = vld [vmem:[#allocation92_spill] sm:$0xff] }
0x15af   :  { %3311 = vmatpush.msrb.mxu0 %v6820_v47  ;;  %3331 = vmatpush.msrb.mxu1 %v6823_v24  ;;  %v8170_v47 = vld [vmem:[#allocation103_spill] sm:$0xff]  ;;  %v8171_v24 = vld [vmem:[#allocation82_spill] sm:$0xff] }
0x15b0   :  { %3280 = vmatpush.msrb.mxu3 %v8056_v46  ;;  %v8172_v46 = vld [vmem:[#allocation104_spill] sm:$0xff] }
0x15b1   :  { %3312 = vmatpush.msrb.mxu0 %v6827_v60  ;;  %3332 = vmatpush.msrb.mxu1 %v6830_v45  ;;  %v8173_v60 = vld [vmem:[#allocation105_spill] sm:$0xff] }
0x15b2   :  { %3281 = vmatpush.msrb.mxu3 %v8057_v16  ;;  %v8174_v45 = vld [vmem:[#allocation85_spill] sm:$0xff]  ;;  %v8175_v16 = vld [vmem:[#allocation106_spill] sm:$0xff] }
0x15b3   :  { %3313 = vmatpush.msrb.mxu0 %v8153_v22  ;;  %3333 = vmatpush.msrb.mxu1 %v8154_v21  ;;  %v4051_v22 = vld [vmem:[#allocation19 + $0x140] sm:$0xff]  ;;  %v8198_v21 = vld [vmem:[#allocation95_spill] sm:$0xff] }
0x15b4   :  { %3282 = vmatpush.msrb.mxu3 %v8155_v8  ;;  %v4052_v8 = vld [vmem:[#allocation19 + $0x148] sm:$0xff] }
0x15b5   :  { %3144 = vmatmul.f32.vlgmr.msra.gmra.mxu3 %v7016_v52  ;;  %3164 = vmatmul.f32.vlgmr.msra.gmra.mxu0 %v7016_v52 }
0x15b6   :  { %3232 = vmatmul.f32.vlgmr.msra.gmra.mxu1 %v3047_v58  ;;  %3283 = vmatpush.msrb.mxu3 %v8156_v55  ;;  %v4050_v58 = vld [vmem:[#allocation19 + $0x160] sm:$0xff]  ;;  %v4053_v55 = vld [vmem:[#allocation19 + $0x128] sm:$0xff] }
0x15b7   :  { %3314 = vmatpush.msrb.mxu0 %v8157_v19  ;;  %3334 = vmatpush.msrb.mxu1 %v8158_v31  ;;  %v8199_v19 = vld [vmem:[#allocation96_spill] sm:$0xff]  ;;  %v4054_v31 = vld [vmem:[#allocation19 + $0x130] sm:$0xff] }
0x15b8   :  { %3284 = vmatpush.msrb.mxu3 %v8159_v48  ;;  %v4055_v48 = vld [vmem:[#allocation19 + $0x110] sm:$0xff] }
0x15b9   :  { %3315 = vmatpush.msrb.mxu0 %v8160_v25  ;;  %3335 = vmatpush.msrb.mxu1 %v8161_v14  ;;  %v8200_v25 = vld [vmem:[#allocation97_spill] sm:$0xff]  ;;  %v4056_v14 = vld [vmem:[#allocation19 + $0x118] sm:$0xff] }
0x15ba   :  { %3285 = vmatpush.msrb.mxu3 %v8162_v57  ;;  %v4057_v57 = vld [vmem:[#allocation19 + $0xf8] sm:$0xff] }
0x15bb   :  { %3316 = vmatpush.msrb.mxu0 %v8163_v28  ;;  %3336 = vmatpush.msrb.mxu1 %v8164_v6  ;;  %v8201_v28 = vld [vmem:[#allocation98_spill] sm:$0xff]  ;;  %v4058_v6 = vld [vmem:[#allocation19 + $0x100] sm:$0xff] }
0x15bc   :  { %3286 = vmatpush.msrb.mxu3 %v8165_v63  ;;  %v4059_v63 = vld [vmem:[#allocation19 + $0xe0] sm:$0xff] }
0x15bd   :  { %3317 = vmatpush.msrb.mxu0 %v8166_v62  ;;  %3337 = vmatpush.msrb.mxu1 %v8167_v30  ;;  %v8202_v62 = vld [vmem:[#allocation99_spill] sm:$0xff]  ;;  %v4060_v30 = vld [vmem:[#allocation19 + $0xe8] sm:$0xff] }
0x15be   :  { %3287 = vmatpush.msrb.mxu3 %v8168_v59  ;;  %v4061_v59 = vld [vmem:[#allocation19 + $0xc8] sm:$0xff] }
0x15bf   :  { %3318 = vmatpush.msrb.mxu0 %v8169_v27  ;;  %3338 = vmatpush.msrb.mxu1 %v8170_v47  ;;  %v8203_v27 = vld [vmem:[#allocation52_spill] sm:$0xff]  ;;  %v4062_v47 = vld [vmem:[#allocation19 + $0xd0] sm:$0xff] }
0x15c0   :  { %3288 = vmatpush.msrb.mxu3 %v8171_v24  ;;  %v4063_v24 = vld [vmem:[#allocation19 + $0xb0] sm:$0xff] }
0x15c1   :  { %3319 = vmatpush.msrb.mxu0 %v8172_v46  ;;  %3339 = vmatpush.msrb.mxu1 %v8173_v60  ;;  %v8204_v46 = vld [vmem:[#allocation45_spill] sm:$0xff]  ;;  %v4064_v60 = vld [vmem:[#allocation19 + $0xb8] sm:$0xff] }
0x15c2   :  { %3289 = vmatpush.msrb.mxu3 %v8174_v45  ;;  %v4065_v45 = vld [vmem:[#allocation19 + $0x98] sm:$0xff] }
0x15c3   :  { %3320 = vmatpush.msrb.mxu0 %v8175_v16  ;;  %3340 = vmatpush.msrb.mxu1 %v8176_v53  ;;  %v8205_v16 = vld [vmem:[#allocation100_spill] sm:$0xff] }
0x15c4   :  { %3290 = vmatpush.msrb.mxu3 %v8177_v49  ;;  %v4066_v53 = vld [vmem:[#allocation19 + $0xa0] sm:$0xff] }
0x15c5   :  { %3321 = vmatpush.msrb.mxu0 %v8178_v61  ;;  %3341 = vmatpush.msrb.mxu1 %v8179_v3  ;;  %v4067_v49 = vld [vmem:[#allocation19 + $0x80] sm:$0xff]  ;;  %v8206_v61 = vld [vmem:[#allocation61_spill] sm:$0xff] }
0x15c6   :  { %3291 = vmatpush.msrb.mxu3 %v8180_v9  ;;  %v4068_v3 = vld [vmem:[#allocation19 + $0x88] sm:$0xff] }
0x15c7   :  { %3322 = vmatpush.msrb.mxu0 %v8181_v35  ;;  %3342 = vmatpush.msrb.mxu1 %v8182_v1  ;;  %v4069_v9 = vld [vmem:[#allocation19 + $0x68] sm:$0xff]  ;;  %v4070_v1 = vld [vmem:[#allocation19 + $0x70] sm:$0xff] }
0x15c8   :  { %3292 = vmatpush.msrb.mxu3 %v8183_v50  ;;  %v8207_v35 = vld [vmem:[#allocation41_spill] sm:$0xff]  ;;  %v4071_v50 = vld [vmem:[#allocation19 + $0x50] sm:$0xff] }
0x15c9   :  { %3323 = vmatpush.msrb.mxu0 %v8184_v42  ;;  %3343 = vmatpush.msrb.mxu1 %v8185_v37  ;;  %v8208_v42 = vld [vmem:[#allocation67_spill] sm:$0xff] }
0x15ca   :  { %3293 = vmatpush.msrb.mxu3 %v8186_v17  ;;  %v4072_v37 = vld [vmem:[#allocation19 + $0x58] sm:$0xff] }
0x15cb   :  { %3324 = vmatpush.msrb.mxu0 %v8187_v13  ;;  %3344 = vmatpush.msrb.mxu1 %v8188_v38  ;;  %v4073_v17 = vld [vmem:[#allocation19 + $0x38] sm:$0xff]  ;;  %v8209_v13 = vld [vmem:[#allocation68_spill] sm:$0xff] }
0x15cc   :  { %3294 = vmatpush.msrb.mxu3 %v8189_v56  ;;  %v4074_v38 = vld [vmem:[#allocation19 + $0x40] sm:$0xff] }
0x15cd   :  { %3325 = vmatpush.msrb.mxu0 %v8191_v26  ;;  %3345 = vmatpush.msrb.mxu1 %v8192_v12  ;;  %v4075_v56 = vld [vmem:[#allocation19 + $0x20] sm:$0xff]  ;;  %v4077_v26 = vld [vmem:[#allocation19 + $0x8] sm:$0xff]  ;;  %v4078_v12 = vld [vmem:[#allocation19 + $0x10] sm:$0xff] }
0x15ce   :  { %3371 = vmatpush.msra.mxu3 %v8190_v51  ;;  %v4076_v51 = vld [vmem:[#allocation19 + $0x28] sm:$0xff] }
0x15cf   :  { %3326 = vmatpush.msrb.mxu0 %v8194_v54  ;;  %3346 = vmatpush.msrb.mxu1 %v8195_v4  ;;  %v8210_v54 = vld [vmem:[#allocation101_spill] sm:$0xff] }
0x15d0   :  { %3372 = vmatpush.msra.mxu3 %v8193_v32 }
0x15d1   :  { %3391 = vmatpush.msra.mxu0 %v4047_v33  ;;  %3411 = vmatpush.msra.mxu1 %v4048_v18  ;;  %v3125_v33 = vpop.f32.mrf.mxu2 }
0x15d2   :  { %3373 = vmatpush.msra.mxu3 %v8196_v34 }
0x15d3   :  { %3392 = vmatpush.msra.mxu0 %v4049_v44  ;;  %3412 = vmatpush.msra.mxu1 %v4050_v58 }
0x15d4   :  { %3374 = vmatpush.msra.mxu3 %v8197_v5  ;;  %v8211_v5 = vld [vmem:[#allocation102_spill] sm:$0xff] }
0x15d5   :  { %3393 = vmatpush.msra.mxu0 %v4051_v22  ;;  %3413 = vmatpush.msra.mxu1 %v4052_v8 }
0x15d6   :  { %3375 = vmatpush.msra.mxu3 %v8198_v21 }
0x15d7   :  { %3394 = vmatpush.msra.mxu0 %v4053_v55  ;;  %3414 = vmatpush.msra.mxu1 %v4054_v31 }
0x15d8   :  { %3376 = vmatpush.msra.mxu3 %v8199_v19 }
0x15d9   :  { %3395 = vmatpush.msra.mxu0 %v4055_v48  ;;  %3415 = vmatpush.msra.mxu1 %v4056_v14 }
0x15da   :  { %3377 = vmatpush.msra.mxu3 %v8200_v25 }
0x15db   :  { %3396 = vmatpush.msra.mxu0 %v4057_v57  ;;  %3416 = vmatpush.msra.mxu1 %v4058_v6 }
0x15dc   :  { %3378 = vmatpush.msra.mxu3 %v8201_v28 }
0x15dd   :  { %3397 = vmatpush.msra.mxu0 %v4059_v63  ;;  %3417 = vmatpush.msra.mxu1 %v4060_v30 }
0x15de   :  { %3379 = vmatpush.msra.mxu3 %v8202_v62 }
0x15df   :  { %3398 = vmatpush.msra.mxu0 %v4061_v59  ;;  %3418 = vmatpush.msra.mxu1 %v4062_v47 }
0x15e0   :  { %3380 = vmatpush.msra.mxu3 %v8203_v27 }
0x15e1   :  { %3399 = vmatpush.msra.mxu0 %v4063_v24  ;;  %3419 = vmatpush.msra.mxu1 %v4064_v60  ;;  %v7168_v60 = vld [vmem:[%s7222_s12] ss:$0 sm:$0xff]  ;;  %s3598_s12 = sld [smem:[#allocation3 + $0x5]] }
0x15e2   :  { %3381 = vmatpush.msra.mxu3 %v8204_v46 }
0x15e3   :  { %3400 = vmatpush.msra.mxu0 %v4065_v45  ;;  %3420 = vmatpush.msra.mxu1 %v4066_v53 }
0x15e4   :  { %3382 = vmatpush.msra.mxu3 %v8205_v16 }
0x15e5   :  { %3401 = vmatpush.msra.mxu0 %v4067_v49  ;;  %3421 = vmatpush.msra.mxu1 %v4068_v3 }
0x15e6   :  { %3383 = vmatpush.msra.mxu3 %v8206_v61 }
0x15e7   :  { %3402 = vmatpush.msra.mxu0 %v4069_v9  ;;  %3422 = vmatpush.msra.mxu1 %v4070_v1  ;;  %p3300_p5 = scmp.gt.s32.totalorder %s3598_s12, 0 }
0x15e8   :  { %3384 = vmatpush.msra.mxu3 %v8207_v35 }
0x15e9   :  { %3403 = vmatpush.msra.mxu0 %v4071_v50  ;;  %3423 = vmatpush.msra.mxu1 %v4072_v37  ;;  %s3301_s24 = scalar_select %p3300_p5, 1, 0 }
0x15ea   :  { %3385 = vmatpush.msra.mxu3 %v8208_v42 }
0x15eb   :  { %3404 = vmatpush.msra.mxu0 %v4073_v17  ;;  %3424 = vmatpush.msra.mxu1 %v4074_v38  ;;  %s3302_s3 = scvt.s32.f32 %s3301_s24 }
0x15ec   :  { %3386 = vmatpush.msra.mxu3 %v8209_v13 }
0x15ed   :  { %3405 = vmatpush.msra.mxu0 %v4075_v56  ;;  %3425 = vmatpush.msra.mxu1 %v4076_v51  ;;  %s3307_s4 = ssub.f32 1.0, %s3302_s3 }
0x15ef   :  { %3406 = vmatpush.msra.mxu0 %v4077_v26  ;;  %3426 = vmatpush.msra.mxu1 %v4078_v12 }
0x162a   :  { %v3085_v18 = vpop.f32.mrf.mxu0 }
0x162b   :  { %v3086_v58 = vadd.f32 %v3085_v18, %v8211_v5  ;;  %v3105_v59 = vpop.f32.mrf.mxu1 }
0x162c   :  { %v3106_v53 = vadd.f32 %v3105_v59, %v7862_v23  ;;  %v4095_v59 = vld [vmem:[#allocation20 + $0x88] sm:$0xff] }
0x1630   :  { %v3065_v32 = vpop.f32.mrf.mxu3 }
0x1631   :  { %v3066_v4 = vadd.f32 %v3065_v32, %v8210_v54 }
0x1632   :  { %v3165_v30 = vpop.f32.mrf.mxu0 }
0x1633   :  { %v3168_v34 = vadd.f32 %v3125_v33, %v3066_v4  ;;  %v3208_v45 = vadd.f32 %v7168_v60, %v3165_v30  ;;  %v4094_v30 = vld [vmem:[#allocation20 + $0x90] sm:$0xff] }
0x1635   :  { %v3594_v44 = vmul.f32 -1.442695, %v3168_v34 }
0x1637   :  { %3754 = vpow2.f32 %v3594_v44 }
0x1638   :  { %v3145_v22 = vpop.f32.mrf.mxu3 }
0x1639   :  { %v3188_v21 = vadd.f32 %v3145_v22, %v3086_v58 }
0x163b   :  { %v3595_v8 = vmul.f32 -1.442695, %v3188_v21 }
0x163d   :  { %v3755_v55 = vpop.eup %3754  ;;  %3756 = vpow2.f32 %v3595_v8 }
0x163e   :  { %v3172_v19 = vadd.f32 1.0, %v3755_v55  ;;  %v4081_v55 = vld [vmem:[#allocation20 + $0xf8] sm:$0xff] }
0x1640   :  { %3758 = vrcp.f32 %v3172_v19  ;;  %v3184_v28 = vand.u32 2147483648, %v3172_v19  ;;  %v3182_v63 = vand.u32 2147483647, %v3172_v19  ;;  %vm3178_vm8 = vweird.f32 %v3172_v19 }
0x1642   :  { %v3185_v24 = vor.u32 1.1754944e-38, %v3184_v28  ;;  %vm3183_vm10 = vcmp.eq.f32.partialorder %v3182_v63, 8.507059e+37  ;;  %v4088_v28 = vld [vmem:[#allocation20 + $0xc0] sm:$0xff] }
0x1643   :  { %v3757_v31 = vpop.eup %3756  ;;  %v4092_v63 = vld [vmem:[#allocation20 + $0xa0] sm:$0xff] }
0x1644   :  { %v3192_v48 = vadd.f32 1.0, %v3757_v31  ;;  %v4083_v31 = vld [vmem:[#allocation20 + $0xe8] sm:$0xff] }
0x1646   :  { %v3759_v25 = vpop.eup %3758  ;;  %3760 = vrcp.f32 %v3192_v48  ;;  %v3204_v9 = vand.u32 2147483648, %v3192_v48  ;;  %v3202_v35 = vand.u32 2147483647, %v3192_v48  ;;  %vm3198_vm12 = vweird.f32 %v3192_v48 }
0x1647   :  { %v3174_v14 = vmul.f32 %v3759_v25, %v3172_v19  ;;  %vm3179_vm7 = vweird.f32 %v3759_v25  ;;  %v4082_v19 = vld [vmem:[#allocation20 + $0xf0] sm:$0xff] }
0x1648   :  { %vm3180_vm9 = vmor %vm3178_vm8, %vm3179_vm7  ;;  %v3205_v42 = vor.u32 1.1754944e-38, %v3204_v9  ;;  %vm3203_vm14 = vcmp.eq.f32.partialorder %v3202_v35, 8.507059e+37 }
0x1649   :  { %v3175_v57 = vsub.f32 1.0, %v3174_v14  ;;  %v4086_v14 = vld [vmem:[#allocation20 + $0xd0] sm:$0xff] }
0x164b   :  { %v3176_v6 = vmul.f32 %v3759_v25, %v3175_v57  ;;  %v4087_v57 = vld [vmem:[#allocation20 + $0xc8] sm:$0xff] }
0x164c   :  { %v3761_v62 = vpop.eup %3760 }
0x164d   :  { %v3177_v27 = vadd.f32 %v3759_v25, %v3176_v6  ;;  %v3194_v47 = vmul.f32 %v3761_v62, %v3192_v48  ;;  %vm3199_vm11 = vweird.f32 %v3761_v62  ;;  %v4084_v48 = vld [vmem:[#allocation20 + $0xe0] sm:$0xff]  ;;  %v4091_v6 = vld [vmem:[#allocation20 + $0xa8] sm:$0xff] }
0x164e   :  { %vm3200_vm13 = vmor %vm3198_vm12, %vm3199_vm11 }
0x164f   :  { %v3181_v46 = vsel %vm3180_vm9, %v3759_v25, %v3177_v27  ;;  %v3195_v16 = vsub.f32 1.0, %v3194_v47  ;;  %v4085_v25 = vld [vmem:[#allocation20 + $0xd8] sm:$0xff]  ;;  %v4096_v27 = vld [vmem:[#allocation20 + $0x80] sm:$0xff]  ;;  %v3304_v47 = vld [vmem:[#allocation10 + $0x28] sm:$0xff] }
0x1650   :  { %v3186_v49 = vsel %vm3183_vm10, %v3185_v24, %v3181_v46  ;;  %v3305_v24 = vstv %s3302_s3  ;;  %v3308_v46 = vstv %s3307_s4 }
0x1651   :  { %v3209_v61 = vmul.f32 %v3208_v45, %v3186_v49  ;;  %v3196_v3 = vmul.f32 %v3761_v62, %v3195_v16  ;;  %v3306_v45 = vmul.f32 %v3305_v24, %v3304_v47 }
0x1653   :  { %v3210_v1 = vadd.f32 %v3209_v61, %v3106_v53  ;;  %v3197_v50 = vadd.f32 %v3761_v62, %v3196_v3 }
0x1655   :  { %3762 = vtanh.f32 %v3210_v1  ;;  %v3201_v37 = vsel %vm3200_vm13, %v3761_v62, %v3197_v50  ;;  %v4093_v62 = vld [vmem:[#allocation20 + $0x98] sm:$0xff] }
0x1656   :  { %v3206_v17 = vsel %vm3203_vm14, %v3205_v42, %v3201_v37 }
0x1657   :  { %v3212_v13 = vsub.f32 1.0, %v3206_v17  ;;  %v3214_v51 = vmul.f32 %v3206_v17, %v7016_v52  ;;  %v8212_v52 = vld [vmem:[#allocation50_spill] sm:$0xff] }
0x165b   :  { %v3763_v38 = vpop.eup %3762 }
0x165c   :  { %v3213_v56 = vmul.f32 %v3763_v38, %v3212_v13 }
0x165e   :  { %v7173_v26 = vadd.f32 %v3214_v51, %v3213_v56 }
0x1660   :  { %3252 = vmatmul.f32.vlgmr.msra.gmra.mxu2 %v7173_v26 }
0x1661   :  { %3479 = vmatpush.msra.mxu2 %v7019_v40  ;;  %v8213_v40 = vld [vmem:[#allocation69_spill] sm:$0xff] }
0x1663   :  { %3480 = vmatpush.msra.mxu2 %v7022_v43  ;;  %v8214_v43 = vld [vmem:[#allocation40_spill] sm:$0xff] }
0x1665   :  { %3481 = vmatpush.msra.mxu2 %v7025_v2  ;;  %v8215_v2 = vld [vmem:[#allocation70_spill] sm:$0xff] }
0x1667   :  { %3482 = vmatpush.msra.mxu2 %v7028_v11  ;;  %v4080_v11 = vld [vmem:[#allocation20] sm:$0xff] }
0x1669   :  { %3483 = vmatpush.msra.mxu2 %v7031_v29  ;;  %v3233_v29 = vpop.f32.mrf.mxu1 }
0x166b   :  { %3484 = vmatpush.msra.mxu2 %v7034_v39  ;;  %v8216_v39 = vld [vmem:[#allocation36_spill] sm:$0xff] }
0x166d   :  { %3485 = vmatpush.msra.mxu2 %v7037_v36  ;;  %v3234_v36 = vadd.f32 %v3233_v29, %v8216_v39 }
0x166f   :  { %3486 = vmatpush.msra.mxu2 %v7040_v15 }
0x1671   :  { %3487 = vmatpush.msra.mxu2 %v7043_v0 }
0x1673   :  { %3488 = vmatpush.msra.mxu2 %v7046_v41 }
0x1675   :  { %3489 = vmatpush.msra.mxu2 %v7049_v7 }
0x1677   :  { %3490 = vmatpush.msra.mxu2 %v8212_v52 }
0x1679   :  { %3491 = vmatpush.msra.mxu2 %v8213_v40 }
0x167b   :  { %3492 = vmatpush.msra.mxu2 %v8214_v43 }
0x167d   :  { %3493 = vmatpush.msra.mxu2 %v8215_v2 }
0x167f   :  { %3494 = vmatpush.msra.mxu2 %v4080_v11 }
0x16e3   :  { %v3253_v15 = vpop.f32.mrf.mxu2 }
0x16e4   :  { %v3254_v12 = vadd.f32 %v3253_v15, %v3234_v36 }
0x16e6   :  { %3257 = vst [vmem:[#allocation25 + $0x28] sm:$0xff] %v3254_v12  ;;  %3258 = vmax.xlane.f32.xlu0 %v3254_v12 }
0x1759   :  { %v3259_v0 = vpop.xlane.xlu0 %3258 }
0x175a   :  { %vm3260_vm15 = vcmp.eq.f32.partialorder %v3254_v12, %v3259_v0 }
0x175b   :  { %v3261_v41 = vsel %vm3260_vm15, %v5923_v20, 128 }
0x175c   :  { %v3263_v7 = vshra.s32 %v3261_v41, 16  ;;  %v3262_v4 = vand.u32 65535, %v3261_v41 }
0x175e   :  { %v3265_v32 = vcvt.s32.f32 %v3263_v7  ;;  %v3264_v34 = vcvt.s32.f32 %v3262_v4 }
0x1760   :  { %3266 = vmin.xlane.f32.xlu1 %v3265_v32 }
0x17d3   :  { %v3267_v33 = vpop.xlane.xlu1 %3266 }
0x17d4   :  { %vm3268_vm0 = vcmp.eq.f32.partialorder %v3265_v32, %v3267_v33  ;;  %v3273_v44 = vcvt.f32.s32 %v3267_v33 }
0x17d5   :  { %v3269_v18 = vsel %vm3268_vm0, %v3264_v34, inf }
0x17d6   :  { %3270 = vmin.xlane.f32.xlu2 %v3269_v18  ;;  %v3274_v22 = vshll.u32 %v3273_v44, 16 }
0x1849   :  { %v3271_v58 = vpop.xlane.xlu2 %3270 }
0x184a   :  { %v3272_v21 = vcvt.f32.s32 %v3271_v58 }
0x184c   :  { %v3275_v8 = vadd.s32 %v3274_v22, %v3272_v21 }
0x184e   :  { %vm3276_vm1 = vcmp.eq.s32.totalorder %v5923_v20, %v3275_v8  ;;  %v4089_v20 = vld [vmem:[#allocation20 + $0xb8] sm:$0xff] }
0x184f   :  { %3597 = vmatmul.msk.f32.vlgmr.msrb.gmra.mxu3 %vm3276_vm1, %v7871_v10  ;;  %v4090_v10 = vld [vmem:[#allocation20 + $0xb0] sm:$0xff] }
0x1850   :  { %3499 = vmatpush.msrb.mxu3 %v4081_v55 }
0x1852   :  { %3500 = vmatpush.msrb.mxu3 %v4082_v19 }
0x1854   :  { %3501 = vmatpush.msrb.mxu3 %v4083_v31 }
0x1856   :  { %3502 = vmatpush.msrb.mxu3 %v4084_v48 }
0x1857   :  { %3387 = vmatmul.f32.vlgmr.msra.gmra.mxu3 %v7173_v26 }
0x1858   :  { %3503 = vmatpush.msrb.mxu3 %v4085_v25 }
0x185a   :  { %3504 = vmatpush.msrb.mxu3 %v4086_v14 }
0x185c   :  { %3505 = vmatpush.msrb.mxu3 %v4087_v57 }
0x185e   :  { %3506 = vmatpush.msrb.mxu3 %v4088_v28 }
0x1860   :  { %3507 = vmatpush.msrb.mxu3 %v4089_v20 }
0x1862   :  { %3508 = vmatpush.msrb.mxu3 %v4090_v10 }
0x1864   :  { %3509 = vmatpush.msrb.mxu3 %v4091_v6 }
0x1866   :  { %3510 = vmatpush.msrb.mxu3 %v4092_v63 }
0x1868   :  { %3511 = vmatpush.msrb.mxu3 %v4093_v62 }
0x186a   :  { %3512 = vmatpush.msrb.mxu3 %v4094_v30 }
0x186c   :  { %3513 = vmatpush.msrb.mxu3 %v4095_v59 }
0x186e   :  { %3514 = vmatpush.msrb.mxu3 %v4096_v27 }
0x18d2   :  { %v3296_v16 = vpop.f32.mrf.mxu3 }
0x18d3   :  { %v3309_v53 = vmul.f32 %v3308_v46, %v3296_v16 }
0x18d5   :  { %v3310_v49 = vadd.f32 %v3309_v53, %v3306_v45 }
0x18d7   :  { %3327 = vmatmul.f32.vlgmr.msrb.gmra.mxu0 %v3310_v49  ;;  %3347 = vmatmul.f32.vlgmr.msrb.gmra.mxu1 %v3310_v49 }
0x18d8   :  { %3367 = vmatmul.f32.vlgmr.msrb.gmra.mxu2 %v3310_v49 }
0x18da   :  { %v3388_v9 = vpop.f32.mrf.mxu3 }
0x18df   :  { %3407 = vmatmul.f32.vlgmr.msra.gmra.mxu0 %v7173_v26  ;;  %3427 = vmatmul.f32.vlgmr.msra.gmra.mxu1 %v7173_v26 }
0x18e0   :  { %3495 = vmatmul.f32.vlgmr.msra.gmra.mxu2 %v3310_v49 }
0x1954   :  { %v3328_v61 = vpop.f32.mrf.mxu0  ;;  %v3348_v1 = vpop.f32.mrf.mxu1 }
0x1955   :  { %v3329_v3 = vadd.f32 %v3328_v61, %v8210_v54  ;;  %v3349_v42 = vadd.f32 %v3348_v1, %v8211_v5 }
0x1957   :  { %v3431_v35 = vadd.f32 %v3388_v9, %v3329_v3 }
0x1959   :  { %v3599_v50 = vmul.f32 -1.442695, %v3431_v35 }
0x195b   :  { %3764 = vpow2.f32 %v3599_v50  ;;  %v3368_v5 = vpop.f32.mrf.mxu2 }
0x195c   :  { %v3408_v37 = vpop.f32.mrf.mxu0  ;;  %v3428_v15 = vpop.f32.mrf.mxu1  ;;  %v3369_v33 = vadd.f32 %v3368_v5, %v7862_v23 }
0x195d   :  { %v3451_v17 = vadd.f32 %v3408_v37, %v3349_v42  ;;  %v3471_v4 = vadd.f32 %v7168_v60, %v3428_v15 }
0x195f   :  { %v3600_v13 = vmul.f32 -1.442695, %v3451_v17 }
0x1961   :  { %v3765_v38 = vpop.eup %3764  ;;  %3766 = vpow2.f32 %v3600_v13 }
0x1962   :  { %v3435_v56 = vadd.f32 1.0, %v3765_v38 }
0x1963   :  { %v3496_v57 = vpop.f32.mrf.mxu2 }
0x1964   :  { %3768 = vrcp.f32 %v3435_v56  ;;  %v3447_v2 = vand.u32 2147483648, %v3435_v56  ;;  %v3445_v29 = vand.u32 2147483647, %v3435_v56  ;;  %vm3441_vm3 = vweird.f32 %v3435_v56 }
0x1965   :  { %v3497_v28 = vadd.f32 %v3496_v57, %v8216_v39 }
0x1966   :  { %v3448_v41 = vor.u32 1.1754944e-38, %v3447_v2  ;;  %vm3446_vm5 = vcmp.eq.f32.partialorder %v3445_v29, 8.507059e+37 }
0x1967   :  { %v3767_v51 = vpop.eup %3766 }
0x1968   :  { %v3455_v52 = vadd.f32 1.0, %v3767_v51 }
0x196a   :  { %v3769_v40 = vpop.eup %3768  ;;  %3770 = vrcp.f32 %v3455_v52  ;;  %v3467_v58 = vand.u32 2147483648, %v3455_v52  ;;  %v3465_v22 = vand.u32 2147483647, %v3455_v52  ;;  %vm3461_vm7 = vweird.f32 %v3455_v52 }
0x196b   :  { %v3437_v43 = vmul.f32 %v3769_v40, %v3435_v56  ;;  %vm3442_vm2 = vweird.f32 %v3769_v40 }
0x196c   :  { %vm3443_vm4 = vmor %vm3441_vm3, %vm3442_vm2  ;;  %v3468_v19 = vor.u32 1.1754944e-38, %v3467_v58  ;;  %vm3466_vm9 = vcmp.eq.f32.partialorder %v3465_v22, 8.507059e+37 }
0x196d   :  { %v3438_v54 = vsub.f32 1.0, %v3437_v43 }
0x196f   :  { %v3439_v11 = vmul.f32 %v3769_v40, %v3438_v54 }
0x1970   :  { %v3771_v36 = vpop.eup %3770 }
0x1971   :  { %v3457_v12 = vmul.f32 %v3771_v36, %v3455_v52  ;;  %v3440_v0 = vadd.f32 %v3769_v40, %v3439_v11  ;;  %vm3462_vm6 = vweird.f32 %v3771_v36 }
0x1972   :  { %vm3463_vm8 = vmor %vm3461_vm7, %vm3462_vm6 }
0x1973   :  { %v3458_v7 = vsub.f32 1.0, %v3457_v12  ;;  %v3444_v32 = vsel %vm3443_vm4, %v3769_v40, %v3440_v0 }
0x1974   :  { %v3449_v34 = vsel %vm3446_vm5, %v3448_v41, %v3444_v32 }
0x1975   :  { %v3459_v18 = vmul.f32 %v3771_v36, %v3458_v7  ;;  %v3472_v44 = vmul.f32 %v3471_v4, %v3449_v34 }
0x1977   :  { %v3473_v21 = vadd.f32 %v3472_v44, %v3369_v33  ;;  %v3460_v8 = vadd.f32 %v3771_v36, %v3459_v18 }
0x1979   :  { %3772 = vtanh.f32 %v3473_v21  ;;  %v3464_v55 = vsel %vm3463_vm8, %v3771_v36, %v3460_v8 }
0x197a   :  { %v3469_v31 = vsel %vm3466_vm9, %v3468_v19, %v3464_v55 }
0x197b   :  { %v3475_v48 = vsub.f32 1.0, %v3469_v31  ;;  %v3477_v23 = vmul.f32 %v3469_v31, %v7173_v26 }
0x197f   :  { %v3773_v25 = vpop.eup %3772 }
0x1980   :  { %v3476_v60 = vmul.f32 %v3773_v25, %v3475_v48 }
0x1982   :  { %v3478_v14 = vadd.f32 %v3477_v23, %v3476_v60 }
0x1984   :  { %3515 = vmatmul.f32.vlgmr.msrb.gmra.mxu3 %v3478_v14 }
0x1a07   :  { %v3516_v20 = vpop.f32.mrf.mxu3 }
0x1a08   :  { %v3517_v10 = vadd.f32 %v3516_v20, %v3497_v28 }
0x1a0a   :  { %3520 = vst [vmem:[#allocation25 + $0x30] sm:$0xff] %v3517_v10 }
0x1a0b   :  { %3533 = dma.vmem_to_hbm [thread:$0]  %s3526_s25, 896, %s3528_s26, [#allocation5], %s4446_s22, %s4446_s22, %s4447_s23  }
0x1a0c   :  { %4437 = dma.done.wait [#allocation5], 896  }
0x1a0d   :  { %4438 = vsyncadd [#allocation5], 4294966400 }
0x1a0e   :  { %3538 = vsyncpa [#allocation4], 1 }
0x1a0f   :  { %3539 = vsyncpa [#allocation9], 1 }
0x1a10   :  { %3540 = vsyncpa [#allocation12], 1 }
0x1a11   :  { %3541 = vsyncpa [#allocation15], 1 }
0x1a12   :  { %3542 = vsyncpa [#allocation18], 1 }
0x1a13   :  { %3543 = vsyncpa [#allocation21], 1 }
0x1a14   :  { %3544 = vsyncpa [#allocation24], 1 }
0x1a15   :  { %3545 = vsyncpa [#allocation5], 1 }
0x1a16   :  { %3546 = vsyncpa [#allocation6], 1 }

</bundles_post_ra>
